<compile_context>
chip_gen: v7x
topology: tpu7x:2x2x1
jax: 0.10.0
libtpu: 0.0.40
codegen_flags: <defaults>
</compile_context>

<pallas_src>
import functools
import math

import jax
import jax.numpy as jnp
from jax.experimental import pallas as pl
from jax.experimental.pallas import tpu as pltpu

BN_EPS = 1e-5
CP = 128            # lane-padded channel width for every block (max C = 108)
BLOCK_N = 6


# --------------------------------------------------------------------------
# Fused whole-network Pallas kernel (one grid step = one batch element)
# --------------------------------------------------------------------------
def _msdnn_kernel(x_ref, w1_ref, b1_ref, w2_ref, b2_ref, wsc_ref, bsc_ref,
                  wse1_ref, wse2_ref, o_ref, *scratch, lengths):
    """Runs all BLOCK_N BasicBlock1D's for one batch element, VMEM resident.

    x_ref:   (L0+6, CP) f32 — block-0 input, length-padded by 3 each side.
    w1/w2:   (6, 7, CP, CP) bf16 — tap-major conv weights (BN scale folded).
    wsc:     (6, CP, CP) bf16 — shortcut 1x1 conv * BN scale.
    wse1/2:  (6, CP, CP) bf16 — SE FC weights (zero-padded).
    b1/b2/bsc: (6, 1, CP) f32 — folded biases.
    o_ref:   (L_final, CP) f32 — network output for this batch element.
    scratch: 5 xpad buffers (L_i+6, CP) f32 for blocks 1..5, then one shared
             y1pad buffer (max_lh+6, CP) f32.
    """
    f32, bf16 = jnp.float32, jnp.bfloat16
    xpads = (x_ref,) + tuple(scratch[:-1])      # per-block padded inputs
    y1p = scratch[-1]                           # shared conv1-output staging
    zero3 = jnp.zeros((3, CP), f32)

    for i, L in enumerate(lengths):
        lh = L // 2
        xin = xpads[i]

        # ---- BranchConv1D(stride=2) folded to one k=7 conv + BN1 + ReLU ----
        # y1[j] = sum_t x_pad[2j + t] @ W1[t]; taps read as stride-2 slices.
        acc = jnp.dot(xin[pl.ds(0, lh, stride=2), :].astype(bf16), w1_ref[i, 0],
                      preferred_element_type=f32)
        for t in range(1, 7):
            acc += jnp.dot(xin[pl.ds(t, lh, stride=2), :].astype(bf16),
                           w1_ref[i, t], preferred_element_type=f32)
        y1 = jnp.maximum(acc + b1_ref[i], 0.0)           # BN1 folded; Dropout=id

        # ---- stage y1 with 3-row zero halos (halo-only zeroing) ------------
        y1p[pl.ds(0, 3), :] = zero3
        y1p[pl.ds(lh + 3, 3), :] = zero3
        y1p[pl.ds(3, lh), :] = y1

        # ---- BranchConv1D(stride=1) folded k=7 conv + BN2 ------------------
        acc2 = jnp.dot(y1p[pl.ds(0, lh), :].astype(bf16), w2_ref[i, 0],
                       preferred_element_type=f32)
        for t in range(1, 7):
            acc2 += jnp.dot(y1p[pl.ds(t, lh), :].astype(bf16), w2_ref[i, t],
                            preferred_element_type=f32)
        y2 = acc2 + b2_ref[i]

        # ---- shortcut: MaxPool1d(2, ceil) + Conv1x1(+bias) + BN (folded) ---
        # max(x[2j], x[2j+1]) == max(x_pad[2j+3], x_pad[2j+4])
        mp = jnp.maximum(xin[pl.ds(3, lh, stride=2), :],
                         xin[pl.ds(4, lh, stride=2), :])
        sc = jnp.dot(mp.astype(bf16), wsc_ref[i],
                     preferred_element_type=f32) + bsc_ref[i]

        # ---- SELayer1D gate + residual add + final ReLU --------------------
        mean = jnp.mean(y2, axis=0, keepdims=True)                   # (1, CP)
        hdn = jnp.maximum(jnp.dot(mean.astype(bf16), wse1_ref[i],
                                  preferred_element_type=f32), 0.0)
        alpha = jax.nn.sigmoid(jnp.dot(hdn.astype(bf16), wse2_ref[i],
                                       preferred_element_type=f32))
        out = jnp.maximum(y2 * alpha + sc, 0.0)

        if i + 1 < len(lengths):
            nxt = xpads[i + 1]                  # becomes next block's input
            nxt[pl.ds(0, 3), :] = zero3
            nxt[pl.ds(lh + 3, 3), :] = zero3
            nxt[pl.ds(3, lh), :] = out
        else:
            o_ref[...] = out


def _msdnn_pallas(xpad, params, *, L):
    """xpad: (N, L+6, CP) f32 — channel- and length-padded input."""
    N = xpad.shape[0]
    lengths = tuple(L // (2 ** i) for i in range(BLOCK_N))
    Lf = lengths[-1] // 2

    def wspec(shape):
        return pl.BlockSpec(shape, lambda n, _s=len(shape): (0,) * _s)

    scratch = [pltpu.VMEM((lengths[i] + 6, CP), jnp.float32)
               for i in range(1, BLOCK_N)]
    scratch.append(pltpu.VMEM((lengths[0] // 2 + 6, CP), jnp.float32))  # y1pad

    return pl.pallas_call(
        functools.partial(_msdnn_kernel, lengths=lengths),
        out_shape=jax.ShapeDtypeStruct((N, Lf, CP), jnp.float32),
        grid=(N,),
        in_specs=[
            pl.BlockSpec((None, L + 6, CP), lambda n: (n, 0, 0)),  # x (block 0)
            wspec((BLOCK_N, 7, CP, CP)),                           # w1
            wspec((BLOCK_N, 1, CP)),                               # b1
            wspec((BLOCK_N, 7, CP, CP)),                           # w2
            wspec((BLOCK_N, 1, CP)),                               # b2
            wspec((BLOCK_N, CP, CP)),                              # wsc
            wspec((BLOCK_N, 1, CP)),                               # bsc
            wspec((BLOCK_N, CP, CP)),                              # wse1
            wspec((BLOCK_N, CP, CP)),                              # wse2
        ],
        out_specs=pl.BlockSpec((None, Lf, CP), lambda n: (n, 0, 0)),
        scratch_shapes=scratch,
        compiler_params=pltpu.CompilerParams(
            dimension_semantics=("parallel",)),
    )(xpad, params["w1"], params["b1"], params["w2"], params["b2"],
      params["wsc"], params["bsc"], params["wse1"], params["wse2"])


# --------------------------------------------------------------------------
# Pure-JAX reference with identical math (same folding, same bf16 casts)
# --------------------------------------------------------------------------
def _ref_forward(x, params):
    f32, bf16 = jnp.float32, jnp.bfloat16

    def mm(a, w):
        return jnp.einsum("nlc,cd->nld", a.astype(bf16), w,
                          preferred_element_type=f32)

    for i in range(BLOCK_N):
        L = x.shape[1]
        lh = L // 2
        xpad = jnp.pad(x, ((0, 0), (3, 3), (0, 0)))

        acc = mm(xpad[:, 0:2 * lh:2, :], params["w1"][i, 0])
        for t in range(1, 7):
            acc = acc + mm(xpad[:, t:t + 2 * lh:2, :], params["w1"][i, t])
        y1 = jnp.maximum(acc + params["b1"][i], 0.0)

        y1pad = jnp.pad(y1, ((0, 0), (3, 3), (0, 0)))
        acc2 = mm(y1pad[:, 0:lh, :], params["w2"][i, 0])
        for t in range(1, 7):
            acc2 = acc2 + mm(y1pad[:, t:t + lh, :], params["w2"][i, t])
        y2 = acc2 + params["b2"][i]

        mp = jnp.maximum(xpad[:, 3:3 + 2 * lh:2, :], xpad[:, 4:4 + 2 * lh:2, :])
        sc = mm(mp, params["wsc"][i]) + params["bsc"][i]

        mean = jnp.mean(y2, axis=1)                                   # (N, CP)
        hdn = jnp.maximum(jnp.dot(mean.astype(bf16), params["wse1"][i],
                                  preferred_element_type=f32), 0.0)
        alpha = jax.nn.sigmoid(jnp.dot(hdn.astype(bf16), params["wse2"][i],
                                       preferred_element_type=f32))
        x = jnp.maximum(y2 * alpha[:, None, :] + sc, 0.0)
    return x


# --------------------------------------------------------------------------
# Top-level forward (final_cout is STATIC — bound via functools.partial)
# --------------------------------------------------------------------------
def msdnn_forward(x_ncl, params, *, final_cout, use_pallas=True):
    N, c0, L = x_ncl.shape
    assert L % (2 ** BLOCK_N) == 0 and L >= 2 ** BLOCK_N, "length must be /64"
    x = jnp.transpose(x_ncl, (0, 2, 1))                    # NCL -> NLC
    x = jnp.pad(x, ((0, 0), (0, 0), (0, CP - c0)))         # lane-pad channels once

    if use_pallas:
        xpad = jnp.pad(x, ((0, 0), (3, 3), (0, 0)))        # length halo once
        out_nlc = _msdnn_pallas(xpad, params, L=L)
    else:
        out_nlc = _ref_forward(x, params)

    out_nlc = out_nlc[:, :, :final_cout]                   # static slice now
    out = jnp.transpose(out_nlc, (0, 2, 1))                # NLC -> NCL
    return jnp.squeeze(out)                                # matches torch.squeeze


# --------------------------------------------------------------------------
# Parameter construction (BN folded + lane-padded + bf16 at build time)
# --------------------------------------------------------------------------
def _bn_fold(key, c):
    kg, kb, km, kv = jax.random.split(key, 4)
    gamma = 1.0 + 0.1 * jax.random.normal(kg, (c,), jnp.float32)
    beta = 0.1 * jax.random.normal(kb, (c,), jnp.float32)
    mean = 0.1 * jax.random.normal(km, (c,), jnp.float32)
    var = 1.0 + 0.1 * jax.random.uniform(kv, (c,), jnp.float32)
    scale = gamma / jnp.sqrt(var + BN_EPS)
    bias = beta - mean * scale
    return scale, bias


def _branch_weight(key, cin, cout):
    """BranchConv1D (k=3/5/7, pad=1/2/3) folded into one (cout, cin, 7) weight."""
    c3 = cout // 3
    k2k, k3k, k4k = jax.random.split(key, 3)

    def init(k, kk):
        return jax.random.normal(k, (c3, cin, kk), jnp.float32) / math.sqrt(cin * kk)

    w = jnp.zeros((cout, cin, 7), jnp.float32)
    w = w.at[0:c3, :, 2:5].set(init(k2k, 3))        # k=3, pad=1 branch
    w = w.at[c3:2 * c3, :, 1:6].set(init(k3k, 5))   # k=5, pad=2 branch
    w = w.at[2 * c3:, :, :].set(init(k4k, 7))       # k=7, pad=3 branch
    return w


def _fold_conv(w, scale, cin, cout):
    """(cout,cin,7) * BN scale -> (7, CP, CP) bf16, tap-major, zero-padded."""
    wt = jnp.transpose(w * scale[:, None, None], (2, 1, 0))   # (7, cin, cout)
    return (jnp.zeros((7, CP, CP), jnp.float32)
            .at[:, :cin, :cout].set(wt)).astype(jnp.bfloat16)


def _pad_vec(v, c):
    return jnp.zeros((1, CP), jnp.float32).at[0, :c].set(v)


def _pad_mat(m, r, c):
    return (jnp.zeros((CP, CP), jnp.float32).at[:r, :c].set(m)).astype(jnp.bfloat16)


def build_params(key, init_channels=1, base_channels=48, growth_rate=12,
                 block_n=BLOCK_N, reduction=16):
    cin = init_channels
    acc = {k: [] for k in ("w1", "b1", "w2", "b2", "wsc", "bsc", "wse1", "wse2")}
    for i in range(block_n):
        cout = base_channels + i * growth_rate
        keys = jax.random.split(jax.random.fold_in(key, i), 8)

        s1, b1 = _bn_fold(keys[1], cout)
        w1 = _fold_conv(_branch_weight(keys[0], cin, cout), s1, cin, cout)
        s2, b2 = _bn_fold(keys[3], cout)
        w2 = _fold_conv(_branch_weight(keys[2], cout, cout), s2, cout, cout)

        # shortcut: Conv1d(cin, cout, 1) with bias, then BN -> folded affine
        wsc_raw = jax.random.normal(keys[4], (cin, cout), jnp.float32) / math.sqrt(cin)
        bconv = 0.1 * jax.random.normal(keys[5], (cout,), jnp.float32)
        ssc, bsc_bn = _bn_fold(keys[6], cout)

        h = cout // reduction
        k_se1, k_se2 = jax.random.split(keys[7])

        acc["w1"].append(w1)
        acc["b1"].append(_pad_vec(b1, cout))
        acc["w2"].append(w2)
        acc["b2"].append(_pad_vec(b2, cout))
        acc["wsc"].append(_pad_mat(wsc_raw * ssc[None, :], cin, cout))
        acc["bsc"].append(_pad_vec(bsc_bn + bconv * ssc, cout))
        acc["wse1"].append(_pad_mat(jax.random.normal(k_se1, (cout, h), jnp.float32)
                                    / math.sqrt(cout), cout, h))
        acc["wse2"].append(_pad_mat(jax.random.normal(k_se2, (h, cout), jnp.float32)
                                    / math.sqrt(h), h, cout))
        cin = cout

    params = {k: jnp.stack(v) for k, v in acc.items()}
    return params, cin                      # cin == final out_channels (static)


# --------------------------------------------------------------------------
if __name__ == "__main__":
    key = jax.random.PRNGKey(0)
    kx, kp = jax.random.split(key)

    # PyTorch Conv1d input layout: (batch, init_channels, seq_len)
    N, C0, L = 2, 1, 128
    x = jax.random.normal(kx, (N, C0, L), jnp.float32)
    params, final_cout = build_params(kp)

    fwd = jax.jit(functools.partial(msdnn_forward, final_cout=final_cout,
                                    use_pallas=True))
    ref_fwd = jax.jit(functools.partial(msdnn_forward, final_cout=final_cout,
                                        use_pallas=False))

    out = jax.block_until_ready(fwd(x, params))
    ref = jax.block_until_ready(ref_fwd(x, params))

    assert out.shape == ref.shape == (N, final_cout, L // 64), out.shape
    rel_err = float(jnp.max(jnp.abs(out - ref)) / (jnp.max(jnp.abs(ref)) + 1e-6))
    assert rel_err < 1e-2, f"mismatch vs pure-JAX reference: rel err {rel_err}"
    print("KERNEL_OK")
</pallas_src>

<mosaic_0001>
module attributes {stable_mosaic.version = 11 : i64} {
  func.func @_msdnn_kernel(%arg0: i32, %arg1: memref<1x134x128xf32, #tpu.memory_space<vmem>>, %arg2: memref<6x7x128x128xbf16, #tpu.memory_space<vmem>>, %arg3: memref<6x1x128xf32, #tpu.memory_space<vmem>>, %arg4: memref<6x7x128x128xbf16, #tpu.memory_space<vmem>>, %arg5: memref<6x1x128xf32, #tpu.memory_space<vmem>>, %arg6: memref<6x128x128xbf16, #tpu.memory_space<vmem>>, %arg7: memref<6x1x128xf32, #tpu.memory_space<vmem>>, %arg8: memref<6x128x128xbf16, #tpu.memory_space<vmem>>, %arg9: memref<6x128x128xbf16, #tpu.memory_space<vmem>>, %arg10: memref<1x2x128xf32, #tpu.memory_space<vmem>>, %arg11: memref<70x128xf32, #tpu.memory_space<vmem>>, %arg12: memref<38x128xf32, #tpu.memory_space<vmem>>, %arg13: memref<22x128xf32, #tpu.memory_space<vmem>>, %arg14: memref<14x128xf32, #tpu.memory_space<vmem>>, %arg15: memref<10x128xf32, #tpu.memory_space<vmem>>, %arg16: memref<70x128xf32, #tpu.memory_space<vmem>>) attributes {dimension_semantics = [#tpu.dimension_semantics<parallel>], iteration_bounds = array<i64: 2>, scalar_prefetch = 0 : i64, scratch_operands = 6 : i64, tpu.core_type = #tpu.core_type<tc>, window_params = [{transform_indices = @transform_0, window_bounds = array<i64: 1, 134, 128>}, {pipeline_mode = #tpu.pipeline_mode<synchronous>, transform_indices = @transform_1, window_bounds = array<i64: 6, 7, 128, 128>}, {pipeline_mode = #tpu.pipeline_mode<synchronous>, transform_indices = @transform_2, window_bounds = array<i64: 6, 1, 128>}, {pipeline_mode = #tpu.pipeline_mode<synchronous>, transform_indices = @transform_3, window_bounds = array<i64: 6, 7, 128, 128>}, {pipeline_mode = #tpu.pipeline_mode<synchronous>, transform_indices = @transform_4, window_bounds = array<i64: 6, 1, 128>}, {pipeline_mode = #tpu.pipeline_mode<synchronous>, transform_indices = @transform_5, window_bounds = array<i64: 6, 128, 128>}, {pipeline_mode = #tpu.pipeline_mode<synchronous>, transform_indices = @transform_6, window_bounds = array<i64: 6, 1, 128>}, {pipeline_mode = #tpu.pipeline_mode<synchronous>, transform_indices = @transform_7, window_bounds = array<i64: 6, 128, 128>}, {pipeline_mode = #tpu.pipeline_mode<synchronous>, transform_indices = @transform_8, window_bounds = array<i64: 6, 128, 128>}, {transform_indices = @transform_9, window_bounds = array<i64: 1, 2, 128>}]} {
    %cst = arith.constant 0.000000e+00 : f32
    %0 = vector.broadcast %cst : f32 to vector<3x128xf32>
    %c0 = arith.constant 0 : index
    %c0_0 = arith.constant 0 : index
    %c0_1 = arith.constant 0 : index
    %1 = tpu.strided_load %arg1[%c0, %c0_0, %c0_1] {strides = array<i32: 1, 2, 1>} : memref<1x134x128xf32, #tpu.memory_space<vmem>>, vector<1x64x128xf32>
    %2 = vector.shape_cast %1 : vector<1x64x128xf32> to vector<64x128xf32>
    %3 = arith.truncf %2 : vector<64x128xf32> to vector<64x128xbf16>
    %c0_2 = arith.constant 0 : index
    %c0_3 = arith.constant 0 : index
    %c0_4 = arith.constant 0 : index
    %c0_5 = arith.constant 0 : index
    %4 = vector.load %arg2[%c0_2, %c0_3, %c0_4, %c0_5] : memref<6x7x128x128xbf16, #tpu.memory_space<vmem>>, vector<1x1x128x128xbf16>
    %5 = vector.shape_cast %4 : vector<1x1x128x128xbf16> to vector<128x128xbf16>
    %cst_6 = arith.constant dense<0.000000e+00> : vector<64x128xf32>
    %6 = tpu.matmul %3, %5, %cst_6 {dimension_numbers = #tpu.dot_dimension_numbers<[1], [0], [0], [1], [0, 0, 1, 1], [], []>} : vector<64x128xbf16>, vector<128x128xbf16>, vector<64x128xf32> -> vector<64x128xf32>
    %c0_7 = arith.constant 0 : index
    %c1 = arith.constant 1 : index
    %c0_8 = arith.constant 0 : index
    %7 = tpu.strided_load %arg1[%c0_7, %c1, %c0_8] {strides = array<i32: 1, 2, 1>} : memref<1x134x128xf32, #tpu.memory_space<vmem>>, vector<1x64x128xf32>
    %8 = vector.shape_cast %7 : vector<1x64x128xf32> to vector<64x128xf32>
    %9 = arith.truncf %8 : vector<64x128xf32> to vector<64x128xbf16>
    %c0_9 = arith.constant 0 : index
    %c1_10 = arith.constant 1 : index
    %c0_11 = arith.constant 0 : index
    %c0_12 = arith.constant 0 : index
    %10 = vector.load %arg2[%c0_9, %c1_10, %c0_11, %c0_12] : memref<6x7x128x128xbf16, #tpu.memory_space<vmem>>, vector<1x1x128x128xbf16>
    %11 = vector.shape_cast %10 : vector<1x1x128x128xbf16> to vector<128x128xbf16>
    %cst_13 = arith.constant dense<0.000000e+00> : vector<64x128xf32>
    %12 = tpu.matmul %9, %11, %cst_13 {dimension_numbers = #tpu.dot_dimension_numbers<[1], [0], [0], [1], [0, 0, 1, 1], [], []>} : vector<64x128xbf16>, vector<128x128xbf16>, vector<64x128xf32> -> vector<64x128xf32>
    %13 = arith.addf %6, %12 : vector<64x128xf32>
    %c0_14 = arith.constant 0 : index
    %c2 = arith.constant 2 : index
    %c0_15 = arith.constant 0 : index
    %14 = tpu.strided_load %arg1[%c0_14, %c2, %c0_15] {strides = array<i32: 1, 2, 1>} : memref<1x134x128xf32, #tpu.memory_space<vmem>>, vector<1x64x128xf32>
    %15 = vector.shape_cast %14 : vector<1x64x128xf32> to vector<64x128xf32>
    %16 = arith.truncf %15 : vector<64x128xf32> to vector<64x128xbf16>
    %c0_16 = arith.constant 0 : index
    %c2_17 = arith.constant 2 : index
    %c0_18 = arith.constant 0 : index
    %c0_19 = arith.constant 0 : index
    %17 = vector.load %arg2[%c0_16, %c2_17, %c0_18, %c0_19] : memref<6x7x128x128xbf16, #tpu.memory_space<vmem>>, vector<1x1x128x128xbf16>
    %18 = vector.shape_cast %17 : vector<1x1x128x128xbf16> to vector<128x128xbf16>
    %cst_20 = arith.constant dense<0.000000e+00> : vector<64x128xf32>
    %19 = tpu.matmul %16, %18, %cst_20 {dimension_numbers = #tpu.dot_dimension_numbers<[1], [0], [0], [1], [0, 0, 1, 1], [], []>} : vector<64x128xbf16>, vector<128x128xbf16>, vector<64x128xf32> -> vector<64x128xf32>
    %20 = arith.addf %13, %19 : vector<64x128xf32>
    %c0_21 = arith.constant 0 : index
    %c3 = arith.constant 3 : index
    %c0_22 = arith.constant 0 : index
    %21 = tpu.strided_load %arg1[%c0_21, %c3, %c0_22] {strides = array<i32: 1, 2, 1>} : memref<1x134x128xf32, #tpu.memory_space<vmem>>, vector<1x64x128xf32>
    %22 = vector.shape_cast %21 : vector<1x64x128xf32> to vector<64x128xf32>
    %23 = arith.truncf %22 : vector<64x128xf32> to vector<64x128xbf16>
    %c0_23 = arith.constant 0 : index
    %c3_24 = arith.constant 3 : index
    %c0_25 = arith.constant 0 : index
    %c0_26 = arith.constant 0 : index
    %24 = vector.load %arg2[%c0_23, %c3_24, %c0_25, %c0_26] : memref<6x7x128x128xbf16, #tpu.memory_space<vmem>>, vector<1x1x128x128xbf16>
    %25 = vector.shape_cast %24 : vector<1x1x128x128xbf16> to vector<128x128xbf16>
    %cst_27 = arith.constant dense<0.000000e+00> : vector<64x128xf32>
    %26 = tpu.matmul %23, %25, %cst_27 {dimension_numbers = #tpu.dot_dimension_numbers<[1], [0], [0], [1], [0, 0, 1, 1], [], []>} : vector<64x128xbf16>, vector<128x128xbf16>, vector<64x128xf32> -> vector<64x128xf32>
    %27 = arith.addf %20, %26 : vector<64x128xf32>
    %c0_28 = arith.constant 0 : index
    %c4 = arith.constant 4 : index
    %c0_29 = arith.constant 0 : index
    %28 = tpu.strided_load %arg1[%c0_28, %c4, %c0_29] {strides = array<i32: 1, 2, 1>} : memref<1x134x128xf32, #tpu.memory_space<vmem>>, vector<1x64x128xf32>
    %29 = vector.shape_cast %28 : vector<1x64x128xf32> to vector<64x128xf32>
    %30 = arith.truncf %29 : vector<64x128xf32> to vector<64x128xbf16>
    %c0_30 = arith.constant 0 : index
    %c4_31 = arith.constant 4 : index
    %c0_32 = arith.constant 0 : index
    %c0_33 = arith.constant 0 : index
    %31 = vector.load %arg2[%c0_30, %c4_31, %c0_32, %c0_33] : memref<6x7x128x128xbf16, #tpu.memory_space<vmem>>, vector<1x1x128x128xbf16>
    %32 = vector.shape_cast %31 : vector<1x1x128x128xbf16> to vector<128x128xbf16>
    %cst_34 = arith.constant dense<0.000000e+00> : vector<64x128xf32>
    %33 = tpu.matmul %30, %32, %cst_34 {dimension_numbers = #tpu.dot_dimension_numbers<[1], [0], [0], [1], [0, 0, 1, 1], [], []>} : vector<64x128xbf16>, vector<128x128xbf16>, vector<64x128xf32> -> vector<64x128xf32>
    %34 = arith.addf %27, %33 : vector<64x128xf32>
    %c0_35 = arith.constant 0 : index
    %c5 = arith.constant 5 : index
    %c0_36 = arith.constant 0 : index
    %35 = tpu.strided_load %arg1[%c0_35, %c5, %c0_36] {strides = array<i32: 1, 2, 1>} : memref<1x134x128xf32, #tpu.memory_space<vmem>>, vector<1x64x128xf32>
    %36 = vector.shape_cast %35 : vector<1x64x128xf32> to vector<64x128xf32>
    %37 = arith.truncf %36 : vector<64x128xf32> to vector<64x128xbf16>
    %c0_37 = arith.constant 0 : index
    %c5_38 = arith.constant 5 : index
    %c0_39 = arith.constant 0 : index
    %c0_40 = arith.constant 0 : index
    %38 = vector.load %arg2[%c0_37, %c5_38, %c0_39, %c0_40] : memref<6x7x128x128xbf16, #tpu.memory_space<vmem>>, vector<1x1x128x128xbf16>
    %39 = vector.shape_cast %38 : vector<1x1x128x128xbf16> to vector<128x128xbf16>
    %cst_41 = arith.constant dense<0.000000e+00> : vector<64x128xf32>
    %40 = tpu.matmul %37, %39, %cst_41 {dimension_numbers = #tpu.dot_dimension_numbers<[1], [0], [0], [1], [0, 0, 1, 1], [], []>} : vector<64x128xbf16>, vector<128x128xbf16>, vector<64x128xf32> -> vector<64x128xf32>
    %41 = arith.addf %34, %40 : vector<64x128xf32>
    %c0_42 = arith.constant 0 : index
    %c6 = arith.constant 6 : index
    %c0_43 = arith.constant 0 : index
    %42 = tpu.strided_load %arg1[%c0_42, %c6, %c0_43] {strides = array<i32: 1, 2, 1>} : memref<1x134x128xf32, #tpu.memory_space<vmem>>, vector<1x64x128xf32>
    %43 = vector.shape_cast %42 : vector<1x64x128xf32> to vector<64x128xf32>
    %44 = arith.truncf %43 : vector<64x128xf32> to vector<64x128xbf16>
    %c0_44 = arith.constant 0 : index
    %c6_45 = arith.constant 6 : index
    %c0_46 = arith.constant 0 : index
    %c0_47 = arith.constant 0 : index
    %45 = vector.load %arg2[%c0_44, %c6_45, %c0_46, %c0_47] : memref<6x7x128x128xbf16, #tpu.memory_space<vmem>>, vector<1x1x128x128xbf16>
    %46 = vector.shape_cast %45 : vector<1x1x128x128xbf16> to vector<128x128xbf16>
    %cst_48 = arith.constant dense<0.000000e+00> : vector<64x128xf32>
    %47 = tpu.matmul %44, %46, %cst_48 {dimension_numbers = #tpu.dot_dimension_numbers<[1], [0], [0], [1], [0, 0, 1, 1], [], []>} : vector<64x128xbf16>, vector<128x128xbf16>, vector<64x128xf32> -> vector<64x128xf32>
    %48 = arith.addf %41, %47 : vector<64x128xf32>
    %c0_49 = arith.constant 0 : index
    %c0_50 = arith.constant 0 : index
    %c0_51 = arith.constant 0 : index
    %49 = vector.load %arg3[%c0_49, %c0_50, %c0_51] : memref<6x1x128xf32, #tpu.memory_space<vmem>>, vector<1x1x128xf32>
    %50 = vector.shape_cast %49 : vector<1x1x128xf32> to vector<1x128xf32>
    %51 = vector.broadcast %50 : vector<1x128xf32> to vector<64x128xf32>
    %52 = arith.addf %48, %51 : vector<64x128xf32>
    %cst_52 = arith.constant 0.000000e+00 : f32
    %53 = vector.broadcast %cst_52 : f32 to vector<64x128xf32>
    %54 = arith.maximumf %52, %53 : vector<64x128xf32>
    %c0_53 = arith.constant 0 : index
    %c0_54 = arith.constant 0 : index
    %55 = vector.load %arg16[%c0_53, %c0_54] : memref<70x128xf32, #tpu.memory_space<vmem>>, vector<3x128xf32>
    tpu.vector_store %arg16[%c0_53, %c0_54], %0 {strides = array<i32>} : memref<70x128xf32, #tpu.memory_space<vmem>>, vector<3x128xf32>,
    %c67 = arith.constant 67 : index
    %c0_55 = arith.constant 0 : index
    %56 = vector.load %arg16[%c67, %c0_55] : memref<70x128xf32, #tpu.memory_space<vmem>>, vector<3x128xf32>
    tpu.vector_store %arg16[%c67, %c0_55], %0 {strides = array<i32>} : memref<70x128xf32, #tpu.memory_space<vmem>>, vector<3x128xf32>,
    %c3_56 = arith.constant 3 : index
    %c0_57 = arith.constant 0 : index
    %57 = vector.load %arg16[%c3_56, %c0_57] : memref<70x128xf32, #tpu.memory_space<vmem>>, vector<64x128xf32>
    tpu.vector_store %arg16[%c3_56, %c0_57], %54 {strides = array<i32>} : memref<70x128xf32, #tpu.memory_space<vmem>>, vector<64x128xf32>,
    %c0_58 = arith.constant 0 : index
    %c0_59 = arith.constant 0 : index
    %58 = vector.load %arg16[%c0_58, %c0_59] : memref<70x128xf32, #tpu.memory_space<vmem>>, vector<64x128xf32>
    %59 = arith.truncf %58 : vector<64x128xf32> to vector<64x128xbf16>
    %c0_60 = arith.constant 0 : index
    %c0_61 = arith.constant 0 : index
    %c0_62 = arith.constant 0 : index
    %c0_63 = arith.constant 0 : index
    %60 = vector.load %arg4[%c0_60, %c0_61, %c0_62, %c0_63] : memref<6x7x128x128xbf16, #tpu.memory_space<vmem>>, vector<1x1x128x128xbf16>
    %61 = vector.shape_cast %60 : vector<1x1x128x128xbf16> to vector<128x128xbf16>
    %cst_64 = arith.constant dense<0.000000e+00> : vector<64x128xf32>
    %62 = tpu.matmul %59, %61, %cst_64 {dimension_numbers = #tpu.dot_dimension_numbers<[1], [0], [0], [1], [0, 0, 1, 1], [], []>} : vector<64x128xbf16>, vector<128x128xbf16>, vector<64x128xf32> -> vector<64x128xf32>
    %c1_65 = arith.constant 1 : index
    %c0_66 = arith.constant 0 : index
    %63 = vector.load %arg16[%c1_65, %c0_66] : memref<70x128xf32, #tpu.memory_space<vmem>>, vector<64x128xf32>
    %64 = arith.truncf %63 : vector<64x128xf32> to vector<64x128xbf16>
    %c0_67 = arith.constant 0 : index
    %c1_68 = arith.constant 1 : index
    %c0_69 = arith.constant 0 : index
    %c0_70 = arith.constant 0 : index
    %65 = vector.load %arg4[%c0_67, %c1_68, %c0_69, %c0_70] : memref<6x7x128x128xbf16, #tpu.memory_space<vmem>>, vector<1x1x128x128xbf16>
    %66 = vector.shape_cast %65 : vector<1x1x128x128xbf16> to vector<128x128xbf16>
    %cst_71 = arith.constant dense<0.000000e+00> : vector<64x128xf32>
    %67 = tpu.matmul %64, %66, %cst_71 {dimension_numbers = #tpu.dot_dimension_numbers<[1], [0], [0], [1], [0, 0, 1, 1], [], []>} : vector<64x128xbf16>, vector<128x128xbf16>, vector<64x128xf32> -> vector<64x128xf32>
    %68 = arith.addf %62, %67 : vector<64x128xf32>
    %c2_72 = arith.constant 2 : index
    %c0_73 = arith.constant 0 : index
    %69 = vector.load %arg16[%c2_72, %c0_73] : memref<70x128xf32, #tpu.memory_space<vmem>>, vector<64x128xf32>
    %70 = arith.truncf %69 : vector<64x128xf32> to vector<64x128xbf16>
    %c0_74 = arith.constant 0 : index
    %c2_75 = arith.constant 2 : index
    %c0_76 = arith.constant 0 : index
    %c0_77 = arith.constant 0 : index
    %71 = vector.load %arg4[%c0_74, %c2_75, %c0_76, %c0_77] : memref<6x7x128x128xbf16, #tpu.memory_space<vmem>>, vector<1x1x128x128xbf16>
    %72 = vector.shape_cast %71 : vector<1x1x128x128xbf16> to vector<128x128xbf16>
    %cst_78 = arith.constant dense<0.000000e+00> : vector<64x128xf32>
    %73 = tpu.matmul %70, %72, %cst_78 {dimension_numbers = #tpu.dot_dimension_numbers<[1], [0], [0], [1], [0, 0, 1, 1], [], []>} : vector<64x128xbf16>, vector<128x128xbf16>, vector<64x128xf32> -> vector<64x128xf32>
    %74 = arith.addf %68, %73 : vector<64x128xf32>
    %c3_79 = arith.constant 3 : index
    %c0_80 = arith.constant 0 : index
    %75 = vector.load %arg16[%c3_79, %c0_80] : memref<70x128xf32, #tpu.memory_space<vmem>>, vector<64x128xf32>
    %76 = arith.truncf %75 : vector<64x128xf32> to vector<64x128xbf16>
    %c0_81 = arith.constant 0 : index
    %c3_82 = arith.constant 3 : index
    %c0_83 = arith.constant 0 : index
    %c0_84 = arith.constant 0 : index
    %77 = vector.load %arg4[%c0_81, %c3_82, %c0_83, %c0_84] : memref<6x7x128x128xbf16, #tpu.memory_space<vmem>>, vector<1x1x128x128xbf16>
    %78 = vector.shape_cast %77 : vector<1x1x128x128xbf16> to vector<128x128xbf16>
    %cst_85 = arith.constant dense<0.000000e+00> : vector<64x128xf32>
    %79 = tpu.matmul %76, %78, %cst_85 {dimension_numbers = #tpu.dot_dimension_numbers<[1], [0], [0], [1], [0, 0, 1, 1], [], []>} : vector<64x128xbf16>, vector<128x128xbf16>, vector<64x128xf32> -> vector<64x128xf32>
    %80 = arith.addf %74, %79 : vector<64x128xf32>
    %c4_86 = arith.constant 4 : index
    %c0_87 = arith.constant 0 : index
    %81 = vector.load %arg16[%c4_86, %c0_87] : memref<70x128xf32, #tpu.memory_space<vmem>>, vector<64x128xf32>
    %82 = arith.truncf %81 : vector<64x128xf32> to vector<64x128xbf16>
    %c0_88 = arith.constant 0 : index
    %c4_89 = arith.constant 4 : index
    %c0_90 = arith.constant 0 : index
    %c0_91 = arith.constant 0 : index
    %83 = vector.load %arg4[%c0_88, %c4_89, %c0_90, %c0_91] : memref<6x7x128x128xbf16, #tpu.memory_space<vmem>>, vector<1x1x128x128xbf16>
    %84 = vector.shape_cast %83 : vector<1x1x128x128xbf16> to vector<128x128xbf16>
    %cst_92 = arith.constant dense<0.000000e+00> : vector<64x128xf32>
    %85 = tpu.matmul %82, %84, %cst_92 {dimension_numbers = #tpu.dot_dimension_numbers<[1], [0], [0], [1], [0, 0, 1, 1], [], []>} : vector<64x128xbf16>, vector<128x128xbf16>, vector<64x128xf32> -> vector<64x128xf32>
    %86 = arith.addf %80, %85 : vector<64x128xf32>
    %c5_93 = arith.constant 5 : index
    %c0_94 = arith.constant 0 : index
    %87 = vector.load %arg16[%c5_93, %c0_94] : memref<70x128xf32, #tpu.memory_space<vmem>>, vector<64x128xf32>
    %88 = arith.truncf %87 : vector<64x128xf32> to vector<64x128xbf16>
    %c0_95 = arith.constant 0 : index
    %c5_96 = arith.constant 5 : index
    %c0_97 = arith.constant 0 : index
    %c0_98 = arith.constant 0 : index
    %89 = vector.load %arg4[%c0_95, %c5_96, %c0_97, %c0_98] : memref<6x7x128x128xbf16, #tpu.memory_space<vmem>>, vector<1x1x128x128xbf16>
    %90 = vector.shape_cast %89 : vector<1x1x128x128xbf16> to vector<128x128xbf16>
    %cst_99 = arith.constant dense<0.000000e+00> : vector<64x128xf32>
    %91 = tpu.matmul %88, %90, %cst_99 {dimension_numbers = #tpu.dot_dimension_numbers<[1], [0], [0], [1], [0, 0, 1, 1], [], []>} : vector<64x128xbf16>, vector<128x128xbf16>, vector<64x128xf32> -> vector<64x128xf32>
    %92 = arith.addf %86, %91 : vector<64x128xf32>
    %c6_100 = arith.constant 6 : index
    %c0_101 = arith.constant 0 : index
    %93 = vector.load %arg16[%c6_100, %c0_101] : memref<70x128xf32, #tpu.memory_space<vmem>>, vector<64x128xf32>
    %94 = arith.truncf %93 : vector<64x128xf32> to vector<64x128xbf16>
    %c0_102 = arith.constant 0 : index
    %c6_103 = arith.constant 6 : index
    %c0_104 = arith.constant 0 : index
    %c0_105 = arith.constant 0 : index
    %95 = vector.load %arg4[%c0_102, %c6_103, %c0_104, %c0_105] : memref<6x7x128x128xbf16, #tpu.memory_space<vmem>>, vector<1x1x128x128xbf16>
    %96 = vector.shape_cast %95 : vector<1x1x128x128xbf16> to vector<128x128xbf16>
    %cst_106 = arith.constant dense<0.000000e+00> : vector<64x128xf32>
    %97 = tpu.matmul %94, %96, %cst_106 {dimension_numbers = #tpu.dot_dimension_numbers<[1], [0], [0], [1], [0, 0, 1, 1], [], []>} : vector<64x128xbf16>, vector<128x128xbf16>, vector<64x128xf32> -> vector<64x128xf32>
    %98 = arith.addf %92, %97 : vector<64x128xf32>
    %c0_107 = arith.constant 0 : index
    %c0_108 = arith.constant 0 : index
    %c0_109 = arith.constant 0 : index
    %99 = vector.load %arg5[%c0_107, %c0_108, %c0_109] : memref<6x1x128xf32, #tpu.memory_space<vmem>>, vector<1x1x128xf32>
    %100 = vector.shape_cast %99 : vector<1x1x128xf32> to vector<1x128xf32>
    %101 = vector.broadcast %100 : vector<1x128xf32> to vector<64x128xf32>
    %102 = arith.addf %98, %101 : vector<64x128xf32>
    %c0_110 = arith.constant 0 : index
    %c3_111 = arith.constant 3 : index
    %c0_112 = arith.constant 0 : index
    %103 = tpu.strided_load %arg1[%c0_110, %c3_111, %c0_112] {strides = array<i32: 1, 2, 1>} : memref<1x134x128xf32, #tpu.memory_space<vmem>>, vector<1x64x128xf32>
    %104 = vector.shape_cast %103 : vector<1x64x128xf32> to vector<64x128xf32>
    %c0_113 = arith.constant 0 : index
    %c4_114 = arith.constant 4 : index
    %c0_115 = arith.constant 0 : index
    %105 = tpu.strided_load %arg1[%c0_113, %c4_114, %c0_115] {strides = array<i32: 1, 2, 1>} : memref<1x134x128xf32, #tpu.memory_space<vmem>>, vector<1x64x128xf32>
    %106 = vector.shape_cast %105 : vector<1x64x128xf32> to vector<64x128xf32>
    %107 = arith.maximumf %104, %106 : vector<64x128xf32>
    %108 = arith.truncf %107 : vector<64x128xf32> to vector<64x128xbf16>
    %c0_116 = arith.constant 0 : index
    %c0_117 = arith.constant 0 : index
    %c0_118 = arith.constant 0 : index
    %109 = vector.load %arg6[%c0_116, %c0_117, %c0_118] : memref<6x128x128xbf16, #tpu.memory_space<vmem>>, vector<1x128x128xbf16>
    %110 = vector.shape_cast %109 : vector<1x128x128xbf16> to vector<128x128xbf16>
    %cst_119 = arith.constant dense<0.000000e+00> : vector<64x128xf32>
    %111 = tpu.matmul %108, %110, %cst_119 {dimension_numbers = #tpu.dot_dimension_numbers<[1], [0], [0], [1], [0, 0, 1, 1], [], []>} : vector<64x128xbf16>, vector<128x128xbf16>, vector<64x128xf32> -> vector<64x128xf32>
    %c0_120 = arith.constant 0 : index
    %c0_121 = arith.constant 0 : index
    %c0_122 = arith.constant 0 : index
    %112 = vector.load %arg7[%c0_120, %c0_121, %c0_122] : memref<6x1x128xf32, #tpu.memory_space<vmem>>, vector<1x1x128xf32>
    %113 = vector.shape_cast %112 : vector<1x1x128xf32> to vector<1x128xf32>
    %114 = vector.broadcast %113 : vector<1x128xf32> to vector<64x128xf32>
    %115 = arith.addf %111, %114 : vector<64x128xf32>
    %cst_123 = arith.constant dense<0.000000e+00> : vector<128xf32>
    %116 = vector.multi_reduction <add>, %102, %cst_123 [0] : vector<64x128xf32> to vector<128xf32>
    %117 = vector.shape_cast %116 : vector<128xf32> to vector<1x128xf32>
    %cst_124 = arith.constant 6.400000e+01 : f32
    %118 = vector.broadcast %cst_124 : f32 to vector<1x128xf32>
    %119 = arith.divf %117, %118 : vector<1x128xf32>
    %120 = arith.truncf %119 : vector<1x128xf32> to vector<1x128xbf16>
    %c0_125 = arith.constant 0 : index
    %c0_126 = arith.constant 0 : index
    %c0_127 = arith.constant 0 : index
    %121 = vector.load %arg8[%c0_125, %c0_126, %c0_127] : memref<6x128x128xbf16, #tpu.memory_space<vmem>>, vector<1x128x128xbf16>
    %122 = vector.shape_cast %121 : vector<1x128x128xbf16> to vector<128x128xbf16>
    %cst_128 = arith.constant dense<0.000000e+00> : vector<1x128xf32>
    %123 = tpu.matmul %120, %122, %cst_128 {dimension_numbers = #tpu.dot_dimension_numbers<[1], [0], [0], [1], [0, 0, 1, 1], [], []>} : vector<1x128xbf16>, vector<128x128xbf16>, vector<1x128xf32> -> vector<1x128xf32>
    %cst_129 = arith.constant 0.000000e+00 : f32
    %124 = vector.broadcast %cst_129 : f32 to vector<1x128xf32>
    %125 = arith.maximumf %123, %124 : vector<1x128xf32>
    %126 = arith.truncf %125 : vector<1x128xf32> to vector<1x128xbf16>
    %c0_130 = arith.constant 0 : index
    %c0_131 = arith.constant 0 : index
    %c0_132 = arith.constant 0 : index
    %127 = vector.load %arg9[%c0_130, %c0_131, %c0_132] : memref<6x128x128xbf16, #tpu.memory_space<vmem>>, vector<1x128x128xbf16>
    %128 = vector.shape_cast %127 : vector<1x128x128xbf16> to vector<128x128xbf16>
    %cst_133 = arith.constant dense<0.000000e+00> : vector<1x128xf32>
    %129 = tpu.matmul %126, %128, %cst_133 {dimension_numbers = #tpu.dot_dimension_numbers<[1], [0], [0], [1], [0, 0, 1, 1], [], []>} : vector<1x128xbf16>, vector<128x128xbf16>, vector<1x128xf32> -> vector<1x128xf32>
    %130 = arith.negf %129 : vector<1x128xf32>
    %131 = math.exp %130 : vector<1x128xf32>
    %cst_134 = arith.constant 1.000000e+00 : f32
    %132 = vector.broadcast %cst_134 : f32 to vector<1x128xf32>
    %133 = arith.addf %132, %131 : vector<1x128xf32>
    %134 = arith.divf %132, %133 : vector<1x128xf32>
    %135 = vector.broadcast %134 : vector<1x128xf32> to vector<64x128xf32>
    %136 = arith.mulf %102, %135 : vector<64x128xf32>
    %137 = arith.addf %136, %115 : vector<64x128xf32>
    %cst_135 = arith.constant 0.000000e+00 : f32
    %138 = vector.broadcast %cst_135 : f32 to vector<64x128xf32>
    %139 = arith.maximumf %137, %138 : vector<64x128xf32>
    %c0_136 = arith.constant 0 : index
    %c0_137 = arith.constant 0 : index
    %140 = vector.load %arg11[%c0_136, %c0_137] : memref<70x128xf32, #tpu.memory_space<vmem>>, vector<3x128xf32>
    tpu.vector_store %arg11[%c0_136, %c0_137], %0 {strides = array<i32>} : memref<70x128xf32, #tpu.memory_space<vmem>>, vector<3x128xf32>,
    %c67_138 = arith.constant 67 : index
    %c0_139 = arith.constant 0 : index
    %141 = vector.load %arg11[%c67_138, %c0_139] : memref<70x128xf32, #tpu.memory_space<vmem>>, vector<3x128xf32>
    tpu.vector_store %arg11[%c67_138, %c0_139], %0 {strides = array<i32>} : memref<70x128xf32, #tpu.memory_space<vmem>>, vector<3x128xf32>,
    %c3_140 = arith.constant 3 : index
    %c0_141 = arith.constant 0 : index
    %142 = vector.load %arg11[%c3_140, %c0_141] : memref<70x128xf32, #tpu.memory_space<vmem>>, vector<64x128xf32>
    tpu.vector_store %arg11[%c3_140, %c0_141], %139 {strides = array<i32>} : memref<70x128xf32, #tpu.memory_space<vmem>>, vector<64x128xf32>,
    %c0_142 = arith.constant 0 : index
    %c0_143 = arith.constant 0 : index
    %143 = tpu.strided_load %arg11[%c0_142, %c0_143] {strides = array<i32: 2, 1>} : memref<70x128xf32, #tpu.memory_space<vmem>>, vector<32x128xf32>
    %144 = arith.truncf %143 : vector<32x128xf32> to vector<32x128xbf16>
    %c1_144 = arith.constant 1 : index
    %c0_145 = arith.constant 0 : index
    %c0_146 = arith.constant 0 : index
    %c0_147 = arith.constant 0 : index
    %145 = vector.load %arg2[%c1_144, %c0_145, %c0_146, %c0_147] : memref<6x7x128x128xbf16, #tpu.memory_space<vmem>>, vector<1x1x128x128xbf16>
    %146 = vector.shape_cast %145 : vector<1x1x128x128xbf16> to vector<128x128xbf16>
    %cst_148 = arith.constant dense<0.000000e+00> : vector<32x128xf32>
    %147 = tpu.matmul %144, %146, %cst_148 {dimension_numbers = #tpu.dot_dimension_numbers<[1], [0], [0], [1], [0, 0, 1, 1], [], []>} : vector<32x128xbf16>, vector<128x128xbf16>, vector<32x128xf32> -> vector<32x128xf32>
    %c1_149 = arith.constant 1 : index
    %c0_150 = arith.constant 0 : index
    %148 = tpu.strided_load %arg11[%c1_149, %c0_150] {strides = array<i32: 2, 1>} : memref<70x128xf32, #tpu.memory_space<vmem>>, vector<32x128xf32>
    %149 = arith.truncf %148 : vector<32x128xf32> to vector<32x128xbf16>
    %c1_151 = arith.constant 1 : index
    %c1_152 = arith.constant 1 : index
    %c0_153 = arith.constant 0 : index
    %c0_154 = arith.constant 0 : index
    %150 = vector.load %arg2[%c1_151, %c1_152, %c0_153, %c0_154] : memref<6x7x128x128xbf16, #tpu.memory_space<vmem>>, vector<1x1x128x128xbf16>
    %151 = vector.shape_cast %150 : vector<1x1x128x128xbf16> to vector<128x128xbf16>
    %cst_155 = arith.constant dense<0.000000e+00> : vector<32x128xf32>
    %152 = tpu.matmul %149, %151, %cst_155 {dimension_numbers = #tpu.dot_dimension_numbers<[1], [0], [0], [1], [0, 0, 1, 1], [], []>} : vector<32x128xbf16>, vector<128x128xbf16>, vector<32x128xf32> -> vector<32x128xf32>
    %153 = arith.addf %147, %152 : vector<32x128xf32>
    %c2_156 = arith.constant 2 : index
    %c0_157 = arith.constant 0 : index
    %154 = tpu.strided_load %arg11[%c2_156, %c0_157] {strides = array<i32: 2, 1>} : memref<70x128xf32, #tpu.memory_space<vmem>>, vector<32x128xf32>
    %155 = arith.truncf %154 : vector<32x128xf32> to vector<32x128xbf16>
    %c1_158 = arith.constant 1 : index
    %c2_159 = arith.constant 2 : index
    %c0_160 = arith.constant 0 : index
    %c0_161 = arith.constant 0 : index
    %156 = vector.load %arg2[%c1_158, %c2_159, %c0_160, %c0_161] : memref<6x7x128x128xbf16, #tpu.memory_space<vmem>>, vector<1x1x128x128xbf16>
    %157 = vector.shape_cast %156 : vector<1x1x128x128xbf16> to vector<128x128xbf16>
    %cst_162 = arith.constant dense<0.000000e+00> : vector<32x128xf32>
    %158 = tpu.matmul %155, %157, %cst_162 {dimension_numbers = #tpu.dot_dimension_numbers<[1], [0], [0], [1], [0, 0, 1, 1], [], []>} : vector<32x128xbf16>, vector<128x128xbf16>, vector<32x128xf32> -> vector<32x128xf32>
    %159 = arith.addf %153, %158 : vector<32x128xf32>
    %c3_163 = arith.constant 3 : index
    %c0_164 = arith.constant 0 : index
    %160 = tpu.strided_load %arg11[%c3_163, %c0_164] {strides = array<i32: 2, 1>} : memref<70x128xf32, #tpu.memory_space<vmem>>, vector<32x128xf32>
    %161 = arith.truncf %160 : vector<32x128xf32> to vector<32x128xbf16>
    %c1_165 = arith.constant 1 : index
    %c3_166 = arith.constant 3 : index
    %c0_167 = arith.constant 0 : index
    %c0_168 = arith.constant 0 : index
    %162 = vector.load %arg2[%c1_165, %c3_166, %c0_167, %c0_168] : memref<6x7x128x128xbf16, #tpu.memory_space<vmem>>, vector<1x1x128x128xbf16>
    %163 = vector.shape_cast %162 : vector<1x1x128x128xbf16> to vector<128x128xbf16>
    %cst_169 = arith.constant dense<0.000000e+00> : vector<32x128xf32>
    %164 = tpu.matmul %161, %163, %cst_169 {dimension_numbers = #tpu.dot_dimension_numbers<[1], [0], [0], [1], [0, 0, 1, 1], [], []>} : vector<32x128xbf16>, vector<128x128xbf16>, vector<32x128xf32> -> vector<32x128xf32>
    %165 = arith.addf %159, %164 : vector<32x128xf32>
    %c4_170 = arith.constant 4 : index
    %c0_171 = arith.constant 0 : index
    %166 = tpu.strided_load %arg11[%c4_170, %c0_171] {strides = array<i32: 2, 1>} : memref<70x128xf32, #tpu.memory_space<vmem>>, vector<32x128xf32>
    %167 = arith.truncf %166 : vector<32x128xf32> to vector<32x128xbf16>
    %c1_172 = arith.constant 1 : index
    %c4_173 = arith.constant 4 : index
    %c0_174 = arith.constant 0 : index
    %c0_175 = arith.constant 0 : index
    %168 = vector.load %arg2[%c1_172, %c4_173, %c0_174, %c0_175] : memref<6x7x128x128xbf16, #tpu.memory_space<vmem>>, vector<1x1x128x128xbf16>
    %169 = vector.shape_cast %168 : vector<1x1x128x128xbf16> to vector<128x128xbf16>
    %cst_176 = arith.constant dense<0.000000e+00> : vector<32x128xf32>
    %170 = tpu.matmul %167, %169, %cst_176 {dimension_numbers = #tpu.dot_dimension_numbers<[1], [0], [0], [1], [0, 0, 1, 1], [], []>} : vector<32x128xbf16>, vector<128x128xbf16>, vector<32x128xf32> -> vector<32x128xf32>
    %171 = arith.addf %165, %170 : vector<32x128xf32>
    %c5_177 = arith.constant 5 : index
    %c0_178 = arith.constant 0 : index
    %172 = tpu.strided_load %arg11[%c5_177, %c0_178] {strides = array<i32: 2, 1>} : memref<70x128xf32, #tpu.memory_space<vmem>>, vector<32x128xf32>
    %173 = arith.truncf %172 : vector<32x128xf32> to vector<32x128xbf16>
    %c1_179 = arith.constant 1 : index
    %c5_180 = arith.constant 5 : index
    %c0_181 = arith.constant 0 : index
    %c0_182 = arith.constant 0 : index
    %174 = vector.load %arg2[%c1_179, %c5_180, %c0_181, %c0_182] : memref<6x7x128x128xbf16, #tpu.memory_space<vmem>>, vector<1x1x128x128xbf16>
    %175 = vector.shape_cast %174 : vector<1x1x128x128xbf16> to vector<128x128xbf16>
    %cst_183 = arith.constant dense<0.000000e+00> : vector<32x128xf32>
    %176 = tpu.matmul %173, %175, %cst_183 {dimension_numbers = #tpu.dot_dimension_numbers<[1], [0], [0], [1], [0, 0, 1, 1], [], []>} : vector<32x128xbf16>, vector<128x128xbf16>, vector<32x128xf32> -> vector<32x128xf32>
    %177 = arith.addf %171, %176 : vector<32x128xf32>
    %c6_184 = arith.constant 6 : index
    %c0_185 = arith.constant 0 : index
    %178 = tpu.strided_load %arg11[%c6_184, %c0_185] {strides = array<i32: 2, 1>} : memref<70x128xf32, #tpu.memory_space<vmem>>, vector<32x128xf32>
    %179 = arith.truncf %178 : vector<32x128xf32> to vector<32x128xbf16>
    %c1_186 = arith.constant 1 : index
    %c6_187 = arith.constant 6 : index
    %c0_188 = arith.constant 0 : index
    %c0_189 = arith.constant 0 : index
    %180 = vector.load %arg2[%c1_186, %c6_187, %c0_188, %c0_189] : memref<6x7x128x128xbf16, #tpu.memory_space<vmem>>, vector<1x1x128x128xbf16>
    %181 = vector.shape_cast %180 : vector<1x1x128x128xbf16> to vector<128x128xbf16>
    %cst_190 = arith.constant dense<0.000000e+00> : vector<32x128xf32>
    %182 = tpu.matmul %179, %181, %cst_190 {dimension_numbers = #tpu.dot_dimension_numbers<[1], [0], [0], [1], [0, 0, 1, 1], [], []>} : vector<32x128xbf16>, vector<128x128xbf16>, vector<32x128xf32> -> vector<32x128xf32>
    %183 = arith.addf %177, %182 : vector<32x128xf32>
    %c1_191 = arith.constant 1 : index
    %c0_192 = arith.constant 0 : index
    %c0_193 = arith.constant 0 : index
    %184 = vector.load %arg3[%c1_191, %c0_192, %c0_193] : memref<6x1x128xf32, #tpu.memory_space<vmem>>, vector<1x1x128xf32>
    %185 = vector.shape_cast %184 : vector<1x1x128xf32> to vector<1x128xf32>
    %186 = vector.broadcast %185 : vector<1x128xf32> to vector<32x128xf32>
    %187 = arith.addf %183, %186 : vector<32x128xf32>
    %cst_194 = arith.constant 0.000000e+00 : f32
    %188 = vector.broadcast %cst_194 : f32 to vector<32x128xf32>
    %189 = arith.maximumf %187, %188 : vector<32x128xf32>
    %c0_195 = arith.constant 0 : index
    %c0_196 = arith.constant 0 : index
    %190 = vector.load %arg16[%c0_195, %c0_196] : memref<70x128xf32, #tpu.memory_space<vmem>>, vector<3x128xf32>
    tpu.vector_store %arg16[%c0_195, %c0_196], %0 {strides = array<i32>} : memref<70x128xf32, #tpu.memory_space<vmem>>, vector<3x128xf32>,
    %c35 = arith.constant 35 : index
    %c0_197 = arith.constant 0 : index
    %191 = vector.load %arg16[%c35, %c0_197] : memref<70x128xf32, #tpu.memory_space<vmem>>, vector<3x128xf32>
    tpu.vector_store %arg16[%c35, %c0_197], %0 {strides = array<i32>} : memref<70x128xf32, #tpu.memory_space<vmem>>, vector<3x128xf32>,
    %c3_198 = arith.constant 3 : index
    %c0_199 = arith.constant 0 : index
    %192 = vector.load %arg16[%c3_198, %c0_199] : memref<70x128xf32, #tpu.memory_space<vmem>>, vector<32x128xf32>
    tpu.vector_store %arg16[%c3_198, %c0_199], %189 {strides = array<i32>} : memref<70x128xf32, #tpu.memory_space<vmem>>, vector<32x128xf32>,
    %c0_200 = arith.constant 0 : index
    %c0_201 = arith.constant 0 : index
    %193 = vector.load %arg16[%c0_200, %c0_201] : memref<70x128xf32, #tpu.memory_space<vmem>>, vector<32x128xf32>
    %194 = arith.truncf %193 : vector<32x128xf32> to vector<32x128xbf16>
    %c1_202 = arith.constant 1 : index
    %c0_203 = arith.constant 0 : index
    %c0_204 = arith.constant 0 : index
    %c0_205 = arith.constant 0 : index
    %195 = vector.load %arg4[%c1_202, %c0_203, %c0_204, %c0_205] : memref<6x7x128x128xbf16, #tpu.memory_space<vmem>>, vector<1x1x128x128xbf16>
    %196 = vector.shape_cast %195 : vector<1x1x128x128xbf16> to vector<128x128xbf16>
    %cst_206 = arith.constant dense<0.000000e+00> : vector<32x128xf32>
    %197 = tpu.matmul %194, %196, %cst_206 {dimension_numbers = #tpu.dot_dimension_numbers<[1], [0], [0], [1], [0, 0, 1, 1], [], []>} : vector<32x128xbf16>, vector<128x128xbf16>, vector<32x128xf32> -> vector<32x128xf32>
    %c1_207 = arith.constant 1 : index
    %c0_208 = arith.constant 0 : index
    %198 = vector.load %arg16[%c1_207, %c0_208] : memref<70x128xf32, #tpu.memory_space<vmem>>, vector<32x128xf32>
    %199 = arith.truncf %198 : vector<32x128xf32> to vector<32x128xbf16>
    %c1_209 = arith.constant 1 : index
    %c1_210 = arith.constant 1 : index
    %c0_211 = arith.constant 0 : index
    %c0_212 = arith.constant 0 : index
    %200 = vector.load %arg4[%c1_209, %c1_210, %c0_211, %c0_212] : memref<6x7x128x128xbf16, #tpu.memory_space<vmem>>, vector<1x1x128x128xbf16>
    %201 = vector.shape_cast %200 : vector<1x1x128x128xbf16> to vector<128x128xbf16>
    %cst_213 = arith.constant dense<0.000000e+00> : vector<32x128xf32>
    %202 = tpu.matmul %199, %201, %cst_213 {dimension_numbers = #tpu.dot_dimension_numbers<[1], [0], [0], [1], [0, 0, 1, 1], [], []>} : vector<32x128xbf16>, vector<128x128xbf16>, vector<32x128xf32> -> vector<32x128xf32>
    %203 = arith.addf %197, %202 : vector<32x128xf32>
    %c2_214 = arith.constant 2 : index
    %c0_215 = arith.constant 0 : index
    %204 = vector.load %arg16[%c2_214, %c0_215] : memref<70x128xf32, #tpu.memory_space<vmem>>, vector<32x128xf32>
    %205 = arith.truncf %204 : vector<32x128xf32> to vector<32x128xbf16>
    %c1_216 = arith.constant 1 : index
    %c2_217 = arith.constant 2 : index
    %c0_218 = arith.constant 0 : index
    %c0_219 = arith.constant 0 : index
    %206 = vector.load %arg4[%c1_216, %c2_217, %c0_218, %c0_219] : memref<6x7x128x128xbf16, #tpu.memory_space<vmem>>, vector<1x1x128x128xbf16>
    %207 = vector.shape_cast %206 : vector<1x1x128x128xbf16> to vector<128x128xbf16>
    %cst_220 = arith.constant dense<0.000000e+00> : vector<32x128xf32>
    %208 = tpu.matmul %205, %207, %cst_220 {dimension_numbers = #tpu.dot_dimension_numbers<[1], [0], [0], [1], [0, 0, 1, 1], [], []>} : vector<32x128xbf16>, vector<128x128xbf16>, vector<32x128xf32> -> vector<32x128xf32>
    %209 = arith.addf %203, %208 : vector<32x128xf32>
    %c3_221 = arith.constant 3 : index
    %c0_222 = arith.constant 0 : index
    %210 = vector.load %arg16[%c3_221, %c0_222] : memref<70x128xf32, #tpu.memory_space<vmem>>, vector<32x128xf32>
    %211 = arith.truncf %210 : vector<32x128xf32> to vector<32x128xbf16>
    %c1_223 = arith.constant 1 : index
    %c3_224 = arith.constant 3 : index
    %c0_225 = arith.constant 0 : index
    %c0_226 = arith.constant 0 : index
    %212 = vector.load %arg4[%c1_223, %c3_224, %c0_225, %c0_226] : memref<6x7x128x128xbf16, #tpu.memory_space<vmem>>, vector<1x1x128x128xbf16>
    %213 = vector.shape_cast %212 : vector<1x1x128x128xbf16> to vector<128x128xbf16>
    %cst_227 = arith.constant dense<0.000000e+00> : vector<32x128xf32>
    %214 = tpu.matmul %211, %213, %cst_227 {dimension_numbers = #tpu.dot_dimension_numbers<[1], [0], [0], [1], [0, 0, 1, 1], [], []>} : vector<32x128xbf16>, vector<128x128xbf16>, vector<32x128xf32> -> vector<32x128xf32>
    %215 = arith.addf %209, %214 : vector<32x128xf32>
    %c4_228 = arith.constant 4 : index
    %c0_229 = arith.constant 0 : index
    %216 = vector.load %arg16[%c4_228, %c0_229] : memref<70x128xf32, #tpu.memory_space<vmem>>, vector<32x128xf32>
    %217 = arith.truncf %216 : vector<32x128xf32> to vector<32x128xbf16>
    %c1_230 = arith.constant 1 : index
    %c4_231 = arith.constant 4 : index
    %c0_232 = arith.constant 0 : index
    %c0_233 = arith.constant 0 : index
    %218 = vector.load %arg4[%c1_230, %c4_231, %c0_232, %c0_233] : memref<6x7x128x128xbf16, #tpu.memory_space<vmem>>, vector<1x1x128x128xbf16>
    %219 = vector.shape_cast %218 : vector<1x1x128x128xbf16> to vector<128x128xbf16>
    %cst_234 = arith.constant dense<0.000000e+00> : vector<32x128xf32>
    %220 = tpu.matmul %217, %219, %cst_234 {dimension_numbers = #tpu.dot_dimension_numbers<[1], [0], [0], [1], [0, 0, 1, 1], [], []>} : vector<32x128xbf16>, vector<128x128xbf16>, vector<32x128xf32> -> vector<32x128xf32>
    %221 = arith.addf %215, %220 : vector<32x128xf32>
    %c5_235 = arith.constant 5 : index
    %c0_236 = arith.constant 0 : index
    %222 = vector.load %arg16[%c5_235, %c0_236] : memref<70x128xf32, #tpu.memory_space<vmem>>, vector<32x128xf32>
    %223 = arith.truncf %222 : vector<32x128xf32> to vector<32x128xbf16>
    %c1_237 = arith.constant 1 : index
    %c5_238 = arith.constant 5 : index
    %c0_239 = arith.constant 0 : index
    %c0_240 = arith.constant 0 : index
    %224 = vector.load %arg4[%c1_237, %c5_238, %c0_239, %c0_240] : memref<6x7x128x128xbf16, #tpu.memory_space<vmem>>, vector<1x1x128x128xbf16>
    %225 = vector.shape_cast %224 : vector<1x1x128x128xbf16> to vector<128x128xbf16>
    %cst_241 = arith.constant dense<0.000000e+00> : vector<32x128xf32>
    %226 = tpu.matmul %223, %225, %cst_241 {dimension_numbers = #tpu.dot_dimension_numbers<[1], [0], [0], [1], [0, 0, 1, 1], [], []>} : vector<32x128xbf16>, vector<128x128xbf16>, vector<32x128xf32> -> vector<32x128xf32>
    %227 = arith.addf %221, %226 : vector<32x128xf32>
    %c6_242 = arith.constant 6 : index
    %c0_243 = arith.constant 0 : index
    %228 = vector.load %arg16[%c6_242, %c0_243] : memref<70x128xf32, #tpu.memory_space<vmem>>, vector<32x128xf32>
    %229 = arith.truncf %228 : vector<32x128xf32> to vector<32x128xbf16>
    %c1_244 = arith.constant 1 : index
    %c6_245 = arith.constant 6 : index
    %c0_246 = arith.constant 0 : index
    %c0_247 = arith.constant 0 : index
    %230 = vector.load %arg4[%c1_244, %c6_245, %c0_246, %c0_247] : memref<6x7x128x128xbf16, #tpu.memory_space<vmem>>, vector<1x1x128x128xbf16>
    %231 = vector.shape_cast %230 : vector<1x1x128x128xbf16> to vector<128x128xbf16>
    %cst_248 = arith.constant dense<0.000000e+00> : vector<32x128xf32>
    %232 = tpu.matmul %229, %231, %cst_248 {dimension_numbers = #tpu.dot_dimension_numbers<[1], [0], [0], [1], [0, 0, 1, 1], [], []>} : vector<32x128xbf16>, vector<128x128xbf16>, vector<32x128xf32> -> vector<32x128xf32>
    %233 = arith.addf %227, %232 : vector<32x128xf32>
    %c1_249 = arith.constant 1 : index
    %c0_250 = arith.constant 0 : index
    %c0_251 = arith.constant 0 : index
    %234 = vector.load %arg5[%c1_249, %c0_250, %c0_251] : memref<6x1x128xf32, #tpu.memory_space<vmem>>, vector<1x1x128xf32>
    %235 = vector.shape_cast %234 : vector<1x1x128xf32> to vector<1x128xf32>
    %236 = vector.broadcast %235 : vector<1x128xf32> to vector<32x128xf32>
    %237 = arith.addf %233, %236 : vector<32x128xf32>
    %c3_252 = arith.constant 3 : index
    %c0_253 = arith.constant 0 : index
    %238 = tpu.strided_load %arg11[%c3_252, %c0_253] {strides = array<i32: 2, 1>} : memref<70x128xf32, #tpu.memory_space<vmem>>, vector<32x128xf32>
    %c4_254 = arith.constant 4 : index
    %c0_255 = arith.constant 0 : index
    %239 = tpu.strided_load %arg11[%c4_254, %c0_255] {strides = array<i32: 2, 1>} : memref<70x128xf32, #tpu.memory_space<vmem>>, vector<32x128xf32>
    %240 = arith.maximumf %238, %239 : vector<32x128xf32>
    %241 = arith.truncf %240 : vector<32x128xf32> to vector<32x128xbf16>
    %c1_256 = arith.constant 1 : index
    %c0_257 = arith.constant 0 : index
    %c0_258 = arith.constant 0 : index
    %242 = vector.load %arg6[%c1_256, %c0_257, %c0_258] : memref<6x128x128xbf16, #tpu.memory_space<vmem>>, vector<1x128x128xbf16>
    %243 = vector.shape_cast %242 : vector<1x128x128xbf16> to vector<128x128xbf16>
    %cst_259 = arith.constant dense<0.000000e+00> : vector<32x128xf32>
    %244 = tpu.matmul %241, %243, %cst_259 {dimension_numbers = #tpu.dot_dimension_numbers<[1], [0], [0], [1], [0, 0, 1, 1], [], []>} : vector<32x128xbf16>, vector<128x128xbf16>, vector<32x128xf32> -> vector<32x128xf32>
    %c1_260 = arith.constant 1 : index
    %c0_261 = arith.constant 0 : index
    %c0_262 = arith.constant 0 : index
    %245 = vector.load %arg7[%c1_260, %c0_261, %c0_262] : memref<6x1x128xf32, #tpu.memory_space<vmem>>, vector<1x1x128xf32>
    %246 = vector.shape_cast %245 : vector<1x1x128xf32> to vector<1x128xf32>
    %247 = vector.broadcast %246 : vector<1x128xf32> to vector<32x128xf32>
    %248 = arith.addf %244, %247 : vector<32x128xf32>
    %cst_263 = arith.constant dense<0.000000e+00> : vector<128xf32>
    %249 = vector.multi_reduction <add>, %237, %cst_263 [0] : vector<32x128xf32> to vector<128xf32>
    %250 = vector.shape_cast %249 : vector<128xf32> to vector<1x128xf32>
    %cst_264 = arith.constant 3.200000e+01 : f32
    %251 = vector.broadcast %cst_264 : f32 to vector<1x128xf32>
    %252 = arith.divf %250, %251 : vector<1x128xf32>
    %253 = arith.truncf %252 : vector<1x128xf32> to vector<1x128xbf16>
    %c1_265 = arith.constant 1 : index
    %c0_266 = arith.constant 0 : index
    %c0_267 = arith.constant 0 : index
    %254 = vector.load %arg8[%c1_265, %c0_266, %c0_267] : memref<6x128x128xbf16, #tpu.memory_space<vmem>>, vector<1x128x128xbf16>
    %255 = vector.shape_cast %254 : vector<1x128x128xbf16> to vector<128x128xbf16>
    %cst_268 = arith.constant dense<0.000000e+00> : vector<1x128xf32>
    %256 = tpu.matmul %253, %255, %cst_268 {dimension_numbers = #tpu.dot_dimension_numbers<[1], [0], [0], [1], [0, 0, 1, 1], [], []>} : vector<1x128xbf16>, vector<128x128xbf16>, vector<1x128xf32> -> vector<1x128xf32>
    %cst_269 = arith.constant 0.000000e+00 : f32
    %257 = vector.broadcast %cst_269 : f32 to vector<1x128xf32>
    %258 = arith.maximumf %256, %257 : vector<1x128xf32>
    %259 = arith.truncf %258 : vector<1x128xf32> to vector<1x128xbf16>
    %c1_270 = arith.constant 1 : index
    %c0_271 = arith.constant 0 : index
    %c0_272 = arith.constant 0 : index
    %260 = vector.load %arg9[%c1_270, %c0_271, %c0_272] : memref<6x128x128xbf16, #tpu.memory_space<vmem>>, vector<1x128x128xbf16>
    %261 = vector.shape_cast %260 : vector<1x128x128xbf16> to vector<128x128xbf16>
    %cst_273 = arith.constant dense<0.000000e+00> : vector<1x128xf32>
    %262 = tpu.matmul %259, %261, %cst_273 {dimension_numbers = #tpu.dot_dimension_numbers<[1], [0], [0], [1], [0, 0, 1, 1], [], []>} : vector<1x128xbf16>, vector<128x128xbf16>, vector<1x128xf32> -> vector<1x128xf32>
    %263 = arith.negf %262 : vector<1x128xf32>
    %264 = math.exp %263 : vector<1x128xf32>
    %cst_274 = arith.constant 1.000000e+00 : f32
    %265 = vector.broadcast %cst_274 : f32 to vector<1x128xf32>
    %266 = arith.addf %265, %264 : vector<1x128xf32>
    %267 = arith.divf %265, %266 : vector<1x128xf32>
    %268 = vector.broadcast %267 : vector<1x128xf32> to vector<32x128xf32>
    %269 = arith.mulf %237, %268 : vector<32x128xf32>
    %270 = arith.addf %269, %248 : vector<32x128xf32>
    %cst_275 = arith.constant 0.000000e+00 : f32
    %271 = vector.broadcast %cst_275 : f32 to vector<32x128xf32>
    %272 = arith.maximumf %270, %271 : vector<32x128xf32>
    %c0_276 = arith.constant 0 : index
    %c0_277 = arith.constant 0 : index
    %273 = vector.load %arg12[%c0_276, %c0_277] : memref<38x128xf32, #tpu.memory_space<vmem>>, vector<3x128xf32>
    tpu.vector_store %arg12[%c0_276, %c0_277], %0 {strides = array<i32>} : memref<38x128xf32, #tpu.memory_space<vmem>>, vector<3x128xf32>,
    %c35_278 = arith.constant 35 : index
    %c0_279 = arith.constant 0 : index
    %274 = vector.load %arg12[%c35_278, %c0_279] : memref<38x128xf32, #tpu.memory_space<vmem>>, vector<3x128xf32>
    tpu.vector_store %arg12[%c35_278, %c0_279], %0 {strides = array<i32>} : memref<38x128xf32, #tpu.memory_space<vmem>>, vector<3x128xf32>,
    %c3_280 = arith.constant 3 : index
    %c0_281 = arith.constant 0 : index
    %275 = vector.load %arg12[%c3_280, %c0_281] : memref<38x128xf32, #tpu.memory_space<vmem>>, vector<32x128xf32>
    tpu.vector_store %arg12[%c3_280, %c0_281], %272 {strides = array<i32>} : memref<38x128xf32, #tpu.memory_space<vmem>>, vector<32x128xf32>,
    %c0_282 = arith.constant 0 : index
    %c0_283 = arith.constant 0 : index
    %276 = tpu.strided_load %arg12[%c0_282, %c0_283] {strides = array<i32: 2, 1>} : memref<38x128xf32, #tpu.memory_space<vmem>>, vector<16x128xf32>
    %277 = arith.truncf %276 : vector<16x128xf32> to vector<16x128xbf16>
    %c2_284 = arith.constant 2 : index
    %c0_285 = arith.constant 0 : index
    %c0_286 = arith.constant 0 : index
    %c0_287 = arith.constant 0 : index
    %278 = vector.load %arg2[%c2_284, %c0_285, %c0_286, %c0_287] : memref<6x7x128x128xbf16, #tpu.memory_space<vmem>>, vector<1x1x128x128xbf16>
    %279 = vector.shape_cast %278 : vector<1x1x128x128xbf16> to vector<128x128xbf16>
    %cst_288 = arith.constant dense<0.000000e+00> : vector<16x128xf32>
    %280 = tpu.matmul %277, %279, %cst_288 {dimension_numbers = #tpu.dot_dimension_numbers<[1], [0], [0], [1], [0, 0, 1, 1], [], []>} : vector<16x128xbf16>, vector<128x128xbf16>, vector<16x128xf32> -> vector<16x128xf32>
    %c1_289 = arith.constant 1 : index
    %c0_290 = arith.constant 0 : index
    %281 = tpu.strided_load %arg12[%c1_289, %c0_290] {strides = array<i32: 2, 1>} : memref<38x128xf32, #tpu.memory_space<vmem>>, vector<16x128xf32>
    %282 = arith.truncf %281 : vector<16x128xf32> to vector<16x128xbf16>
    %c2_291 = arith.constant 2 : index
    %c1_292 = arith.constant 1 : index
    %c0_293 = arith.constant 0 : index
    %c0_294 = arith.constant 0 : index
    %283 = vector.load %arg2[%c2_291, %c1_292, %c0_293, %c0_294] : memref<6x7x128x128xbf16, #tpu.memory_space<vmem>>, vector<1x1x128x128xbf16>
    %284 = vector.shape_cast %283 : vector<1x1x128x128xbf16> to vector<128x128xbf16>
    %cst_295 = arith.constant dense<0.000000e+00> : vector<16x128xf32>
    %285 = tpu.matmul %282, %284, %cst_295 {dimension_numbers = #tpu.dot_dimension_numbers<[1], [0], [0], [1], [0, 0, 1, 1], [], []>} : vector<16x128xbf16>, vector<128x128xbf16>, vector<16x128xf32> -> vector<16x128xf32>
    %286 = arith.addf %280, %285 : vector<16x128xf32>
    %c2_296 = arith.constant 2 : index
    %c0_297 = arith.constant 0 : index
    %287 = tpu.strided_load %arg12[%c2_296, %c0_297] {strides = array<i32: 2, 1>} : memref<38x128xf32, #tpu.memory_space<vmem>>, vector<16x128xf32>
    %288 = arith.truncf %287 : vector<16x128xf32> to vector<16x128xbf16>
    %c2_298 = arith.constant 2 : index
    %c2_299 = arith.constant 2 : index
    %c0_300 = arith.constant 0 : index
    %c0_301 = arith.constant 0 : index
    %289 = vector.load %arg2[%c2_298, %c2_299, %c0_300, %c0_301] : memref<6x7x128x128xbf16, #tpu.memory_space<vmem>>, vector<1x1x128x128xbf16>
    %290 = vector.shape_cast %289 : vector<1x1x128x128xbf16> to vector<128x128xbf16>
    %cst_302 = arith.constant dense<0.000000e+00> : vector<16x128xf32>
    %291 = tpu.matmul %288, %290, %cst_302 {dimension_numbers = #tpu.dot_dimension_numbers<[1], [0], [0], [1], [0, 0, 1, 1], [], []>} : vector<16x128xbf16>, vector<128x128xbf16>, vector<16x128xf32> -> vector<16x128xf32>
    %292 = arith.addf %286, %291 : vector<16x128xf32>
    %c3_303 = arith.constant 3 : index
    %c0_304 = arith.constant 0 : index
    %293 = tpu.strided_load %arg12[%c3_303, %c0_304] {strides = array<i32: 2, 1>} : memref<38x128xf32, #tpu.memory_space<vmem>>, vector<16x128xf32>
    %294 = arith.truncf %293 : vector<16x128xf32> to vector<16x128xbf16>
    %c2_305 = arith.constant 2 : index
    %c3_306 = arith.constant 3 : index
    %c0_307 = arith.constant 0 : index
    %c0_308 = arith.constant 0 : index
    %295 = vector.load %arg2[%c2_305, %c3_306, %c0_307, %c0_308] : memref<6x7x128x128xbf16, #tpu.memory_space<vmem>>, vector<1x1x128x128xbf16>
    %296 = vector.shape_cast %295 : vector<1x1x128x128xbf16> to vector<128x128xbf16>
    %cst_309 = arith.constant dense<0.000000e+00> : vector<16x128xf32>
    %297 = tpu.matmul %294, %296, %cst_309 {dimension_numbers = #tpu.dot_dimension_numbers<[1], [0], [0], [1], [0, 0, 1, 1], [], []>} : vector<16x128xbf16>, vector<128x128xbf16>, vector<16x128xf32> -> vector<16x128xf32>
    %298 = arith.addf %292, %297 : vector<16x128xf32>
    %c4_310 = arith.constant 4 : index
    %c0_311 = arith.constant 0 : index
    %299 = tpu.strided_load %arg12[%c4_310, %c0_311] {strides = array<i32: 2, 1>} : memref<38x128xf32, #tpu.memory_space<vmem>>, vector<16x128xf32>
    %300 = arith.truncf %299 : vector<16x128xf32> to vector<16x128xbf16>
    %c2_312 = arith.constant 2 : index
    %c4_313 = arith.constant 4 : index
    %c0_314 = arith.constant 0 : index
    %c0_315 = arith.constant 0 : index
    %301 = vector.load %arg2[%c2_312, %c4_313, %c0_314, %c0_315] : memref<6x7x128x128xbf16, #tpu.memory_space<vmem>>, vector<1x1x128x128xbf16>
    %302 = vector.shape_cast %301 : vector<1x1x128x128xbf16> to vector<128x128xbf16>
    %cst_316 = arith.constant dense<0.000000e+00> : vector<16x128xf32>
    %303 = tpu.matmul %300, %302, %cst_316 {dimension_numbers = #tpu.dot_dimension_numbers<[1], [0], [0], [1], [0, 0, 1, 1], [], []>} : vector<16x128xbf16>, vector<128x128xbf16>, vector<16x128xf32> -> vector<16x128xf32>
    %304 = arith.addf %298, %303 : vector<16x128xf32>
    %c5_317 = arith.constant 5 : index
    %c0_318 = arith.constant 0 : index
    %305 = tpu.strided_load %arg12[%c5_317, %c0_318] {strides = array<i32: 2, 1>} : memref<38x128xf32, #tpu.memory_space<vmem>>, vector<16x128xf32>
    %306 = arith.truncf %305 : vector<16x128xf32> to vector<16x128xbf16>
    %c2_319 = arith.constant 2 : index
    %c5_320 = arith.constant 5 : index
    %c0_321 = arith.constant 0 : index
    %c0_322 = arith.constant 0 : index
    %307 = vector.load %arg2[%c2_319, %c5_320, %c0_321, %c0_322] : memref<6x7x128x128xbf16, #tpu.memory_space<vmem>>, vector<1x1x128x128xbf16>
    %308 = vector.shape_cast %307 : vector<1x1x128x128xbf16> to vector<128x128xbf16>
    %cst_323 = arith.constant dense<0.000000e+00> : vector<16x128xf32>
    %309 = tpu.matmul %306, %308, %cst_323 {dimension_numbers = #tpu.dot_dimension_numbers<[1], [0], [0], [1], [0, 0, 1, 1], [], []>} : vector<16x128xbf16>, vector<128x128xbf16>, vector<16x128xf32> -> vector<16x128xf32>
    %310 = arith.addf %304, %309 : vector<16x128xf32>
    %c6_324 = arith.constant 6 : index
    %c0_325 = arith.constant 0 : index
    %311 = tpu.strided_load %arg12[%c6_324, %c0_325] {strides = array<i32: 2, 1>} : memref<38x128xf32, #tpu.memory_space<vmem>>, vector<16x128xf32>
    %312 = arith.truncf %311 : vector<16x128xf32> to vector<16x128xbf16>
    %c2_326 = arith.constant 2 : index
    %c6_327 = arith.constant 6 : index
    %c0_328 = arith.constant 0 : index
    %c0_329 = arith.constant 0 : index
    %313 = vector.load %arg2[%c2_326, %c6_327, %c0_328, %c0_329] : memref<6x7x128x128xbf16, #tpu.memory_space<vmem>>, vector<1x1x128x128xbf16>
    %314 = vector.shape_cast %313 : vector<1x1x128x128xbf16> to vector<128x128xbf16>
    %cst_330 = arith.constant dense<0.000000e+00> : vector<16x128xf32>
    %315 = tpu.matmul %312, %314, %cst_330 {dimension_numbers = #tpu.dot_dimension_numbers<[1], [0], [0], [1], [0, 0, 1, 1], [], []>} : vector<16x128xbf16>, vector<128x128xbf16>, vector<16x128xf32> -> vector<16x128xf32>
    %316 = arith.addf %310, %315 : vector<16x128xf32>
    %c2_331 = arith.constant 2 : index
    %c0_332 = arith.constant 0 : index
    %c0_333 = arith.constant 0 : index
    %317 = vector.load %arg3[%c2_331, %c0_332, %c0_333] : memref<6x1x128xf32, #tpu.memory_space<vmem>>, vector<1x1x128xf32>
    %318 = vector.shape_cast %317 : vector<1x1x128xf32> to vector<1x128xf32>
    %319 = vector.broadcast %318 : vector<1x128xf32> to vector<16x128xf32>
    %320 = arith.addf %316, %319 : vector<16x128xf32>
    %cst_334 = arith.constant 0.000000e+00 : f32
    %321 = vector.broadcast %cst_334 : f32 to vector<16x128xf32>
    %322 = arith.maximumf %320, %321 : vector<16x128xf32>
    %c0_335 = arith.constant 0 : index
    %c0_336 = arith.constant 0 : index
    %323 = vector.load %arg16[%c0_335, %c0_336] : memref<70x128xf32, #tpu.memory_space<vmem>>, vector<3x128xf32>
    tpu.vector_store %arg16[%c0_335, %c0_336], %0 {strides = array<i32>} : memref<70x128xf32, #tpu.memory_space<vmem>>, vector<3x128xf32>,
    %c19 = arith.constant 19 : index
    %c0_337 = arith.constant 0 : index
    %324 = vector.load %arg16[%c19, %c0_337] : memref<70x128xf32, #tpu.memory_space<vmem>>, vector<3x128xf32>
    tpu.vector_store %arg16[%c19, %c0_337], %0 {strides = array<i32>} : memref<70x128xf32, #tpu.memory_space<vmem>>, vector<3x128xf32>,
    %c3_338 = arith.constant 3 : index
    %c0_339 = arith.constant 0 : index
    %325 = vector.load %arg16[%c3_338, %c0_339] : memref<70x128xf32, #tpu.memory_space<vmem>>, vector<16x128xf32>
    tpu.vector_store %arg16[%c3_338, %c0_339], %322 {strides = array<i32>} : memref<70x128xf32, #tpu.memory_space<vmem>>, vector<16x128xf32>,
    %c0_340 = arith.constant 0 : index
    %c0_341 = arith.constant 0 : index
    %326 = vector.load %arg16[%c0_340, %c0_341] : memref<70x128xf32, #tpu.memory_space<vmem>>, vector<16x128xf32>
    %327 = arith.truncf %326 : vector<16x128xf32> to vector<16x128xbf16>
    %c2_342 = arith.constant 2 : index
    %c0_343 = arith.constant 0 : index
    %c0_344 = arith.constant 0 : index
    %c0_345 = arith.constant 0 : index
    %328 = vector.load %arg4[%c2_342, %c0_343, %c0_344, %c0_345] : memref<6x7x128x128xbf16, #tpu.memory_space<vmem>>, vector<1x1x128x128xbf16>
    %329 = vector.shape_cast %328 : vector<1x1x128x128xbf16> to vector<128x128xbf16>
    %cst_346 = arith.constant dense<0.000000e+00> : vector<16x128xf32>
    %330 = tpu.matmul %327, %329, %cst_346 {dimension_numbers = #tpu.dot_dimension_numbers<[1], [0], [0], [1], [0, 0, 1, 1], [], []>} : vector<16x128xbf16>, vector<128x128xbf16>, vector<16x128xf32> -> vector<16x128xf32>
    %c1_347 = arith.constant 1 : index
    %c0_348 = arith.constant 0 : index
    %331 = vector.load %arg16[%c1_347, %c0_348] : memref<70x128xf32, #tpu.memory_space<vmem>>, vector<16x128xf32>
    %332 = arith.truncf %331 : vector<16x128xf32> to vector<16x128xbf16>
    %c2_349 = arith.constant 2 : index
    %c1_350 = arith.constant 1 : index
    %c0_351 = arith.constant 0 : index
    %c0_352 = arith.constant 0 : index
    %333 = vector.load %arg4[%c2_349, %c1_350, %c0_351, %c0_352] : memref<6x7x128x128xbf16, #tpu.memory_space<vmem>>, vector<1x1x128x128xbf16>
    %334 = vector.shape_cast %333 : vector<1x1x128x128xbf16> to vector<128x128xbf16>
    %cst_353 = arith.constant dense<0.000000e+00> : vector<16x128xf32>
    %335 = tpu.matmul %332, %334, %cst_353 {dimension_numbers = #tpu.dot_dimension_numbers<[1], [0], [0], [1], [0, 0, 1, 1], [], []>} : vector<16x128xbf16>, vector<128x128xbf16>, vector<16x128xf32> -> vector<16x128xf32>
    %336 = arith.addf %330, %335 : vector<16x128xf32>
    %c2_354 = arith.constant 2 : index
    %c0_355 = arith.constant 0 : index
    %337 = vector.load %arg16[%c2_354, %c0_355] : memref<70x128xf32, #tpu.memory_space<vmem>>, vector<16x128xf32>
    %338 = arith.truncf %337 : vector<16x128xf32> to vector<16x128xbf16>
    %c2_356 = arith.constant 2 : index
    %c2_357 = arith.constant 2 : index
    %c0_358 = arith.constant 0 : index
    %c0_359 = arith.constant 0 : index
    %339 = vector.load %arg4[%c2_356, %c2_357, %c0_358, %c0_359] : memref<6x7x128x128xbf16, #tpu.memory_space<vmem>>, vector<1x1x128x128xbf16>
    %340 = vector.shape_cast %339 : vector<1x1x128x128xbf16> to vector<128x128xbf16>
    %cst_360 = arith.constant dense<0.000000e+00> : vector<16x128xf32>
    %341 = tpu.matmul %338, %340, %cst_360 {dimension_numbers = #tpu.dot_dimension_numbers<[1], [0], [0], [1], [0, 0, 1, 1], [], []>} : vector<16x128xbf16>, vector<128x128xbf16>, vector<16x128xf32> -> vector<16x128xf32>
    %342 = arith.addf %336, %341 : vector<16x128xf32>
    %c3_361 = arith.constant 3 : index
    %c0_362 = arith.constant 0 : index
    %343 = vector.load %arg16[%c3_361, %c0_362] : memref<70x128xf32, #tpu.memory_space<vmem>>, vector<16x128xf32>
    %344 = arith.truncf %343 : vector<16x128xf32> to vector<16x128xbf16>
    %c2_363 = arith.constant 2 : index
    %c3_364 = arith.constant 3 : index
    %c0_365 = arith.constant 0 : index
    %c0_366 = arith.constant 0 : index
    %345 = vector.load %arg4[%c2_363, %c3_364, %c0_365, %c0_366] : memref<6x7x128x128xbf16, #tpu.memory_space<vmem>>, vector<1x1x128x128xbf16>
    %346 = vector.shape_cast %345 : vector<1x1x128x128xbf16> to vector<128x128xbf16>
    %cst_367 = arith.constant dense<0.000000e+00> : vector<16x128xf32>
    %347 = tpu.matmul %344, %346, %cst_367 {dimension_numbers = #tpu.dot_dimension_numbers<[1], [0], [0], [1], [0, 0, 1, 1], [], []>} : vector<16x128xbf16>, vector<128x128xbf16>, vector<16x128xf32> -> vector<16x128xf32>
    %348 = arith.addf %342, %347 : vector<16x128xf32>
    %c4_368 = arith.constant 4 : index
    %c0_369 = arith.constant 0 : index
    %349 = vector.load %arg16[%c4_368, %c0_369] : memref<70x128xf32, #tpu.memory_space<vmem>>, vector<16x128xf32>
    %350 = arith.truncf %349 : vector<16x128xf32> to vector<16x128xbf16>
    %c2_370 = arith.constant 2 : index
    %c4_371 = arith.constant 4 : index
    %c0_372 = arith.constant 0 : index
    %c0_373 = arith.constant 0 : index
    %351 = vector.load %arg4[%c2_370, %c4_371, %c0_372, %c0_373] : memref<6x7x128x128xbf16, #tpu.memory_space<vmem>>, vector<1x1x128x128xbf16>
    %352 = vector.shape_cast %351 : vector<1x1x128x128xbf16> to vector<128x128xbf16>
    %cst_374 = arith.constant dense<0.000000e+00> : vector<16x128xf32>
    %353 = tpu.matmul %350, %352, %cst_374 {dimension_numbers = #tpu.dot_dimension_numbers<[1], [0], [0], [1], [0, 0, 1, 1], [], []>} : vector<16x128xbf16>, vector<128x128xbf16>, vector<16x128xf32> -> vector<16x128xf32>
    %354 = arith.addf %348, %353 : vector<16x128xf32>
    %c5_375 = arith.constant 5 : index
    %c0_376 = arith.constant 0 : index
    %355 = vector.load %arg16[%c5_375, %c0_376] : memref<70x128xf32, #tpu.memory_space<vmem>>, vector<16x128xf32>
    %356 = arith.truncf %355 : vector<16x128xf32> to vector<16x128xbf16>
    %c2_377 = arith.constant 2 : index
    %c5_378 = arith.constant 5 : index
    %c0_379 = arith.constant 0 : index
    %c0_380 = arith.constant 0 : index
    %357 = vector.load %arg4[%c2_377, %c5_378, %c0_379, %c0_380] : memref<6x7x128x128xbf16, #tpu.memory_space<vmem>>, vector<1x1x128x128xbf16>
    %358 = vector.shape_cast %357 : vector<1x1x128x128xbf16> to vector<128x128xbf16>
    %cst_381 = arith.constant dense<0.000000e+00> : vector<16x128xf32>
    %359 = tpu.matmul %356, %358, %cst_381 {dimension_numbers = #tpu.dot_dimension_numbers<[1], [0], [0], [1], [0, 0, 1, 1], [], []>} : vector<16x128xbf16>, vector<128x128xbf16>, vector<16x128xf32> -> vector<16x128xf32>
    %360 = arith.addf %354, %359 : vector<16x128xf32>
    %c6_382 = arith.constant 6 : index
    %c0_383 = arith.constant 0 : index
    %361 = vector.load %arg16[%c6_382, %c0_383] : memref<70x128xf32, #tpu.memory_space<vmem>>, vector<16x128xf32>
    %362 = arith.truncf %361 : vector<16x128xf32> to vector<16x128xbf16>
    %c2_384 = arith.constant 2 : index
    %c6_385 = arith.constant 6 : index
    %c0_386 = arith.constant 0 : index
    %c0_387 = arith.constant 0 : index
    %363 = vector.load %arg4[%c2_384, %c6_385, %c0_386, %c0_387] : memref<6x7x128x128xbf16, #tpu.memory_space<vmem>>, vector<1x1x128x128xbf16>
    %364 = vector.shape_cast %363 : vector<1x1x128x128xbf16> to vector<128x128xbf16>
    %cst_388 = arith.constant dense<0.000000e+00> : vector<16x128xf32>
    %365 = tpu.matmul %362, %364, %cst_388 {dimension_numbers = #tpu.dot_dimension_numbers<[1], [0], [0], [1], [0, 0, 1, 1], [], []>} : vector<16x128xbf16>, vector<128x128xbf16>, vector<16x128xf32> -> vector<16x128xf32>
    %366 = arith.addf %360, %365 : vector<16x128xf32>
    %c2_389 = arith.constant 2 : index
    %c0_390 = arith.constant 0 : index
    %c0_391 = arith.constant 0 : index
    %367 = vector.load %arg5[%c2_389, %c0_390, %c0_391] : memref<6x1x128xf32, #tpu.memory_space<vmem>>, vector<1x1x128xf32>
    %368 = vector.shape_cast %367 : vector<1x1x128xf32> to vector<1x128xf32>
    %369 = vector.broadcast %368 : vector<1x128xf32> to vector<16x128xf32>
    %370 = arith.addf %366, %369 : vector<16x128xf32>
    %c3_392 = arith.constant 3 : index
    %c0_393 = arith.constant 0 : index
    %371 = tpu.strided_load %arg12[%c3_392, %c0_393] {strides = array<i32: 2, 1>} : memref<38x128xf32, #tpu.memory_space<vmem>>, vector<16x128xf32>
    %c4_394 = arith.constant 4 : index
    %c0_395 = arith.constant 0 : index
    %372 = tpu.strided_load %arg12[%c4_394, %c0_395] {strides = array<i32: 2, 1>} : memref<38x128xf32, #tpu.memory_space<vmem>>, vector<16x128xf32>
    %373 = arith.maximumf %371, %372 : vector<16x128xf32>
    %374 = arith.truncf %373 : vector<16x128xf32> to vector<16x128xbf16>
    %c2_396 = arith.constant 2 : index
    %c0_397 = arith.constant 0 : index
    %c0_398 = arith.constant 0 : index
    %375 = vector.load %arg6[%c2_396, %c0_397, %c0_398] : memref<6x128x128xbf16, #tpu.memory_space<vmem>>, vector<1x128x128xbf16>
    %376 = vector.shape_cast %375 : vector<1x128x128xbf16> to vector<128x128xbf16>
    %cst_399 = arith.constant dense<0.000000e+00> : vector<16x128xf32>
    %377 = tpu.matmul %374, %376, %cst_399 {dimension_numbers = #tpu.dot_dimension_numbers<[1], [0], [0], [1], [0, 0, 1, 1], [], []>} : vector<16x128xbf16>, vector<128x128xbf16>, vector<16x128xf32> -> vector<16x128xf32>
    %c2_400 = arith.constant 2 : index
    %c0_401 = arith.constant 0 : index
    %c0_402 = arith.constant 0 : index
    %378 = vector.load %arg7[%c2_400, %c0_401, %c0_402] : memref<6x1x128xf32, #tpu.memory_space<vmem>>, vector<1x1x128xf32>
    %379 = vector.shape_cast %378 : vector<1x1x128xf32> to vector<1x128xf32>
    %380 = vector.broadcast %379 : vector<1x128xf32> to vector<16x128xf32>
    %381 = arith.addf %377, %380 : vector<16x128xf32>
    %cst_403 = arith.constant dense<0.000000e+00> : vector<128xf32>
    %382 = vector.multi_reduction <add>, %370, %cst_403 [0] : vector<16x128xf32> to vector<128xf32>
    %383 = vector.shape_cast %382 : vector<128xf32> to vector<1x128xf32>
    %cst_404 = arith.constant 1.600000e+01 : f32
    %384 = vector.broadcast %cst_404 : f32 to vector<1x128xf32>
    %385 = arith.divf %383, %384 : vector<1x128xf32>
    %386 = arith.truncf %385 : vector<1x128xf32> to vector<1x128xbf16>
    %c2_405 = arith.constant 2 : index
    %c0_406 = arith.constant 0 : index
    %c0_407 = arith.constant 0 : index
    %387 = vector.load %arg8[%c2_405, %c0_406, %c0_407] : memref<6x128x128xbf16, #tpu.memory_space<vmem>>, vector<1x128x128xbf16>
    %388 = vector.shape_cast %387 : vector<1x128x128xbf16> to vector<128x128xbf16>
    %cst_408 = arith.constant dense<0.000000e+00> : vector<1x128xf32>
    %389 = tpu.matmul %386, %388, %cst_408 {dimension_numbers = #tpu.dot_dimension_numbers<[1], [0], [0], [1], [0, 0, 1, 1], [], []>} : vector<1x128xbf16>, vector<128x128xbf16>, vector<1x128xf32> -> vector<1x128xf32>
    %cst_409 = arith.constant 0.000000e+00 : f32
    %390 = vector.broadcast %cst_409 : f32 to vector<1x128xf32>
    %391 = arith.maximumf %389, %390 : vector<1x128xf32>
    %392 = arith.truncf %391 : vector<1x128xf32> to vector<1x128xbf16>
    %c2_410 = arith.constant 2 : index
    %c0_411 = arith.constant 0 : index
    %c0_412 = arith.constant 0 : index
    %393 = vector.load %arg9[%c2_410, %c0_411, %c0_412] : memref<6x128x128xbf16, #tpu.memory_space<vmem>>, vector<1x128x128xbf16>
    %394 = vector.shape_cast %393 : vector<1x128x128xbf16> to vector<128x128xbf16>
    %cst_413 = arith.constant dense<0.000000e+00> : vector<1x128xf32>
    %395 = tpu.matmul %392, %394, %cst_413 {dimension_numbers = #tpu.dot_dimension_numbers<[1], [0], [0], [1], [0, 0, 1, 1], [], []>} : vector<1x128xbf16>, vector<128x128xbf16>, vector<1x128xf32> -> vector<1x128xf32>
    %396 = arith.negf %395 : vector<1x128xf32>
    %397 = math.exp %396 : vector<1x128xf32>
    %cst_414 = arith.constant 1.000000e+00 : f32
    %398 = vector.broadcast %cst_414 : f32 to vector<1x128xf32>
    %399 = arith.addf %398, %397 : vector<1x128xf32>
    %400 = arith.divf %398, %399 : vector<1x128xf32>
    %401 = vector.broadcast %400 : vector<1x128xf32> to vector<16x128xf32>
    %402 = arith.mulf %370, %401 : vector<16x128xf32>
    %403 = arith.addf %402, %381 : vector<16x128xf32>
    %cst_415 = arith.constant 0.000000e+00 : f32
    %404 = vector.broadcast %cst_415 : f32 to vector<16x128xf32>
    %405 = arith.maximumf %403, %404 : vector<16x128xf32>
    %c0_416 = arith.constant 0 : index
    %c0_417 = arith.constant 0 : index
    %406 = vector.load %arg13[%c0_416, %c0_417] : memref<22x128xf32, #tpu.memory_space<vmem>>, vector<3x128xf32>
    tpu.vector_store %arg13[%c0_416, %c0_417], %0 {strides = array<i32>} : memref<22x128xf32, #tpu.memory_space<vmem>>, vector<3x128xf32>,
    %c19_418 = arith.constant 19 : index
    %c0_419 = arith.constant 0 : index
    %407 = vector.load %arg13[%c19_418, %c0_419] : memref<22x128xf32, #tpu.memory_space<vmem>>, vector<3x128xf32>
    tpu.vector_store %arg13[%c19_418, %c0_419], %0 {strides = array<i32>} : memref<22x128xf32, #tpu.memory_space<vmem>>, vector<3x128xf32>,
    %c3_420 = arith.constant 3 : index
    %c0_421 = arith.constant 0 : index
    %408 = vector.load %arg13[%c3_420, %c0_421] : memref<22x128xf32, #tpu.memory_space<vmem>>, vector<16x128xf32>
    tpu.vector_store %arg13[%c3_420, %c0_421], %405 {strides = array<i32>} : memref<22x128xf32, #tpu.memory_space<vmem>>, vector<16x128xf32>,
    %c0_422 = arith.constant 0 : index
    %c0_423 = arith.constant 0 : index
    %409 = tpu.strided_load %arg13[%c0_422, %c0_423] {strides = array<i32: 2, 1>} : memref<22x128xf32, #tpu.memory_space<vmem>>, vector<8x128xf32>
    %410 = arith.truncf %409 : vector<8x128xf32> to vector<8x128xbf16>
    %c3_424 = arith.constant 3 : index
    %c0_425 = arith.constant 0 : index
    %c0_426 = arith.constant 0 : index
    %c0_427 = arith.constant 0 : index
    %411 = vector.load %arg2[%c3_424, %c0_425, %c0_426, %c0_427] : memref<6x7x128x128xbf16, #tpu.memory_space<vmem>>, vector<1x1x128x128xbf16>
    %412 = vector.shape_cast %411 : vector<1x1x128x128xbf16> to vector<128x128xbf16>
    %cst_428 = arith.constant dense<0.000000e+00> : vector<8x128xf32>
    %413 = tpu.matmul %410, %412, %cst_428 {dimension_numbers = #tpu.dot_dimension_numbers<[1], [0], [0], [1], [0, 0, 1, 1], [], []>} : vector<8x128xbf16>, vector<128x128xbf16>, vector<8x128xf32> -> vector<8x128xf32>
    %c1_429 = arith.constant 1 : index
    %c0_430 = arith.constant 0 : index
    %414 = tpu.strided_load %arg13[%c1_429, %c0_430] {strides = array<i32: 2, 1>} : memref<22x128xf32, #tpu.memory_space<vmem>>, vector<8x128xf32>
    %415 = arith.truncf %414 : vector<8x128xf32> to vector<8x128xbf16>
    %c3_431 = arith.constant 3 : index
    %c1_432 = arith.constant 1 : index
    %c0_433 = arith.constant 0 : index
    %c0_434 = arith.constant 0 : index
    %416 = vector.load %arg2[%c3_431, %c1_432, %c0_433, %c0_434] : memref<6x7x128x128xbf16, #tpu.memory_space<vmem>>, vector<1x1x128x128xbf16>
    %417 = vector.shape_cast %416 : vector<1x1x128x128xbf16> to vector<128x128xbf16>
    %cst_435 = arith.constant dense<0.000000e+00> : vector<8x128xf32>
    %418 = tpu.matmul %415, %417, %cst_435 {dimension_numbers = #tpu.dot_dimension_numbers<[1], [0], [0], [1], [0, 0, 1, 1], [], []>} : vector<8x128xbf16>, vector<128x128xbf16>, vector<8x128xf32> -> vector<8x128xf32>
    %419 = arith.addf %413, %418 : vector<8x128xf32>
    %c2_436 = arith.constant 2 : index
    %c0_437 = arith.constant 0 : index
    %420 = tpu.strided_load %arg13[%c2_436, %c0_437] {strides = array<i32: 2, 1>} : memref<22x128xf32, #tpu.memory_space<vmem>>, vector<8x128xf32>
    %421 = arith.truncf %420 : vector<8x128xf32> to vector<8x128xbf16>
    %c3_438 = arith.constant 3 : index
    %c2_439 = arith.constant 2 : index
    %c0_440 = arith.constant 0 : index
    %c0_441 = arith.constant 0 : index
    %422 = vector.load %arg2[%c3_438, %c2_439, %c0_440, %c0_441] : memref<6x7x128x128xbf16, #tpu.memory_space<vmem>>, vector<1x1x128x128xbf16>
    %423 = vector.shape_cast %422 : vector<1x1x128x128xbf16> to vector<128x128xbf16>
    %cst_442 = arith.constant dense<0.000000e+00> : vector<8x128xf32>
    %424 = tpu.matmul %421, %423, %cst_442 {dimension_numbers = #tpu.dot_dimension_numbers<[1], [0], [0], [1], [0, 0, 1, 1], [], []>} : vector<8x128xbf16>, vector<128x128xbf16>, vector<8x128xf32> -> vector<8x128xf32>
    %425 = arith.addf %419, %424 : vector<8x128xf32>
    %c3_443 = arith.constant 3 : index
    %c0_444 = arith.constant 0 : index
    %426 = tpu.strided_load %arg13[%c3_443, %c0_444] {strides = array<i32: 2, 1>} : memref<22x128xf32, #tpu.memory_space<vmem>>, vector<8x128xf32>
    %427 = arith.truncf %426 : vector<8x128xf32> to vector<8x128xbf16>
    %c3_445 = arith.constant 3 : index
    %c3_446 = arith.constant 3 : index
    %c0_447 = arith.constant 0 : index
    %c0_448 = arith.constant 0 : index
    %428 = vector.load %arg2[%c3_445, %c3_446, %c0_447, %c0_448] : memref<6x7x128x128xbf16, #tpu.memory_space<vmem>>, vector<1x1x128x128xbf16>
    %429 = vector.shape_cast %428 : vector<1x1x128x128xbf16> to vector<128x128xbf16>
    %cst_449 = arith.constant dense<0.000000e+00> : vector<8x128xf32>
    %430 = tpu.matmul %427, %429, %cst_449 {dimension_numbers = #tpu.dot_dimension_numbers<[1], [0], [0], [1], [0, 0, 1, 1], [], []>} : vector<8x128xbf16>, vector<128x128xbf16>, vector<8x128xf32> -> vector<8x128xf32>
    %431 = arith.addf %425, %430 : vector<8x128xf32>
    %c4_450 = arith.constant 4 : index
    %c0_451 = arith.constant 0 : index
    %432 = tpu.strided_load %arg13[%c4_450, %c0_451] {strides = array<i32: 2, 1>} : memref<22x128xf32, #tpu.memory_space<vmem>>, vector<8x128xf32>
    %433 = arith.truncf %432 : vector<8x128xf32> to vector<8x128xbf16>
    %c3_452 = arith.constant 3 : index
    %c4_453 = arith.constant 4 : index
    %c0_454 = arith.constant 0 : index
    %c0_455 = arith.constant 0 : index
    %434 = vector.load %arg2[%c3_452, %c4_453, %c0_454, %c0_455] : memref<6x7x128x128xbf16, #tpu.memory_space<vmem>>, vector<1x1x128x128xbf16>
    %435 = vector.shape_cast %434 : vector<1x1x128x128xbf16> to vector<128x128xbf16>
    %cst_456 = arith.constant dense<0.000000e+00> : vector<8x128xf32>
    %436 = tpu.matmul %433, %435, %cst_456 {dimension_numbers = #tpu.dot_dimension_numbers<[1], [0], [0], [1], [0, 0, 1, 1], [], []>} : vector<8x128xbf16>, vector<128x128xbf16>, vector<8x128xf32> -> vector<8x128xf32>
    %437 = arith.addf %431, %436 : vector<8x128xf32>
    %c5_457 = arith.constant 5 : index
    %c0_458 = arith.constant 0 : index
    %438 = tpu.strided_load %arg13[%c5_457, %c0_458] {strides = array<i32: 2, 1>} : memref<22x128xf32, #tpu.memory_space<vmem>>, vector<8x128xf32>
    %439 = arith.truncf %438 : vector<8x128xf32> to vector<8x128xbf16>
    %c3_459 = arith.constant 3 : index
    %c5_460 = arith.constant 5 : index
    %c0_461 = arith.constant 0 : index
    %c0_462 = arith.constant 0 : index
    %440 = vector.load %arg2[%c3_459, %c5_460, %c0_461, %c0_462] : memref<6x7x128x128xbf16, #tpu.memory_space<vmem>>, vector<1x1x128x128xbf16>
    %441 = vector.shape_cast %440 : vector<1x1x128x128xbf16> to vector<128x128xbf16>
    %cst_463 = arith.constant dense<0.000000e+00> : vector<8x128xf32>
    %442 = tpu.matmul %439, %441, %cst_463 {dimension_numbers = #tpu.dot_dimension_numbers<[1], [0], [0], [1], [0, 0, 1, 1], [], []>} : vector<8x128xbf16>, vector<128x128xbf16>, vector<8x128xf32> -> vector<8x128xf32>
    %443 = arith.addf %437, %442 : vector<8x128xf32>
    %c6_464 = arith.constant 6 : index
    %c0_465 = arith.constant 0 : index
    %444 = tpu.strided_load %arg13[%c6_464, %c0_465] {strides = array<i32: 2, 1>} : memref<22x128xf32, #tpu.memory_space<vmem>>, vector<8x128xf32>
    %445 = arith.truncf %444 : vector<8x128xf32> to vector<8x128xbf16>
    %c3_466 = arith.constant 3 : index
    %c6_467 = arith.constant 6 : index
    %c0_468 = arith.constant 0 : index
    %c0_469 = arith.constant 0 : index
    %446 = vector.load %arg2[%c3_466, %c6_467, %c0_468, %c0_469] : memref<6x7x128x128xbf16, #tpu.memory_space<vmem>>, vector<1x1x128x128xbf16>
    %447 = vector.shape_cast %446 : vector<1x1x128x128xbf16> to vector<128x128xbf16>
    %cst_470 = arith.constant dense<0.000000e+00> : vector<8x128xf32>
    %448 = tpu.matmul %445, %447, %cst_470 {dimension_numbers = #tpu.dot_dimension_numbers<[1], [0], [0], [1], [0, 0, 1, 1], [], []>} : vector<8x128xbf16>, vector<128x128xbf16>, vector<8x128xf32> -> vector<8x128xf32>
    %449 = arith.addf %443, %448 : vector<8x128xf32>
    %c3_471 = arith.constant 3 : index
    %c0_472 = arith.constant 0 : index
    %c0_473 = arith.constant 0 : index
    %450 = vector.load %arg3[%c3_471, %c0_472, %c0_473] : memref<6x1x128xf32, #tpu.memory_space<vmem>>, vector<1x1x128xf32>
    %451 = vector.shape_cast %450 : vector<1x1x128xf32> to vector<1x128xf32>
    %452 = vector.broadcast %451 : vector<1x128xf32> to vector<8x128xf32>
    %453 = arith.addf %449, %452 : vector<8x128xf32>
    %cst_474 = arith.constant 0.000000e+00 : f32
    %454 = vector.broadcast %cst_474 : f32 to vector<8x128xf32>
    %455 = arith.maximumf %453, %454 : vector<8x128xf32>
    %c0_475 = arith.constant 0 : index
    %c0_476 = arith.constant 0 : index
    %456 = vector.load %arg16[%c0_475, %c0_476] : memref<70x128xf32, #tpu.memory_space<vmem>>, vector<3x128xf32>
    tpu.vector_store %arg16[%c0_475, %c0_476], %0 {strides = array<i32>} : memref<70x128xf32, #tpu.memory_space<vmem>>, vector<3x128xf32>,
    %c11 = arith.constant 11 : index
    %c0_477 = arith.constant 0 : index
    %457 = vector.load %arg16[%c11, %c0_477] : memref<70x128xf32, #tpu.memory_space<vmem>>, vector<3x128xf32>
    tpu.vector_store %arg16[%c11, %c0_477], %0 {strides = array<i32>} : memref<70x128xf32, #tpu.memory_space<vmem>>, vector<3x128xf32>,
    %c3_478 = arith.constant 3 : index
    %c0_479 = arith.constant 0 : index
    %458 = vector.load %arg16[%c3_478, %c0_479] : memref<70x128xf32, #tpu.memory_space<vmem>>, vector<8x128xf32>
    tpu.vector_store %arg16[%c3_478, %c0_479], %455 {strides = array<i32>} : memref<70x128xf32, #tpu.memory_space<vmem>>, vector<8x128xf32>,
    %c0_480 = arith.constant 0 : index
    %c0_481 = arith.constant 0 : index
    %459 = vector.load %arg16[%c0_480, %c0_481] : memref<70x128xf32, #tpu.memory_space<vmem>>, vector<8x128xf32>
    %460 = arith.truncf %459 : vector<8x128xf32> to vector<8x128xbf16>
    %c3_482 = arith.constant 3 : index
    %c0_483 = arith.constant 0 : index
    %c0_484 = arith.constant 0 : index
    %c0_485 = arith.constant 0 : index
    %461 = vector.load %arg4[%c3_482, %c0_483, %c0_484, %c0_485] : memref<6x7x128x128xbf16, #tpu.memory_space<vmem>>, vector<1x1x128x128xbf16>
    %462 = vector.shape_cast %461 : vector<1x1x128x128xbf16> to vector<128x128xbf16>
    %cst_486 = arith.constant dense<0.000000e+00> : vector<8x128xf32>
    %463 = tpu.matmul %460, %462, %cst_486 {dimension_numbers = #tpu.dot_dimension_numbers<[1], [0], [0], [1], [0, 0, 1, 1], [], []>} : vector<8x128xbf16>, vector<128x128xbf16>, vector<8x128xf32> -> vector<8x128xf32>
    %c1_487 = arith.constant 1 : index
    %c0_488 = arith.constant 0 : index
    %464 = vector.load %arg16[%c1_487, %c0_488] : memref<70x128xf32, #tpu.memory_space<vmem>>, vector<8x128xf32>
    %465 = arith.truncf %464 : vector<8x128xf32> to vector<8x128xbf16>
    %c3_489 = arith.constant 3 : index
    %c1_490 = arith.constant 1 : index
    %c0_491 = arith.constant 0 : index
    %c0_492 = arith.constant 0 : index
    %466 = vector.load %arg4[%c3_489, %c1_490, %c0_491, %c0_492] : memref<6x7x128x128xbf16, #tpu.memory_space<vmem>>, vector<1x1x128x128xbf16>
    %467 = vector.shape_cast %466 : vector<1x1x128x128xbf16> to vector<128x128xbf16>
    %cst_493 = arith.constant dense<0.000000e+00> : vector<8x128xf32>
    %468 = tpu.matmul %465, %467, %cst_493 {dimension_numbers = #tpu.dot_dimension_numbers<[1], [0], [0], [1], [0, 0, 1, 1], [], []>} : vector<8x128xbf16>, vector<128x128xbf16>, vector<8x128xf32> -> vector<8x128xf32>
    %469 = arith.addf %463, %468 : vector<8x128xf32>
    %c2_494 = arith.constant 2 : index
    %c0_495 = arith.constant 0 : index
    %470 = vector.load %arg16[%c2_494, %c0_495] : memref<70x128xf32, #tpu.memory_space<vmem>>, vector<8x128xf32>
    %471 = arith.truncf %470 : vector<8x128xf32> to vector<8x128xbf16>
    %c3_496 = arith.constant 3 : index
    %c2_497 = arith.constant 2 : index
    %c0_498 = arith.constant 0 : index
    %c0_499 = arith.constant 0 : index
    %472 = vector.load %arg4[%c3_496, %c2_497, %c0_498, %c0_499] : memref<6x7x128x128xbf16, #tpu.memory_space<vmem>>, vector<1x1x128x128xbf16>
    %473 = vector.shape_cast %472 : vector<1x1x128x128xbf16> to vector<128x128xbf16>
    %cst_500 = arith.constant dense<0.000000e+00> : vector<8x128xf32>
    %474 = tpu.matmul %471, %473, %cst_500 {dimension_numbers = #tpu.dot_dimension_numbers<[1], [0], [0], [1], [0, 0, 1, 1], [], []>} : vector<8x128xbf16>, vector<128x128xbf16>, vector<8x128xf32> -> vector<8x128xf32>
    %475 = arith.addf %469, %474 : vector<8x128xf32>
    %c3_501 = arith.constant 3 : index
    %c0_502 = arith.constant 0 : index
    %476 = vector.load %arg16[%c3_501, %c0_502] : memref<70x128xf32, #tpu.memory_space<vmem>>, vector<8x128xf32>
    %477 = arith.truncf %476 : vector<8x128xf32> to vector<8x128xbf16>
    %c3_503 = arith.constant 3 : index
    %c3_504 = arith.constant 3 : index
    %c0_505 = arith.constant 0 : index
    %c0_506 = arith.constant 0 : index
    %478 = vector.load %arg4[%c3_503, %c3_504, %c0_505, %c0_506] : memref<6x7x128x128xbf16, #tpu.memory_space<vmem>>, vector<1x1x128x128xbf16>
    %479 = vector.shape_cast %478 : vector<1x1x128x128xbf16> to vector<128x128xbf16>
    %cst_507 = arith.constant dense<0.000000e+00> : vector<8x128xf32>
    %480 = tpu.matmul %477, %479, %cst_507 {dimension_numbers = #tpu.dot_dimension_numbers<[1], [0], [0], [1], [0, 0, 1, 1], [], []>} : vector<8x128xbf16>, vector<128x128xbf16>, vector<8x128xf32> -> vector<8x128xf32>
    %481 = arith.addf %475, %480 : vector<8x128xf32>
    %c4_508 = arith.constant 4 : index
    %c0_509 = arith.constant 0 : index
    %482 = vector.load %arg16[%c4_508, %c0_509] : memref<70x128xf32, #tpu.memory_space<vmem>>, vector<8x128xf32>
    %483 = arith.truncf %482 : vector<8x128xf32> to vector<8x128xbf16>
    %c3_510 = arith.constant 3 : index
    %c4_511 = arith.constant 4 : index
    %c0_512 = arith.constant 0 : index
    %c0_513 = arith.constant 0 : index
    %484 = vector.load %arg4[%c3_510, %c4_511, %c0_512, %c0_513] : memref<6x7x128x128xbf16, #tpu.memory_space<vmem>>, vector<1x1x128x128xbf16>
    %485 = vector.shape_cast %484 : vector<1x1x128x128xbf16> to vector<128x128xbf16>
    %cst_514 = arith.constant dense<0.000000e+00> : vector<8x128xf32>
    %486 = tpu.matmul %483, %485, %cst_514 {dimension_numbers = #tpu.dot_dimension_numbers<[1], [0], [0], [1], [0, 0, 1, 1], [], []>} : vector<8x128xbf16>, vector<128x128xbf16>, vector<8x128xf32> -> vector<8x128xf32>
    %487 = arith.addf %481, %486 : vector<8x128xf32>
    %c5_515 = arith.constant 5 : index
    %c0_516 = arith.constant 0 : index
    %488 = vector.load %arg16[%c5_515, %c0_516] : memref<70x128xf32, #tpu.memory_space<vmem>>, vector<8x128xf32>
    %489 = arith.truncf %488 : vector<8x128xf32> to vector<8x128xbf16>
    %c3_517 = arith.constant 3 : index
    %c5_518 = arith.constant 5 : index
    %c0_519 = arith.constant 0 : index
    %c0_520 = arith.constant 0 : index
    %490 = vector.load %arg4[%c3_517, %c5_518, %c0_519, %c0_520] : memref<6x7x128x128xbf16, #tpu.memory_space<vmem>>, vector<1x1x128x128xbf16>
    %491 = vector.shape_cast %490 : vector<1x1x128x128xbf16> to vector<128x128xbf16>
    %cst_521 = arith.constant dense<0.000000e+00> : vector<8x128xf32>
    %492 = tpu.matmul %489, %491, %cst_521 {dimension_numbers = #tpu.dot_dimension_numbers<[1], [0], [0], [1], [0, 0, 1, 1], [], []>} : vector<8x128xbf16>, vector<128x128xbf16>, vector<8x128xf32> -> vector<8x128xf32>
    %493 = arith.addf %487, %492 : vector<8x128xf32>
    %c6_522 = arith.constant 6 : index
    %c0_523 = arith.constant 0 : index
    %494 = vector.load %arg16[%c6_522, %c0_523] : memref<70x128xf32, #tpu.memory_space<vmem>>, vector<8x128xf32>
    %495 = arith.truncf %494 : vector<8x128xf32> to vector<8x128xbf16>
    %c3_524 = arith.constant 3 : index
    %c6_525 = arith.constant 6 : index
    %c0_526 = arith.constant 0 : index
    %c0_527 = arith.constant 0 : index
    %496 = vector.load %arg4[%c3_524, %c6_525, %c0_526, %c0_527] : memref<6x7x128x128xbf16, #tpu.memory_space<vmem>>, vector<1x1x128x128xbf16>
    %497 = vector.shape_cast %496 : vector<1x1x128x128xbf16> to vector<128x128xbf16>
    %cst_528 = arith.constant dense<0.000000e+00> : vector<8x128xf32>
    %498 = tpu.matmul %495, %497, %cst_528 {dimension_numbers = #tpu.dot_dimension_numbers<[1], [0], [0], [1], [0, 0, 1, 1], [], []>} : vector<8x128xbf16>, vector<128x128xbf16>, vector<8x128xf32> -> vector<8x128xf32>
    %499 = arith.addf %493, %498 : vector<8x128xf32>
    %c3_529 = arith.constant 3 : index
    %c0_530 = arith.constant 0 : index
    %c0_531 = arith.constant 0 : index
    %500 = vector.load %arg5[%c3_529, %c0_530, %c0_531] : memref<6x1x128xf32, #tpu.memory_space<vmem>>, vector<1x1x128xf32>
    %501 = vector.shape_cast %500 : vector<1x1x128xf32> to vector<1x128xf32>
    %502 = vector.broadcast %501 : vector<1x128xf32> to vector<8x128xf32>
    %503 = arith.addf %499, %502 : vector<8x128xf32>
    %c3_532 = arith.constant 3 : index
    %c0_533 = arith.constant 0 : index
    %504 = tpu.strided_load %arg13[%c3_532, %c0_533] {strides = array<i32: 2, 1>} : memref<22x128xf32, #tpu.memory_space<vmem>>, vector<8x128xf32>
    %c4_534 = arith.constant 4 : index
    %c0_535 = arith.constant 0 : index
    %505 = tpu.strided_load %arg13[%c4_534, %c0_535] {strides = array<i32: 2, 1>} : memref<22x128xf32, #tpu.memory_space<vmem>>, vector<8x128xf32>
    %506 = arith.maximumf %504, %505 : vector<8x128xf32>
    %507 = arith.truncf %506 : vector<8x128xf32> to vector<8x128xbf16>
    %c3_536 = arith.constant 3 : index
    %c0_537 = arith.constant 0 : index
    %c0_538 = arith.constant 0 : index
    %508 = vector.load %arg6[%c3_536, %c0_537, %c0_538] : memref<6x128x128xbf16, #tpu.memory_space<vmem>>, vector<1x128x128xbf16>
    %509 = vector.shape_cast %508 : vector<1x128x128xbf16> to vector<128x128xbf16>
    %cst_539 = arith.constant dense<0.000000e+00> : vector<8x128xf32>
    %510 = tpu.matmul %507, %509, %cst_539 {dimension_numbers = #tpu.dot_dimension_numbers<[1], [0], [0], [1], [0, 0, 1, 1], [], []>} : vector<8x128xbf16>, vector<128x128xbf16>, vector<8x128xf32> -> vector<8x128xf32>
    %c3_540 = arith.constant 3 : index
    %c0_541 = arith.constant 0 : index
    %c0_542 = arith.constant 0 : index
    %511 = vector.load %arg7[%c3_540, %c0_541, %c0_542] : memref<6x1x128xf32, #tpu.memory_space<vmem>>, vector<1x1x128xf32>
    %512 = vector.shape_cast %511 : vector<1x1x128xf32> to vector<1x128xf32>
    %513 = vector.broadcast %512 : vector<1x128xf32> to vector<8x128xf32>
    %514 = arith.addf %510, %513 : vector<8x128xf32>
    %cst_543 = arith.constant dense<0.000000e+00> : vector<128xf32>
    %515 = vector.multi_reduction <add>, %503, %cst_543 [0] : vector<8x128xf32> to vector<128xf32>
    %516 = vector.shape_cast %515 : vector<128xf32> to vector<1x128xf32>
    %cst_544 = arith.constant 8.000000e+00 : f32
    %517 = vector.broadcast %cst_544 : f32 to vector<1x128xf32>
    %518 = arith.divf %516, %517 : vector<1x128xf32>
    %519 = arith.truncf %518 : vector<1x128xf32> to vector<1x128xbf16>
    %c3_545 = arith.constant 3 : index
    %c0_546 = arith.constant 0 : index
    %c0_547 = arith.constant 0 : index
    %520 = vector.load %arg8[%c3_545, %c0_546, %c0_547] : memref<6x128x128xbf16, #tpu.memory_space<vmem>>, vector<1x128x128xbf16>
    %521 = vector.shape_cast %520 : vector<1x128x128xbf16> to vector<128x128xbf16>
    %cst_548 = arith.constant dense<0.000000e+00> : vector<1x128xf32>
    %522 = tpu.matmul %519, %521, %cst_548 {dimension_numbers = #tpu.dot_dimension_numbers<[1], [0], [0], [1], [0, 0, 1, 1], [], []>} : vector<1x128xbf16>, vector<128x128xbf16>, vector<1x128xf32> -> vector<1x128xf32>
    %cst_549 = arith.constant 0.000000e+00 : f32
    %523 = vector.broadcast %cst_549 : f32 to vector<1x128xf32>
    %524 = arith.maximumf %522, %523 : vector<1x128xf32>
    %525 = arith.truncf %524 : vector<1x128xf32> to vector<1x128xbf16>
    %c3_550 = arith.constant 3 : index
    %c0_551 = arith.constant 0 : index
    %c0_552 = arith.constant 0 : index
    %526 = vector.load %arg9[%c3_550, %c0_551, %c0_552] : memref<6x128x128xbf16, #tpu.memory_space<vmem>>, vector<1x128x128xbf16>
    %527 = vector.shape_cast %526 : vector<1x128x128xbf16> to vector<128x128xbf16>
    %cst_553 = arith.constant dense<0.000000e+00> : vector<1x128xf32>
    %528 = tpu.matmul %525, %527, %cst_553 {dimension_numbers = #tpu.dot_dimension_numbers<[1], [0], [0], [1], [0, 0, 1, 1], [], []>} : vector<1x128xbf16>, vector<128x128xbf16>, vector<1x128xf32> -> vector<1x128xf32>
    %529 = arith.negf %528 : vector<1x128xf32>
    %530 = math.exp %529 : vector<1x128xf32>
    %cst_554 = arith.constant 1.000000e+00 : f32
    %531 = vector.broadcast %cst_554 : f32 to vector<1x128xf32>
    %532 = arith.addf %531, %530 : vector<1x128xf32>
    %533 = arith.divf %531, %532 : vector<1x128xf32>
    %534 = vector.broadcast %533 : vector<1x128xf32> to vector<8x128xf32>
    %535 = arith.mulf %503, %534 : vector<8x128xf32>
    %536 = arith.addf %535, %514 : vector<8x128xf32>
    %cst_555 = arith.constant 0.000000e+00 : f32
    %537 = vector.broadcast %cst_555 : f32 to vector<8x128xf32>
    %538 = arith.maximumf %536, %537 : vector<8x128xf32>
    %c0_556 = arith.constant 0 : index
    %c0_557 = arith.constant 0 : index
    %539 = vector.load %arg14[%c0_556, %c0_557] : memref<14x128xf32, #tpu.memory_space<vmem>>, vector<3x128xf32>
    tpu.vector_store %arg14[%c0_556, %c0_557], %0 {strides = array<i32>} : memref<14x128xf32, #tpu.memory_space<vmem>>, vector<3x128xf32>,
    %c11_558 = arith.constant 11 : index
    %c0_559 = arith.constant 0 : index
    %540 = vector.load %arg14[%c11_558, %c0_559] : memref<14x128xf32, #tpu.memory_space<vmem>>, vector<3x128xf32>
    tpu.vector_store %arg14[%c11_558, %c0_559], %0 {strides = array<i32>} : memref<14x128xf32, #tpu.memory_space<vmem>>, vector<3x128xf32>,
    %c3_560 = arith.constant 3 : index
    %c0_561 = arith.constant 0 : index
    %541 = vector.load %arg14[%c3_560, %c0_561] : memref<14x128xf32, #tpu.memory_space<vmem>>, vector<8x128xf32>
    tpu.vector_store %arg14[%c3_560, %c0_561], %538 {strides = array<i32>} : memref<14x128xf32, #tpu.memory_space<vmem>>, vector<8x128xf32>,
    %c0_562 = arith.constant 0 : index
    %c0_563 = arith.constant 0 : index
    %542 = tpu.strided_load %arg14[%c0_562, %c0_563] {strides = array<i32: 2, 1>} : memref<14x128xf32, #tpu.memory_space<vmem>>, vector<4x128xf32>
    %543 = arith.truncf %542 : vector<4x128xf32> to vector<4x128xbf16>
    %c4_564 = arith.constant 4 : index
    %c0_565 = arith.constant 0 : index
    %c0_566 = arith.constant 0 : index
    %c0_567 = arith.constant 0 : index
    %544 = vector.load %arg2[%c4_564, %c0_565, %c0_566, %c0_567] : memref<6x7x128x128xbf16, #tpu.memory_space<vmem>>, vector<1x1x128x128xbf16>
    %545 = vector.shape_cast %544 : vector<1x1x128x128xbf16> to vector<128x128xbf16>
    %cst_568 = arith.constant dense<0.000000e+00> : vector<4x128xf32>
    %546 = tpu.matmul %543, %545, %cst_568 {dimension_numbers = #tpu.dot_dimension_numbers<[1], [0], [0], [1], [0, 0, 1, 1], [], []>} : vector<4x128xbf16>, vector<128x128xbf16>, vector<4x128xf32> -> vector<4x128xf32>
    %c1_569 = arith.constant 1 : index
    %c0_570 = arith.constant 0 : index
    %547 = tpu.strided_load %arg14[%c1_569, %c0_570] {strides = array<i32: 2, 1>} : memref<14x128xf32, #tpu.memory_space<vmem>>, vector<4x128xf32>
    %548 = arith.truncf %547 : vector<4x128xf32> to vector<4x128xbf16>
    %c4_571 = arith.constant 4 : index
    %c1_572 = arith.constant 1 : index
    %c0_573 = arith.constant 0 : index
    %c0_574 = arith.constant 0 : index
    %549 = vector.load %arg2[%c4_571, %c1_572, %c0_573, %c0_574] : memref<6x7x128x128xbf16, #tpu.memory_space<vmem>>, vector<1x1x128x128xbf16>
    %550 = vector.shape_cast %549 : vector<1x1x128x128xbf16> to vector<128x128xbf16>
    %cst_575 = arith.constant dense<0.000000e+00> : vector<4x128xf32>
    %551 = tpu.matmul %548, %550, %cst_575 {dimension_numbers = #tpu.dot_dimension_numbers<[1], [0], [0], [1], [0, 0, 1, 1], [], []>} : vector<4x128xbf16>, vector<128x128xbf16>, vector<4x128xf32> -> vector<4x128xf32>
    %552 = arith.addf %546, %551 : vector<4x128xf32>
    %c2_576 = arith.constant 2 : index
    %c0_577 = arith.constant 0 : index
    %553 = tpu.strided_load %arg14[%c2_576, %c0_577] {strides = array<i32: 2, 1>} : memref<14x128xf32, #tpu.memory_space<vmem>>, vector<4x128xf32>
    %554 = arith.truncf %553 : vector<4x128xf32> to vector<4x128xbf16>
    %c4_578 = arith.constant 4 : index
    %c2_579 = arith.constant 2 : index
    %c0_580 = arith.constant 0 : index
    %c0_581 = arith.constant 0 : index
    %555 = vector.load %arg2[%c4_578, %c2_579, %c0_580, %c0_581] : memref<6x7x128x128xbf16, #tpu.memory_space<vmem>>, vector<1x1x128x128xbf16>
    %556 = vector.shape_cast %555 : vector<1x1x128x128xbf16> to vector<128x128xbf16>
    %cst_582 = arith.constant dense<0.000000e+00> : vector<4x128xf32>
    %557 = tpu.matmul %554, %556, %cst_582 {dimension_numbers = #tpu.dot_dimension_numbers<[1], [0], [0], [1], [0, 0, 1, 1], [], []>} : vector<4x128xbf16>, vector<128x128xbf16>, vector<4x128xf32> -> vector<4x128xf32>
    %558 = arith.addf %552, %557 : vector<4x128xf32>
    %c3_583 = arith.constant 3 : index
    %c0_584 = arith.constant 0 : index
    %559 = tpu.strided_load %arg14[%c3_583, %c0_584] {strides = array<i32: 2, 1>} : memref<14x128xf32, #tpu.memory_space<vmem>>, vector<4x128xf32>
    %560 = arith.truncf %559 : vector<4x128xf32> to vector<4x128xbf16>
    %c4_585 = arith.constant 4 : index
    %c3_586 = arith.constant 3 : index
    %c0_587 = arith.constant 0 : index
    %c0_588 = arith.constant 0 : index
    %561 = vector.load %arg2[%c4_585, %c3_586, %c0_587, %c0_588] : memref<6x7x128x128xbf16, #tpu.memory_space<vmem>>, vector<1x1x128x128xbf16>
    %562 = vector.shape_cast %561 : vector<1x1x128x128xbf16> to vector<128x128xbf16>
    %cst_589 = arith.constant dense<0.000000e+00> : vector<4x128xf32>
    %563 = tpu.matmul %560, %562, %cst_589 {dimension_numbers = #tpu.dot_dimension_numbers<[1], [0], [0], [1], [0, 0, 1, 1], [], []>} : vector<4x128xbf16>, vector<128x128xbf16>, vector<4x128xf32> -> vector<4x128xf32>
    %564 = arith.addf %558, %563 : vector<4x128xf32>
    %c4_590 = arith.constant 4 : index
    %c0_591 = arith.constant 0 : index
    %565 = tpu.strided_load %arg14[%c4_590, %c0_591] {strides = array<i32: 2, 1>} : memref<14x128xf32, #tpu.memory_space<vmem>>, vector<4x128xf32>
    %566 = arith.truncf %565 : vector<4x128xf32> to vector<4x128xbf16>
    %c4_592 = arith.constant 4 : index
    %c4_593 = arith.constant 4 : index
    %c0_594 = arith.constant 0 : index
    %c0_595 = arith.constant 0 : index
    %567 = vector.load %arg2[%c4_592, %c4_593, %c0_594, %c0_595] : memref<6x7x128x128xbf16, #tpu.memory_space<vmem>>, vector<1x1x128x128xbf16>
    %568 = vector.shape_cast %567 : vector<1x1x128x128xbf16> to vector<128x128xbf16>
    %cst_596 = arith.constant dense<0.000000e+00> : vector<4x128xf32>
    %569 = tpu.matmul %566, %568, %cst_596 {dimension_numbers = #tpu.dot_dimension_numbers<[1], [0], [0], [1], [0, 0, 1, 1], [], []>} : vector<4x128xbf16>, vector<128x128xbf16>, vector<4x128xf32> -> vector<4x128xf32>
    %570 = arith.addf %564, %569 : vector<4x128xf32>
    %c5_597 = arith.constant 5 : index
    %c0_598 = arith.constant 0 : index
    %571 = tpu.strided_load %arg14[%c5_597, %c0_598] {strides = array<i32: 2, 1>} : memref<14x128xf32, #tpu.memory_space<vmem>>, vector<4x128xf32>
    %572 = arith.truncf %571 : vector<4x128xf32> to vector<4x128xbf16>
    %c4_599 = arith.constant 4 : index
    %c5_600 = arith.constant 5 : index
    %c0_601 = arith.constant 0 : index
    %c0_602 = arith.constant 0 : index
    %573 = vector.load %arg2[%c4_599, %c5_600, %c0_601, %c0_602] : memref<6x7x128x128xbf16, #tpu.memory_space<vmem>>, vector<1x1x128x128xbf16>
    %574 = vector.shape_cast %573 : vector<1x1x128x128xbf16> to vector<128x128xbf16>
    %cst_603 = arith.constant dense<0.000000e+00> : vector<4x128xf32>
    %575 = tpu.matmul %572, %574, %cst_603 {dimension_numbers = #tpu.dot_dimension_numbers<[1], [0], [0], [1], [0, 0, 1, 1], [], []>} : vector<4x128xbf16>, vector<128x128xbf16>, vector<4x128xf32> -> vector<4x128xf32>
    %576 = arith.addf %570, %575 : vector<4x128xf32>
    %c6_604 = arith.constant 6 : index
    %c0_605 = arith.constant 0 : index
    %577 = tpu.strided_load %arg14[%c6_604, %c0_605] {strides = array<i32: 2, 1>} : memref<14x128xf32, #tpu.memory_space<vmem>>, vector<4x128xf32>
    %578 = arith.truncf %577 : vector<4x128xf32> to vector<4x128xbf16>
    %c4_606 = arith.constant 4 : index
    %c6_607 = arith.constant 6 : index
    %c0_608 = arith.constant 0 : index
    %c0_609 = arith.constant 0 : index
    %579 = vector.load %arg2[%c4_606, %c6_607, %c0_608, %c0_609] : memref<6x7x128x128xbf16, #tpu.memory_space<vmem>>, vector<1x1x128x128xbf16>
    %580 = vector.shape_cast %579 : vector<1x1x128x128xbf16> to vector<128x128xbf16>
    %cst_610 = arith.constant dense<0.000000e+00> : vector<4x128xf32>
    %581 = tpu.matmul %578, %580, %cst_610 {dimension_numbers = #tpu.dot_dimension_numbers<[1], [0], [0], [1], [0, 0, 1, 1], [], []>} : vector<4x128xbf16>, vector<128x128xbf16>, vector<4x128xf32> -> vector<4x128xf32>
    %582 = arith.addf %576, %581 : vector<4x128xf32>
    %c4_611 = arith.constant 4 : index
    %c0_612 = arith.constant 0 : index
    %c0_613 = arith.constant 0 : index
    %583 = vector.load %arg3[%c4_611, %c0_612, %c0_613] : memref<6x1x128xf32, #tpu.memory_space<vmem>>, vector<1x1x128xf32>
    %584 = vector.shape_cast %583 : vector<1x1x128xf32> to vector<1x128xf32>
    %585 = vector.broadcast %584 : vector<1x128xf32> to vector<4x128xf32>
    %586 = arith.addf %582, %585 : vector<4x128xf32>
    %cst_614 = arith.constant 0.000000e+00 : f32
    %587 = vector.broadcast %cst_614 : f32 to vector<4x128xf32>
    %588 = arith.maximumf %586, %587 : vector<4x128xf32>
    %c0_615 = arith.constant 0 : index
    %c0_616 = arith.constant 0 : index
    %589 = vector.load %arg16[%c0_615, %c0_616] : memref<70x128xf32, #tpu.memory_space<vmem>>, vector<3x128xf32>
    tpu.vector_store %arg16[%c0_615, %c0_616], %0 {strides = array<i32>} : memref<70x128xf32, #tpu.memory_space<vmem>>, vector<3x128xf32>,
    %c7 = arith.constant 7 : index
    %c0_617 = arith.constant 0 : index
    %590 = vector.load %arg16[%c7, %c0_617] : memref<70x128xf32, #tpu.memory_space<vmem>>, vector<3x128xf32>
    tpu.vector_store %arg16[%c7, %c0_617], %0 {strides = array<i32>} : memref<70x128xf32, #tpu.memory_space<vmem>>, vector<3x128xf32>,
    %c3_618 = arith.constant 3 : index
    %c0_619 = arith.constant 0 : index
    %591 = vector.load %arg16[%c3_618, %c0_619] : memref<70x128xf32, #tpu.memory_space<vmem>>, vector<4x128xf32>
    tpu.vector_store %arg16[%c3_618, %c0_619], %588 {strides = array<i32>} : memref<70x128xf32, #tpu.memory_space<vmem>>, vector<4x128xf32>,
    %c0_620 = arith.constant 0 : index
    %c0_621 = arith.constant 0 : index
    %592 = vector.load %arg16[%c0_620, %c0_621] : memref<70x128xf32, #tpu.memory_space<vmem>>, vector<4x128xf32>
    %593 = arith.truncf %592 : vector<4x128xf32> to vector<4x128xbf16>
    %c4_622 = arith.constant 4 : index
    %c0_623 = arith.constant 0 : index
    %c0_624 = arith.constant 0 : index
    %c0_625 = arith.constant 0 : index
    %594 = vector.load %arg4[%c4_622, %c0_623, %c0_624, %c0_625] : memref<6x7x128x128xbf16, #tpu.memory_space<vmem>>, vector<1x1x128x128xbf16>
    %595 = vector.shape_cast %594 : vector<1x1x128x128xbf16> to vector<128x128xbf16>
    %cst_626 = arith.constant dense<0.000000e+00> : vector<4x128xf32>
    %596 = tpu.matmul %593, %595, %cst_626 {dimension_numbers = #tpu.dot_dimension_numbers<[1], [0], [0], [1], [0, 0, 1, 1], [], []>} : vector<4x128xbf16>, vector<128x128xbf16>, vector<4x128xf32> -> vector<4x128xf32>
    %c1_627 = arith.constant 1 : index
    %c0_628 = arith.constant 0 : index
    %597 = vector.load %arg16[%c1_627, %c0_628] : memref<70x128xf32, #tpu.memory_space<vmem>>, vector<4x128xf32>
    %598 = arith.truncf %597 : vector<4x128xf32> to vector<4x128xbf16>
    %c4_629 = arith.constant 4 : index
    %c1_630 = arith.constant 1 : index
    %c0_631 = arith.constant 0 : index
    %c0_632 = arith.constant 0 : index
    %599 = vector.load %arg4[%c4_629, %c1_630, %c0_631, %c0_632] : memref<6x7x128x128xbf16, #tpu.memory_space<vmem>>, vector<1x1x128x128xbf16>
    %600 = vector.shape_cast %599 : vector<1x1x128x128xbf16> to vector<128x128xbf16>
    %cst_633 = arith.constant dense<0.000000e+00> : vector<4x128xf32>
    %601 = tpu.matmul %598, %600, %cst_633 {dimension_numbers = #tpu.dot_dimension_numbers<[1], [0], [0], [1], [0, 0, 1, 1], [], []>} : vector<4x128xbf16>, vector<128x128xbf16>, vector<4x128xf32> -> vector<4x128xf32>
    %602 = arith.addf %596, %601 : vector<4x128xf32>
    %c2_634 = arith.constant 2 : index
    %c0_635 = arith.constant 0 : index
    %603 = vector.load %arg16[%c2_634, %c0_635] : memref<70x128xf32, #tpu.memory_space<vmem>>, vector<4x128xf32>
    %604 = arith.truncf %603 : vector<4x128xf32> to vector<4x128xbf16>
    %c4_636 = arith.constant 4 : index
    %c2_637 = arith.constant 2 : index
    %c0_638 = arith.constant 0 : index
    %c0_639 = arith.constant 0 : index
    %605 = vector.load %arg4[%c4_636, %c2_637, %c0_638, %c0_639] : memref<6x7x128x128xbf16, #tpu.memory_space<vmem>>, vector<1x1x128x128xbf16>
    %606 = vector.shape_cast %605 : vector<1x1x128x128xbf16> to vector<128x128xbf16>
    %cst_640 = arith.constant dense<0.000000e+00> : vector<4x128xf32>
    %607 = tpu.matmul %604, %606, %cst_640 {dimension_numbers = #tpu.dot_dimension_numbers<[1], [0], [0], [1], [0, 0, 1, 1], [], []>} : vector<4x128xbf16>, vector<128x128xbf16>, vector<4x128xf32> -> vector<4x128xf32>
    %608 = arith.addf %602, %607 : vector<4x128xf32>
    %c3_641 = arith.constant 3 : index
    %c0_642 = arith.constant 0 : index
    %609 = vector.load %arg16[%c3_641, %c0_642] : memref<70x128xf32, #tpu.memory_space<vmem>>, vector<4x128xf32>
    %610 = arith.truncf %609 : vector<4x128xf32> to vector<4x128xbf16>
    %c4_643 = arith.constant 4 : index
    %c3_644 = arith.constant 3 : index
    %c0_645 = arith.constant 0 : index
    %c0_646 = arith.constant 0 : index
    %611 = vector.load %arg4[%c4_643, %c3_644, %c0_645, %c0_646] : memref<6x7x128x128xbf16, #tpu.memory_space<vmem>>, vector<1x1x128x128xbf16>
    %612 = vector.shape_cast %611 : vector<1x1x128x128xbf16> to vector<128x128xbf16>
    %cst_647 = arith.constant dense<0.000000e+00> : vector<4x128xf32>
    %613 = tpu.matmul %610, %612, %cst_647 {dimension_numbers = #tpu.dot_dimension_numbers<[1], [0], [0], [1], [0, 0, 1, 1], [], []>} : vector<4x128xbf16>, vector<128x128xbf16>, vector<4x128xf32> -> vector<4x128xf32>
    %614 = arith.addf %608, %613 : vector<4x128xf32>
    %c4_648 = arith.constant 4 : index
    %c0_649 = arith.constant 0 : index
    %615 = vector.load %arg16[%c4_648, %c0_649] : memref<70x128xf32, #tpu.memory_space<vmem>>, vector<4x128xf32>
    %616 = arith.truncf %615 : vector<4x128xf32> to vector<4x128xbf16>
    %c4_650 = arith.constant 4 : index
    %c4_651 = arith.constant 4 : index
    %c0_652 = arith.constant 0 : index
    %c0_653 = arith.constant 0 : index
    %617 = vector.load %arg4[%c4_650, %c4_651, %c0_652, %c0_653] : memref<6x7x128x128xbf16, #tpu.memory_space<vmem>>, vector<1x1x128x128xbf16>
    %618 = vector.shape_cast %617 : vector<1x1x128x128xbf16> to vector<128x128xbf16>
    %cst_654 = arith.constant dense<0.000000e+00> : vector<4x128xf32>
    %619 = tpu.matmul %616, %618, %cst_654 {dimension_numbers = #tpu.dot_dimension_numbers<[1], [0], [0], [1], [0, 0, 1, 1], [], []>} : vector<4x128xbf16>, vector<128x128xbf16>, vector<4x128xf32> -> vector<4x128xf32>
    %620 = arith.addf %614, %619 : vector<4x128xf32>
    %c5_655 = arith.constant 5 : index
    %c0_656 = arith.constant 0 : index
    %621 = vector.load %arg16[%c5_655, %c0_656] : memref<70x128xf32, #tpu.memory_space<vmem>>, vector<4x128xf32>
    %622 = arith.truncf %621 : vector<4x128xf32> to vector<4x128xbf16>
    %c4_657 = arith.constant 4 : index
    %c5_658 = arith.constant 5 : index
    %c0_659 = arith.constant 0 : index
    %c0_660 = arith.constant 0 : index
    %623 = vector.load %arg4[%c4_657, %c5_658, %c0_659, %c0_660] : memref<6x7x128x128xbf16, #tpu.memory_space<vmem>>, vector<1x1x128x128xbf16>
    %624 = vector.shape_cast %623 : vector<1x1x128x128xbf16> to vector<128x128xbf16>
    %cst_661 = arith.constant dense<0.000000e+00> : vector<4x128xf32>
    %625 = tpu.matmul %622, %624, %cst_661 {dimension_numbers = #tpu.dot_dimension_numbers<[1], [0], [0], [1], [0, 0, 1, 1], [], []>} : vector<4x128xbf16>, vector<128x128xbf16>, vector<4x128xf32> -> vector<4x128xf32>
    %626 = arith.addf %620, %625 : vector<4x128xf32>
    %c6_662 = arith.constant 6 : index
    %c0_663 = arith.constant 0 : index
    %627 = vector.load %arg16[%c6_662, %c0_663] : memref<70x128xf32, #tpu.memory_space<vmem>>, vector<4x128xf32>
    %628 = arith.truncf %627 : vector<4x128xf32> to vector<4x128xbf16>
    %c4_664 = arith.constant 4 : index
    %c6_665 = arith.constant 6 : index
    %c0_666 = arith.constant 0 : index
    %c0_667 = arith.constant 0 : index
    %629 = vector.load %arg4[%c4_664, %c6_665, %c0_666, %c0_667] : memref<6x7x128x128xbf16, #tpu.memory_space<vmem>>, vector<1x1x128x128xbf16>
    %630 = vector.shape_cast %629 : vector<1x1x128x128xbf16> to vector<128x128xbf16>
    %cst_668 = arith.constant dense<0.000000e+00> : vector<4x128xf32>
    %631 = tpu.matmul %628, %630, %cst_668 {dimension_numbers = #tpu.dot_dimension_numbers<[1], [0], [0], [1], [0, 0, 1, 1], [], []>} : vector<4x128xbf16>, vector<128x128xbf16>, vector<4x128xf32> -> vector<4x128xf32>
    %632 = arith.addf %626, %631 : vector<4x128xf32>
    %c4_669 = arith.constant 4 : index
    %c0_670 = arith.constant 0 : index
    %c0_671 = arith.constant 0 : index
    %633 = vector.load %arg5[%c4_669, %c0_670, %c0_671] : memref<6x1x128xf32, #tpu.memory_space<vmem>>, vector<1x1x128xf32>
    %634 = vector.shape_cast %633 : vector<1x1x128xf32> to vector<1x128xf32>
    %635 = vector.broadcast %634 : vector<1x128xf32> to vector<4x128xf32>
    %636 = arith.addf %632, %635 : vector<4x128xf32>
    %c3_672 = arith.constant 3 : index
    %c0_673 = arith.constant 0 : index
    %637 = tpu.strided_load %arg14[%c3_672, %c0_673] {strides = array<i32: 2, 1>} : memref<14x128xf32, #tpu.memory_space<vmem>>, vector<4x128xf32>
    %c4_674 = arith.constant 4 : index
    %c0_675 = arith.constant 0 : index
    %638 = tpu.strided_load %arg14[%c4_674, %c0_675] {strides = array<i32: 2, 1>} : memref<14x128xf32, #tpu.memory_space<vmem>>, vector<4x128xf32>
    %639 = arith.maximumf %637, %638 : vector<4x128xf32>
    %640 = arith.truncf %639 : vector<4x128xf32> to vector<4x128xbf16>
    %c4_676 = arith.constant 4 : index
    %c0_677 = arith.constant 0 : index
    %c0_678 = arith.constant 0 : index
    %641 = vector.load %arg6[%c4_676, %c0_677, %c0_678] : memref<6x128x128xbf16, #tpu.memory_space<vmem>>, vector<1x128x128xbf16>
    %642 = vector.shape_cast %641 : vector<1x128x128xbf16> to vector<128x128xbf16>
    %cst_679 = arith.constant dense<0.000000e+00> : vector<4x128xf32>
    %643 = tpu.matmul %640, %642, %cst_679 {dimension_numbers = #tpu.dot_dimension_numbers<[1], [0], [0], [1], [0, 0, 1, 1], [], []>} : vector<4x128xbf16>, vector<128x128xbf16>, vector<4x128xf32> -> vector<4x128xf32>
    %c4_680 = arith.constant 4 : index
    %c0_681 = arith.constant 0 : index
    %c0_682 = arith.constant 0 : index
    %644 = vector.load %arg7[%c4_680, %c0_681, %c0_682] : memref<6x1x128xf32, #tpu.memory_space<vmem>>, vector<1x1x128xf32>
    %645 = vector.shape_cast %644 : vector<1x1x128xf32> to vector<1x128xf32>
    %646 = vector.broadcast %645 : vector<1x128xf32> to vector<4x128xf32>
    %647 = arith.addf %643, %646 : vector<4x128xf32>
    %cst_683 = arith.constant dense<0.000000e+00> : vector<128xf32>
    %648 = vector.multi_reduction <add>, %636, %cst_683 [0] : vector<4x128xf32> to vector<128xf32>
    %649 = vector.shape_cast %648 : vector<128xf32> to vector<1x128xf32>
    %cst_684 = arith.constant 4.000000e+00 : f32
    %650 = vector.broadcast %cst_684 : f32 to vector<1x128xf32>
    %651 = arith.divf %649, %650 : vector<1x128xf32>
    %652 = arith.truncf %651 : vector<1x128xf32> to vector<1x128xbf16>
    %c4_685 = arith.constant 4 : index
    %c0_686 = arith.constant 0 : index
    %c0_687 = arith.constant 0 : index
    %653 = vector.load %arg8[%c4_685, %c0_686, %c0_687] : memref<6x128x128xbf16, #tpu.memory_space<vmem>>, vector<1x128x128xbf16>
    %654 = vector.shape_cast %653 : vector<1x128x128xbf16> to vector<128x128xbf16>
    %cst_688 = arith.constant dense<0.000000e+00> : vector<1x128xf32>
    %655 = tpu.matmul %652, %654, %cst_688 {dimension_numbers = #tpu.dot_dimension_numbers<[1], [0], [0], [1], [0, 0, 1, 1], [], []>} : vector<1x128xbf16>, vector<128x128xbf16>, vector<1x128xf32> -> vector<1x128xf32>
    %cst_689 = arith.constant 0.000000e+00 : f32
    %656 = vector.broadcast %cst_689 : f32 to vector<1x128xf32>
    %657 = arith.maximumf %655, %656 : vector<1x128xf32>
    %658 = arith.truncf %657 : vector<1x128xf32> to vector<1x128xbf16>
    %c4_690 = arith.constant 4 : index
    %c0_691 = arith.constant 0 : index
    %c0_692 = arith.constant 0 : index
    %659 = vector.load %arg9[%c4_690, %c0_691, %c0_692] : memref<6x128x128xbf16, #tpu.memory_space<vmem>>, vector<1x128x128xbf16>
    %660 = vector.shape_cast %659 : vector<1x128x128xbf16> to vector<128x128xbf16>
    %cst_693 = arith.constant dense<0.000000e+00> : vector<1x128xf32>
    %661 = tpu.matmul %658, %660, %cst_693 {dimension_numbers = #tpu.dot_dimension_numbers<[1], [0], [0], [1], [0, 0, 1, 1], [], []>} : vector<1x128xbf16>, vector<128x128xbf16>, vector<1x128xf32> -> vector<1x128xf32>
    %662 = arith.negf %661 : vector<1x128xf32>
    %663 = math.exp %662 : vector<1x128xf32>
    %cst_694 = arith.constant 1.000000e+00 : f32
    %664 = vector.broadcast %cst_694 : f32 to vector<1x128xf32>
    %665 = arith.addf %664, %663 : vector<1x128xf32>
    %666 = arith.divf %664, %665 : vector<1x128xf32>
    %667 = vector.broadcast %666 : vector<1x128xf32> to vector<4x128xf32>
    %668 = arith.mulf %636, %667 : vector<4x128xf32>
    %669 = arith.addf %668, %647 : vector<4x128xf32>
    %cst_695 = arith.constant 0.000000e+00 : f32
    %670 = vector.broadcast %cst_695 : f32 to vector<4x128xf32>
    %671 = arith.maximumf %669, %670 : vector<4x128xf32>
    %c0_696 = arith.constant 0 : index
    %c0_697 = arith.constant 0 : index
    %672 = vector.load %arg15[%c0_696, %c0_697] : memref<10x128xf32, #tpu.memory_space<vmem>>, vector<3x128xf32>
    tpu.vector_store %arg15[%c0_696, %c0_697], %0 {strides = array<i32>} : memref<10x128xf32, #tpu.memory_space<vmem>>, vector<3x128xf32>,
    %c7_698 = arith.constant 7 : index
    %c0_699 = arith.constant 0 : index
    %673 = vector.load %arg15[%c7_698, %c0_699] : memref<10x128xf32, #tpu.memory_space<vmem>>, vector<3x128xf32>
    tpu.vector_store %arg15[%c7_698, %c0_699], %0 {strides = array<i32>} : memref<10x128xf32, #tpu.memory_space<vmem>>, vector<3x128xf32>,
    %c3_700 = arith.constant 3 : index
    %c0_701 = arith.constant 0 : index
    %674 = vector.load %arg15[%c3_700, %c0_701] : memref<10x128xf32, #tpu.memory_space<vmem>>, vector<4x128xf32>
    tpu.vector_store %arg15[%c3_700, %c0_701], %671 {strides = array<i32>} : memref<10x128xf32, #tpu.memory_space<vmem>>, vector<4x128xf32>,
    %c0_702 = arith.constant 0 : index
    %c0_703 = arith.constant 0 : index
    %675 = tpu.strided_load %arg15[%c0_702, %c0_703] {strides = array<i32: 2, 1>} : memref<10x128xf32, #tpu.memory_space<vmem>>, vector<2x128xf32>
    %676 = arith.truncf %675 : vector<2x128xf32> to vector<2x128xbf16>
    %c5_704 = arith.constant 5 : index
    %c0_705 = arith.constant 0 : index
    %c0_706 = arith.constant 0 : index
    %c0_707 = arith.constant 0 : index
    %677 = vector.load %arg2[%c5_704, %c0_705, %c0_706, %c0_707] : memref<6x7x128x128xbf16, #tpu.memory_space<vmem>>, vector<1x1x128x128xbf16>
    %678 = vector.shape_cast %677 : vector<1x1x128x128xbf16> to vector<128x128xbf16>
    %cst_708 = arith.constant dense<0.000000e+00> : vector<2x128xf32>
    %679 = tpu.matmul %676, %678, %cst_708 {dimension_numbers = #tpu.dot_dimension_numbers<[1], [0], [0], [1], [0, 0, 1, 1], [], []>} : vector<2x128xbf16>, vector<128x128xbf16>, vector<2x128xf32> -> vector<2x128xf32>
    %c1_709 = arith.constant 1 : index
    %c0_710 = arith.constant 0 : index
    %680 = tpu.strided_load %arg15[%c1_709, %c0_710] {strides = array<i32: 2, 1>} : memref<10x128xf32, #tpu.memory_space<vmem>>, vector<2x128xf32>
    %681 = arith.truncf %680 : vector<2x128xf32> to vector<2x128xbf16>
    %c5_711 = arith.constant 5 : index
    %c1_712 = arith.constant 1 : index
    %c0_713 = arith.constant 0 : index
    %c0_714 = arith.constant 0 : index
    %682 = vector.load %arg2[%c5_711, %c1_712, %c0_713, %c0_714] : memref<6x7x128x128xbf16, #tpu.memory_space<vmem>>, vector<1x1x128x128xbf16>
    %683 = vector.shape_cast %682 : vector<1x1x128x128xbf16> to vector<128x128xbf16>
    %cst_715 = arith.constant dense<0.000000e+00> : vector<2x128xf32>
    %684 = tpu.matmul %681, %683, %cst_715 {dimension_numbers = #tpu.dot_dimension_numbers<[1], [0], [0], [1], [0, 0, 1, 1], [], []>} : vector<2x128xbf16>, vector<128x128xbf16>, vector<2x128xf32> -> vector<2x128xf32>
    %685 = arith.addf %679, %684 : vector<2x128xf32>
    %c2_716 = arith.constant 2 : index
    %c0_717 = arith.constant 0 : index
    %686 = tpu.strided_load %arg15[%c2_716, %c0_717] {strides = array<i32: 2, 1>} : memref<10x128xf32, #tpu.memory_space<vmem>>, vector<2x128xf32>
    %687 = arith.truncf %686 : vector<2x128xf32> to vector<2x128xbf16>
    %c5_718 = arith.constant 5 : index
    %c2_719 = arith.constant 2 : index
    %c0_720 = arith.constant 0 : index
    %c0_721 = arith.constant 0 : index
    %688 = vector.load %arg2[%c5_718, %c2_719, %c0_720, %c0_721] : memref<6x7x128x128xbf16, #tpu.memory_space<vmem>>, vector<1x1x128x128xbf16>
    %689 = vector.shape_cast %688 : vector<1x1x128x128xbf16> to vector<128x128xbf16>
    %cst_722 = arith.constant dense<0.000000e+00> : vector<2x128xf32>
    %690 = tpu.matmul %687, %689, %cst_722 {dimension_numbers = #tpu.dot_dimension_numbers<[1], [0], [0], [1], [0, 0, 1, 1], [], []>} : vector<2x128xbf16>, vector<128x128xbf16>, vector<2x128xf32> -> vector<2x128xf32>
    %691 = arith.addf %685, %690 : vector<2x128xf32>
    %c3_723 = arith.constant 3 : index
    %c0_724 = arith.constant 0 : index
    %692 = tpu.strided_load %arg15[%c3_723, %c0_724] {strides = array<i32: 2, 1>} : memref<10x128xf32, #tpu.memory_space<vmem>>, vector<2x128xf32>
    %693 = arith.truncf %692 : vector<2x128xf32> to vector<2x128xbf16>
    %c5_725 = arith.constant 5 : index
    %c3_726 = arith.constant 3 : index
    %c0_727 = arith.constant 0 : index
    %c0_728 = arith.constant 0 : index
    %694 = vector.load %arg2[%c5_725, %c3_726, %c0_727, %c0_728] : memref<6x7x128x128xbf16, #tpu.memory_space<vmem>>, vector<1x1x128x128xbf16>
    %695 = vector.shape_cast %694 : vector<1x1x128x128xbf16> to vector<128x128xbf16>
    %cst_729 = arith.constant dense<0.000000e+00> : vector<2x128xf32>
    %696 = tpu.matmul %693, %695, %cst_729 {dimension_numbers = #tpu.dot_dimension_numbers<[1], [0], [0], [1], [0, 0, 1, 1], [], []>} : vector<2x128xbf16>, vector<128x128xbf16>, vector<2x128xf32> -> vector<2x128xf32>
    %697 = arith.addf %691, %696 : vector<2x128xf32>
    %c4_730 = arith.constant 4 : index
    %c0_731 = arith.constant 0 : index
    %698 = tpu.strided_load %arg15[%c4_730, %c0_731] {strides = array<i32: 2, 1>} : memref<10x128xf32, #tpu.memory_space<vmem>>, vector<2x128xf32>
    %699 = arith.truncf %698 : vector<2x128xf32> to vector<2x128xbf16>
    %c5_732 = arith.constant 5 : index
    %c4_733 = arith.constant 4 : index
    %c0_734 = arith.constant 0 : index
    %c0_735 = arith.constant 0 : index
    %700 = vector.load %arg2[%c5_732, %c4_733, %c0_734, %c0_735] : memref<6x7x128x128xbf16, #tpu.memory_space<vmem>>, vector<1x1x128x128xbf16>
    %701 = vector.shape_cast %700 : vector<1x1x128x128xbf16> to vector<128x128xbf16>
    %cst_736 = arith.constant dense<0.000000e+00> : vector<2x128xf32>
    %702 = tpu.matmul %699, %701, %cst_736 {dimension_numbers = #tpu.dot_dimension_numbers<[1], [0], [0], [1], [0, 0, 1, 1], [], []>} : vector<2x128xbf16>, vector<128x128xbf16>, vector<2x128xf32> -> vector<2x128xf32>
    %703 = arith.addf %697, %702 : vector<2x128xf32>
    %c5_737 = arith.constant 5 : index
    %c0_738 = arith.constant 0 : index
    %704 = tpu.strided_load %arg15[%c5_737, %c0_738] {strides = array<i32: 2, 1>} : memref<10x128xf32, #tpu.memory_space<vmem>>, vector<2x128xf32>
    %705 = arith.truncf %704 : vector<2x128xf32> to vector<2x128xbf16>
    %c5_739 = arith.constant 5 : index
    %c5_740 = arith.constant 5 : index
    %c0_741 = arith.constant 0 : index
    %c0_742 = arith.constant 0 : index
    %706 = vector.load %arg2[%c5_739, %c5_740, %c0_741, %c0_742] : memref<6x7x128x128xbf16, #tpu.memory_space<vmem>>, vector<1x1x128x128xbf16>
    %707 = vector.shape_cast %706 : vector<1x1x128x128xbf16> to vector<128x128xbf16>
    %cst_743 = arith.constant dense<0.000000e+00> : vector<2x128xf32>
    %708 = tpu.matmul %705, %707, %cst_743 {dimension_numbers = #tpu.dot_dimension_numbers<[1], [0], [0], [1], [0, 0, 1, 1], [], []>} : vector<2x128xbf16>, vector<128x128xbf16>, vector<2x128xf32> -> vector<2x128xf32>
    %709 = arith.addf %703, %708 : vector<2x128xf32>
    %c6_744 = arith.constant 6 : index
    %c0_745 = arith.constant 0 : index
    %710 = tpu.strided_load %arg15[%c6_744, %c0_745] {strides = array<i32: 2, 1>} : memref<10x128xf32, #tpu.memory_space<vmem>>, vector<2x128xf32>
    %711 = arith.truncf %710 : vector<2x128xf32> to vector<2x128xbf16>
    %c5_746 = arith.constant 5 : index
    %c6_747 = arith.constant 6 : index
    %c0_748 = arith.constant 0 : index
    %c0_749 = arith.constant 0 : index
    %712 = vector.load %arg2[%c5_746, %c6_747, %c0_748, %c0_749] : memref<6x7x128x128xbf16, #tpu.memory_space<vmem>>, vector<1x1x128x128xbf16>
    %713 = vector.shape_cast %712 : vector<1x1x128x128xbf16> to vector<128x128xbf16>
    %cst_750 = arith.constant dense<0.000000e+00> : vector<2x128xf32>
    %714 = tpu.matmul %711, %713, %cst_750 {dimension_numbers = #tpu.dot_dimension_numbers<[1], [0], [0], [1], [0, 0, 1, 1], [], []>} : vector<2x128xbf16>, vector<128x128xbf16>, vector<2x128xf32> -> vector<2x128xf32>
    %715 = arith.addf %709, %714 : vector<2x128xf32>
    %c5_751 = arith.constant 5 : index
    %c0_752 = arith.constant 0 : index
    %c0_753 = arith.constant 0 : index
    %716 = vector.load %arg3[%c5_751, %c0_752, %c0_753] : memref<6x1x128xf32, #tpu.memory_space<vmem>>, vector<1x1x128xf32>
    %717 = vector.shape_cast %716 : vector<1x1x128xf32> to vector<1x128xf32>
    %718 = vector.broadcast %717 : vector<1x128xf32> to vector<2x128xf32>
    %719 = arith.addf %715, %718 : vector<2x128xf32>
    %cst_754 = arith.constant 0.000000e+00 : f32
    %720 = vector.broadcast %cst_754 : f32 to vector<2x128xf32>
    %721 = arith.maximumf %719, %720 : vector<2x128xf32>
    %c0_755 = arith.constant 0 : index
    %c0_756 = arith.constant 0 : index
    %722 = vector.load %arg16[%c0_755, %c0_756] : memref<70x128xf32, #tpu.memory_space<vmem>>, vector<3x128xf32>
    tpu.vector_store %arg16[%c0_755, %c0_756], %0 {strides = array<i32>} : memref<70x128xf32, #tpu.memory_space<vmem>>, vector<3x128xf32>,
    %c5_757 = arith.constant 5 : index
    %c0_758 = arith.constant 0 : index
    %723 = vector.load %arg16[%c5_757, %c0_758] : memref<70x128xf32, #tpu.memory_space<vmem>>, vector<3x128xf32>
    tpu.vector_store %arg16[%c5_757, %c0_758], %0 {strides = array<i32>} : memref<70x128xf32, #tpu.memory_space<vmem>>, vector<3x128xf32>,
    %c3_759 = arith.constant 3 : index
    %c0_760 = arith.constant 0 : index
    %724 = vector.load %arg16[%c3_759, %c0_760] : memref<70x128xf32, #tpu.memory_space<vmem>>, vector<2x128xf32>
    tpu.vector_store %arg16[%c3_759, %c0_760], %721 {strides = array<i32>} : memref<70x128xf32, #tpu.memory_space<vmem>>, vector<2x128xf32>,
    %c0_761 = arith.constant 0 : index
    %c0_762 = arith.constant 0 : index
    %725 = vector.load %arg16[%c0_761, %c0_762] : memref<70x128xf32, #tpu.memory_space<vmem>>, vector<2x128xf32>
    %726 = arith.truncf %725 : vector<2x128xf32> to vector<2x128xbf16>
    %c5_763 = arith.constant 5 : index
    %c0_764 = arith.constant 0 : index
    %c0_765 = arith.constant 0 : index
    %c0_766 = arith.constant 0 : index
    %727 = vector.load %arg4[%c5_763, %c0_764, %c0_765, %c0_766] : memref<6x7x128x128xbf16, #tpu.memory_space<vmem>>, vector<1x1x128x128xbf16>
    %728 = vector.shape_cast %727 : vector<1x1x128x128xbf16> to vector<128x128xbf16>
    %cst_767 = arith.constant dense<0.000000e+00> : vector<2x128xf32>
    %729 = tpu.matmul %726, %728, %cst_767 {dimension_numbers = #tpu.dot_dimension_numbers<[1], [0], [0], [1], [0, 0, 1, 1], [], []>} : vector<2x128xbf16>, vector<128x128xbf16>, vector<2x128xf32> -> vector<2x128xf32>
    %c1_768 = arith.constant 1 : index
    %c0_769 = arith.constant 0 : index
    %730 = vector.load %arg16[%c1_768, %c0_769] : memref<70x128xf32, #tpu.memory_space<vmem>>, vector<2x128xf32>
    %731 = arith.truncf %730 : vector<2x128xf32> to vector<2x128xbf16>
    %c5_770 = arith.constant 5 : index
    %c1_771 = arith.constant 1 : index
    %c0_772 = arith.constant 0 : index
    %c0_773 = arith.constant 0 : index
    %732 = vector.load %arg4[%c5_770, %c1_771, %c0_772, %c0_773] : memref<6x7x128x128xbf16, #tpu.memory_space<vmem>>, vector<1x1x128x128xbf16>
    %733 = vector.shape_cast %732 : vector<1x1x128x128xbf16> to vector<128x128xbf16>
    %cst_774 = arith.constant dense<0.000000e+00> : vector<2x128xf32>
    %734 = tpu.matmul %731, %733, %cst_774 {dimension_numbers = #tpu.dot_dimension_numbers<[1], [0], [0], [1], [0, 0, 1, 1], [], []>} : vector<2x128xbf16>, vector<128x128xbf16>, vector<2x128xf32> -> vector<2x128xf32>
    %735 = arith.addf %729, %734 : vector<2x128xf32>
    %c2_775 = arith.constant 2 : index
    %c0_776 = arith.constant 0 : index
    %736 = vector.load %arg16[%c2_775, %c0_776] : memref<70x128xf32, #tpu.memory_space<vmem>>, vector<2x128xf32>
    %737 = arith.truncf %736 : vector<2x128xf32> to vector<2x128xbf16>
    %c5_777 = arith.constant 5 : index
    %c2_778 = arith.constant 2 : index
    %c0_779 = arith.constant 0 : index
    %c0_780 = arith.constant 0 : index
    %738 = vector.load %arg4[%c5_777, %c2_778, %c0_779, %c0_780] : memref<6x7x128x128xbf16, #tpu.memory_space<vmem>>, vector<1x1x128x128xbf16>
    %739 = vector.shape_cast %738 : vector<1x1x128x128xbf16> to vector<128x128xbf16>
    %cst_781 = arith.constant dense<0.000000e+00> : vector<2x128xf32>
    %740 = tpu.matmul %737, %739, %cst_781 {dimension_numbers = #tpu.dot_dimension_numbers<[1], [0], [0], [1], [0, 0, 1, 1], [], []>} : vector<2x128xbf16>, vector<128x128xbf16>, vector<2x128xf32> -> vector<2x128xf32>
    %741 = arith.addf %735, %740 : vector<2x128xf32>
    %c3_782 = arith.constant 3 : index
    %c0_783 = arith.constant 0 : index
    %742 = vector.load %arg16[%c3_782, %c0_783] : memref<70x128xf32, #tpu.memory_space<vmem>>, vector<2x128xf32>
    %743 = arith.truncf %742 : vector<2x128xf32> to vector<2x128xbf16>
    %c5_784 = arith.constant 5 : index
    %c3_785 = arith.constant 3 : index
    %c0_786 = arith.constant 0 : index
    %c0_787 = arith.constant 0 : index
    %744 = vector.load %arg4[%c5_784, %c3_785, %c0_786, %c0_787] : memref<6x7x128x128xbf16, #tpu.memory_space<vmem>>, vector<1x1x128x128xbf16>
    %745 = vector.shape_cast %744 : vector<1x1x128x128xbf16> to vector<128x128xbf16>
    %cst_788 = arith.constant dense<0.000000e+00> : vector<2x128xf32>
    %746 = tpu.matmul %743, %745, %cst_788 {dimension_numbers = #tpu.dot_dimension_numbers<[1], [0], [0], [1], [0, 0, 1, 1], [], []>} : vector<2x128xbf16>, vector<128x128xbf16>, vector<2x128xf32> -> vector<2x128xf32>
    %747 = arith.addf %741, %746 : vector<2x128xf32>
    %c4_789 = arith.constant 4 : index
    %c0_790 = arith.constant 0 : index
    %748 = vector.load %arg16[%c4_789, %c0_790] : memref<70x128xf32, #tpu.memory_space<vmem>>, vector<2x128xf32>
    %749 = arith.truncf %748 : vector<2x128xf32> to vector<2x128xbf16>
    %c5_791 = arith.constant 5 : index
    %c4_792 = arith.constant 4 : index
    %c0_793 = arith.constant 0 : index
    %c0_794 = arith.constant 0 : index
    %750 = vector.load %arg4[%c5_791, %c4_792, %c0_793, %c0_794] : memref<6x7x128x128xbf16, #tpu.memory_space<vmem>>, vector<1x1x128x128xbf16>
    %751 = vector.shape_cast %750 : vector<1x1x128x128xbf16> to vector<128x128xbf16>
    %cst_795 = arith.constant dense<0.000000e+00> : vector<2x128xf32>
    %752 = tpu.matmul %749, %751, %cst_795 {dimension_numbers = #tpu.dot_dimension_numbers<[1], [0], [0], [1], [0, 0, 1, 1], [], []>} : vector<2x128xbf16>, vector<128x128xbf16>, vector<2x128xf32> -> vector<2x128xf32>
    %753 = arith.addf %747, %752 : vector<2x128xf32>
    %c5_796 = arith.constant 5 : index
    %c0_797 = arith.constant 0 : index
    %754 = vector.load %arg16[%c5_796, %c0_797] : memref<70x128xf32, #tpu.memory_space<vmem>>, vector<2x128xf32>
    %755 = arith.truncf %754 : vector<2x128xf32> to vector<2x128xbf16>
    %c5_798 = arith.constant 5 : index
    %c5_799 = arith.constant 5 : index
    %c0_800 = arith.constant 0 : index
    %c0_801 = arith.constant 0 : index
    %756 = vector.load %arg4[%c5_798, %c5_799, %c0_800, %c0_801] : memref<6x7x128x128xbf16, #tpu.memory_space<vmem>>, vector<1x1x128x128xbf16>
    %757 = vector.shape_cast %756 : vector<1x1x128x128xbf16> to vector<128x128xbf16>
    %cst_802 = arith.constant dense<0.000000e+00> : vector<2x128xf32>
    %758 = tpu.matmul %755, %757, %cst_802 {dimension_numbers = #tpu.dot_dimension_numbers<[1], [0], [0], [1], [0, 0, 1, 1], [], []>} : vector<2x128xbf16>, vector<128x128xbf16>, vector<2x128xf32> -> vector<2x128xf32>
    %759 = arith.addf %753, %758 : vector<2x128xf32>
    %c6_803 = arith.constant 6 : index
    %c0_804 = arith.constant 0 : index
    %760 = vector.load %arg16[%c6_803, %c0_804] : memref<70x128xf32, #tpu.memory_space<vmem>>, vector<2x128xf32>
    %761 = arith.truncf %760 : vector<2x128xf32> to vector<2x128xbf16>
    %c5_805 = arith.constant 5 : index
    %c6_806 = arith.constant 6 : index
    %c0_807 = arith.constant 0 : index
    %c0_808 = arith.constant 0 : index
    %762 = vector.load %arg4[%c5_805, %c6_806, %c0_807, %c0_808] : memref<6x7x128x128xbf16, #tpu.memory_space<vmem>>, vector<1x1x128x128xbf16>
    %763 = vector.shape_cast %762 : vector<1x1x128x128xbf16> to vector<128x128xbf16>
    %cst_809 = arith.constant dense<0.000000e+00> : vector<2x128xf32>
    %764 = tpu.matmul %761, %763, %cst_809 {dimension_numbers = #tpu.dot_dimension_numbers<[1], [0], [0], [1], [0, 0, 1, 1], [], []>} : vector<2x128xbf16>, vector<128x128xbf16>, vector<2x128xf32> -> vector<2x128xf32>
    %765 = arith.addf %759, %764 : vector<2x128xf32>
    %c5_810 = arith.constant 5 : index
    %c0_811 = arith.constant 0 : index
    %c0_812 = arith.constant 0 : index
    %766 = vector.load %arg5[%c5_810, %c0_811, %c0_812] : memref<6x1x128xf32, #tpu.memory_space<vmem>>, vector<1x1x128xf32>
    %767 = vector.shape_cast %766 : vector<1x1x128xf32> to vector<1x128xf32>
    %768 = vector.broadcast %767 : vector<1x128xf32> to vector<2x128xf32>
    %769 = arith.addf %765, %768 : vector<2x128xf32>
    %c3_813 = arith.constant 3 : index
    %c0_814 = arith.constant 0 : index
    %770 = tpu.strided_load %arg15[%c3_813, %c0_814] {strides = array<i32: 2, 1>} : memref<10x128xf32, #tpu.memory_space<vmem>>, vector<2x128xf32>
    %c4_815 = arith.constant 4 : index
    %c0_816 = arith.constant 0 : index
    %771 = tpu.strided_load %arg15[%c4_815, %c0_816] {strides = array<i32: 2, 1>} : memref<10x128xf32, #tpu.memory_space<vmem>>, vector<2x128xf32>
    %772 = arith.maximumf %770, %771 : vector<2x128xf32>
    %773 = arith.truncf %772 : vector<2x128xf32> to vector<2x128xbf16>
    %c5_817 = arith.constant 5 : index
    %c0_818 = arith.constant 0 : index
    %c0_819 = arith.constant 0 : index
    %774 = vector.load %arg6[%c5_817, %c0_818, %c0_819] : memref<6x128x128xbf16, #tpu.memory_space<vmem>>, vector<1x128x128xbf16>
    %775 = vector.shape_cast %774 : vector<1x128x128xbf16> to vector<128x128xbf16>
    %cst_820 = arith.constant dense<0.000000e+00> : vector<2x128xf32>
    %776 = tpu.matmul %773, %775, %cst_820 {dimension_numbers = #tpu.dot_dimension_numbers<[1], [0], [0], [1], [0, 0, 1, 1], [], []>} : vector<2x128xbf16>, vector<128x128xbf16>, vector<2x128xf32> -> vector<2x128xf32>
    %c5_821 = arith.constant 5 : index
    %c0_822 = arith.constant 0 : index
    %c0_823 = arith.constant 0 : index
    %777 = vector.load %arg7[%c5_821, %c0_822, %c0_823] : memref<6x1x128xf32, #tpu.memory_space<vmem>>, vector<1x1x128xf32>
    %778 = vector.shape_cast %777 : vector<1x1x128xf32> to vector<1x128xf32>
    %779 = vector.broadcast %778 : vector<1x128xf32> to vector<2x128xf32>
    %780 = arith.addf %776, %779 : vector<2x128xf32>
    %cst_824 = arith.constant dense<0.000000e+00> : vector<128xf32>
    %781 = vector.multi_reduction <add>, %769, %cst_824 [0] : vector<2x128xf32> to vector<128xf32>
    %782 = vector.shape_cast %781 : vector<128xf32> to vector<1x128xf32>
    %cst_825 = arith.constant 2.000000e+00 : f32
    %783 = vector.broadcast %cst_825 : f32 to vector<1x128xf32>
    %784 = arith.divf %782, %783 : vector<1x128xf32>
    %785 = arith.truncf %784 : vector<1x128xf32> to vector<1x128xbf16>
    %c5_826 = arith.constant 5 : index
    %c0_827 = arith.constant 0 : index
    %c0_828 = arith.constant 0 : index
    %786 = vector.load %arg8[%c5_826, %c0_827, %c0_828] : memref<6x128x128xbf16, #tpu.memory_space<vmem>>, vector<1x128x128xbf16>
    %787 = vector.shape_cast %786 : vector<1x128x128xbf16> to vector<128x128xbf16>
    %cst_829 = arith.constant dense<0.000000e+00> : vector<1x128xf32>
    %788 = tpu.matmul %785, %787, %cst_829 {dimension_numbers = #tpu.dot_dimension_numbers<[1], [0], [0], [1], [0, 0, 1, 1], [], []>} : vector<1x128xbf16>, vector<128x128xbf16>, vector<1x128xf32> -> vector<1x128xf32>
    %cst_830 = arith.constant 0.000000e+00 : f32
    %789 = vector.broadcast %cst_830 : f32 to vector<1x128xf32>
    %790 = arith.maximumf %788, %789 : vector<1x128xf32>
    %791 = arith.truncf %790 : vector<1x128xf32> to vector<1x128xbf16>
    %c5_831 = arith.constant 5 : index
    %c0_832 = arith.constant 0 : index
    %c0_833 = arith.constant 0 : index
    %792 = vector.load %arg9[%c5_831, %c0_832, %c0_833] : memref<6x128x128xbf16, #tpu.memory_space<vmem>>, vector<1x128x128xbf16>
    %793 = vector.shape_cast %792 : vector<1x128x128xbf16> to vector<128x128xbf16>
    %cst_834 = arith.constant dense<0.000000e+00> : vector<1x128xf32>
    %794 = tpu.matmul %791, %793, %cst_834 {dimension_numbers = #tpu.dot_dimension_numbers<[1], [0], [0], [1], [0, 0, 1, 1], [], []>} : vector<1x128xbf16>, vector<128x128xbf16>, vector<1x128xf32> -> vector<1x128xf32>
    %795 = arith.negf %794 : vector<1x128xf32>
    %796 = math.exp %795 : vector<1x128xf32>
    %cst_835 = arith.constant 1.000000e+00 : f32
    %797 = vector.broadcast %cst_835 : f32 to vector<1x128xf32>
    %798 = arith.addf %797, %796 : vector<1x128xf32>
    %799 = arith.divf %797, %798 : vector<1x128xf32>
    %800 = vector.broadcast %799 : vector<1x128xf32> to vector<2x128xf32>
    %801 = arith.mulf %769, %800 : vector<2x128xf32>
    %802 = arith.addf %801, %780 : vector<2x128xf32>
    %cst_836 = arith.constant 0.000000e+00 : f32
    %803 = vector.broadcast %cst_836 : f32 to vector<2x128xf32>
    %804 = arith.maximumf %802, %803 : vector<2x128xf32>
    %c0_837 = arith.constant 0 : index
    %c0_838 = arith.constant 0 : index
    %c0_839 = arith.constant 0 : index
    %805 = vector.load %arg10[%c0_837, %c0_838, %c0_839] : memref<1x2x128xf32, #tpu.memory_space<vmem>>, vector<1x2x128xf32>
    %806 = vector.shape_cast %805 : vector<1x2x128xf32> to vector<2x128xf32>
    %807 = vector.shape_cast %804 : vector<2x128xf32> to vector<1x2x128xf32>
    tpu.vector_store %arg10[%c0_837, %c0_838, %c0_839], %807 {strides = array<i32>} : memref<1x2x128xf32, #tpu.memory_space<vmem>>, vector<1x2x128xf32>,
    return
  }
  func.func @transform_0(%arg0: i32) -> (i32, i32, i32) {
    %c0_i32 = arith.constant 0 : i32
    %c0_i32_0 = arith.constant 0 : i32
    %c0_i32_1 = arith.constant 0 : i32
    return %arg0, %c0_i32, %c0_i32_0 : i32, i32, i32
  }
  func.func @transform_1(%arg0: i32) -> (i32, i32, i32, i32) {
    %c0_i32 = arith.constant 0 : i32
    %c0_i32_0 = arith.constant 0 : i32
    %c0_i32_1 = arith.constant 0 : i32
    %c0_i32_2 = arith.constant 0 : i32
    %c0_i32_3 = arith.constant 0 : i32
    return %c0_i32, %c0_i32_0, %c0_i32_1, %c0_i32_2 : i32, i32, i32, i32
  }
  func.func @transform_2(%arg0: i32) -> (i32, i32, i32) {
    %c0_i32 = arith.constant 0 : i32
    %c0_i32_0 = arith.constant 0 : i32
    %c0_i32_1 = arith.constant 0 : i32
    %c0_i32_2 = arith.constant 0 : i32
    return %c0_i32, %c0_i32_0, %c0_i32_1 : i32, i32, i32
  }
  func.func @transform_3(%arg0: i32) -> (i32, i32, i32, i32) {
    %c0_i32 = arith.constant 0 : i32
    %c0_i32_0 = arith.constant 0 : i32
    %c0_i32_1 = arith.constant 0 : i32
    %c0_i32_2 = arith.constant 0 : i32
    %c0_i32_3 = arith.constant 0 : i32
    return %c0_i32, %c0_i32_0, %c0_i32_1, %c0_i32_2 : i32, i32, i32, i32
  }
  func.func @transform_4(%arg0: i32) -> (i32, i32, i32) {
    %c0_i32 = arith.constant 0 : i32
    %c0_i32_0 = arith.constant 0 : i32
    %c0_i32_1 = arith.constant 0 : i32
    %c0_i32_2 = arith.constant 0 : i32
    return %c0_i32, %c0_i32_0, %c0_i32_1 : i32, i32, i32
  }
  func.func @transform_5(%arg0: i32) -> (i32, i32, i32) {
    %c0_i32 = arith.constant 0 : i32
    %c0_i32_0 = arith.constant 0 : i32
    %c0_i32_1 = arith.constant 0 : i32
    %c0_i32_2 = arith.constant 0 : i32
    return %c0_i32, %c0_i32_0, %c0_i32_1 : i32, i32, i32
  }
  func.func @transform_6(%arg0: i32) -> (i32, i32, i32) {
    %c0_i32 = arith.constant 0 : i32
    %c0_i32_0 = arith.constant 0 : i32
    %c0_i32_1 = arith.constant 0 : i32
    %c0_i32_2 = arith.constant 0 : i32
    return %c0_i32, %c0_i32_0, %c0_i32_1 : i32, i32, i32
  }
  func.func @transform_7(%arg0: i32) -> (i32, i32, i32) {
    %c0_i32 = arith.constant 0 : i32
    %c0_i32_0 = arith.constant 0 : i32
    %c0_i32_1 = arith.constant 0 : i32
    %c0_i32_2 = arith.constant 0 : i32
    return %c0_i32, %c0_i32_0, %c0_i32_1 : i32, i32, i32
  }
  func.func @transform_8(%arg0: i32) -> (i32, i32, i32) {
    %c0_i32 = arith.constant 0 : i32
    %c0_i32_0 = arith.constant 0 : i32
    %c0_i32_1 = arith.constant 0 : i32
    %c0_i32_2 = arith.constant 0 : i32
    return %c0_i32, %c0_i32_0, %c0_i32_1 : i32, i32, i32
  }
  func.func @transform_9(%arg0: i32) -> (i32, i32, i32) {
    %c0_i32 = arith.constant 0 : i32
    %c0_i32_0 = arith.constant 0 : i32
    %c0_i32_1 = arith.constant 0 : i32
    return %arg0, %c0_i32, %c0_i32_0 : i32, i32, i32
  }
}

</mosaic_0001>

<bundles_post_ra>
// kernel: msdnn_forward.1
= control target key start
LH: loop header
LB: loop body
LE: loop exit
PB: predicated region body
PF: predicated region fallthrough
CT: control target
= control target key end

     0   :  { %14 = vsyncpa [#allocation9], 0  ;;  %s19675_s0 = inlined_call_operand.vmem [shape: f32[2,134,128], index: 0, kind: input, shape index: {}]   ;;  %s19676_s1 = inlined_call_operand.hbm [shape: bf16[6,7,128,128], index: 1, kind: input, shape index: {}]   ;;  %s19677_s2 = inlined_call_operand.hbm [shape: f32[6,1,128], index: 2, kind: input, shape index: {}]   ;;  %s19678_s3 = inlined_call_operand.hbm [shape: bf16[6,7,128,128], index: 3, kind: input, shape index: {}]   ;;  %s19679_s4 = inlined_call_operand.hbm [shape: f32[6,1,128], index: 4, kind: input, shape index: {}]   ;;  %s19680_s5 = inlined_call_operand.hbm [shape: bf16[6,128,128], index: 5, kind: input, shape index: {}]   ;;  %s19681_s6 = inlined_call_operand.hbm [shape: f32[6,1,128], index: 6, kind: input, shape index: {}]   ;;  %s19682_s7 = inlined_call_operand.hbm [shape: bf16[6,128,128], index: 7, kind: input, shape index: {}]   ;;  %s19683_s8 = inlined_call_operand.hbm [shape: bf16[6,128,128], index: 8, kind: input, shape index: {}]   ;;  %s19684_s9 = inlined_call_operand.vmem [shape: f32[2,2,128], index: 9, kind: output, shape index: {}]  }
   0x1   :  { %15 = vsyncpa [#allocation11], 0 }
   0x2   :  { %16 = vsyncpa [#allocation14], 0 }
   0x3   :  { %17 = vsyncpa [#allocation17], 0 }
   0x4   :  { %18 = vsyncpa [#allocation20], 0  ;;  %s18383_s30 = smov 0  }
   0x5 LB: > { %s18319_s10 = smov [#allocation10]   ;;  %s18389_s12 = sadd.s32 4294967295, %s18317_s30   ;;  %s18317_s30 = sphi %s18383_s30, %s24_s30  }
   0x6   : > { %s274_s11 = sshll.u32 %s18319_s10, 4  ;;  %p12975_p0 = scmp.ge.s32.totalorder %s18317_s30, 1  ;;  %s18394_s11 = int_to_ptr.vmem [resolvable:$true] %s274_s11 }
   0x7   : > { %p249_p1 = scmp.lt.s32.totalorder %s18317_s30, 3  ;;  %p19685_p2 = scmp.eq.s32.totalorder %s18389_s12, 0 }
   0x8   : > { %s18320_s14 = smov [#allocation13]   ;;  %s18321_s17 = smov [#allocation16]  }
   0x9   : > { %p18396_p3 = pnand %p12975_p0, %p249_p1  ;;  %s300_s15 = sshll.u32 %s18320_s14, 4  ;;  %s18402_s15 = int_to_ptr.vmem [resolvable:$true] %s300_s15 }
   0xa   : > { %s326_s18 = sshll.u32 %s18321_s17, 4  ;;  %s18322_s19 = smov [#allocation8]   ;;  %s18410_s18 = int_to_ptr.vmem [resolvable:$true] %s326_s18 }
   0xb   : > { %s19687_s13 = scalar_select %p18396_p3, 1, 0 }
   0xc   : > { %p17164_p4 = pneg %p18396_p3  ;;  %s18412_s20 = sshll.u32 %s18322_s19, 4  ;;  %s262_s20 = int_to_ptr.vmem [resolvable:$true] %s18412_s20 }
   0xd   : > { %s18067_s23 = scalar_lea.hbm %s19677_s2, 96 }
   0xe   : > { %p18406_p5 = pnand %p19685_p2, %p17164_p4  ;;  %p18068_p6 = scmp.ne.s32.totalorder %s19677_s2, %s18067_s23 }
   0xf   : > { %p18074_p10 = scmp.lt.u32.totalorder %s18067_s23, %s19677_s2 }
  0x10   : > { %p18422_p7 = pneg %p18406_p5 }
  0x12   : > { %p18070_p8 = pnand %p18422_p7, %p18068_p6 }
  0x14   : > { %p18071_p9 = pneg %p18070_p8 }
  0x16   : > { %p18076_p11 = pnand %p18074_p10, %p18071_p9 }
  0x18   : > { %18079 = shalt.err (!%p18076_p11)
}
  0x19   : > { %s18080_s29 = scalar_lea.vmem %s18394_s11, 96  ;;  %p18088_p1 = scmp.lt.s32.totalorder %s18394_s11, %s18394_s11 }
  0x1a   : > { %p18081_p12 = scmp.ne.s32.totalorder %s18394_s11, %s18080_s29  ;;  %p18089_p4 = scmp.lt.s32.totalorder %s18080_s29, %s18080_s29 }
  0x1c   : > { %p18083_p13 = pnand %p18081_p12, %p18422_p7  ;;  %p18090_p6 = por %p18089_p4, %p18088_p1 }
  0x1e   : > { %p18084_p0 = pneg %p18083_p13 }
  0x20   : > { %p18091_p8 = pnand %p18090_p6, %p18084_p0 }
  0x22   : > { %18094 = shalt.err (!%p18091_p8)
}
  0x23   : > { %s18323_s10 = smov 16   ;;  %s18324_s14 = smov 1  }
  0x24   : > { %17170 = dma.hbm_to_vmem [thread:$0]  (!%p18406_p5), %s19677_s2, 96, %s18394_s11, [#allocation11], %s18323_s10, %s18323_s10, %s18324_s14  }
  0x25   : > { %s18095_s23 = scalar_lea.hbm %s19679_s4, 96 }
  0x26   : > { %p18096_p9 = scmp.ne.s32.totalorder %s19679_s4, %s18095_s23  ;;  %p18102_p12 = scmp.lt.u32.totalorder %s18095_s23, %s19679_s4 }
  0x28   : > { %p18098_p10 = pnand %p18096_p9, %p18422_p7 }
  0x2a   : > { %p18099_p11 = pneg %p18098_p10 }
  0x2c   : > { %p18104_p13 = pnand %p18102_p12, %p18099_p11 }
  0x2e   : > { %18107 = shalt.err (!%p18104_p13)
}
  0x2f   : > { %s18108_s11 = scalar_lea.vmem %s18402_s15, 96  ;;  %p18116_p6 = scmp.lt.s32.totalorder %s18402_s15, %s18402_s15 }
  0x30   : > { %p18109_p0 = scmp.ne.s32.totalorder %s18402_s15, %s18108_s11  ;;  %p18117_p8 = scmp.lt.s32.totalorder %s18108_s11, %s18108_s11 }
  0x32   : > { %p18111_p1 = pnand %p18109_p0, %p18422_p7  ;;  %p18118_p9 = por %p18117_p8, %p18116_p6 }
  0x34   : > { %p18112_p4 = pneg %p18111_p1 }
  0x36   : > { %p18119_p10 = pnand %p18118_p9, %p18112_p4 }
  0x38   : > { %18122 = shalt.err (!%p18119_p10)
}
  0x39   : > { %17176 = dma.hbm_to_vmem [thread:$0]  (!%p18406_p5), %s19679_s4, 96, %s18402_s15, [#allocation14], %s18323_s10, %s18323_s10, %s18324_s14  }
  0x3a   : > { %s18123_s22 = scalar_lea.hbm %s19681_s6, 96 }
  0x3b   : > { %p18124_p11 = scmp.ne.s32.totalorder %s19681_s6, %s18123_s22  ;;  %p18130_p0 = scmp.lt.u32.totalorder %s18123_s22, %s19681_s6 }
  0x3d   : > { %p18126_p12 = pnand %p18124_p11, %p18422_p7 }
  0x3f   : > { %p18127_p13 = pneg %p18126_p12 }
  0x41   : > { %p18132_p1 = pnand %p18130_p0, %p18127_p13 }
  0x43   : > { %18135 = shalt.err (!%p18132_p1)
}
  0x44   : > { %s18136_s15 = scalar_lea.vmem %s18410_s18, 96  ;;  %p18144_p9 = scmp.lt.s32.totalorder %s18410_s18, %s18410_s18 }
  0x45   : > { %p18137_p4 = scmp.ne.s32.totalorder %s18410_s18, %s18136_s15  ;;  %p18145_p10 = scmp.lt.s32.totalorder %s18136_s15, %s18136_s15 }
  0x47   : > { %p18139_p6 = pnand %p18137_p4, %p18422_p7  ;;  %p18146_p11 = por %p18145_p10, %p18144_p9 }
  0x49   : > { %p18140_p8 = pneg %p18139_p6 }
  0x4b   : > { %p18147_p12 = pnand %p18146_p11, %p18140_p8 }
  0x4d   : > { %18150 = shalt.err (!%p18147_p12)
}
  0x4e   : > { %17182 = dma.hbm_to_vmem [thread:$0]  (!%p18406_p5), %s19681_s6, 96, %s18410_s18, [#allocation17], %s18323_s10, %s18323_s10, %s18324_s14  }
  0x4f   : > { %s18151_s19 = scalar_lea.hbm %s19676_s1, 43008 }
  0x50   : > { %p18152_p13 = scmp.ne.s32.totalorder %s19676_s1, %s18151_s19  ;;  %p18158_p4 = scmp.lt.u32.totalorder %s18151_s19, %s19676_s1 }
  0x52   : > { %p18154_p0 = pnand %p18152_p13, %p18422_p7 }
  0x54   : > { %p18155_p1 = pneg %p18154_p0 }
  0x56   : > { %p18160_p6 = pnand %p18158_p4, %p18155_p1 }
  0x58   : > { %18163 = shalt.err (!%p18160_p6)
}
  0x59   : > { %s18164_s25 = scalar_lea.vmem %s262_s20, 43008  ;;  %p18172_p11 = scmp.lt.s32.totalorder %s262_s20, %s262_s20 }
  0x5a   : > { %p18165_p8 = scmp.ne.s32.totalorder %s262_s20, %s18164_s25  ;;  %p18173_p12 = scmp.lt.s32.totalorder %s18164_s25, %s18164_s25 }
  0x5c   : > { %p18167_p9 = pnand %p18165_p8, %p18422_p7  ;;  %p18174_p2 = por %p18173_p12, %p18172_p11 }
  0x5e   : > { %p18168_p10 = pneg %p18167_p9 }
  0x60   : > { %p18175_p3 = pnand %p18174_p2, %p18168_p10 }
  0x62   : > { %18178 = shalt.err (!%p18175_p3)
}
  0x63   : > { %s18325_s18 = smov 64   ;;  %s18326_s10 = smov 4  }
  0x64   : > { %17167 = dma.hbm_to_vmem [thread:$0]  (!%p18406_p5), %s19676_s1, 43008, %s262_s20, [#allocation9], %s18325_s18, %s18325_s18, %s18326_s10  }
  0x65   : > { %s18327_s15 = smov [#allocation12]   ;;  %s18328_s11 = smov [#allocation15]  }
  0x66   : > { %s287_s28 = sshll.u32 %s18327_s15, 4  ;;  %s313_s29 = sshll.u32 %s18328_s11, 4  ;;  %s288_s28 = int_to_ptr.vmem [resolvable:$true] %s287_s28  ;;  %s314_s29 = int_to_ptr.vmem [resolvable:$true] %s313_s29 }
  0x67   : > { %s18179_s21 = scalar_lea.hbm %s19678_s3, 43008 }
  0x68   : > { %p18180_p2 = scmp.ne.s32.totalorder %s19678_s3, %s18179_s21  ;;  %p18186_p0 = scmp.lt.u32.totalorder %s18179_s21, %s19678_s3 }
  0x6a   : > { %p18182_p3 = pnand %p18180_p2, %p18422_p7 }
  0x6c   : > { %p18183_p13 = pneg %p18182_p3 }
  0x6e   : > { %p18188_p1 = pnand %p18186_p0, %p18183_p13 }
  0x70   : > { %18191 = shalt.err (!%p18188_p1)
}
  0x71   : > { %s18192_s20 = scalar_lea.vmem %s288_s28, 43008  ;;  %p18200_p9 = scmp.lt.s32.totalorder %s288_s28, %s288_s28 }
  0x72   : > { %p18193_p4 = scmp.ne.s32.totalorder %s288_s28, %s18192_s20  ;;  %p18201_p10 = scmp.lt.s32.totalorder %s18192_s20, %s18192_s20 }
  0x74   : > { %p18195_p6 = pnand %p18193_p4, %p18422_p7  ;;  %p18202_p11 = por %p18201_p10, %p18200_p9 }
  0x76   : > { %p18196_p8 = pneg %p18195_p6 }
  0x78   : > { %p18203_p12 = pnand %p18202_p11, %p18196_p8 }
  0x7a   : > { %18206 = shalt.err (!%p18203_p12)
}
  0x7b   : > { %17173 = dma.hbm_to_vmem [thread:$0]  (!%p18406_p5), %s19678_s3, 43008, %s288_s28, [#allocation11], %s18325_s18, %s18325_s18, %s18326_s10  }
  0x7c   : > { %s18207_s17 = scalar_lea.hbm %s19680_s5, 6144 }
  0x7d   : > { %p18208_p2 = scmp.ne.s32.totalorder %s19680_s5, %s18207_s17  ;;  %p18214_p0 = scmp.lt.u32.totalorder %s18207_s17, %s19680_s5 }
  0x7f   : > { %p18210_p3 = pnand %p18208_p2, %p18422_p7 }
  0x81   : > { %p18211_p13 = pneg %p18210_p3 }
  0x83   : > { %p18216_p1 = pnand %p18214_p0, %p18211_p13 }
  0x85   : > { %18219 = shalt.err (!%p18216_p1)
}
  0x86   : > { %s18220_s24 = scalar_lea.vmem %s314_s29, 6144  ;;  %p18228_p9 = scmp.lt.s32.totalorder %s314_s29, %s314_s29 }
  0x87   : > { %p18221_p4 = scmp.ne.s32.totalorder %s314_s29, %s18220_s24  ;;  %p18229_p10 = scmp.lt.s32.totalorder %s18220_s24, %s18220_s24 }
  0x89   : > { %p18223_p6 = pnand %p18221_p4, %p18422_p7  ;;  %p18230_p11 = por %p18229_p10, %p18228_p9 }
  0x8b   : > { %p18224_p8 = pneg %p18223_p6 }
  0x8d   : > { %p18231_p12 = pnand %p18230_p11, %p18224_p8 }
  0x8f   : > { %18234 = shalt.err (!%p18231_p12)
}
  0x90   : > { %17179 = dma.hbm_to_vmem [thread:$0]  (!%p18406_p5), %s19680_s5, 6144, %s314_s29, [#allocation14], %s18325_s18, %s18325_s18, %s18326_s10  }
  0x91   : > { %s18329_s20 = smov [#allocation18]   ;;  %s18330_s27 = smov [#allocation19]  }
  0x92   : > { %s339_s14 = sshll.u32 %s18329_s20, 4  ;;  %s352_s15 = sshll.u32 %s18330_s27, 4  ;;  %s340_s14 = int_to_ptr.vmem [resolvable:$true] %s339_s14  ;;  %s353_s15 = int_to_ptr.vmem [resolvable:$true] %s352_s15 }
  0x93   : > { %s18235_s19 = scalar_lea.hbm %s19682_s7, 6144 }
  0x94   : > { %p18236_p2 = scmp.ne.s32.totalorder %s19682_s7, %s18235_s19  ;;  %p18242_p0 = scmp.lt.u32.totalorder %s18235_s19, %s19682_s7 }
  0x96   : > { %p18238_p3 = pnand %p18236_p2, %p18422_p7 }
  0x98   : > { %p18239_p13 = pneg %p18238_p3 }
  0x9a   : > { %p18244_p1 = pnand %p18242_p0, %p18239_p13 }
  0x9c   : > { %18247 = shalt.err (!%p18244_p1)
}
  0x9d   : > { %s18248_s29 = scalar_lea.vmem %s340_s14, 6144  ;;  %p18256_p9 = scmp.lt.s32.totalorder %s340_s14, %s340_s14 }
  0x9e   : > { %p18249_p4 = scmp.ne.s32.totalorder %s340_s14, %s18248_s29  ;;  %p18257_p10 = scmp.lt.s32.totalorder %s18248_s29, %s18248_s29 }
  0xa0   : > { %p18251_p6 = pnand %p18249_p4, %p18422_p7  ;;  %p18258_p11 = por %p18257_p10, %p18256_p9 }
  0xa2   : > { %p18252_p8 = pneg %p18251_p6 }
  0xa4   : > { %p18259_p12 = pnand %p18258_p11, %p18252_p8 }
  0xa6   : > { %18262 = shalt.err (!%p18259_p12)
}
  0xa7   : > { %17185 = dma.hbm_to_vmem [thread:$0]  (!%p18406_p5), %s19682_s7, 6144, %s340_s14, [#allocation17], %s18325_s18, %s18325_s18, %s18326_s10  }
  0xa8   : > { %s18263_s11 = scalar_lea.hbm %s19683_s8, 6144 }
  0xa9   : > { %p18264_p2 = scmp.ne.s32.totalorder %s19683_s8, %s18263_s11  ;;  %p18270_p0 = scmp.lt.u32.totalorder %s18263_s11, %s19683_s8 }
  0xab   : > { %p18266_p3 = pnand %p18264_p2, %p18422_p7 }
  0xad   : > { %p18267_p13 = pneg %p18266_p3 }
  0xaf   : > { %p18272_p1 = pnand %p18270_p0, %p18267_p13 }
  0xb1   : > { %18275 = shalt.err (!%p18272_p1)
}
  0xb2   : > { %s18276_s23 = scalar_lea.vmem %s353_s15, 6144  ;;  %p18284_p9 = scmp.lt.s32.totalorder %s353_s15, %s353_s15 }
  0xb3   : > { %p18277_p4 = scmp.ne.s32.totalorder %s353_s15, %s18276_s23  ;;  %p18285_p10 = scmp.lt.s32.totalorder %s18276_s23, %s18276_s23 }
  0xb5   : > { %p18279_p6 = pnand %p18277_p4, %p18422_p7  ;;  %p18286_p11 = por %p18285_p10, %p18284_p9 }
  0xb7   : > { %p18280_p8 = pneg %p18279_p6 }
  0xb9   : > { %p18287_p12 = pnand %p18286_p11, %p18280_p8 }
  0xbb   : > { %18290 = shalt.err (!%p18287_p12)
}
  0xbc   : > { %17188 = dma.hbm_to_vmem [thread:$0]  (!%p18406_p5), %s19683_s8, 6144, %s353_s15, [#allocation20], %s18325_s18, %s18325_s18, %s18326_s10  }
  0xbd   : > { %p19690_p2 = scmp.ne.s32.totalorder %s19687_s13, 0 }
  0xbe   : > { %p19691_p7 = scmp.eq.s32.totalorder (!%p19690_p2), %s18389_s12, 0 }
  0xbf   : > { %376 = sbr.rel (%p19690_p2) target bundleno = 7373 (0x1ccd), region = 56 }
  0xc6   : > { %18296 = dma.done.wait (%p19691_p7), [#allocation9], 43008   ;;  %p19692_p3 = pmov %p19691_p7 }
  0xc8   : > { %18298 = vsyncadd (%p19692_p3), [#allocation9], 4294924288  ;;  %p19693_p13 = pmov %p19692_p3 }
  0xc9   : > { %p19694_p0 = pmov %p19692_p3 }
  0xca   : > { %18300 = dma.done.wait (%p19693_p13), [#allocation11], 43104  }
  0xcb   : > { %18302 = vsyncadd (%p19694_p0), [#allocation11], 4294924192  ;;  %p19695_p1 = pmov %p19694_p0 }
  0xcc   : > { %p19696_p5 = pmov %p19694_p0 }
  0xcd   : > { %18304 = dma.done.wait (%p19695_p1), [#allocation14], 6240  }
  0xce   : > { %18306 = vsyncadd (%p19696_p5), [#allocation14], 4294961056  ;;  %p19697_p4 = pmov %p19694_p0 }
  0xcf   : > { %p19698_p6 = pmov %p19694_p0 }
  0xd0   : > { %18308 = dma.done.wait (%p19697_p4), [#allocation17], 6240  }
  0xd1   : > { %18310 = vsyncadd (%p19698_p6), [#allocation17], 4294961056  ;;  %p19699_p8 = pmov %p19694_p0 }
  0xd2   : > { %p19700_p9 = pmov %p19694_p0 }
  0xd3   : > { %18312 = dma.done.wait (%p19699_p8), [#allocation20], 6144  }
  0xd4   : > { %18314 = vsyncadd (%p19700_p9), [#allocation20], 4294961152  ;;  %p439_p10 = scmp.lt.s32.totalorder %s18389_s12, 1  ;;  %v17227_v0 = vld [vmem:[#allocation8 + $0x40] sm:$0xff]   ;;  %v17228_v1 = vld [vmem:[#allocation8 + $0x48] sm:$0xff]   ;;  %vm18332_vm0 = vmmov 0  }
  0xd5   : > { %14887 = vmatprep.subr.bf16.mxu0 %v17227_v0  ;;  %v17229_v2 = vld [vmem:[#allocation8 + $0x50] sm:$0xff]   ;;  %v17230_v3 = vld [vmem:[#allocation8 + $0x58] sm:$0xff]   ;;  %v17231_v7 = vld [vmem:[#allocation8 + $0x60] sm:$0xff]   ;;  %vm10712_vm1 = vcmask 1043456   ;;  %vm12604_vm2 = vcmask 1041408  }
  0xd6   : > { %s19702_s12 = smov (!%p439_p10, %s18389_s12), 1  ;;  %14888 = vmatpush3.bf16.msra.mxu0 %v17227_v0  ;;  %v17232_v8 = vld [vmem:[#allocation8 + $0x68] sm:$0xff]   ;;  %v17233_v9 = vld [vmem:[#allocation8 + $0x70] sm:$0xff]   ;;  %v17234_v10 = vld [vmem:[#allocation8 + $0x78] sm:$0xff]  }
  0xd7   : > { %s17131_s13 = smul.u32 136, %s19702_s12  ;;  %14889 = vmatprep.subr.bf16.mxu0 %v17228_v1  ;;  %v17235_v11 = vld [vmem:[#allocation8] sm:$0xff]   ;;  %v17236_v18 = vld [vmem:[#allocation8 + $0x8] sm:$0xff]   ;;  %v17237_v19 = vld [vmem:[#allocation8 + $0x10] sm:$0xff]   ;;  %s12995_s10 = sshll.u32 %s19702_s12, 1 }
  0xd8   : > { %v17238_v26 = vld [vmem:[#allocation8 + $0x18] sm:$0xff]   ;;  %v17239_v27 = vld [vmem:[#allocation8 + $0x20] sm:$0xff]   ;;  %v17240_v28 = vld [vmem:[#allocation8 + $0x28] sm:$0xff]   ;;  %s447_s28 = scalar_lea.vmem %s19684_s9, %s12995_s10 }
  0xd9   : > { %s18634_s18 = scalar_lea.vmem %s19675_s0, %s17131_s13  ;;  %v17241_v29 = vld [vmem:[#allocation8 + $0x30] sm:$0xff]   ;;  %v17242_v30 = vld [vmem:[#allocation8 + $0x38] sm:$0xff]   ;;  %v17243_v31 = vld [vmem:[#allocation8 + $0x80] sm:$0xff]  }
  0xda   : > { %14890 = vmatpush3.bf16.msra.mxu0 %v17228_v1  ;;  %v13003_v4 = vld [vmem:[%s18634_s18 + $0x1] ss:$2 sm:$0xff]  ;;  %v13004_v5 = vld [vmem:[%s18634_s18 + $0x11] ss:$2 sm:$0xff]  ;;  %v449_v22 = vld [vmem:[%s18634_s18] ss:$2 sm:$0xff] }
  0xdb   : > { %14891 = vmatprep.subr.bf16.mxu0 %v17229_v2  ;;  %v500_v6 = vpack.c.bf16 %v13004_v5, %v13003_v4  ;;  %v13005_v12 = vld [vmem:[%s18634_s18 + $0x21] ss:$2 sm:$0xff]  ;;  %v13006_v13 = vld [vmem:[%s18634_s18 + $0x31] ss:$2 sm:$0xff]  ;;  %v12996_v23 = vld [vmem:[%s18634_s18 + $0x10] ss:$2 sm:$0xff] }
  0xdc   : > { %v13007_v14 = vld [vmem:[%s18634_s18 + $0x41] ss:$2 sm:$0xff]  ;;  %v13008_v15 = vld [vmem:[%s18634_s18 + $0x51] ss:$2 sm:$0xff]  ;;  %v501_v16 = vpack.c.bf16 %v13006_v13, %v13005_v12  ;;  %v464_v25 = vpack.c.bf16 %v12996_v23, %v449_v22  ;;  %v12997_v32 = vld [vmem:[%s18634_s18 + $0x20] ss:$2 sm:$0xff] }
  0xdd   : > { %14903 = vmatprep.mubr.bf16.mxu0 %v500_v6  ;;  %v502_v17 = vpack.c.bf16 %v13008_v15, %v13007_v14  ;;  %v13009_v20 = vld [vmem:[%s18634_s18 + $0x61] ss:$2 sm:$0xff]  ;;  %v13010_v21 = vld [vmem:[%s18634_s18 + $0x71] ss:$2 sm:$0xff]  ;;  %v12998_v33 = vld [vmem:[%s18634_s18 + $0x30] ss:$2 sm:$0xff] }
  0xde   : > { %14892 = vmatpush3.bf16.msra.mxu0 %v17229_v2  ;;  %v503_v24 = vpack.c.bf16 %v13010_v21, %v13009_v20  ;;  %v12999_v34 = vld [vmem:[%s18634_s18 + $0x40] ss:$2 sm:$0xff]  ;;  %v13000_v35 = vld [vmem:[%s18634_s18 + $0x50] ss:$2 sm:$0xff]  ;;  %v465_v36 = vpack.c.bf16 %v12998_v33, %v12997_v32  ;;  %v13043_v62 = vld [vmem:[%s18634_s18 + $0x3] ss:$2 sm:$0xff] }
  0xdf   : > { %14893 = vmatprep.subr.bf16.mxu0 %v17230_v3  ;;  %v466_v37 = vpack.c.bf16 %v13000_v35, %v12999_v34  ;;  %v17244_v38 = vld [vmem:[#allocation8 + $0x88] sm:$0xff]   ;;  %v13001_v39 = vld [vmem:[%s18634_s18 + $0x60] ss:$2 sm:$0xff]  ;;  %v17247_v47 = vld [vmem:[#allocation8 + $0xa0] sm:$0xff]  }
  0xe0   : > { %v13002_v40 = vld [vmem:[%s18634_s18 + $0x70] ss:$2 sm:$0xff]  ;;  %v17245_v41 = vld [vmem:[#allocation8 + $0x90] sm:$0xff]   ;;  %v17246_v45 = vld [vmem:[#allocation8 + $0x98] sm:$0xff]  }
  0xe1   : > { %v13027_v42 = vld [vmem:[%s18634_s18 + $0x2] ss:$2 sm:$0xff]  ;;  %v13028_v43 = vld [vmem:[%s18634_s18 + $0x12] ss:$2 sm:$0xff]  ;;  %v467_v44 = vpack.c.bf16 %v13002_v40, %v13001_v39  ;;  %v13044_v63 = vld [vmem:[%s18634_s18 + $0x13] ss:$2 sm:$0xff] }
  0xe2   : > { %14894 = vmatpush3.bf16.msra.mxu0 %v17230_v3  ;;  %v763_v46 = vpack.c.bf16 %v13028_v43, %v13027_v42  ;;  %v17248_v48 = vld [vmem:[#allocation8 + $0xa8] sm:$0xff]   ;;  %v17249_v49 = vld [vmem:[#allocation8 + $0xb0] sm:$0xff]   ;;  %v17250_v50 = vld [vmem:[#allocation8 + $0xb8] sm:$0xff]   ;;  %v921_v2 = vpack.c.bf16 %v13044_v63, %v13043_v62 }
  0xe3   : > { %14895 = vmatprep.subr.bf16.mxu0 %v17231_v7  ;;  %v13029_v51 = vld [vmem:[%s18634_s18 + $0x22] ss:$2 sm:$0xff]  ;;  %v13030_v52 = vld [vmem:[%s18634_s18 + $0x32] ss:$2 sm:$0xff]  ;;  %v13046_v12 = vld [vmem:[%s18634_s18 + $0x33] ss:$2 sm:$0xff] }
  0xe4   : > { %v17251_v53 = vld [vmem:[#allocation8 + $0xc0] sm:$0xff]   ;;  %v764_v56 = vpack.c.bf16 %v13030_v52, %v13029_v51  ;;  %v17252_v57 = vld [vmem:[#allocation8 + $0xc8] sm:$0xff]   ;;  %v17253_v59 = vld [vmem:[#allocation8 + $0xd0] sm:$0xff]  }
  0xe5   : > { %v13031_v54 = vld [vmem:[%s18634_s18 + $0x42] ss:$2 sm:$0xff]  ;;  %v13032_v55 = vld [vmem:[%s18634_s18 + $0x52] ss:$2 sm:$0xff]  ;;  %v13047_v14 = vld [vmem:[%s18634_s18 + $0x43] ss:$2 sm:$0xff] }
  0xe6   : > { %14896 = vmatpush3.bf16.msra.mxu0 %v17231_v7  ;;  %v765_v58 = vpack.c.bf16 %v13032_v55, %v13031_v54  ;;  %v13033_v60 = vld [vmem:[%s18634_s18 + $0x62] ss:$2 sm:$0xff]  ;;  %v13034_v61 = vld [vmem:[%s18634_s18 + $0x72] ss:$2 sm:$0xff]  ;;  %v13048_v15 = vld [vmem:[%s18634_s18 + $0x53] ss:$2 sm:$0xff] }
  0xe7   : > { %14897 = vmatprep.subr.bf16.mxu0 %v17232_v8  ;;  %v17254_v0 = vld [vmem:[#allocation8 + $0xd8] sm:$0xff]   ;;  %v766_v1 = vpack.c.bf16 %v13034_v61, %v13033_v60  ;;  %v17283_v3 = vld [vmem:[#allocation12 + $0x40] sm:$0xff]   ;;  %v17284_v4 = vld [vmem:[#allocation12 + $0x48] sm:$0xff]  }
  0xe8   : > { %v17255_v5 = vld [vmem:[#allocation8 + $0xe0] sm:$0xff]   ;;  %15055 = vmatprep.subr.bf16.mxu1 %v17283_v3  ;;  %v17285_v6 = vld [vmem:[#allocation12 + $0x50] sm:$0xff]   ;;  %v17256_v7 = vld [vmem:[#allocation8 + $0xe8] sm:$0xff]  }
  0xe9   : > { %15056 = vmatpush3.bf16.msra.mxu1 %v17283_v3  ;;  %v17259_v13 = vld [vmem:[#allocation8 + $0x100] sm:$0xff]   ;;  %v17261_v21 = vld [vmem:[#allocation8 + $0x110] sm:$0xff]  }
  0xea   : > { %14898 = vmatpush3.bf16.msra.mxu0 %v17232_v8  ;;  %15057 = vmatprep.subr.bf16.mxu1 %v17284_v4  ;;  %v17286_v8 = vld [vmem:[#allocation12 + $0x58] sm:$0xff]   ;;  %v17277_v61 = vld [vmem:[#allocation8 + $0x190] sm:$0xff]  }
  0xeb   : > { %14899 = vmatprep.subr.bf16.mxu0 %v17233_v9  ;;  %v13050_v20 = vld [vmem:[%s18634_s18 + $0x73] ss:$2 sm:$0xff]  ;;  %v13059_v22 = vld [vmem:[%s18634_s18 + $0x4] ss:$2 sm:$0xff]  ;;  %v13060_v23 = vld [vmem:[%s18634_s18 + $0x14] ss:$2 sm:$0xff] }
  0xec   : > { %v13062_v32 = vld [vmem:[%s18634_s18 + $0x34] ss:$2 sm:$0xff]  ;;  %v13063_v34 = vld [vmem:[%s18634_s18 + $0x44] ss:$2 sm:$0xff]  ;;  %v13075_v42 = vld [vmem:[%s18634_s18 + $0x5] ss:$2 sm:$0xff] }
  0xed   : > { %15058 = vmatpush3.bf16.msra.mxu1 %v17284_v4  ;;  %v17267_v33 = vld [vmem:[#allocation8 + $0x140] sm:$0xff]   ;;  %v17280_v4 = vld [vmem:[#allocation8 + $0x1a8] sm:$0xff]  }
  0xee   : > { %14900 = vmatpush3.bf16.msra.mxu0 %v17233_v9  ;;  %v17257_v9 = vld [vmem:[#allocation8 + $0xf0] sm:$0xff]   ;;  %15059 = vmatprep.subr.bf16.mxu1 %v17285_v6  ;;  %v17279_v3 = vld [vmem:[#allocation8 + $0x1a0] sm:$0xff]  }
  0xef   : > { %14901 = vmatprep.subr.bf16.mxu0 %v17234_v10  ;;  %v13064_v35 = vld [vmem:[%s18634_s18 + $0x54] ss:$2 sm:$0xff]  ;;  %v13065_v39 = vld [vmem:[%s18634_s18 + $0x64] ss:$2 sm:$0xff]  ;;  %v13076_v43 = vld [vmem:[%s18634_s18 + $0x15] ss:$2 sm:$0xff] }
  0xf0   : > { %v13066_v40 = vld [vmem:[%s18634_s18 + $0x74] ss:$2 sm:$0xff]  ;;  %v13077_v51 = vld [vmem:[%s18634_s18 + $0x25] ss:$2 sm:$0xff]  ;;  %v13078_v52 = vld [vmem:[%s18634_s18 + $0x35] ss:$2 sm:$0xff] }
  0xf1   : > { %15060 = vmatpush3.bf16.msra.mxu1 %v17285_v6  ;;  %v13079_v54 = vld [vmem:[%s18634_s18 + $0x45] ss:$2 sm:$0xff]  ;;  %v13080_v55 = vld [vmem:[%s18634_s18 + $0x55] ss:$2 sm:$0xff]  ;;  %v13091_v62 = vld [vmem:[%s18634_s18 + $0x6] ss:$2 sm:$0xff] }
  0xf2   : > { %14902 = vmatpush3.bf16.msra.mxu0 %v17234_v10  ;;  %v17258_v10 = vld [vmem:[#allocation8 + $0xf8] sm:$0xff]   ;;  %15061 = vmatprep.subr.bf16.mxu1 %v17286_v8  ;;  %v13082_v60 = vld [vmem:[%s18634_s18 + $0x75] ss:$2 sm:$0xff]  ;;  %v13092_v63 = vld [vmem:[%s18634_s18 + $0x16] ss:$2 sm:$0xff] }
  0xf3   : > { %14911 = vmatprep.subr.bf16.mxu0 %v17235_v11  ;;  %v17282_v6 = vld [vmem:[#allocation8 + $0x1b8] sm:$0xff]  }
  0xf5   : > { %14904 = vmatmul.mubr.bf16.vlgmr.msra.gmra.mrb[0].mxu0 %v501_v16  ;;  %15062 = vmatpush3.bf16.msra.mxu1 %v17286_v8  ;;  %v13094_v8 = vld [vmem:[%s18634_s18 + $0x36] ss:$2 sm:$0xff] }
  0xf6   : > { %14912 = vmatpush3.bf16.msra.mxu0 %v17235_v11  ;;  %14907 = vmatprep.mubr.bf16.mxu0 %v502_v17  ;;  %v13045_v11 = vld [vmem:[%s18634_s18 + $0x23] ss:$2 sm:$0xff]  ;;  %v17260_v17 = vld [vmem:[#allocation8 + $0x108] sm:$0xff]  }
  0xf7   : > { %14913 = vmatprep.subr.bf16.mxu0 %v17236_v18  ;;  %v922_v16 = vpack.c.bf16 %v13046_v12, %v13045_v11 }
  0xfa   : > { %14914 = vmatpush3.bf16.msra.mxu0 %v17236_v18  ;;  %v923_v18 = vpack.c.bf16 %v13048_v15, %v13047_v14  ;;  %v13098_v14 = vld [vmem:[%s18634_s18 + $0x76] ss:$2 sm:$0xff] }
  0xfb   : > { %14915 = vmatprep.subr.bf16.mxu0 %v17237_v19 }
  0xfd   : > { %14908 = vmatmul.mubr.bf16.gmra.mrb[4].mxu0 %v503_v24  ;;  %v17262_v24 = vld [vmem:[#allocation8 + $0x118] sm:$0xff]  }
  0xfe   : > { %14916 = vmatpush3.bf16.msra.mxu0 %v17237_v19  ;;  %14927 = vmatprep.mubr.bf16.mxu0 %v464_v25  ;;  %v13049_v19 = vld [vmem:[%s18634_s18 + $0x63] ss:$2 sm:$0xff] }
  0xff   : > { %14917 = vmatprep.subr.bf16.mxu0 %v17238_v26  ;;  %v924_v25 = vpack.c.bf16 %v13050_v20, %v13049_v19  ;;  %v17289_v19 = vld [vmem:[#allocation12 + $0x70] sm:$0xff]   ;;  %v17290_v20 = vld [vmem:[#allocation12 + $0x78] sm:$0xff]  }
 0x102   : > { %14918 = vmatpush3.bf16.msra.mxu0 %v17238_v26  ;;  %v1079_v26 = vpack.c.bf16 %v13060_v23, %v13059_v22  ;;  %v13107_v22 = vld [vmem:[#allocation10] ss:$0 sm:$0xff] }
 0x103   : > { %14919 = vmatprep.subr.bf16.mxu0 %v17239_v27 }
 0x106   : > { %14920 = vmatpush3.bf16.msra.mxu0 %v17239_v27  ;;  %v17263_v27 = vld [vmem:[#allocation8 + $0x120] sm:$0xff]  }
 0x107   : > { %14921 = vmatprep.subr.bf16.mxu0 %v17240_v28 }
 0x10a   : > { %14922 = vmatpush3.bf16.msra.mxu0 %v17240_v28  ;;  %v17264_v28 = vld [vmem:[#allocation8 + $0x128] sm:$0xff]  }
 0x10b   : > { %14923 = vmatprep.subr.bf16.mxu0 %v17241_v29 }
 0x10e   : > { %14924 = vmatpush3.bf16.msra.mxu0 %v17241_v29  ;;  %v17265_v29 = vld [vmem:[#allocation8 + $0x130] sm:$0xff]  }
 0x10f   : > { %14925 = vmatprep.subr.bf16.mxu0 %v17242_v30 }
 0x112   : > { %14926 = vmatpush3.bf16.msra.mxu0 %v17242_v30  ;;  %v17266_v30 = vld [vmem:[#allocation8 + $0x138] sm:$0xff]  }
 0x113   : > { %14935 = vmatprep.subr.bf16.mxu0 %v17243_v31 }
 0x115   : > { %14928 = vmatmul.mubr.bf16.vlgmr.msra.gmra.mrb[0].mxu0 %v465_v36 }
 0x116   : > { %14936 = vmatpush3.bf16.msra.mxu0 %v17243_v31  ;;  %14931 = vmatprep.mubr.bf16.mxu0 %v466_v37  ;;  %v13061_v31 = vld [vmem:[%s18634_s18 + $0x24] ss:$2 sm:$0xff]  ;;  %v17268_v37 = vld [vmem:[#allocation8 + $0x148] sm:$0xff]  }
 0x117   : > { %14937 = vmatprep.subr.bf16.mxu0 %v17244_v38  ;;  %v1080_v36 = vpack.c.bf16 %v13062_v32, %v13061_v31 }
 0x11a   : > { %14938 = vmatpush3.bf16.msra.mxu0 %v17244_v38  ;;  %v1081_v38 = vpack.c.bf16 %v13064_v35, %v13063_v34 }
 0x11b   : > { %14939 = vmatprep.subr.bf16.mxu0 %v17245_v41 }
 0x11d   : > { %14932 = vmatmul.mubr.bf16.gmra.mrb[4].mxu0 %v467_v44  ;;  %v17270_v44 = vld [vmem:[#allocation8 + $0x158] sm:$0xff]  }
 0x11e   : > { %14940 = vmatpush3.bf16.msra.mxu0 %v17245_v41  ;;  %14951 = vmatprep.mubr.bf16.mxu0 %v763_v46  ;;  %v17269_v41 = vld [vmem:[#allocation8 + $0x150] sm:$0xff]   ;;  %v1237_v46 = vpack.c.bf16 %v13076_v43, %v13075_v42 }
 0x11f   : > { %14941 = vmatprep.subr.bf16.mxu0 %v17246_v45 }
 0x122   : > { %14942 = vmatpush3.bf16.msra.mxu0 %v17246_v45  ;;  %v1082_v45 = vpack.c.bf16 %v13066_v40, %v13065_v39 }
 0x123   : > { %14943 = vmatprep.subr.bf16.mxu0 %v17247_v47 }
 0x126   : > { %14944 = vmatpush3.bf16.msra.mxu0 %v17247_v47  ;;  %v17271_v47 = vld [vmem:[#allocation8 + $0x160] sm:$0xff]  }
 0x127   : > { %14945 = vmatprep.subr.bf16.mxu0 %v17248_v48 }
 0x12a   : > { %14946 = vmatpush3.bf16.msra.mxu0 %v17248_v48  ;;  %v17272_v48 = vld [vmem:[#allocation8 + $0x168] sm:$0xff]  }
 0x12b   : > { %14947 = vmatprep.subr.bf16.mxu0 %v17249_v49 }
 0x12e   : > { %14948 = vmatpush3.bf16.msra.mxu0 %v17249_v49  ;;  %v17273_v49 = vld [vmem:[#allocation8 + $0x170] sm:$0xff]  }
 0x12f   : > { %14949 = vmatprep.subr.bf16.mxu0 %v17250_v50 }
 0x132   : > { %14950 = vmatpush3.bf16.msra.mxu0 %v17250_v50  ;;  %v17274_v50 = vld [vmem:[#allocation8 + $0x178] sm:$0xff]  }
 0x133   : > { %14959 = vmatprep.subr.bf16.mxu0 %v17251_v53 }
 0x135   : > { %14952 = vmatmul.mubr.bf16.vlgmr.msra.gmra.mrb[0].mxu0 %v764_v56  ;;  %v1238_v56 = vpack.c.bf16 %v13078_v52, %v13077_v51 }
 0x136   : > { %14960 = vmatpush3.bf16.msra.mxu0 %v17251_v53  ;;  %14955 = vmatprep.mubr.bf16.mxu0 %v765_v58  ;;  %v17275_v53 = vld [vmem:[#allocation8 + $0x180] sm:$0xff]   ;;  %v1239_v58 = vpack.c.bf16 %v13080_v55, %v13079_v54 }
 0x137   : > { %14961 = vmatprep.subr.bf16.mxu0 %v17252_v57 }
 0x13a   : > { %14962 = vmatpush3.bf16.msra.mxu0 %v17252_v57  ;;  %v17276_v57 = vld [vmem:[#allocation8 + $0x188] sm:$0xff]  }
 0x13b   : > { %14963 = vmatprep.subr.bf16.mxu0 %v17253_v59 }
 0x13d   : > { %14956 = vmatmul.mubr.bf16.gmra.mrb[4].mxu0 %v766_v1 }
 0x13e   : > { %14964 = vmatpush3.bf16.msra.mxu0 %v17253_v59  ;;  %14975 = vmatprep.mubr.bf16.mxu0 %v921_v2  ;;  %v13081_v59 = vld [vmem:[%s18634_s18 + $0x65] ss:$2 sm:$0xff]  ;;  %v1395_v2 = vpack.c.bf16 %v13092_v63, %v13091_v62 }
 0x13f   : > { %14965 = vmatprep.subr.bf16.mxu0 %v17254_v0  ;;  %v1240_v1 = vpack.c.bf16 %v13082_v60, %v13081_v59  ;;  %v17292_v59 = vld [vmem:[#allocation12 + $0x8] sm:$0xff]   ;;  %v17293_v60 = vld [vmem:[#allocation12 + $0x10] sm:$0xff]  }
 0x142   : > { %14966 = vmatpush3.bf16.msra.mxu0 %v17254_v0  ;;  %v17278_v0 = vld [vmem:[#allocation8 + $0x198] sm:$0xff]  }
 0x143   : > { %14967 = vmatprep.subr.bf16.mxu0 %v17255_v5 }
 0x146   : > { %14968 = vmatpush3.bf16.msra.mxu0 %v17255_v5  ;;  %v17281_v5 = vld [vmem:[#allocation8 + $0x1b0] sm:$0xff]  }
 0x147   : > { %14969 = vmatprep.subr.bf16.mxu0 %v17256_v7 }
 0x14a   : > { %14970 = vmatpush3.bf16.msra.mxu0 %v17256_v7  ;;  %v13093_v7 = vld [vmem:[%s18634_s18 + $0x26] ss:$2 sm:$0xff] }
 0x14b   : > { %14971 = vmatprep.subr.bf16.mxu0 %v17257_v9  ;;  %v1396_v11 = vpack.c.bf16 %v13094_v8, %v13093_v7 }
 0x14e   : > { %14972 = vmatpush3.bf16.msra.mxu0 %v17257_v9  ;;  %v13095_v9 = vld [vmem:[%s18634_s18 + $0x46] ss:$2 sm:$0xff] }
 0x14f   : > { %14973 = vmatprep.subr.bf16.mxu0 %v17258_v10 }
 0x152   : > { %14974 = vmatpush3.bf16.msra.mxu0 %v17258_v10  ;;  %v13096_v10 = vld [vmem:[%s18634_s18 + $0x56] ss:$2 sm:$0xff] }
 0x153   : > { %14983 = vmatprep.subr.bf16.mxu0 %v17259_v13  ;;  %v1397_v12 = vpack.c.bf16 %v13096_v10, %v13095_v9 }
 0x155   : > { %14976 = vmatmul.mubr.bf16.vlgmr.msra.gmra.mrb[0].mxu0 %v922_v16  ;;  %v17287_v16 = vld [vmem:[#allocation12 + $0x60] sm:$0xff]  }
 0x156   : > { %14984 = vmatpush3.bf16.msra.mxu0 %v17259_v13  ;;  %14979 = vmatprep.mubr.bf16.mxu0 %v923_v18  ;;  %v13097_v13 = vld [vmem:[%s18634_s18 + $0x66] ss:$2 sm:$0xff]  ;;  %v18331_v18 = vmov 0.0  }
 0x157   : > { %14985 = vmatprep.subr.bf16.mxu0 %v17260_v17  ;;  %v1398_v15 = vpack.c.bf16 %v13098_v14, %v13097_v13  ;;  %15063 = vmatprep.subr.bf16.mxu1 %v17287_v16  ;;  %1560 = vst [vmem:[#allocation7] sm:$0x7] %v18331_v18  ;;  %1561 = vst [vmem:[#allocation7 + $0x43] sm:$0x7] %v18331_v18  ;;  %v17296_v14 = vld [vmem:[#allocation12 + $0x28] sm:$0xff]  }
 0x158   : > { %15064 = vmatpush3.bf16.msra.mxu1 %v17287_v16  ;;  %3042 = vst [vmem:[#allocation2] sm:$0x7] %v18331_v18  ;;  %3043 = vst [vmem:[#allocation2 + $0x43] sm:$0x7] %v18331_v18  ;;  %v17298_v16 = vld [vmem:[#allocation12 + $0x38] sm:$0xff]  }
 0x159   : > { %5215 = vst [vmem:[#allocation3] sm:$0x7] %v18331_v18  ;;  %5216 = vst [vmem:[#allocation3 + $0x23] sm:$0x7] %v18331_v18 }
 0x15a   : > { %14986 = vmatpush3.bf16.msra.mxu0 %v17260_v17  ;;  %v17288_v17 = vld [vmem:[#allocation12 + $0x68] sm:$0xff]   ;;  %7165 = vst [vmem:[#allocation4] sm:$0x7] %v18331_v18  ;;  %7166 = vst [vmem:[#allocation4 + $0x13] sm:$0x7] %v18331_v18 }
 0x15b   : > { %14987 = vmatprep.subr.bf16.mxu0 %v17261_v21  ;;  %9056 = vst [vmem:[#allocation5] sm:$0x7] %v18331_v18  ;;  %9057 = vst [vmem:[#allocation5 + $0xb] sm:$0x7] %v18331_v18  ;;  %15065 = vmatprep.subr.bf16.mxu1 %v17288_v17 }
 0x15c   : > { %10948 = vst [vmem:[#allocation6] sm:$0x7] %v18331_v18  ;;  %10949 = vst [vmem:[#allocation6 + $0x7] sm:$0x7] %v18331_v18  ;;  %15066 = vmatpush3.bf16.msra.mxu1 %v17288_v17  ;;  %v17299_v17 = vld [vmem:[#allocation12 + $0x80] sm:$0xff]  }
 0x15d   : > { %14980 = vmatmul.mubr.bf16.gmra.mrb[4].mxu0 %v924_v25  ;;  %15067 = vmatprep.subr.bf16.mxu1 %v17289_v19 }
 0x15e   : > { %14988 = vmatpush3.bf16.msra.mxu0 %v17261_v21  ;;  %14999 = vmatprep.mubr.bf16.mxu0 %v1079_v26  ;;  %v17291_v21 = vld [vmem:[#allocation12] sm:$0xff]  }
 0x15f   : > { %14989 = vmatprep.subr.bf16.mxu0 %v17262_v24 }
 0x160   : > { %15068 = vmatpush3.bf16.msra.mxu1 %v17289_v19 }
 0x161   : > { %15069 = vmatprep.subr.bf16.mxu1 %v17290_v20 }
 0x162   : > { %14990 = vmatpush3.bf16.msra.mxu0 %v17262_v24 }
 0x163   : > { %14991 = vmatprep.subr.bf16.mxu0 %v17263_v27 }
 0x164   : > { %15070 = vmatpush3.bf16.msra.mxu1 %v17290_v20 }
 0x165   : > { %15079 = vmatprep.subr.bf16.mxu1 %v17291_v21 }
 0x166   : > { %14992 = vmatpush3.bf16.msra.mxu0 %v17263_v27 }
 0x167   : > { %14993 = vmatprep.subr.bf16.mxu0 %v17264_v28 }
 0x16a   : > { %14994 = vmatpush3.bf16.msra.mxu0 %v17264_v28 }
 0x16b   : > { %14995 = vmatprep.subr.bf16.mxu0 %v17265_v29 }
 0x16e   : > { %14996 = vmatpush3.bf16.msra.mxu0 %v17265_v29 }
 0x16f   : > { %14997 = vmatprep.subr.bf16.mxu0 %v17266_v30 }
 0x172   : > { %14998 = vmatpush3.bf16.msra.mxu0 %v17266_v30 }
 0x173   : > { %15007 = vmatprep.subr.bf16.mxu0 %v17267_v33 }
 0x175   : > { %15000 = vmatmul.mubr.bf16.vlgmr.msra.gmra.mrb[0].mxu0 %v1080_v36 }
 0x176   : > { %15008 = vmatpush3.bf16.msra.mxu0 %v17267_v33  ;;  %15003 = vmatprep.mubr.bf16.mxu0 %v1081_v38 }
 0x177   : > { %15009 = vmatprep.subr.bf16.mxu0 %v17268_v37 }
 0x17a   : > { %15010 = vmatpush3.bf16.msra.mxu0 %v17268_v37 }
 0x17b   : > { %15011 = vmatprep.subr.bf16.mxu0 %v17269_v41 }
 0x17d   : > { %15004 = vmatmul.mubr.bf16.gmra.mrb[4].mxu0 %v1082_v45 }
 0x17e   : > { %15012 = vmatpush3.bf16.msra.mxu0 %v17269_v41  ;;  %15023 = vmatprep.mubr.bf16.mxu0 %v1237_v46 }
 0x17f   : > { %15013 = vmatprep.subr.bf16.mxu0 %v17270_v44 }
 0x182   : > { %15014 = vmatpush3.bf16.msra.mxu0 %v17270_v44 }
 0x183   : > { %15015 = vmatprep.subr.bf16.mxu0 %v17271_v47 }
 0x186   : > { %15016 = vmatpush3.bf16.msra.mxu0 %v17271_v47 }
 0x187   : > { %15017 = vmatprep.subr.bf16.mxu0 %v17272_v48 }
 0x18a   : > { %15018 = vmatpush3.bf16.msra.mxu0 %v17272_v48 }
 0x18b   : > { %15019 = vmatprep.subr.bf16.mxu0 %v17273_v49 }
 0x18e   : > { %15020 = vmatpush3.bf16.msra.mxu0 %v17273_v49 }
 0x18f   : > { %15021 = vmatprep.subr.bf16.mxu0 %v17274_v50 }
 0x192   : > { %15022 = vmatpush3.bf16.msra.mxu0 %v17274_v50 }
 0x193   : > { %15031 = vmatprep.subr.bf16.mxu0 %v17275_v53 }
 0x195   : > { %15024 = vmatmul.mubr.bf16.vlgmr.msra.gmra.mrb[0].mxu0 %v1238_v56 }
 0x196   : > { %15032 = vmatpush3.bf16.msra.mxu0 %v17275_v53  ;;  %15027 = vmatprep.mubr.bf16.mxu0 %v1239_v58 }
 0x197   : > { %15033 = vmatprep.subr.bf16.mxu0 %v17276_v57 }
 0x19a   : > { %15034 = vmatpush3.bf16.msra.mxu0 %v17276_v57 }
 0x19b   : > { %15035 = vmatprep.subr.bf16.mxu0 %v17277_v61 }
 0x19d   : > { %15028 = vmatmul.mubr.bf16.gmra.mrb[4].mxu0 %v1240_v1 }
 0x19e   : > { %15036 = vmatpush3.bf16.msra.mxu0 %v17277_v61  ;;  %15047 = vmatprep.mubr.bf16.mxu0 %v1395_v2 }
 0x19f   : > { %15037 = vmatprep.subr.bf16.mxu0 %v17278_v0 }
 0x1a2   : > { %15038 = vmatpush3.bf16.msra.mxu0 %v17278_v0 }
 0x1a3   : > { %15039 = vmatprep.subr.bf16.mxu0 %v17279_v3 }
 0x1a6   : > { %15040 = vmatpush3.bf16.msra.mxu0 %v17279_v3 }
 0x1a7   : > { %15041 = vmatprep.subr.bf16.mxu0 %v17280_v4 }
 0x1aa   : > { %15042 = vmatpush3.bf16.msra.mxu0 %v17280_v4  ;;  %v17294_v4 = vld [vmem:[#allocation12 + $0x18] sm:$0xff]  }
 0x1ab   : > { %15043 = vmatprep.subr.bf16.mxu0 %v17281_v5 }
 0x1ae   : > { %15044 = vmatpush3.bf16.msra.mxu0 %v17281_v5 }
 0x1af   : > { %15045 = vmatprep.subr.bf16.mxu0 %v17282_v6 }
 0x1b2   : > { %15046 = vmatpush3.bf16.msra.mxu0 %v17282_v6  ;;  %v17295_v6 = vld [vmem:[#allocation12 + $0x20] sm:$0xff]  }
 0x1b5   : > { %15048 = vmatmul.mubr.bf16.vlgmr.msra.gmra.mrb[0].mxu0 %v1396_v11 }
 0x1b6   : > { %15051 = vmatprep.mubr.bf16.mxu0 %v1397_v12 }
 0x1bd   : > { %15052 = vmatmul.mubr.bf16.gmra.mrb[4].mxu0 %v1398_v15  ;;  %v17297_v15 = vld [vmem:[#allocation12 + $0x30] sm:$0xff]  }
 0x288   : > { %v15049_v23 = vpop.f32.mrb[0].mxu0 }
 0x289   : > { %v1546_v24 = vadd.f32 %v15049_v23, %v13107_v22  ;;  %v1498_v25 = vpop.f32.mrb[1].mxu0 }
 0x28a   : > { %v1544_v26 = vadd.f32 %v13107_v22, %v1498_v25  ;;  %v15050_v27 = vpop.f32.mrb[2].mxu0  ;;  %v17301_v25 = vld [vmem:[#allocation12 + $0x90] sm:$0xff]  }
 0x28b   : > { %v1554_v28 = vmax.f32 %v1546_v24, 0.0  ;;  %v1547_v29 = vadd.f32 %v15050_v27, %v13107_v22  ;;  %v1501_v30 = vpop.f32.mrb[3].mxu0 }
 0x28c   : > { %v1552_v31 = vmax.f32 %v1544_v26, 0.0  ;;  %v1545_v32 = vadd.f32 %v13107_v22, %v1501_v30 }
 0x28d   : > { %1564 = vst [vmem:[#allocation7 + $0x13] sm:$0xff] %v1554_v28  ;;  %v1555_v33 = vmax.f32 %v1547_v29, 0.0  ;;  %v17302_v29 = vld [vmem:[#allocation12 + $0x98] sm:$0xff]  }
 0x28e   : > { %1562 = vst [vmem:[#allocation7 + $0x3] sm:$0xff] %v1552_v31  ;;  %v1553_v34 = vmax.f32 %v1545_v32, 0.0  ;;  %v17303_v32 = vld [vmem:[#allocation12 + $0xa0] sm:$0xff]  }
 0x28f   : > { %1565 = vst [vmem:[#allocation7 + $0x1b] sm:$0xff] %v1555_v33  ;;  %v18704_v35 = vpack.c.bf16 %v1555_v33, %v1554_v28  ;;  %v17304_v33 = vld [vmem:[#allocation12 + $0xa8] sm:$0xff]  }
 0x290   : > { %1563 = vst [vmem:[#allocation7 + $0xb] sm:$0xff] %v1553_v34  ;;  %v15053_v36 = vpop.f32.mrb[4].mxu0  ;;  %v18706_v37 = vpack.c.bf16 %v1553_v34, %v1552_v31  ;;  %v17305_v34 = vld [vmem:[#allocation12 + $0xb0] sm:$0xff]  }
 0x291   : > { %v1550_v38 = vadd.f32 %v15053_v36, %v13107_v22  ;;  %v1514_v39 = vpop.f32.mrb[5].mxu0  ;;  %v17306_v36 = vld [vmem:[#allocation12 + $0xb8] sm:$0xff]  }
 0x292   : > { %v1548_v40 = vadd.f32 %v13107_v22, %v1514_v39  ;;  %v15054_v41 = vpop.f32.mrb[6].mxu0 }
 0x293   : > { %v1558_v42 = vmax.f32 %v1550_v38, 0.0  ;;  %v1551_v43 = vadd.f32 %v15054_v41, %v13107_v22  ;;  %v1517_v44 = vpop.f32.mrb[7].mxu0  ;;  %v17307_v38 = vld [vmem:[#allocation12 + $0xc0] sm:$0xff]  }
 0x294   : > { %v1556_v45 = vmax.f32 %v1548_v40, 0.0  ;;  %v1549_v46 = vadd.f32 %v13107_v22, %v1517_v44  ;;  %v17300_v22 = vld [vmem:[#allocation12 + $0x88] sm:$0xff]  }
 0x295   : > { %v1570_v47 = vld [vmem:[#allocation7] sm:$0xff]  ;;  %1568 = vst [vmem:[#allocation7 + $0x33] sm:$0xff] %v1558_v42  ;;  %v1559_v50 = vmax.f32 %v1551_v43, 0.0 }
 0x296   : > { %v1598_v48 = vld [vmem:[#allocation7 + $0x1] sm:$0xff]  ;;  %1566 = vst [vmem:[#allocation7 + $0x23] sm:$0xff] %v1556_v45  ;;  %v1557_v51 = vmax.f32 %v1549_v46, 0.0  ;;  %v1601_v52 = vld [vmem:[#allocation7 + $0x19] sm:$0xff] }
 0x297   : > { %v18708_v49 = vld [vmem:[#allocation7 + $0x2] sm:$0xff]  ;;  %1569 = vst [vmem:[#allocation7 + $0x3b] sm:$0xff] %v1559_v50  ;;  %v1600_v54 = vld [vmem:[#allocation7 + $0x11] sm:$0xff]  ;;  %v18711_v55 = vpack.c.bf16 %v1559_v50, %v1558_v42  ;;  %v1856_v40 = vld [vmem:[#allocation7 + $0x1a] sm:$0xff] }
 0x298   : > { %3955 = vst [vmem:[#allocation7] sm:$0x7] %v18331_v18  ;;  %v1599_v53 = vld [vmem:[#allocation7 + $0x9] sm:$0xff]  ;;  %1567 = vst [vmem:[#allocation7 + $0x2b] sm:$0xff] %v1557_v51  ;;  %v1607_v57 = vpack.c.bf16 %v1601_v52, %v1600_v54  ;;  %v18713_v58 = vpack.c.bf16 %v1557_v51, %v1556_v45  ;;  %v1573_v20 = vld [vmem:[#allocation7 + $0x18] sm:$0xff] }
 0x299   : > { %v1606_v56 = vpack.c.bf16 %v1599_v53, %v1598_v48  ;;  %v1571_v62 = vld [vmem:[#allocation7 + $0x8] sm:$0xff]  ;;  %v1572_v19 = vld [vmem:[#allocation7 + $0x10] sm:$0xff]  ;;  %v17309_v45 = vld [vmem:[#allocation12 + $0xd0] sm:$0xff]  }
 0x29a   : > { %v1578_v5 = vpack.c.bf16 %v1571_v62, %v1570_v47  ;;  %v1579_v23 = vpack.c.bf16 %v1573_v20, %v1572_v19  ;;  %v1854_v28 = vld [vmem:[#allocation7 + $0xa] sm:$0xff]  ;;  %v1855_v39 = vld [vmem:[#allocation7 + $0x12] sm:$0xff]  ;;  %v17313_v52 = vld [vmem:[#allocation12 + $0xf0] sm:$0xff]  }
 0x29b   : > { %15071 = vmatprep.mubr.bf16.mxu1 %v1606_v56  ;;  %v1861_v31 = vpack.c.bf16 %v1854_v28, %v18708_v49  ;;  %v17308_v42 = vld [vmem:[#allocation12 + $0xc8] sm:$0xff]   ;;  %v1862_v43 = vpack.c.bf16 %v1856_v40, %v1855_v39  ;;  %v17310_v48 = vld [vmem:[#allocation12 + $0xd8] sm:$0xff]   ;;  %v17311_v50 = vld [vmem:[#allocation12 + $0xe0] sm:$0xff]  }
 0x29c   : > { %15072 = vmatmul.mubr.bf16.vlgmr.msra.gmra.mrb[0].mxu1 %v1607_v57  ;;  %v17312_v51 = vld [vmem:[#allocation12 + $0xe8] sm:$0xff]   ;;  %v17314_v53 = vld [vmem:[#allocation12 + $0xf8] sm:$0xff]   ;;  %v17315_v54 = vld [vmem:[#allocation12 + $0x100] sm:$0xff]  }
 0x29d   : > { %15080 = vmatpush3.bf16.msra.mxu1 %v17291_v21  ;;  %v1602_v63 = vld [vmem:[#allocation7 + $0x21] sm:$0xff]  ;;  %v17316_v56 = vld [vmem:[#allocation12 + $0x108] sm:$0xff]   ;;  %v17319_v62 = vld [vmem:[#allocation12 + $0x120] sm:$0xff]  }
 0x29e   : > { %15081 = vmatprep.subr.bf16.mxu1 %v17292_v59  ;;  %v1605_v61 = vld [vmem:[#allocation7 + $0x39] sm:$0xff]  ;;  %v18715_v8 = vld [vmem:[#allocation7 + $0x22] sm:$0xff]  ;;  %v17327_v19 = vld [vmem:[#allocation12 + $0x160] sm:$0xff]  }
 0x29f   : > { %v1603_v0 = vld [vmem:[#allocation7 + $0x29] sm:$0xff]  ;;  %v1604_v1 = vld [vmem:[#allocation7 + $0x31] sm:$0xff]  ;;  %v1574_v7 = vld [vmem:[#allocation7 + $0x20] sm:$0xff] }
 0x2a0   : > { %v1608_v2 = vpack.c.bf16 %v1603_v0, %v1602_v63  ;;  %v1609_v3 = vpack.c.bf16 %v1605_v61, %v1604_v1  ;;  %v18717_v9 = vld [vmem:[#allocation7 + $0x1c] sm:$0xff]  ;;  %v18719_v10 = vld [vmem:[#allocation7 + $0x24] sm:$0xff]  ;;  %v1576_v26 = vld [vmem:[#allocation7 + $0x30] sm:$0xff] }
 0x2a1   : > { %15082 = vmatpush3.bf16.msra.mxu1 %v17292_v59  ;;  %v18721_v11 = vld [vmem:[#allocation7 + $0x1d] sm:$0xff]  ;;  %v18723_v12 = vld [vmem:[#allocation7 + $0x25] sm:$0xff]  ;;  %v1859_v46 = vld [vmem:[#allocation7 + $0x32] sm:$0xff] }
 0x2a2   : > { %15083 = vmatprep.subr.bf16.mxu1 %v17293_v60  ;;  %15075 = vmatprep.mubr.bf16.mxu1 %v1608_v2  ;;  %v18725_v13 = vld [vmem:[#allocation7 + $0x1e] sm:$0xff]  ;;  %v1575_v21 = vld [vmem:[#allocation7 + $0x28] sm:$0xff]  ;;  %v17320_v63 = vld [vmem:[#allocation12 + $0x128] sm:$0xff]  }
 0x2a3   : > { %3956 = vst [vmem:[#allocation7 + $0x23] sm:$0x7] %v18331_v18  ;;  %v1580_v24 = vpack.c.bf16 %v1575_v21, %v1574_v7  ;;  %v1577_v27 = vld [vmem:[#allocation7 + $0x38] sm:$0xff]  ;;  %v1858_v41 = vld [vmem:[#allocation7 + $0x2a] sm:$0xff] }
 0x2a4   : > { %15076 = vmatmul.mubr.bf16.gmra.mrb[4].mxu1 %v1609_v3  ;;  %v1581_v30 = vpack.c.bf16 %v1577_v27, %v1576_v26  ;;  %v1863_v44 = vpack.c.bf16 %v1858_v41, %v18715_v8  ;;  %v1860_v47 = vld [vmem:[#allocation7 + $0x3a] sm:$0xff]  ;;  %v2154_v59 = vld [vmem:[#allocation7 + $0xc] sm:$0xff] }
 0x2a5   : > { %15084 = vmatpush3.bf16.msra.mxu1 %v17293_v60  ;;  %15095 = vmatprep.mubr.bf16.mxu1 %v1578_v5  ;;  %v1864_v49 = vpack.c.bf16 %v1860_v47, %v1859_v46  ;;  %v17317_v57 = vld [vmem:[#allocation12 + $0x110] sm:$0xff]   ;;  %v17318_v60 = vld [vmem:[#allocation12 + $0x118] sm:$0xff]   ;;  %v17323_v0 = vld [vmem:[#allocation12 + $0x140] sm:$0xff]  }
 0x2a6   : > { %15085 = vmatprep.subr.bf16.mxu1 %v17294_v4  ;;  %v2158_v1 = vld [vmem:[#allocation7 + $0x2c] sm:$0xff]  ;;  %v2155_v2 = vld [vmem:[#allocation7 + $0x14] sm:$0xff]  ;;  %v17325_v5 = vld [vmem:[#allocation12 + $0x150] sm:$0xff]  }
 0x2a7   : > { %v17324_v3 = vld [vmem:[#allocation12 + $0x148] sm:$0xff]   ;;  %v2303_v8 = vld [vmem:[#allocation7 + $0x5] sm:$0xff]  ;;  %v17331_v21 = vld [vmem:[#allocation12 + $0x180] sm:$0xff]  }
 0x2a8   : > { %v2160_v7 = vld [vmem:[#allocation7 + $0x3c] sm:$0xff]  ;;  %v17330_v20 = vld [vmem:[#allocation12 + $0x178] sm:$0xff]   ;;  %v2458_v40 = vld [vmem:[#allocation7 + $0x2e] sm:$0xff] }
 0x2a9   : > { %15086 = vmatpush3.bf16.msra.mxu1 %v17294_v4  ;;  %v2163_v4 = vpack.c.bf16 %v2158_v1, %v18719_v10  ;;  %v17329_v10 = vld [vmem:[#allocation12 + $0x170] sm:$0xff]   ;;  %v2309_v28 = vld [vmem:[#allocation7 + $0x35] sm:$0xff]  ;;  %v2457_v39 = vld [vmem:[#allocation7 + $0x26] sm:$0xff] }
 0x2aa   : > { %15087 = vmatprep.subr.bf16.mxu1 %v17295_v6  ;;  %v17333_v27 = vld [vmem:[#allocation12 + $0x190] sm:$0xff]   ;;  %v2455_v41 = vld [vmem:[#allocation7 + $0x16] sm:$0xff] }
 0x2ab   : > { %v17339_v47 = vld [vmem:[#allocation18] sm:$0xff]  }
 0x2ac   : > { %v17352_v1 = vld [vmem:[#allocation15 + $0x28] sm:$0xff]  }
 0x2ad   : > { %15088 = vmatpush3.bf16.msra.mxu1 %v17295_v6  ;;  %v2159_v6 = vld [vmem:[#allocation7 + $0x34] sm:$0xff] }
 0x2ae   : > { %15089 = vmatprep.subr.bf16.mxu1 %v17296_v14 }
 0x2b1   : > { %15090 = vmatpush3.bf16.msra.mxu1 %v17296_v14  ;;  %v2304_v14 = vld [vmem:[#allocation7 + $0xd] sm:$0xff] }
 0x2b2   : > { %15091 = vmatprep.subr.bf16.mxu1 %v17297_v15 }
 0x2b5   : > { %15092 = vmatpush3.bf16.msra.mxu1 %v17297_v15  ;;  %v17326_v15 = vld [vmem:[#allocation12 + $0x158] sm:$0xff]  }
 0x2b6   : > { %15093 = vmatprep.subr.bf16.mxu1 %v17298_v16 }
 0x2b9   : > { %15094 = vmatpush3.bf16.msra.mxu1 %v17298_v16  ;;  %v2164_v16 = vpack.c.bf16 %v2160_v7, %v2159_v6  ;;  %v13176_v6 = vld [vmem:[%s18634_s18 + $0x34] ss:$2 sm:$0xff]  ;;  %v13169_v7 = vld [vmem:[%s18634_s18 + $0x43] ss:$2 sm:$0xff] }
 0x2ba   : > { %15103 = vmatprep.subr.bf16.mxu1 %v17299_v17 }
 0x2bc   : > { %15096 = vmatmul.mubr.bf16.vlgmr.msra.gmra.mrb[0].mxu1 %v1579_v23  ;;  %v2305_v23 = vld [vmem:[#allocation7 + $0x15] sm:$0xff] }
 0x2bd   : > { %15099 = vmatprep.mubr.bf16.mxu1 %v1580_v24  ;;  %15104 = vmatpush3.bf16.msra.mxu1 %v17299_v17  ;;  %v2311_v17 = vpack.c.bf16 %v2304_v14, %v2303_v8  ;;  %v17332_v24 = vld [vmem:[#allocation12 + $0x188] sm:$0xff]  }
 0x2be   : > { %15105 = vmatprep.subr.bf16.mxu1 %v17300_v22  ;;  %v13170_v8 = vld [vmem:[%s18634_s18 + $0x53] ss:$2 sm:$0xff]  ;;  %v13177_v14 = vld [vmem:[%s18634_s18 + $0x44] ss:$2 sm:$0xff] }
 0x2c1   : > { %15106 = vmatpush3.bf16.msra.mxu1 %v17300_v22  ;;  %v2308_v22 = vld [vmem:[#allocation7 + $0x2d] sm:$0xff] }
 0x2c2   : > { %15107 = vmatprep.subr.bf16.mxu1 %v17301_v25  ;;  %v2313_v26 = vpack.c.bf16 %v2308_v22, %v18723_v12  ;;  %v17336_v12 = vld [vmem:[#allocation12 + $0x1a8] sm:$0xff]  }
 0x2c4   : > { %15100 = vmatmul.mubr.bf16.gmra.mrb[4].mxu1 %v1581_v30  ;;  %v2453_v30 = vld [vmem:[#allocation7 + $0x6] sm:$0xff] }
 0x2c5   : > { %15108 = vmatpush3.bf16.msra.mxu1 %v17301_v25  ;;  %15119 = vmatprep.mubr.bf16.mxu1 %v1861_v31  ;;  %v2312_v25 = vpack.c.bf16 %v18721_v11, %v2305_v23  ;;  %v2454_v31 = vld [vmem:[#allocation7 + $0xe] sm:$0xff] }
 0x2c6   : > { %15109 = vmatprep.subr.bf16.mxu1 %v17302_v29  ;;  %v17335_v11 = vld [vmem:[#allocation12 + $0x1a0] sm:$0xff]  }
 0x2c7   : > { %v13172_v23 = vld [vmem:[%s18634_s18 + $0x73] ss:$2 sm:$0xff] }
 0x2c9   : > { %15110 = vmatpush3.bf16.msra.mxu1 %v17302_v29  ;;  %v2310_v29 = vld [vmem:[#allocation7 + $0x3d] sm:$0xff] }
 0x2ca   : > { %15111 = vmatprep.subr.bf16.mxu1 %v17303_v32 }
 0x2cd   : > { %15112 = vmatpush3.bf16.msra.mxu1 %v17303_v32  ;;  %v2314_v32 = vpack.c.bf16 %v2310_v29, %v2309_v28  ;;  %v17356_v28 = vld [vmem:[#allocation19 + $0x8] sm:$0xff]  }
 0x2ce   : > { %15113 = vmatprep.subr.bf16.mxu1 %v17304_v33 }
 0x2d1   : > { %15114 = vmatpush3.bf16.msra.mxu1 %v17304_v33  ;;  %v17334_v33 = vld [vmem:[#allocation12 + $0x198] sm:$0xff]  }
 0x2d2   : > { %15115 = vmatprep.subr.bf16.mxu1 %v17305_v34 }
 0x2d5   : > { %15116 = vmatpush3.bf16.msra.mxu1 %v17305_v34  ;;  %v2461_v34 = vpack.c.bf16 %v2454_v31, %v2453_v30  ;;  %v17357_v30 = vld [vmem:[#allocation19 + $0x10] sm:$0xff]   ;;  %v17358_v31 = vld [vmem:[#allocation19 + $0x18] sm:$0xff]  }
 0x2d6   : > { %15117 = vmatprep.subr.bf16.mxu1 %v17306_v36 }
 0x2d9   : > { %15118 = vmatpush3.bf16.msra.mxu1 %v17306_v36  ;;  %v17337_v36 = vld [vmem:[#allocation12 + $0x1b0] sm:$0xff]  }
 0x2da   : > { %15127 = vmatprep.subr.bf16.mxu1 %v17307_v38 }
 0x2dc   : > { %15120 = vmatmul.mubr.bf16.vlgmr.msra.gmra.mrb[0].mxu1 %v1862_v43  ;;  %v2463_v43 = vpack.c.bf16 %v2458_v40, %v2457_v39 }
 0x2dd   : > { %15123 = vmatprep.mubr.bf16.mxu1 %v1863_v44  ;;  %15128 = vmatpush3.bf16.msra.mxu1 %v17307_v38  ;;  %v17338_v38 = vld [vmem:[#allocation12 + $0x1b8] sm:$0xff]   ;;  %v2459_v44 = vld [vmem:[#allocation7 + $0x36] sm:$0xff] }
 0x2de   : > { %15129 = vmatprep.subr.bf16.mxu1 %v17308_v42 }
 0x2e1   : > { %15130 = vmatpush3.bf16.msra.mxu1 %v17308_v42  ;;  %v2462_v42 = vpack.c.bf16 %v18725_v13, %v2455_v41  ;;  %v17342_v13 = vld [vmem:[#allocation18 + $0x18] sm:$0xff]  }
 0x2e2   : > { %15131 = vmatprep.subr.bf16.mxu1 %v17309_v45 }
 0x2e4   : > { %15124 = vmatmul.mubr.bf16.gmra.mrb[4].mxu1 %v1864_v49  ;;  %v17341_v49 = vld [vmem:[#allocation18 + $0x10] sm:$0xff]  }
 0x2e5   : > { %15132 = vmatpush3.bf16.msra.mxu1 %v17309_v45  ;;  %15143 = vmatprep.mubr.bf16.mxu1 %v18706_v37  ;;  %v2153_v37 = vld [vmem:[#allocation7 + $0x4] sm:$0xff] }
 0x2e6   : > { %15133 = vmatprep.subr.bf16.mxu1 %v17310_v48  ;;  %v2161_v61 = vpack.c.bf16 %v2154_v59, %v2153_v37  ;;  %v2460_v45 = vld [vmem:[#allocation7 + $0x3e] sm:$0xff]  ;;  %v13166_v37 = vld [vmem:[%s18634_s18 + $0x13] ss:$2 sm:$0xff] }
 0x2e7   : > { %v2464_v46 = vpack.c.bf16 %v2460_v45, %v2459_v44  ;;  %v13173_v59 = vld [vmem:[%s18634_s18 + $0x4] ss:$2 sm:$0xff] }
 0x2e9   : > { %15134 = vmatpush3.bf16.msra.mxu1 %v17310_v48  ;;  %v17340_v48 = vld [vmem:[#allocation18 + $0x8] sm:$0xff]  }
 0x2ea   : > { %15135 = vmatprep.subr.bf16.mxu1 %v17311_v50 }
 0x2ed   : > { %15136 = vmatpush3.bf16.msra.mxu1 %v17311_v50  ;;  %v17343_v50 = vld [vmem:[#allocation18 + $0x20] sm:$0xff]  }
 0x2ee   : > { %15137 = vmatprep.subr.bf16.mxu1 %v17312_v51 }
 0x2f1   : > { %15138 = vmatpush3.bf16.msra.mxu1 %v17312_v51  ;;  %v17344_v51 = vld [vmem:[#allocation18 + $0x28] sm:$0xff]  }
 0x2f2   : > { %15139 = vmatprep.subr.bf16.mxu1 %v17313_v52 }
 0x2f5   : > { %15140 = vmatpush3.bf16.msra.mxu1 %v17313_v52  ;;  %v17345_v52 = vld [vmem:[#allocation18 + $0x30] sm:$0xff]  }
 0x2f6   : > { %15141 = vmatprep.subr.bf16.mxu1 %v17314_v53 }
 0x2f9   : > { %15142 = vmatpush3.bf16.msra.mxu1 %v17314_v53  ;;  %v17346_v53 = vld [vmem:[#allocation18 + $0x38] sm:$0xff]  }
 0x2fa   : > { %15151 = vmatprep.subr.bf16.mxu1 %v17315_v54 }
 0x2fc   : > { %15144 = vmatmul.mubr.bf16.vlgmr.msra.gmra.mrb[0].mxu1 %v18704_v35  ;;  %v17321_v35 = vld [vmem:[#allocation12 + $0x130] sm:$0xff]  }
 0x2fd   : > { %15147 = vmatprep.mubr.bf16.mxu1 %v18713_v58  ;;  %15152 = vmatpush3.bf16.msra.mxu1 %v17315_v54  ;;  %v17322_v58 = vld [vmem:[#allocation12 + $0x138] sm:$0xff]   ;;  %v17347_v54 = vld [vmem:[#allocation15] sm:$0xff]  }
 0x2fe   : > { %15153 = vmatprep.subr.bf16.mxu1 %v17316_v56  ;;  %15223 = vmatprep.subr.bf16.mxu0 %v17347_v54 }
 0x2ff   : > { %15224 = vmatpush3.bf16.msra.mxu0 %v17347_v54 }
 0x301   : > { %15154 = vmatpush3.bf16.msra.mxu1 %v17316_v56  ;;  %v17348_v56 = vld [vmem:[#allocation15 + $0x8] sm:$0xff]  }
 0x302   : > { %15155 = vmatprep.subr.bf16.mxu1 %v17317_v57  ;;  %15225 = vmatprep.subr.bf16.mxu0 %v17348_v56 }
 0x303   : > { %15226 = vmatpush3.bf16.msra.mxu0 %v17348_v56 }
 0x304   : > { %15148 = vmatmul.mubr.bf16.gmra.mrb[4].mxu1 %v18711_v55  ;;  %v2162_v55 = vpack.c.bf16 %v18717_v9, %v2155_v2  ;;  %v17328_v9 = vld [vmem:[#allocation12 + $0x168] sm:$0xff]   ;;  %v17353_v2 = vld [vmem:[#allocation15 + $0x30] sm:$0xff]  }
 0x305   : > { %15156 = vmatpush3.bf16.msra.mxu1 %v17317_v57  ;;  %15167 = vmatprep.mubr.bf16.mxu1 %v2161_v61  ;;  %v13165_v57 = vld [vmem:[%s18634_s18 + $0x3] ss:$2 sm:$0xff] }
 0x306   : > { %15157 = vmatprep.subr.bf16.mxu1 %v17318_v60  ;;  %v17349_v61 = vld [vmem:[#allocation15 + $0x10] sm:$0xff]  }
 0x307   : > { %15227 = vmatprep.subr.bf16.mxu0 %v17349_v61 }
 0x308   : > { %15228 = vmatpush3.bf16.msra.mxu0 %v17349_v61 }
 0x309   : > { %15158 = vmatpush3.bf16.msra.mxu1 %v17318_v60  ;;  %v13174_v60 = vld [vmem:[%s18634_s18 + $0x14] ss:$2 sm:$0xff] }
 0x30a   : > { %15159 = vmatprep.subr.bf16.mxu1 %v17319_v62 }
 0x30d   : > { %15160 = vmatpush3.bf16.msra.mxu1 %v17319_v62  ;;  %v2634_v62 = vmax.f32 %v13165_v57, %v13173_v59 }
 0x30e   : > { %15161 = vmatprep.subr.bf16.mxu1 %v17320_v63 }
 0x311   : > { %15162 = vmatpush3.bf16.msra.mxu1 %v17320_v63  ;;  %v2635_v63 = vmax.f32 %v13166_v37, %v13174_v60 }
 0x312   : > { %15163 = vmatprep.subr.bf16.mxu1 %v17321_v35 }
 0x315   : > { %15164 = vmatpush3.bf16.msra.mxu1 %v17321_v35  ;;  %v2642_v35 = vpack.c.bf16 %v2635_v63, %v2634_v62 }
 0x316   : > { %15165 = vmatprep.subr.bf16.mxu1 %v17322_v58 }
 0x317   : > { %15239 = vmatprep.mubr.bf16.mxu0 %v2642_v35 }
 0x319   : > { %15166 = vmatpush3.bf16.msra.mxu1 %v17322_v58  ;;  %v17350_v58 = vld [vmem:[#allocation15 + $0x18] sm:$0xff]  }
 0x31a   : > { %15175 = vmatprep.subr.bf16.mxu1 %v17323_v0  ;;  %15229 = vmatprep.subr.bf16.mxu0 %v17350_v58 }
 0x31b   : > { %15230 = vmatpush3.bf16.msra.mxu0 %v17350_v58 }
 0x31c   : > { %15168 = vmatmul.mubr.bf16.vlgmr.msra.gmra.mrb[0].mxu1 %v2162_v55  ;;  %v13167_v55 = vld [vmem:[%s18634_s18 + $0x23] ss:$2 sm:$0xff] }
 0x31d   : > { %15171 = vmatprep.mubr.bf16.mxu1 %v2163_v4  ;;  %15176 = vmatpush3.bf16.msra.mxu1 %v17323_v0  ;;  %v17351_v0 = vld [vmem:[#allocation15 + $0x20] sm:$0xff]  }
 0x31e   : > { %15177 = vmatprep.subr.bf16.mxu1 %v17324_v3  ;;  %15231 = vmatprep.subr.bf16.mxu0 %v17351_v0  ;;  %v13168_v4 = vld [vmem:[%s18634_s18 + $0x33] ss:$2 sm:$0xff] }
 0x31f   : > { %15232 = vmatpush3.bf16.msra.mxu0 %v17351_v0 }
 0x320   : > { %15233 = vmatprep.subr.bf16.mxu0 %v17352_v1 }
 0x321   : > { %15178 = vmatpush3.bf16.msra.mxu1 %v17324_v3  ;;  %v17354_v3 = vld [vmem:[#allocation15 + $0x38] sm:$0xff]  }
 0x322   : > { %15179 = vmatprep.subr.bf16.mxu1 %v17325_v5 }
 0x323   : > { %15234 = vmatpush3.bf16.msra.mxu0 %v17352_v1  ;;  %v17362_v1 = vld [vmem:[#allocation19 + $0x38] sm:$0xff]  }
 0x324   : > { %15172 = vmatmul.mubr.bf16.gmra.mrb[4].mxu1 %v2164_v16  ;;  %15235 = vmatprep.subr.bf16.mxu0 %v17353_v2 }
 0x325   : > { %15180 = vmatpush3.bf16.msra.mxu1 %v17325_v5  ;;  %15191 = vmatprep.mubr.bf16.mxu1 %v2311_v17  ;;  %v13175_v5 = vld [vmem:[%s18634_s18 + $0x24] ss:$2 sm:$0xff]  ;;  %v2637_v17 = vmax.f32 %v13168_v4, %v13176_v6 }
 0x326   : > { %15181 = vmatprep.subr.bf16.mxu1 %v17326_v15  ;;  %v2636_v16 = vmax.f32 %v13167_v55, %v13175_v5 }
 0x327   : > { %15236 = vmatpush3.bf16.msra.mxu0 %v17353_v2 }
 0x328   : > { %15237 = vmatprep.subr.bf16.mxu0 %v17354_v3 }
 0x329   : > { %15182 = vmatpush3.bf16.msra.mxu1 %v17326_v15  ;;  %v13178_v15 = vld [vmem:[%s18634_s18 + $0x54] ss:$2 sm:$0xff] }
 0x32a   : > { %15183 = vmatprep.subr.bf16.mxu1 %v17327_v19 }
 0x32b   : > { %15238 = vmatpush3.bf16.msra.mxu0 %v17354_v3 }
 0x32c   : > { %15267 = vmatprep.subr.bf16.mxu0 %v18331_v18 }
 0x32d   : > { %15184 = vmatpush3.bf16.msra.mxu1 %v17327_v19  ;;  %v2638_v19 = vmax.f32 %v13169_v7, %v13177_v14 }
 0x32e   : > { %15185 = vmatprep.subr.bf16.mxu1 %v17328_v9 }
 0x331   : > { %15186 = vmatpush3.bf16.msra.mxu1 %v17328_v9  ;;  %v2639_v9 = vmax.f32 %v13170_v8, %v13178_v15 }
 0x332   : > { %15187 = vmatprep.subr.bf16.mxu1 %v17329_v10 }
 0x333   : > { %v2644_v22 = vpack.c.bf16 %v2639_v9, %v2638_v19 }
 0x335   : > { %15188 = vmatpush3.bf16.msra.mxu1 %v17329_v10  ;;  %v2643_v10 = vpack.c.bf16 %v2637_v17, %v2636_v16 }
 0x336   : > { %15189 = vmatprep.subr.bf16.mxu1 %v17330_v20 }
 0x337   : > { %15240 = vmatmul.mubr.bf16.vlgmr.msra.gmra.mrb[8].mxu0 %v2643_v10  ;;  %v17363_v10 = vld [vmem:[#allocation8 + $0x200] sm:$0xff]  }
 0x338   : > { %15243 = vmatprep.mubr.bf16.mxu0 %v2644_v22  ;;  %v17366_v22 = vld [vmem:[#allocation8 + $0x218] sm:$0xff]  }
 0x339   : > { %15190 = vmatpush3.bf16.msra.mxu1 %v17330_v20  ;;  %v17355_v20 = vld [vmem:[#allocation19] sm:$0xff]  }
 0x33a   : > { %15199 = vmatprep.subr.bf16.mxu1 %v17331_v21  ;;  %15268 = vmatpush3.bf16.msra.mxu0 %v17355_v20  ;;  %v17364_v20 = vld [vmem:[#allocation8 + $0x208] sm:$0xff]  }
 0x33b   : > { %15269 = vmatprep.subr.bf16.mxu0 %v18331_v18 }
 0x33c   : > { %15192 = vmatmul.mubr.bf16.vlgmr.msra.gmra.mrb[0].mxu1 %v2312_v25  ;;  %v13180_v25 = vld [vmem:[%s18634_s18 + $0x74] ss:$2 sm:$0xff] }
 0x33d   : > { %15195 = vmatprep.mubr.bf16.mxu1 %v2313_v26  ;;  %15200 = vmatpush3.bf16.msra.mxu1 %v17331_v21  ;;  %v13171_v21 = vld [vmem:[%s18634_s18 + $0x63] ss:$2 sm:$0xff] }
 0x33e   : > { %15201 = vmatprep.subr.bf16.mxu1 %v17332_v24  ;;  %15270 = vmatpush3.bf16.msra.mxu0 %v17356_v28 }
 0x33f   : > { %15271 = vmatprep.subr.bf16.mxu0 %v18331_v18 }
 0x341   : > { %15202 = vmatpush3.bf16.msra.mxu1 %v17332_v24  ;;  %v13179_v24 = vld [vmem:[%s18634_s18 + $0x64] ss:$2 sm:$0xff] }
 0x342   : > { %15203 = vmatprep.subr.bf16.mxu1 %v17333_v27  ;;  %v2640_v26 = vmax.f32 %v13171_v21, %v13179_v24  ;;  %15272 = vmatpush3.bf16.msra.mxu0 %v17357_v30  ;;  %v17365_v21 = vld [vmem:[#allocation8 + $0x210] sm:$0xff]   ;;  %v17368_v24 = vld [vmem:[#allocation8 + $0x228] sm:$0xff]  }
 0x343   : > { %15273 = vmatprep.subr.bf16.mxu0 %v18331_v18 }
 0x344   : > { %15196 = vmatmul.mubr.bf16.gmra.mrb[4].mxu1 %v2314_v32  ;;  %v17359_v32 = vld [vmem:[#allocation19 + $0x20] sm:$0xff]  }
 0x345   : > { %15204 = vmatpush3.bf16.msra.mxu1 %v17333_v27  ;;  %15215 = vmatprep.mubr.bf16.mxu1 %v2461_v34  ;;  %v2641_v27 = vmax.f32 %v13172_v23, %v13180_v25  ;;  %v17361_v34 = vld [vmem:[#allocation19 + $0x30] sm:$0xff]   ;;  %v17369_v25 = vld [vmem:[#allocation8 + $0x230] sm:$0xff]  }
 0x346   : > { %15205 = vmatprep.subr.bf16.mxu1 %v17334_v33  ;;  %15274 = vmatpush3.bf16.msra.mxu0 %v17358_v31  ;;  %v17367_v23 = vld [vmem:[#allocation8 + $0x220] sm:$0xff]  }
 0x347   : > { %v2645_v29 = vpack.c.bf16 %v2641_v27, %v2640_v26  ;;  %15275 = vmatprep.subr.bf16.mxu0 %v18331_v18  ;;  %v17370_v26 = vld [vmem:[#allocation8 + $0x238] sm:$0xff]   ;;  %v18799_v27 = vld [vmem:[#allocation8 + $0x1c0] sm:$0xff]  }
 0x349   : > { %15206 = vmatpush3.bf16.msra.mxu1 %v17334_v33  ;;  %15244 = vmatmul.mubr.bf16.gmra.mrb[12].mxu0 %v2645_v29  ;;  %v17360_v33 = vld [vmem:[#allocation19 + $0x28] sm:$0xff]  }
 0x34a   : > { %15207 = vmatprep.subr.bf16.mxu1 %v17335_v11  ;;  %15283 = vmatprep.mubr.msk.bf16.mxu0 %vm18332_vm0, %v18331_v18 }
 0x34b   : > { %15276 = vmatpush3.bf16.msra.mxu0 %v17359_v32 }
 0x34c   : > { %15277 = vmatprep.subr.bf16.mxu0 %v18331_v18 }
 0x34d   : > { %15208 = vmatpush3.bf16.msra.mxu1 %v17335_v11 }
 0x34e   : > { %15209 = vmatprep.subr.bf16.mxu1 %v17336_v12 }
 0x34f   : > { %15278 = vmatpush3.bf16.msra.mxu0 %v17360_v33 }
 0x350   : > { %15279 = vmatprep.subr.bf16.mxu0 %v18331_v18 }
 0x351   : > { %15210 = vmatpush3.bf16.msra.mxu1 %v17336_v12  ;;  %v13164_v12 = vld [vmem:[#allocation13] ss:$0 sm:$0xff] }
 0x352   : > { %15211 = vmatprep.subr.bf16.mxu1 %v17337_v36 }
 0x353   : > { %15280 = vmatpush3.bf16.msra.mxu0 %v17361_v34 }
 0x354   : > { %15281 = vmatprep.subr.bf16.mxu0 %v18331_v18 }
 0x355   : > { %15212 = vmatpush3.bf16.msra.mxu1 %v17337_v36 }
 0x356   : > { %15213 = vmatprep.subr.bf16.mxu1 %v17338_v38 }
 0x357   : > { %15282 = vmatpush3.bf16.msra.mxu0 %v17362_v1 }
 0x359   : > { %15214 = vmatpush3.bf16.msra.mxu1 %v17338_v38 }
 0x35a   : > { %15247 = vmatprep.subr.bf16.mxu1 %v18331_v18 }
 0x35c   : > { %15216 = vmatmul.mubr.bf16.vlgmr.msra.gmra.mrb[0].mxu1 %v2462_v42 }
 0x35d   : > { %15219 = vmatprep.mubr.bf16.mxu1 %v2463_v43  ;;  %15248 = vmatpush3.bf16.msra.mxu1 %v17339_v47 }
 0x35e   : > { %15249 = vmatprep.subr.bf16.mxu1 %v18331_v18 }
 0x361   : > { %15250 = vmatpush3.bf16.msra.mxu1 %v17340_v48 }
 0x362   : > { %15251 = vmatprep.subr.bf16.mxu1 %v18331_v18 }
 0x364   : > { %15220 = vmatmul.mubr.bf16.gmra.mrb[4].mxu1 %v2464_v46 }
 0x365   : > { %15252 = vmatpush3.bf16.msra.mxu1 %v17341_v49  ;;  %15263 = vmatprep.mubr.msk.bf16.mxu1 %vm18332_vm0, %v18331_v18 }
 0x366   : > { %15253 = vmatprep.subr.bf16.mxu1 %v18331_v18 }
 0x369   : > { %15254 = vmatpush3.bf16.msra.mxu1 %v17342_v13 }
 0x36a   : > { %15255 = vmatprep.subr.bf16.mxu1 %v18331_v18 }
 0x36d   : > { %15256 = vmatpush3.bf16.msra.mxu1 %v17343_v50 }
 0x36e   : > { %15257 = vmatprep.subr.bf16.mxu1 %v18331_v18 }
 0x371   : > { %15258 = vmatpush3.bf16.msra.mxu1 %v17344_v51 }
 0x372   : > { %15259 = vmatprep.subr.bf16.mxu1 %v18331_v18 }
 0x375   : > { %15260 = vmatpush3.bf16.msra.mxu1 %v17345_v52 }
 0x376   : > { %15261 = vmatprep.subr.bf16.mxu1 %v18331_v18 }
 0x379   : > { %15262 = vmatpush3.bf16.msra.mxu1 %v17346_v53 }
 0x37a   : > { %15287 = vmatprep.subr.bf16.mxu1 %v17363_v10 }
 0x40a   : > { %v15241_v2 = vpop.f32.mrb[8].mxu0 }
 0x40b   : > { %v2751_v3 = vpop.f32.mrb[9].mxu0 }
 0x40c   : > { %v15242_v55 = vpop.f32.mrb[10].mxu0 }
 0x40d   : > { %v2754_v4 = vpop.f32.mrb[11].mxu0 }
 0x41c   : > { %v15245_v5 = vpop.f32.mrb[12].mxu0 }
 0x41d   : > { %v2767_v6 = vpop.f32.mrb[13].mxu0 }
 0x41e   : > { %v15246_v7 = vpop.f32.mrb[14].mxu0 }
 0x41f   : > { %v2770_v8 = vpop.f32.mrb[15].mxu0 }
 0x42f   : > { %v15217_v11 = vpop.f32.mrb[0].mxu1 }
 0x430   : > { %v2564_v36 = vpop.f32.mrb[1].mxu1  ;;  %v18779_v42 = vadd.f32 %v15217_v11, %v13164_v12  ;;  %v3014_v11 = vlaneseq }
 0x431   : > { %v15218_v38 = vpop.f32.mrb[2].mxu1  ;;  %v18775_v40 = vadd.f32 %v13164_v12, %v2564_v36  ;;  %v13181_v36 = vld [vmem:[#allocation16] ss:$0 sm:$0xff] }
 0x432   : > { %v2567_v39 = vpop.f32.mrb[3].mxu1  ;;  %v18783_v44 = vadd.f32 %v15218_v38, %v13164_v12 }
 0x433   : > { %v18777_v41 = vadd.f32 %v13164_v12, %v2567_v39 }
 0x435   : > { %v2782_v43 = vadd.f32 %v18777_v41, %v18775_v40 }
 0x437   : > { %v2783_v45 = vadd.f32 %v2782_v43, %v18779_v42  ;;  %v15221_v46 = vpop.f32.mrb[4].mxu1  ;;  %v2760_v43 = vadd.f32 %v15241_v2, %v13181_v36 }
 0x438   : > { %v2580_v47 = vpop.f32.mrb[5].mxu1  ;;  %v18792_v53 = vadd.f32 %v15221_v46, %v13164_v12  ;;  %v2763_v46 = vadd.f32 %v15242_v55, %v13181_v36 }
 0x439   : > { %v18786_v48 = vadd.f32 %v13164_v12, %v2580_v47  ;;  %v2784_v49 = vadd.f32 %v2783_v45, %v18783_v44  ;;  %v15222_v13 = vpop.f32.mrb[6].mxu1  ;;  %v2752_v45 = vadd.f32 %v13181_v36, %v2751_v3  ;;  %v2755_v47 = vadd.f32 %v13181_v36, %v2754_v4 }
 0x43a   : > { %v2583_v50 = vpop.f32.mrb[7].mxu1  ;;  %v18795_v56 = vadd.f32 %v15222_v13, %v13164_v12  ;;  %v2776_v13 = vadd.f32 %v15245_v5, %v13181_v36 }
 0x43b   : > { %v2785_v51 = vadd.f32 %v2784_v49, %v18786_v48  ;;  %v18790_v52 = vadd.f32 %v13164_v12, %v2583_v50  ;;  %v3015_v12 = vshrl.u32 %v3014_v11, 7  ;;  %v2768_v50 = vadd.f32 %v13181_v36, %v2767_v6  ;;  %v17382_v11 = vld [vmem:[#allocation8 + $0x258] sm:$0xff]  }
 0x43d   : > { %v2786_v54 = vadd.f32 %v2785_v51, %v18790_v52  ;;  %v18802_v38 = vsub.s32 0, %v3015_v12  ;;  %v2779_v51 = vadd.f32 %v15246_v7, %v13181_v36  ;;  %v17383_v12 = vld [vmem:[#allocation8 + $0x260] sm:$0xff]  }
 0x43f   : > { %v2787_v57 = vadd.f32 %v2786_v54, %v18792_v53  ;;  %v2771_v54 = vadd.f32 %v13181_v36, %v2770_v8  ;;  %v17384_v36 = vld [vmem:[#allocation8 + $0x268] sm:$0xff]  }
 0x441   : > { %v2788_v37 = vadd.f32 %v2787_v57, %v18795_v56 }
 0x443   : > { %v2789_v59 = vrot.slane %v2788_v37, 4 }
 0x445   : > { %v2790_v60 = vadd.f32 %v2789_v59, %v2788_v37 }
 0x447   : > { %v2791_v61 = vrot.slane %v2790_v60, 2 }
 0x449   : > { %v2792_v62 = vadd.f32 %v2791_v61, %v2790_v60 }
 0x44b   : > { %v2793_v63 = vrot.slane %v2792_v62, 1 }
 0x44d   : > { %v2794_v35 = vadd.f32 %v2793_v63, %v2792_v62 }
 0x44f   : > { %v2796_v58 = vmul.f32 0.015625, %v2794_v35 }
 0x451   : > { %v2797_v0 = vpack.c.bf16 %v2796_v58, %v2796_v58 }
 0x453   : > { %15264 = vmatmul.mubr.bf16.vlgmr.msra.gmra.mrb[8].mxu1 %v2797_v0 }
 0x454   : > { %15288 = vmatpush3.bf16.msra.mxu1 %v17363_v10 }
 0x455   : > { %15289 = vmatprep.subr.bf16.mxu1 %v17364_v20 }
 0x458   : > { %15290 = vmatpush3.bf16.msra.mxu1 %v17364_v20  ;;  %v17373_v20 = vld [vmem:[#allocation8 + $0x1d0] sm:$0xff]  }
 0x459   : > { %15291 = vmatprep.subr.bf16.mxu1 %v17365_v21 }
 0x45c   : > { %15292 = vmatpush3.bf16.msra.mxu1 %v17365_v21  ;;  %v17374_v21 = vld [vmem:[#allocation8 + $0x1d8] sm:$0xff]  }
 0x45d   : > { %15293 = vmatprep.subr.bf16.mxu1 %v17366_v22 }
 0x460   : > { %15294 = vmatpush3.bf16.msra.mxu1 %v17366_v22  ;;  %v17375_v22 = vld [vmem:[#allocation8 + $0x1e0] sm:$0xff]  }
 0x461   : > { %15295 = vmatprep.subr.bf16.mxu1 %v17367_v23 }
 0x464   : > { %15296 = vmatpush3.bf16.msra.mxu1 %v17367_v23  ;;  %v17376_v23 = vld [vmem:[#allocation8 + $0x1e8] sm:$0xff]  }
 0x465   : > { %15297 = vmatprep.subr.bf16.mxu1 %v17368_v24 }
 0x468   : > { %15298 = vmatpush3.bf16.msra.mxu1 %v17368_v24  ;;  %v17377_v24 = vld [vmem:[#allocation8 + $0x1f0] sm:$0xff]  }
 0x469   : > { %15299 = vmatprep.subr.bf16.mxu1 %v17369_v25 }
 0x46c   : > { %15300 = vmatpush3.bf16.msra.mxu1 %v17369_v25  ;;  %v17378_v25 = vld [vmem:[#allocation8 + $0x1f8] sm:$0xff]  }
 0x46d   : > { %15301 = vmatprep.subr.bf16.mxu1 %v17370_v26 }
 0x470   : > { %15302 = vmatpush3.bf16.msra.mxu1 %v17370_v26  ;;  %v17379_v26 = vld [vmem:[#allocation8 + $0x240] sm:$0xff]  }
 0x471   : > { %15307 = vmatprep.subr.bf16.mxu1 %v18799_v27 }
 0x526   : > { %v2896_v14 = vpop.f32.mrb[8].mxu1 }
 0x527   : > { %v2902_v15 = vmax.f32 %v2896_v14, 0.0  ;;  %v15265_v16 = vpop.f32.mrb[9].mxu1 }
 0x528   : > { %v2899_v17 = vpop.f32.mrb[10].mxu1 }
 0x529   : > { %v2903_v19 = vpack.c.bf16 %v2902_v15, %v2902_v15  ;;  %v15266_v9 = vpop.f32.mrb[11].mxu1 }
 0x52a   : > { %v17372_v9 = vld [vmem:[#allocation8 + $0x1c8] sm:$0xff]  }
 0x52b   : > { %15284 = vmatmul.mubr.bf16.vlgmr.msra.gmra.mrb[16].mxu0 %v2903_v19 }
 0x5fe   : > { %v3002_v28 = vpop.f32.mrb[16].mxu0 }
 0x5ff   : > { %v13206_v29 = vmul.f32 -1.442695, %v3002_v28  ;;  %v15285_v30 = vpop.f32.mrb[17].mxu0 }
 0x600   : > { %v3005_v31 = vpop.f32.mrb[18].mxu0 }
 0x601   : > { %18043 = vpow2.f32 %v13206_v29  ;;  %v15286_v32 = vpop.f32.mrb[19].mxu0 }
 0x602   : > { %v17380_v32 = vld [vmem:[#allocation8 + $0x248] sm:$0xff]  }
 0x60b   : > { %v18044_v33 = vpop.eup %18043 }
 0x60c   : > { %v3011_v34 = vadd.f32 1.0, %v18044_v33 }
 0x60e   : > { %18045 = vrcp.f32 %v3011_v34  ;;  %v17381_v34 = vld [vmem:[#allocation8 + $0x250] sm:$0xff]  }
 0x618   : > { %v18046_v39 = vpop.eup %18045 }
 0x619   : > { %v3017_v49 = vrot.slane %v18046_v39, %v18802_v38  ;;  %v17385_v39 = vld [vmem:[#allocation8 + $0x270] sm:$0xff]  }
 0x61b   : > { %v3018_v57 = vmul.f32 %v3017_v49, %v18775_v40  ;;  %v3019_v37 = vmul.f32 %v3017_v49, %v18777_v41  ;;  %v3020_v59 = vmul.f32 %v3017_v49, %v18779_v42  ;;  %v3021_v60 = vmul.f32 %v3017_v49, %v18783_v44 }
 0x61c   : > { %v3022_v61 = vmul.f32 %v3017_v49, %v18786_v48  ;;  %v3023_v62 = vmul.f32 %v3017_v49, %v18790_v52  ;;  %v3024_v63 = vmul.f32 %v3017_v49, %v18792_v53  ;;  %v3025_v35 = vmul.f32 %v3017_v49, %v18795_v56 }
 0x61d   : > { %v3026_v58 = vadd.f32 %v3018_v57, %v2752_v45  ;;  %v3027_v0 = vadd.f32 %v3019_v37, %v2755_v47  ;;  %v3028_v1 = vadd.f32 %v3020_v59, %v2760_v43  ;;  %v3029_v2 = vadd.f32 %v3021_v60, %v2763_v46  ;;  %v17386_v43 = vld [vmem:[#allocation8 + $0x278] sm:$0xff]   ;;  %v17387_v45 = vld [vmem:[#allocation8 + $0x280] sm:$0xff]   ;;  %v17389_v57 = vld [vmem:[#allocation8 + $0x290] sm:$0xff]  }
 0x61e   : > { %v3030_v3 = vadd.f32 %v3022_v61, %v2768_v50  ;;  %v3031_v40 = vadd.f32 %v3023_v62, %v2771_v54  ;;  %v3032_v55 = vadd.f32 %v3024_v63, %v2776_v13  ;;  %v3033_v41 = vadd.f32 %v3025_v35, %v2779_v51  ;;  %v17388_v51 = vld [vmem:[#allocation8 + $0x288] sm:$0xff]   ;;  %v17390_v37 = vld [vmem:[#allocation8 + $0x298] sm:$0xff]   ;;  %v17391_v59 = vld [vmem:[#allocation8 + $0x2a0] sm:$0xff]  }
 0x61f   : > { %v3034_v4 = vmax.f32 %v3026_v58, 0.0  ;;  %v3035_v42 = vmax.f32 %v3027_v0, 0.0  ;;  %v3036_v5 = vmax.f32 %v3028_v1, 0.0  ;;  %v3037_v44 = vmax.f32 %v3029_v2, 0.0  ;;  %v17392_v60 = vld [vmem:[#allocation8 + $0x2a8] sm:$0xff]   ;;  %v17393_v61 = vld [vmem:[#allocation8 + $0x2b0] sm:$0xff]  }
 0x620   : > { %v3038_v6 = vmax.f32 %v3030_v3, 0.0  ;;  %v3039_v48 = vmax.f32 %v3031_v40, 0.0  ;;  %v3040_v7 = vmax.f32 %v3032_v55, 0.0  ;;  %v3041_v52 = vmax.f32 %v3033_v41, 0.0  ;;  %v17394_v62 = vld [vmem:[#allocation8 + $0x2b8] sm:$0xff]   ;;  %v17395_v63 = vld [vmem:[#allocation8 + $0x2c0] sm:$0xff]  }
 0x621   : > { %3044 = vst [vmem:[#allocation2 + $0x3] sm:$0xff] %v3034_v4  ;;  %3045 = vst [vmem:[#allocation2 + $0xb] sm:$0xff] %v3035_v42  ;;  %v17396_v3 = vld [vmem:[#allocation8 + $0x2c8] sm:$0xff]   ;;  %v17397_v4 = vld [vmem:[#allocation8 + $0x2d0] sm:$0xff]  }
 0x622   : > { %3046 = vst [vmem:[#allocation2 + $0x13] sm:$0xff] %v3036_v5  ;;  %3047 = vst [vmem:[#allocation2 + $0x1b] sm:$0xff] %v3037_v44  ;;  %v17427_v55 = vld [vmem:[#allocation12 + $0x200] sm:$0xff]   ;;  %v17428_v41 = vld [vmem:[#allocation12 + $0x208] sm:$0xff]  }
 0x623   : > { %3048 = vst [vmem:[#allocation2 + $0x23] sm:$0xff] %v3038_v6  ;;  %3049 = vst [vmem:[#allocation2 + $0x2b] sm:$0xff] %v3039_v48  ;;  %15427 = vmatprep.subr.bf16.mxu0 %v17427_v55  ;;  %v17429_v42 = vld [vmem:[#allocation12 + $0x210] sm:$0xff]   ;;  %v17430_v44 = vld [vmem:[#allocation12 + $0x218] sm:$0xff]  }
 0x624   : > { %3050 = vst [vmem:[#allocation2 + $0x33] sm:$0xff] %v3040_v7  ;;  %3051 = vst [vmem:[#allocation2 + $0x3b] sm:$0xff] %v3041_v52  ;;  %15428 = vmatpush3.bf16.msra.mxu0 %v17427_v55  ;;  %v17398_v5 = vld [vmem:[#allocation8 + $0x2d8] sm:$0xff]   ;;  %v17399_v6 = vld [vmem:[#allocation8 + $0x2e0] sm:$0xff]  }
 0x625   : > { %15429 = vmatprep.subr.bf16.mxu0 %v17428_v41  ;;  %v17400_v48 = vld [vmem:[#allocation8 + $0x2e8] sm:$0xff]   ;;  %v17401_v7 = vld [vmem:[#allocation8 + $0x2f0] sm:$0xff]   ;;  %v17402_v52 = vld [vmem:[#allocation8 + $0x2f8] sm:$0xff]  }
 0x628   : > { %v3079_v53 = vld [vmem:[#allocation2 + $0x1] ss:$2 sm:$0xff]  ;;  %v3052_v8 = vld [vmem:[#allocation2] ss:$2 sm:$0xff]  ;;  %15430 = vmatpush3.bf16.msra.mxu0 %v17428_v41  ;;  %v17431_v41 = vld [vmem:[#allocation12 + $0x220] sm:$0xff]  }
 0x629   : > { %v3081_v56 = vld [vmem:[#allocation2 + $0x11] ss:$2 sm:$0xff]  ;;  %v3054_v17 = vld [vmem:[#allocation2 + $0x10] ss:$2 sm:$0xff]  ;;  %15431 = vmatprep.subr.bf16.mxu0 %v17429_v42 }
 0x62a   : > { %v3086_v14 = vpack.c.bf16 %v3081_v56, %v3079_v53  ;;  %v3083_v15 = vld [vmem:[#allocation2 + $0x21] ss:$2 sm:$0xff]  ;;  %v3059_v10 = vpack.c.bf16 %v3054_v17, %v3052_v8  ;;  %v3300_v29 = vld [vmem:[#allocation2 + $0x2] ss:$2 sm:$0xff]  ;;  %v3302_v30 = vld [vmem:[#allocation2 + $0x12] ss:$2 sm:$0xff] }
 0x62b   : > { %v3085_v16 = vld [vmem:[#allocation2 + $0x31] ss:$2 sm:$0xff]  ;;  %v3058_v28 = vld [vmem:[#allocation2 + $0x30] ss:$2 sm:$0xff]  ;;  %v3307_v33 = vpack.c.bf16 %v3302_v30, %v3300_v29 }
 0x62c   : > { %v3087_v19 = vpack.c.bf16 %v3085_v16, %v3083_v15  ;;  %15303 = vmatprep.mubr.bf16.mxu1 %v3086_v14  ;;  %v3304_v46 = vld [vmem:[#allocation2 + $0x22] ss:$2 sm:$0xff]  ;;  %v3306_v47 = vld [vmem:[#allocation2 + $0x32] ss:$2 sm:$0xff]  ;;  %v3428_v49 = vld [vmem:[#allocation2 + $0x3] ss:$2 sm:$0xff]  ;;  %15432 = vmatpush3.bf16.msra.mxu0 %v17429_v42 }
 0x62d   : > { %v3430_v13 = vld [vmem:[#allocation2 + $0x13] ss:$2 sm:$0xff]  ;;  %v3308_v50 = vpack.c.bf16 %v3306_v47, %v3304_v46  ;;  %v3432_v35 = vld [vmem:[#allocation2 + $0x23] ss:$2 sm:$0xff]  ;;  %v3556_v0 = vld [vmem:[#allocation2 + $0x4] ss:$2 sm:$0xff]  ;;  %15433 = vmatprep.subr.bf16.mxu0 %v17430_v44 }
 0x62e   : > { %15304 = vmatmul.mubr.bf16.vlgmr.msra.gmra.mrb[12].mxu1 %v3087_v19  ;;  %v3435_v54 = vpack.c.bf16 %v3430_v13, %v3428_v49  ;;  %v3434_v58 = vld [vmem:[#allocation2 + $0x33] ss:$2 sm:$0xff]  ;;  %v3558_v1 = vld [vmem:[#allocation2 + $0x14] ss:$2 sm:$0xff]  ;;  %v3560_v56 = vld [vmem:[#allocation2 + $0x24] ss:$2 sm:$0xff] }
 0x62f   : > { %15308 = vmatpush3.bf16.msra.mxu1 %v18799_v27  ;;  %15323 = vmatprep.mubr.bf16.mxu1 %v3059_v10  ;;  %v3056_v27 = vld [vmem:[#allocation2 + $0x20] ss:$2 sm:$0xff]  ;;  %v3436_v2 = vpack.c.bf16 %v3434_v58, %v3432_v35  ;;  %v3563_v40 = vpack.c.bf16 %v3558_v1, %v3556_v0  ;;  %v17403_v53 = vld [vmem:[#allocation8 + $0x300] sm:$0xff]   ;;  %v17404_v17 = vld [vmem:[#allocation8 + $0x308] sm:$0xff]  }
 0x630   : > { %15309 = vmatprep.subr.bf16.mxu1 %v17372_v9  ;;  %v3060_v31 = vpack.c.bf16 %v3058_v28, %v3056_v27  ;;  %15434 = vmatpush3.bf16.msra.mxu0 %v17430_v44  ;;  %v3562_v8 = vld [vmem:[#allocation2 + $0x34] ss:$2 sm:$0xff]  ;;  %v3684_v14 = vld [vmem:[#allocation2 + $0x5] ss:$2 sm:$0xff]  ;;  %v3686_v15 = vld [vmem:[#allocation2 + $0x15] ss:$2 sm:$0xff] }
 0x631   : > { %v3564_v16 = vpack.c.bf16 %v3562_v8, %v3560_v56  ;;  %v3691_v19 = vpack.c.bf16 %v3686_v15, %v3684_v14  ;;  %v17406_v10 = vld [vmem:[#allocation8 + $0x318] sm:$0xff]   ;;  %v3814_v28 = vld [vmem:[#allocation2 + $0x16] ss:$2 sm:$0xff]  ;;  %v4836_v0 = vld [vmem:[#allocation2 + $0x33] ss:$2 sm:$0xff]  ;;  %15435 = vmatprep.subr.bf16.mxu0 %v17431_v41 }
 0x632   : > { %v3812_v27 = vld [vmem:[#allocation2 + $0x6] ss:$2 sm:$0xff]  ;;  %v17412_v30 = vld [vmem:[#allocation8 + $0x348] sm:$0xff]   ;;  %v4835_v58 = vld [vmem:[#allocation2 + $0x23] ss:$2 sm:$0xff] }
 0x633   : > { %15310 = vmatpush3.bf16.msra.mxu1 %v17372_v9  ;;  %v17405_v9 = vld [vmem:[#allocation8 + $0x310] sm:$0xff]   ;;  %v17426_v35 = vld [vmem:[#allocation15 + $0x78] sm:$0xff]  }
 0x634   : > { %15311 = vmatprep.subr.bf16.mxu1 %v17373_v20  ;;  %v4838_v46 = vld [vmem:[#allocation2 + $0x14] ss:$2 sm:$0xff]  ;;  %v4839_v1 = vld [vmem:[#allocation2 + $0x24] ss:$2 sm:$0xff]  ;;  %15436 = vmatpush3.bf16.msra.mxu0 %v17431_v41 }
 0x635   : > { %v17419_v47 = vld [vmem:[#allocation15 + $0x40] sm:$0xff]   ;;  %v3816_v49 = vld [vmem:[#allocation2 + $0x26] ss:$2 sm:$0xff] }
 0x636   : > { %v3818_v13 = vld [vmem:[#allocation2 + $0x36] ss:$2 sm:$0xff]  ;;  %v17433_v42 = vld [vmem:[#allocation12 + $0x230] sm:$0xff]  }
 0x637   : > { %15312 = vmatpush3.bf16.msra.mxu1 %v17373_v20  ;;  %v17407_v20 = vld [vmem:[#allocation8 + $0x320] sm:$0xff]  }
 0x638   : > { %15313 = vmatprep.subr.bf16.mxu1 %v17374_v21  ;;  %v17435_v44 = vld [vmem:[#allocation12 + $0x1c0] sm:$0xff]  }
 0x63b   : > { %15314 = vmatpush3.bf16.msra.mxu1 %v17374_v21  ;;  %v17408_v21 = vld [vmem:[#allocation8 + $0x328] sm:$0xff]  }
 0x63c   : > { %15315 = vmatprep.subr.bf16.mxu1 %v17375_v22 }
 0x63f   : > { %15316 = vmatpush3.bf16.msra.mxu1 %v17375_v22  ;;  %v17409_v22 = vld [vmem:[#allocation8 + $0x330] sm:$0xff]  }
 0x640   : > { %15317 = vmatprep.subr.bf16.mxu1 %v17376_v23 }
 0x643   : > { %15318 = vmatpush3.bf16.msra.mxu1 %v17376_v23  ;;  %v17410_v23 = vld [vmem:[#allocation8 + $0x338] sm:$0xff]  }
 0x644   : > { %15319 = vmatprep.subr.bf16.mxu1 %v17377_v24 }
 0x647   : > { %15320 = vmatpush3.bf16.msra.mxu1 %v17377_v24  ;;  %v17411_v24 = vld [vmem:[#allocation8 + $0x340] sm:$0xff]  }
 0x648   : > { %15321 = vmatprep.subr.bf16.mxu1 %v17378_v25 }
 0x64b   : > { %15322 = vmatpush3.bf16.msra.mxu1 %v17378_v25  ;;  %v3688_v25 = vld [vmem:[#allocation2 + $0x25] ss:$2 sm:$0xff] }
 0x64c   : > { %15327 = vmatprep.subr.bf16.mxu1 %v17379_v26 }
 0x64e   : > { %15324 = vmatmul.mubr.bf16.vlgmr.msra.gmra.mrb[12].mxu1 %v3060_v31  ;;  %v3819_v31 = vpack.c.bf16 %v3814_v28, %v3812_v27 }
 0x64f   : > { %15328 = vmatpush3.bf16.msra.mxu1 %v17379_v26  ;;  %15343 = vmatprep.mubr.bf16.mxu1 %v3307_v33  ;;  %v3690_v26 = vld [vmem:[#allocation2 + $0x35] ss:$2 sm:$0xff]  ;;  %v17414_v33 = vld [vmem:[#allocation8 + $0x358] sm:$0xff]  }
 0x650   : > { %15329 = vmatprep.subr.bf16.mxu1 %v17380_v32  ;;  %v3692_v29 = vpack.c.bf16 %v3690_v26, %v3688_v25 }
 0x653   : > { %15330 = vmatpush3.bf16.msra.mxu1 %v17380_v32  ;;  %v17413_v32 = vld [vmem:[#allocation8 + $0x350] sm:$0xff]  }
 0x654   : > { %15331 = vmatprep.subr.bf16.mxu1 %v17381_v34 }
 0x657   : > { %15332 = vmatpush3.bf16.msra.mxu1 %v17381_v34  ;;  %v17415_v34 = vld [vmem:[#allocation8 + $0x360] sm:$0xff]  }
 0x658   : > { %15333 = vmatprep.subr.bf16.mxu1 %v17382_v11 }
 0x65b   : > { %15334 = vmatpush3.bf16.msra.mxu1 %v17382_v11  ;;  %v17416_v11 = vld [vmem:[#allocation8 + $0x368] sm:$0xff]  }
 0x65c   : > { %15335 = vmatprep.subr.bf16.mxu1 %v17383_v12 }
 0x65f   : > { %15336 = vmatpush3.bf16.msra.mxu1 %v17383_v12  ;;  %v17417_v12 = vld [vmem:[#allocation8 + $0x370] sm:$0xff]  }
 0x660   : > { %15337 = vmatprep.subr.bf16.mxu1 %v17384_v36 }
 0x663   : > { %15338 = vmatpush3.bf16.msra.mxu1 %v17384_v36  ;;  %v17418_v36 = vld [vmem:[#allocation8 + $0x378] sm:$0xff]  }
 0x664   : > { %15339 = vmatprep.subr.bf16.mxu1 %v17385_v39 }
 0x667   : > { %15340 = vmatpush3.bf16.msra.mxu1 %v17385_v39  ;;  %v4833_v39 = vld [vmem:[#allocation2 + $0x3] ss:$2 sm:$0xff] }
 0x668   : > { %15341 = vmatprep.subr.bf16.mxu1 %v17386_v43 }
 0x66b   : > { %15342 = vmatpush3.bf16.msra.mxu1 %v17386_v43  ;;  %v4834_v43 = vld [vmem:[#allocation2 + $0x13] ss:$2 sm:$0xff] }
 0x66c   : > { %15347 = vmatprep.subr.bf16.mxu1 %v17387_v45 }
 0x66e   : > { %15344 = vmatmul.mubr.bf16.vlgmr.msra.gmra.mrb[12].mxu1 %v3308_v50 }
 0x66f   : > { %15348 = vmatpush3.bf16.msra.mxu1 %v17387_v45  ;;  %15363 = vmatprep.mubr.bf16.mxu1 %v3435_v54  ;;  %v4837_v45 = vld [vmem:[#allocation2 + $0x4] ss:$2 sm:$0xff]  ;;  %v3820_v54 = vpack.c.bf16 %v3818_v13, %v3816_v49 }
 0x670   : > { %15349 = vmatprep.subr.bf16.mxu1 %v17388_v51  ;;  %v4841_v50 = vmax.f32 %v4833_v39, %v4837_v45  ;;  %v17438_v45 = vld [vmem:[#allocation12 + $0x1d8] sm:$0xff]   ;;  %v17440_v13 = vld [vmem:[#allocation12 + $0x1e8] sm:$0xff]  }
 0x673   : > { %15350 = vmatpush3.bf16.msra.mxu1 %v17388_v51  ;;  %v4842_v51 = vmax.f32 %v4834_v43, %v4838_v46  ;;  %v17437_v43 = vld [vmem:[#allocation12 + $0x1d0] sm:$0xff]   ;;  %v17439_v46 = vld [vmem:[#allocation12 + $0x1e0] sm:$0xff]  }
 0x674   : > { %15351 = vmatprep.subr.bf16.mxu1 %v17389_v57 }
 0x677   : > { %15352 = vmatpush3.bf16.msra.mxu1 %v17389_v57  ;;  %v17420_v57 = vld [vmem:[#allocation15 + $0x48] sm:$0xff]  }
 0x678   : > { %15353 = vmatprep.subr.bf16.mxu1 %v17390_v37 }
 0x67b   : > { %15354 = vmatpush3.bf16.msra.mxu1 %v17390_v37  ;;  %v4845_v37 = vpack.c.bf16 %v4842_v51, %v4841_v50 }
 0x67c   : > { %15355 = vmatprep.subr.bf16.mxu1 %v17391_v59 }
 0x67f   : > { %15356 = vmatpush3.bf16.msra.mxu1 %v17391_v59  ;;  %v17421_v59 = vld [vmem:[#allocation15 + $0x50] sm:$0xff]  }
 0x680   : > { %15357 = vmatprep.subr.bf16.mxu1 %v17392_v60 }
 0x683   : > { %15358 = vmatpush3.bf16.msra.mxu1 %v17392_v60  ;;  %v17422_v60 = vld [vmem:[#allocation15 + $0x58] sm:$0xff]  }
 0x684   : > { %15359 = vmatprep.subr.bf16.mxu1 %v17393_v61 }
 0x687   : > { %15360 = vmatpush3.bf16.msra.mxu1 %v17393_v61  ;;  %v17423_v61 = vld [vmem:[#allocation15 + $0x60] sm:$0xff]  }
 0x688   : > { %15361 = vmatprep.subr.bf16.mxu1 %v17394_v62 }
 0x68b   : > { %15362 = vmatpush3.bf16.msra.mxu1 %v17394_v62  ;;  %v17424_v62 = vld [vmem:[#allocation15 + $0x68] sm:$0xff]  }
 0x68c   : > { %15367 = vmatprep.subr.bf16.mxu1 %v17395_v63 }
 0x68e   : > { %15364 = vmatmul.mubr.bf16.vlgmr.msra.gmra.mrb[12].mxu1 %v3436_v2  ;;  %v4840_v2 = vld [vmem:[#allocation2 + $0x34] ss:$2 sm:$0xff] }
 0x68f   : > { %15368 = vmatpush3.bf16.msra.mxu1 %v17395_v63  ;;  %15383 = vmatprep.mubr.bf16.mxu1 %v3563_v40  ;;  %v17425_v63 = vld [vmem:[#allocation15 + $0x70] sm:$0xff]   ;;  %v4844_v40 = vmax.f32 %v4836_v0, %v4840_v2  ;;  %v17447_v0 = vld [vmem:[#allocation12 + $0x260] sm:$0xff]  }
 0x690   : > { %15369 = vmatprep.subr.bf16.mxu1 %v17396_v3  ;;  %v17449_v2 = vld [vmem:[#allocation12 + $0x270] sm:$0xff]  }
 0x693   : > { %15370 = vmatpush3.bf16.msra.mxu1 %v17396_v3  ;;  %v4843_v3 = vmax.f32 %v4835_v58, %v4839_v1  ;;  %v17446_v58 = vld [vmem:[#allocation12 + $0x258] sm:$0xff]   ;;  %v17448_v1 = vld [vmem:[#allocation12 + $0x268] sm:$0xff]  }
 0x694   : > { %15371 = vmatprep.subr.bf16.mxu1 %v17397_v4 }
 0x695   : > { %v4846_v55 = vpack.c.bf16 %v4844_v40, %v4843_v3  ;;  %v17450_v3 = vld [vmem:[#allocation12 + $0x278] sm:$0xff]   ;;  %v17451_v40 = vld [vmem:[#allocation12 + $0x280] sm:$0xff]  }
 0x697   : > { %15372 = vmatpush3.bf16.msra.mxu1 %v17397_v4  ;;  %v17432_v4 = vld [vmem:[#allocation12 + $0x228] sm:$0xff]  }
 0x698   : > { %15373 = vmatprep.subr.bf16.mxu1 %v17398_v5  ;;  %15437 = vmatprep.subr.bf16.mxu0 %v17432_v4 }
 0x699   : > { %15438 = vmatpush3.bf16.msra.mxu0 %v17432_v4  ;;  %v17452_v4 = vld [vmem:[#allocation12 + $0x288] sm:$0xff]  }
 0x69a   : > { %15439 = vmatprep.subr.bf16.mxu0 %v17433_v42 }
 0x69b   : > { %15374 = vmatpush3.bf16.msra.mxu1 %v17398_v5  ;;  %v17434_v5 = vld [vmem:[#allocation12 + $0x238] sm:$0xff]  }
 0x69c   : > { %15375 = vmatprep.subr.bf16.mxu1 %v17399_v6 }
 0x69d   : > { %15440 = vmatpush3.bf16.msra.mxu0 %v17433_v42  ;;  %v17453_v42 = vld [vmem:[#allocation12 + $0x290] sm:$0xff]  }
 0x69e   : > { %15441 = vmatprep.subr.bf16.mxu0 %v17434_v5 }
 0x69f   : > { %15376 = vmatpush3.bf16.msra.mxu1 %v17399_v6  ;;  %v13263_v6 = vld [vmem:[#allocation10 + $0x1] ss:$0 sm:$0xff] }
 0x6a0   : > { %15377 = vmatprep.subr.bf16.mxu1 %v17400_v48 }
 0x6a1   : > { %15442 = vmatpush3.bf16.msra.mxu0 %v17434_v5  ;;  %v17454_v5 = vld [vmem:[#allocation12 + $0x298] sm:$0xff]  }
 0x6a2   : > { %15447 = vmatprep.subr.bf16.mxu0 %v17435_v44 }
 0x6a3   : > { %15378 = vmatpush3.bf16.msra.mxu1 %v17400_v48 }
 0x6a4   : > { %15379 = vmatprep.subr.bf16.mxu1 %v17401_v7 }
 0x6a7   : > { %15380 = vmatpush3.bf16.msra.mxu1 %v17401_v7 }
 0x6a8   : > { %15381 = vmatprep.subr.bf16.mxu1 %v17402_v52 }
 0x6ab   : > { %15382 = vmatpush3.bf16.msra.mxu1 %v17402_v52 }
 0x6ac   : > { %15387 = vmatprep.subr.bf16.mxu1 %v17403_v53 }
 0x6ae   : > { %15384 = vmatmul.mubr.bf16.vlgmr.msra.gmra.mrb[12].mxu1 %v3564_v16 }
 0x6af   : > { %15388 = vmatpush3.bf16.msra.mxu1 %v17403_v53  ;;  %15403 = vmatprep.mubr.bf16.mxu1 %v3691_v19 }
 0x6b0   : > { %15389 = vmatprep.subr.bf16.mxu1 %v17404_v17 }
 0x6b3   : > { %15390 = vmatpush3.bf16.msra.mxu1 %v17404_v17 }
 0x6b4   : > { %15391 = vmatprep.subr.bf16.mxu1 %v17405_v9 }
 0x6b7   : > { %15392 = vmatpush3.bf16.msra.mxu1 %v17405_v9 }
 0x6b8   : > { %15393 = vmatprep.subr.bf16.mxu1 %v17406_v10 }
 0x6bb   : > { %15394 = vmatpush3.bf16.msra.mxu1 %v17406_v10 }
 0x6bc   : > { %15395 = vmatprep.subr.bf16.mxu1 %v17407_v20 }
 0x6bf   : > { %15396 = vmatpush3.bf16.msra.mxu1 %v17407_v20 }
 0x6c0   : > { %15397 = vmatprep.subr.bf16.mxu1 %v17408_v21 }
 0x6c3   : > { %15398 = vmatpush3.bf16.msra.mxu1 %v17408_v21 }
 0x6c4   : > { %15399 = vmatprep.subr.bf16.mxu1 %v17409_v22 }
 0x6c7   : > { %15400 = vmatpush3.bf16.msra.mxu1 %v17409_v22 }
 0x6c8   : > { %15401 = vmatprep.subr.bf16.mxu1 %v17410_v23 }
 0x6cb   : > { %15402 = vmatpush3.bf16.msra.mxu1 %v17410_v23 }
 0x6cc   : > { %15407 = vmatprep.subr.bf16.mxu1 %v17411_v24 }
 0x6ce   : > { %15404 = vmatmul.mubr.bf16.vlgmr.msra.gmra.mrb[12].mxu1 %v3692_v29 }
 0x6cf   : > { %15408 = vmatpush3.bf16.msra.mxu1 %v17411_v24  ;;  %15423 = vmatprep.mubr.bf16.mxu1 %v3819_v31 }
 0x6d0   : > { %15409 = vmatprep.subr.bf16.mxu1 %v17412_v30 }
 0x6d3   : > { %15410 = vmatpush3.bf16.msra.mxu1 %v17412_v30  ;;  %v17436_v30 = vld [vmem:[#allocation12 + $0x1c8] sm:$0xff]  }
 0x6d4   : > { %15411 = vmatprep.subr.bf16.mxu1 %v17413_v32 }
 0x6d7   : > { %15412 = vmatpush3.bf16.msra.mxu1 %v17413_v32 }
 0x6d8   : > { %15413 = vmatprep.subr.bf16.mxu1 %v17414_v33 }
 0x6db   : > { %15414 = vmatpush3.bf16.msra.mxu1 %v17414_v33 }
 0x6dc   : > { %15415 = vmatprep.subr.bf16.mxu1 %v17415_v34 }
 0x6df   : > { %15416 = vmatpush3.bf16.msra.mxu1 %v17415_v34 }
 0x6e0   : > { %15417 = vmatprep.subr.bf16.mxu1 %v17416_v11 }
 0x6e3   : > { %15418 = vmatpush3.bf16.msra.mxu1 %v17416_v11 }
 0x6e4   : > { %15419 = vmatprep.subr.bf16.mxu1 %v17417_v12 }
 0x6e7   : > { %15420 = vmatpush3.bf16.msra.mxu1 %v17417_v12 }
 0x6e8   : > { %15421 = vmatprep.subr.bf16.mxu1 %v17418_v36 }
 0x6eb   : > { %15422 = vmatpush3.bf16.msra.mxu1 %v17418_v36 }
 0x6ec   : > { %15567 = vmatprep.subr.bf16.mxu1 %v17419_v47 }
 0x6ee   : > { %15424 = vmatmul.mubr.bf16.vlgmr.msra.gmra.mrb[12].mxu1 %v3820_v54  ;;  %v17441_v54 = vld [vmem:[#allocation12 + $0x1f0] sm:$0xff]  }
 0x6ef   : > { %15568 = vmatpush3.bf16.msra.mxu1 %v17419_v47  ;;  %15583 = vmatprep.mubr.bf16.mxu1 %v4845_v37  ;;  %v17443_v37 = vld [vmem:[#allocation12 + $0x240] sm:$0xff]  }
 0x6f0   : > { %15569 = vmatprep.subr.bf16.mxu1 %v17420_v57 }
 0x6f3   : > { %15570 = vmatpush3.bf16.msra.mxu1 %v17420_v57  ;;  %v17442_v57 = vld [vmem:[#allocation12 + $0x1f8] sm:$0xff]  }
 0x6f4   : > { %15571 = vmatprep.subr.bf16.mxu1 %v17421_v59 }
 0x6f7   : > { %15572 = vmatpush3.bf16.msra.mxu1 %v17421_v59 }
 0x6f8   : > { %15573 = vmatprep.subr.bf16.mxu1 %v17422_v60 }
 0x6fb   : > { %15574 = vmatpush3.bf16.msra.mxu1 %v17422_v60 }
 0x6fc   : > { %15575 = vmatprep.subr.bf16.mxu1 %v17423_v61 }
 0x6ff   : > { %15576 = vmatpush3.bf16.msra.mxu1 %v17423_v61 }
 0x700   : > { %15577 = vmatprep.subr.bf16.mxu1 %v17424_v62 }
 0x703   : > { %15578 = vmatpush3.bf16.msra.mxu1 %v17424_v62  ;;  %v17444_v62 = vld [vmem:[#allocation12 + $0x248] sm:$0xff]  }
 0x704   : > { %15579 = vmatprep.subr.bf16.mxu1 %v17425_v63 }
 0x707   : > { %15580 = vmatpush3.bf16.msra.mxu1 %v17425_v63 }
 0x708   : > { %15581 = vmatprep.subr.bf16.mxu1 %v17426_v35 }
 0x70b   : > { %15582 = vmatpush3.bf16.msra.mxu1 %v17426_v35  ;;  %v17445_v35 = vld [vmem:[#allocation12 + $0x250] sm:$0xff]  }
 0x70c   : > { %15607 = vmatprep.subr.bf16.mxu1 %v18331_v18 }
 0x70e   : > { %15584 = vmatmul.mubr.bf16.vlgmr.msra.gmra.mrb[16].mxu1 %v4846_v55 }
 0x70f   : > { %15623 = vmatprep.mubr.msk.bf16.mxu1 %vm18332_vm0, %v18331_v18 }
 0x7c1   : > { %v15425_v48 = vpop.f32.mrb[12].mxu1 }
 0x7c2   : > { %v3949_v7 = vadd.f32 %v15425_v48, %v13263_v6  ;;  %v3920_v52 = vpop.f32.mrb[13].mxu1  ;;  %v17457_v48 = vld [vmem:[#allocation12 + $0x2b0] sm:$0xff]  }
 0x7c3   : > { %v3947_v53 = vadd.f32 %v13263_v6, %v3920_v52  ;;  %v15426_v56 = vpop.f32.mrb[14].mxu1  ;;  %v17459_v52 = vld [vmem:[#allocation12 + $0x2c0] sm:$0xff]  }
 0x7c4   : > { %v3953_v8 = vmax.f32 %v3949_v7, 0.0  ;;  %v3950_v14 = vadd.f32 %v15426_v56, %v13263_v6  ;;  %v3923_v15 = vpop.f32.mrb[15].mxu1  ;;  %v17458_v7 = vld [vmem:[#allocation12 + $0x2b8] sm:$0xff]   ;;  %v17460_v56 = vld [vmem:[#allocation12 + $0x2c8] sm:$0xff]  }
 0x7c5   : > { %v3951_v16 = vmax.f32 %v3947_v53, 0.0  ;;  %v3948_v17 = vadd.f32 %v13263_v6, %v3923_v15  ;;  %v17456_v6 = vld [vmem:[#allocation12 + $0x2a8] sm:$0xff]   ;;  %v17462_v15 = vld [vmem:[#allocation12 + $0x2d8] sm:$0xff]  }
 0x7c6   : > { %3959 = vst [vmem:[#allocation7 + $0x13] sm:$0xff] %v3953_v8  ;;  %v3954_v19 = vmax.f32 %v3950_v14, 0.0  ;;  %v17461_v14 = vld [vmem:[#allocation12 + $0x2d0] sm:$0xff]  }
 0x7c7   : > { %3957 = vst [vmem:[#allocation7 + $0x3] sm:$0xff] %v3951_v16  ;;  %v3952_v9 = vmax.f32 %v3948_v17, 0.0  ;;  %v17464_v17 = vld [vmem:[#allocation12 + $0x2e8] sm:$0xff]  }
 0x7c8   : > { %3960 = vst [vmem:[#allocation7 + $0x1b] sm:$0xff] %v3954_v19  ;;  %v18817_v10 = vpack.c.bf16 %v3954_v19, %v3953_v8  ;;  %v17465_v19 = vld [vmem:[#allocation12 + $0x2f0] sm:$0xff]  }
 0x7c9   : > { %3958 = vst [vmem:[#allocation7 + $0xb] sm:$0xff] %v3952_v9  ;;  %v18819_v20 = vpack.c.bf16 %v3952_v9, %v3951_v16  ;;  %v17463_v16 = vld [vmem:[#allocation12 + $0x2e0] sm:$0xff]   ;;  %v17466_v9 = vld [vmem:[#allocation12 + $0x2f8] sm:$0xff]  }
 0x7ce   : > { %v3984_v21 = vld [vmem:[#allocation7 + $0x1] sm:$0xff] }
 0x7cf   : > { %v3961_v22 = vld [vmem:[#allocation7] sm:$0xff]  ;;  %v18826_v11 = vld [vmem:[#allocation7 + $0x14] sm:$0xff] }
 0x7d0   : > { %v4201_v23 = vld [vmem:[#allocation7 + $0x2] sm:$0xff]  ;;  %v3987_v24 = vld [vmem:[#allocation7 + $0x19] sm:$0xff]  ;;  %v3986_v26 = vld [vmem:[#allocation7 + $0x11] sm:$0xff] }
 0x7d1   : > { %6019 = vst [vmem:[#allocation7] sm:$0x7] %v18331_v18  ;;  %v3985_v25 = vld [vmem:[#allocation7 + $0x9] sm:$0xff]  ;;  %v3989_v29 = vpack.c.bf16 %v3987_v24, %v3986_v26  ;;  %v18822_v33 = vld [vmem:[#allocation7 + $0x12] sm:$0xff]  ;;  %v4204_v55 = vld [vmem:[#allocation7 + $0x1a] sm:$0xff] }
 0x7d2   : > { %v3962_v27 = vld [vmem:[#allocation7 + $0x8] sm:$0xff]  ;;  %v3988_v28 = vpack.c.bf16 %v3985_v25, %v3984_v21  ;;  %v3963_v32 = vld [vmem:[#allocation7 + $0x10] sm:$0xff]  ;;  %v3964_v59 = vld [vmem:[#allocation7 + $0x18] sm:$0xff]  ;;  %v4206_v41 = vpack.c.bf16 %v4204_v55, %v18822_v33 }
 0x7d3   : > { %v3965_v31 = vpack.c.bf16 %v3962_v27, %v3961_v22  ;;  %v18824_v34 = vld [vmem:[#allocation7 + $0xc] sm:$0xff]  ;;  %v18830_v36 = vld [vmem:[#allocation7 + $0x15] sm:$0xff]  ;;  %v3966_v61 = vpack.c.bf16 %v3964_v59, %v3963_v32  ;;  %v4449_v53 = vld [vmem:[#allocation7 + $0x4] sm:$0xff] }
 0x7d4   : > { %15443 = vmatprep.mubr.bf16.mxu0 %v3988_v28  ;;  %v18828_v12 = vld [vmem:[#allocation7 + $0xd] sm:$0xff]  ;;  %v4453_v8 = vpack.c.bf16 %v18824_v34, %v4449_v53  ;;  %v4573_v21 = vld [vmem:[#allocation7 + $0x5] sm:$0xff]  ;;  %v17472_v28 = vld [vmem:[#allocation12 + $0x328] sm:$0xff]  }
 0x7d5   : > { %15444 = vmatmul.mubr.bf16.vlgmr.msra.gmra.mrb[20].mxu0 %v3989_v29  ;;  %v18832_v39 = vld [vmem:[#allocation7 + $0xe] sm:$0xff]  ;;  %v4577_v24 = vpack.c.bf16 %v18828_v12, %v4573_v21  ;;  %v17469_v25 = vld [vmem:[#allocation12 + $0x310] sm:$0xff]   ;;  %v17470_v26 = vld [vmem:[#allocation12 + $0x318] sm:$0xff]  }
 0x7d6   : > { %15448 = vmatpush3.bf16.msra.mxu0 %v17435_v44  ;;  %15463 = vmatprep.mubr.bf16.mxu0 %v3965_v31  ;;  %6020 = vst [vmem:[#allocation7 + $0x13] sm:$0x7] %v18331_v18  ;;  %v4202_v60 = vld [vmem:[#allocation7 + $0xa] sm:$0xff]  ;;  %v17473_v29 = vld [vmem:[#allocation12 + $0x330] sm:$0xff]  }
 0x7d7   : > { %15449 = vmatprep.subr.bf16.mxu0 %v17436_v30  ;;  %v4205_v63 = vpack.c.bf16 %v4202_v60, %v4201_v23  ;;  %v17455_v44 = vld [vmem:[#allocation12 + $0x2a0] sm:$0xff]   ;;  %v17468_v23 = vld [vmem:[#allocation12 + $0x308] sm:$0xff]   ;;  %v4697_v33 = vld [vmem:[#allocation7 + $0x6] sm:$0xff] }
 0x7d8   : > { %v17471_v27 = vld [vmem:[#allocation12 + $0x320] sm:$0xff]   ;;  %v4576_v32 = vld [vmem:[#allocation7 + $0x1d] sm:$0xff]  ;;  %v4701_v12 = vpack.c.bf16 %v18832_v39, %v4697_v33  ;;  %v17482_v39 = vld [vmem:[#allocation12 + $0x378] sm:$0xff]  }
 0x7d9   : > { %v17475_v31 = vld [vmem:[#allocation12 + $0x340] sm:$0xff]   ;;  %v4578_v34 = vpack.c.bf16 %v4576_v32, %v18830_v36  ;;  %v17481_v36 = vld [vmem:[#allocation12 + $0x370] sm:$0xff]  }
 0x7da   : > { %15450 = vmatpush3.bf16.msra.mxu0 %v17436_v30  ;;  %v17474_v30 = vld [vmem:[#allocation12 + $0x338] sm:$0xff]   ;;  %v17495_v55 = vld [vmem:[#allocation19 + $0x60] sm:$0xff]   ;;  %v17501_v32 = vld [vmem:[#allocation8 + $0x3c8] sm:$0xff]  }
 0x7db   : > { %15451 = vmatprep.subr.bf16.mxu0 %v17437_v43  ;;  %v17484_v60 = vld [vmem:[#allocation18 + $0x48] sm:$0xff]   ;;  %v17502_v33 = vld [vmem:[#allocation8 + $0x388] sm:$0xff]  }
 0x7de   : > { %15452 = vmatpush3.bf16.msra.mxu0 %v17437_v43  ;;  %v17477_v43 = vld [vmem:[#allocation12 + $0x350] sm:$0xff]  }
 0x7df   : > { %15453 = vmatprep.subr.bf16.mxu0 %v17438_v45 }
 0x7e1   : > { %v18835_v47 = vpop.f32.mrb[16].mxu1 }
 0x7e2   : > { %15454 = vmatpush3.bf16.msra.mxu0 %v17438_v45  ;;  %v18837_v49 = vpop.f32.mrb[17].mxu1  ;;  %v17478_v45 = vld [vmem:[#allocation12 + $0x358] sm:$0xff]  }
 0x7e3   : > { %15455 = vmatprep.subr.bf16.mxu0 %v17439_v46  ;;  %v18839_v50 = vpop.f32.mrb[18].mxu1 }
 0x7e4   : > { %v18841_v51 = vpop.f32.mrb[19].mxu1 }
 0x7e6   : > { %15456 = vmatpush3.bf16.msra.mxu0 %v17439_v46  ;;  %v17479_v46 = vld [vmem:[#allocation12 + $0x360] sm:$0xff]  }
 0x7e7   : > { %15457 = vmatprep.subr.bf16.mxu0 %v17440_v13 }
 0x7ea   : > { %15458 = vmatpush3.bf16.msra.mxu0 %v17440_v13  ;;  %v17480_v13 = vld [vmem:[#allocation12 + $0x368] sm:$0xff]  }
 0x7eb   : > { %15459 = vmatprep.subr.bf16.mxu0 %v17441_v54 }
 0x7ee   : > { %15460 = vmatpush3.bf16.msra.mxu0 %v17441_v54  ;;  %v4699_v54 = vld [vmem:[#allocation7 + $0x16] sm:$0xff] }
 0x7ef   : > { %15461 = vmatprep.subr.bf16.mxu0 %v17442_v57 }
 0x7f2   : > { %15462 = vmatpush3.bf16.msra.mxu0 %v17442_v57  ;;  %v4700_v57 = vld [vmem:[#allocation7 + $0x1e] sm:$0xff] }
 0x7f3   : > { %15467 = vmatprep.subr.bf16.mxu0 %v17443_v37  ;;  %v4702_v59 = vpack.c.bf16 %v4700_v57, %v4699_v54  ;;  %v17512_v54 = vld [vmem:[#allocation8 + $0x3b0] sm:$0xff]   ;;  %v17513_v57 = vld [vmem:[#allocation8 + $0x3f8] sm:$0xff]  }
 0x7f5   : > { %15464 = vmatmul.mubr.bf16.vlgmr.msra.gmra.mrb[20].mxu0 %v3966_v61  ;;  %v17485_v61 = vld [vmem:[#allocation18 + $0x50] sm:$0xff]  }
 0x7f6   : > { %15468 = vmatpush3.bf16.msra.mxu0 %v17443_v37  ;;  %15483 = vmatprep.mubr.bf16.mxu0 %v4205_v63  ;;  %v17483_v37 = vld [vmem:[#allocation18 + $0x40] sm:$0xff]  }
 0x7f7   : > { %15469 = vmatprep.subr.bf16.mxu0 %v17444_v62  ;;  %v17487_v63 = vld [vmem:[#allocation18 + $0x60] sm:$0xff]  }
 0x7fa   : > { %15470 = vmatpush3.bf16.msra.mxu0 %v17444_v62  ;;  %v17486_v62 = vld [vmem:[#allocation18 + $0x58] sm:$0xff]  }
 0x7fb   : > { %15471 = vmatprep.subr.bf16.mxu0 %v17445_v35 }
 0x7fe   : > { %15472 = vmatpush3.bf16.msra.mxu0 %v17445_v35  ;;  %v17488_v35 = vld [vmem:[#allocation18 + $0x68] sm:$0xff]  }
 0x7ff   : > { %15473 = vmatprep.subr.bf16.mxu0 %v17446_v58 }
 0x802   : > { %15474 = vmatpush3.bf16.msra.mxu0 %v17446_v58  ;;  %v17489_v58 = vld [vmem:[#allocation18 + $0x70] sm:$0xff]  }
 0x803   : > { %15475 = vmatprep.subr.bf16.mxu0 %v17447_v0 }
 0x806   : > { %15476 = vmatpush3.bf16.msra.mxu0 %v17447_v0  ;;  %v17491_v0 = vld [vmem:[#allocation19 + $0x40] sm:$0xff]  }
 0x807   : > { %15477 = vmatprep.subr.bf16.mxu0 %v17448_v1  ;;  %15608 = vmatpush3.bf16.msra.mxu1 %v17491_v0  ;;  %v13321_v0 = vld [vmem:[#allocation16 + $0x1] ss:$0 sm:$0xff] }
 0x808   : > { %15609 = vmatprep.subr.bf16.mxu1 %v18331_v18 }
 0x80a   : > { %15478 = vmatpush3.bf16.msra.mxu0 %v17448_v1  ;;  %v17492_v1 = vld [vmem:[#allocation19 + $0x48] sm:$0xff]  }
 0x80b   : > { %15479 = vmatprep.subr.bf16.mxu0 %v17449_v2  ;;  %15610 = vmatpush3.bf16.msra.mxu1 %v17492_v1 }
 0x80c   : > { %15611 = vmatprep.subr.bf16.mxu1 %v18331_v18 }
 0x80e   : > { %15480 = vmatpush3.bf16.msra.mxu0 %v17449_v2  ;;  %v17490_v2 = vld [vmem:[#allocation18 + $0x78] sm:$0xff]  }
 0x80f   : > { %15481 = vmatprep.subr.bf16.mxu0 %v17450_v3 }
 0x812   : > { %15482 = vmatpush3.bf16.msra.mxu0 %v17450_v3  ;;  %v17493_v3 = vld [vmem:[#allocation19 + $0x50] sm:$0xff]  }
 0x813   : > { %15487 = vmatprep.subr.bf16.mxu0 %v17451_v40  ;;  %15612 = vmatpush3.bf16.msra.mxu1 %v17493_v3  ;;  %v4963_v3 = vadd.f32 %v18835_v47, %v13321_v0 }
 0x814   : > { %15613 = vmatprep.subr.bf16.mxu1 %v18331_v18 }
 0x815   : > { %15484 = vmatmul.mubr.bf16.vlgmr.msra.gmra.mrb[20].mxu0 %v4206_v41  ;;  %v17496_v41 = vld [vmem:[#allocation19 + $0x68] sm:$0xff]  }
 0x816   : > { %15488 = vmatpush3.bf16.msra.mxu0 %v17451_v40  ;;  %15503 = vmatprep.mubr.bf16.mxu0 %v18819_v20  ;;  %v4452_v20 = vld [vmem:[#allocation7 + $0x1c] sm:$0xff]  ;;  %v17494_v40 = vld [vmem:[#allocation19 + $0x58] sm:$0xff]  }
 0x817   : > { %15489 = vmatprep.subr.bf16.mxu0 %v17452_v4  ;;  %v4454_v22 = vpack.c.bf16 %v4452_v20, %v18826_v11  ;;  %v17476_v11 = vld [vmem:[#allocation12 + $0x348] sm:$0xff]   ;;  %15614 = vmatpush3.bf16.msra.mxu1 %v17494_v40  ;;  %v4955_v40 = vadd.f32 %v13321_v0, %v18837_v49 }
 0x818   : > { %15615 = vmatprep.subr.bf16.mxu1 %v18331_v18 }
 0x81a   : > { %15490 = vmatpush3.bf16.msra.mxu0 %v17452_v4  ;;  %v17497_v4 = vld [vmem:[#allocation19 + $0x70] sm:$0xff]  }
 0x81b   : > { %15491 = vmatprep.subr.bf16.mxu0 %v17453_v42  ;;  %15616 = vmatpush3.bf16.msra.mxu1 %v17495_v55  ;;  %v4966_v55 = vadd.f32 %v18839_v50, %v13321_v0  ;;  %v17515_v50 = vld [vmem:[#allocation8 + $0x400] sm:$0xff]  }
 0x81c   : > { %15617 = vmatprep.subr.bf16.mxu1 %v18331_v18 }
 0x81e   : > { %15492 = vmatpush3.bf16.msra.mxu0 %v17453_v42 }
 0x81f   : > { %15493 = vmatprep.subr.bf16.mxu0 %v17454_v5  ;;  %15618 = vmatpush3.bf16.msra.mxu1 %v17496_v41  ;;  %v4958_v41 = vadd.f32 %v13321_v0, %v18841_v51  ;;  %v17546_v0 = vld [vmem:[#allocation8 + $0x4f8] sm:$0xff]  }
 0x820   : > { %15619 = vmatprep.subr.bf16.mxu1 %v18331_v18 }
 0x822   : > { %15494 = vmatpush3.bf16.msra.mxu0 %v17454_v5  ;;  %v13320_v5 = vld [vmem:[#allocation13 + $0x1] ss:$0 sm:$0xff] }
 0x823   : > { %15495 = vmatprep.subr.bf16.mxu0 %v17455_v44  ;;  %15620 = vmatpush3.bf16.msra.mxu1 %v17497_v4 }
 0x824   : > { %15621 = vmatprep.subr.bf16.mxu1 %v18331_v18 }
 0x826   : > { %15496 = vmatpush3.bf16.msra.mxu0 %v17455_v44 }
 0x827   : > { %15497 = vmatprep.subr.bf16.mxu0 %v17456_v6 }
 0x82a   : > { %15498 = vmatpush3.bf16.msra.mxu0 %v17456_v6 }
 0x82b   : > { %15499 = vmatprep.subr.bf16.mxu0 %v17457_v48 }
 0x82e   : > { %15500 = vmatpush3.bf16.msra.mxu0 %v17457_v48 }
 0x82f   : > { %15501 = vmatprep.subr.bf16.mxu0 %v17458_v7 }
 0x832   : > { %15502 = vmatpush3.bf16.msra.mxu0 %v17458_v7 }
 0x833   : > { %15507 = vmatprep.subr.bf16.mxu0 %v17459_v52 }
 0x835   : > { %15504 = vmatmul.mubr.bf16.vlgmr.msra.gmra.mrb[20].mxu0 %v18817_v10  ;;  %v17467_v10 = vld [vmem:[#allocation12 + $0x300] sm:$0xff]  }
 0x836   : > { %15508 = vmatpush3.bf16.msra.mxu0 %v17459_v52  ;;  %15523 = vmatprep.mubr.bf16.mxu0 %v4453_v8 }
 0x837   : > { %15509 = vmatprep.subr.bf16.mxu0 %v17460_v56 }
 0x83a   : > { %15510 = vmatpush3.bf16.msra.mxu0 %v17460_v56 }
 0x83b   : > { %15511 = vmatprep.subr.bf16.mxu0 %v17461_v14 }
 0x83e   : > { %15512 = vmatpush3.bf16.msra.mxu0 %v17461_v14 }
 0x83f   : > { %15513 = vmatprep.subr.bf16.mxu0 %v17462_v15 }
 0x842   : > { %15514 = vmatpush3.bf16.msra.mxu0 %v17462_v15 }
 0x843   : > { %15515 = vmatprep.subr.bf16.mxu0 %v17463_v16 }
 0x846   : > { %15516 = vmatpush3.bf16.msra.mxu0 %v17463_v16 }
 0x847   : > { %15517 = vmatprep.subr.bf16.mxu0 %v17464_v17 }
 0x84a   : > { %15518 = vmatpush3.bf16.msra.mxu0 %v17464_v17 }
 0x84b   : > { %15519 = vmatprep.subr.bf16.mxu0 %v17465_v19 }
 0x84e   : > { %15520 = vmatpush3.bf16.msra.mxu0 %v17465_v19 }
 0x84f   : > { %15521 = vmatprep.subr.bf16.mxu0 %v17466_v9 }
 0x852   : > { %15522 = vmatpush3.bf16.msra.mxu0 %v17466_v9 }
 0x853   : > { %15527 = vmatprep.subr.bf16.mxu0 %v17467_v10 }
 0x855   : > { %15524 = vmatmul.mubr.bf16.vlgmr.msra.gmra.mrb[20].mxu0 %v4454_v22 }
 0x856   : > { %15528 = vmatpush3.bf16.msra.mxu0 %v17467_v10  ;;  %15543 = vmatprep.mubr.bf16.mxu0 %v4577_v24 }
 0x857   : > { %15529 = vmatprep.subr.bf16.mxu0 %v17468_v23 }
 0x85a   : > { %15530 = vmatpush3.bf16.msra.mxu0 %v17468_v23  ;;  %v17498_v23 = vld [vmem:[#allocation19 + $0x78] sm:$0xff]  }
 0x85b   : > { %15531 = vmatprep.subr.bf16.mxu0 %v17469_v25  ;;  %15622 = vmatpush3.bf16.msra.mxu1 %v17498_v23  ;;  %v17522_v23 = vld [vmem:[#allocation8 + $0x458] sm:$0xff]  }
 0x85c   : > { %15647 = vmatprep.subr.bf16.mxu1 %v18331_v18 }
 0x85e   : > { %15532 = vmatpush3.bf16.msra.mxu0 %v17469_v25 }
 0x85f   : > { %15533 = vmatprep.subr.bf16.mxu0 %v17470_v26 }
 0x862   : > { %15534 = vmatpush3.bf16.msra.mxu0 %v17470_v26 }
 0x863   : > { %15535 = vmatprep.subr.bf16.mxu0 %v17471_v27 }
 0x866   : > { %15536 = vmatpush3.bf16.msra.mxu0 %v17471_v27 }
 0x867   : > { %15537 = vmatprep.subr.bf16.mxu0 %v17472_v28 }
 0x86a   : > { %15538 = vmatpush3.bf16.msra.mxu0 %v17472_v28 }
 0x86b   : > { %15539 = vmatprep.subr.bf16.mxu0 %v17473_v29 }
 0x86e   : > { %15540 = vmatpush3.bf16.msra.mxu0 %v17473_v29 }
 0x86f   : > { %15541 = vmatprep.subr.bf16.mxu0 %v17474_v30 }
 0x872   : > { %15542 = vmatpush3.bf16.msra.mxu0 %v17474_v30  ;;  %v17499_v30 = vld [vmem:[#allocation8 + $0x3c0] sm:$0xff]  }
 0x873   : > { %15547 = vmatprep.subr.bf16.mxu0 %v17475_v31 }
 0x875   : > { %15544 = vmatmul.mubr.bf16.vlgmr.msra.gmra.mrb[20].mxu0 %v4578_v34  ;;  %v17503_v34 = vld [vmem:[#allocation8 + $0x3d0] sm:$0xff]  }
 0x876   : > { %15548 = vmatpush3.bf16.msra.mxu0 %v17475_v31  ;;  %15563 = vmatprep.mubr.bf16.mxu0 %v4701_v12  ;;  %v17500_v31 = vld [vmem:[#allocation8 + $0x380] sm:$0xff]   ;;  %v17505_v12 = vld [vmem:[#allocation8 + $0x3d8] sm:$0xff]  }
 0x877   : > { %15549 = vmatprep.subr.bf16.mxu0 %v17476_v11 }
 0x87a   : > { %15550 = vmatpush3.bf16.msra.mxu0 %v17476_v11  ;;  %v17504_v11 = vld [vmem:[#allocation8 + $0x390] sm:$0xff]  }
 0x87b   : > { %15551 = vmatprep.subr.bf16.mxu0 %v17477_v43 }
 0x87e   : > { %15552 = vmatpush3.bf16.msra.mxu0 %v17477_v43  ;;  %v17506_v43 = vld [vmem:[#allocation8 + $0x398] sm:$0xff]  }
 0x87f   : > { %15553 = vmatprep.subr.bf16.mxu0 %v17478_v45 }
 0x882   : > { %15554 = vmatpush3.bf16.msra.mxu0 %v17478_v45  ;;  %v17507_v45 = vld [vmem:[#allocation8 + $0x3e0] sm:$0xff]  }
 0x883   : > { %15555 = vmatprep.subr.bf16.mxu0 %v17479_v46 }
 0x886   : > { %15556 = vmatpush3.bf16.msra.mxu0 %v17479_v46  ;;  %v17508_v46 = vld [vmem:[#allocation8 + $0x3a0] sm:$0xff]  }
 0x887   : > { %15557 = vmatprep.subr.bf16.mxu0 %v17480_v13 }
 0x88a   : > { %15558 = vmatpush3.bf16.msra.mxu0 %v17480_v13  ;;  %v17509_v13 = vld [vmem:[#allocation8 + $0x3e8] sm:$0xff]  }
 0x88b   : > { %15559 = vmatprep.subr.bf16.mxu0 %v17481_v36 }
 0x88e   : > { %15560 = vmatpush3.bf16.msra.mxu0 %v17481_v36  ;;  %v17510_v36 = vld [vmem:[#allocation8 + $0x3a8] sm:$0xff]  }
 0x88f   : > { %15561 = vmatprep.subr.bf16.mxu0 %v17482_v39 }
 0x892   : > { %15562 = vmatpush3.bf16.msra.mxu0 %v17482_v39  ;;  %v17511_v39 = vld [vmem:[#allocation8 + $0x3f0] sm:$0xff]  }
 0x893   : > { %15587 = vmatprep.subr.bf16.mxu0 %v18331_v18 }
 0x895   : > { %15564 = vmatmul.mubr.bf16.vlgmr.msra.gmra.mrb[20].mxu0 %v4702_v59 }
 0x896   : > { %15588 = vmatpush3.bf16.msra.mxu0 %v17483_v37  ;;  %15603 = vmatprep.mubr.msk.bf16.mxu0 %vm18332_vm0, %v18331_v18  ;;  %v17514_v37 = vld [vmem:[#allocation8 + $0x3b8] sm:$0xff]  }
 0x897   : > { %15589 = vmatprep.subr.bf16.mxu0 %v18331_v18 }
 0x89a   : > { %15590 = vmatpush3.bf16.msra.mxu0 %v17484_v60 }
 0x89b   : > { %15591 = vmatprep.subr.bf16.mxu0 %v18331_v18 }
 0x89e   : > { %15592 = vmatpush3.bf16.msra.mxu0 %v17485_v61 }
 0x89f   : > { %15593 = vmatprep.subr.bf16.mxu0 %v18331_v18 }
 0x8a2   : > { %15594 = vmatpush3.bf16.msra.mxu0 %v17486_v62 }
 0x8a3   : > { %15595 = vmatprep.subr.bf16.mxu0 %v18331_v18 }
 0x8a6   : > { %15596 = vmatpush3.bf16.msra.mxu0 %v17487_v63 }
 0x8a7   : > { %15597 = vmatprep.subr.bf16.mxu0 %v18331_v18 }
 0x8aa   : > { %15598 = vmatpush3.bf16.msra.mxu0 %v17488_v35 }
 0x8ab   : > { %15599 = vmatprep.subr.bf16.mxu0 %v18331_v18 }
 0x8ae   : > { %15600 = vmatpush3.bf16.msra.mxu0 %v17489_v58 }
 0x8af   : > { %15601 = vmatprep.subr.bf16.mxu0 %v18331_v18 }
 0x8b2   : > { %15602 = vmatpush3.bf16.msra.mxu0 %v17490_v2 }
 0x8b3   : > { %15627 = vmatprep.subr.bf16.mxu0 %v18331_v18 }
 0x968   : > { %v15565_v42 = vpop.f32.mrb[20].mxu0 }
 0x969   : > { %v4802_v44 = vpop.f32.mrb[21].mxu0  ;;  %v18873_v53 = vadd.f32 %v15565_v42, %v13320_v5 }
 0x96a   : > { %v15566_v6 = vpop.f32.mrb[22].mxu0  ;;  %v18869_v7 = vadd.f32 %v13320_v5, %v4802_v44 }
 0x96b   : > { %v4805_v48 = vpop.f32.mrb[23].mxu0  ;;  %v18877_v8 = vadd.f32 %v15566_v6, %v13320_v5 }
 0x96c   : > { %v18871_v52 = vadd.f32 %v13320_v5, %v4805_v48 }
 0x96e   : > { %v4969_v56 = vadd.f32 %v18871_v52, %v18869_v7 }
 0x970   : > { %v4970_v14 = vadd.f32 %v4969_v56, %v18873_v53 }
 0x972   : > { %v4971_v15 = vadd.f32 %v4970_v14, %v18877_v8 }
 0x974   : > { %v4972_v16 = vrot.slane %v4971_v15, 4 }
 0x976   : > { %v4973_v17 = vadd.f32 %v4972_v16, %v4971_v15 }
 0x978   : > { %v4974_v19 = vrot.slane %v4973_v17, 2 }
 0x97a   : > { %v4975_v9 = vadd.f32 %v4974_v19, %v4973_v17  ;;  %v17516_v19 = vld [vmem:[#allocation8 + $0x440] sm:$0xff]  }
 0x97c   : > { %v4976_v10 = vrot.slane %v4975_v9, 1 }
 0x97e   : > { %v4977_v20 = vadd.f32 %v4976_v10, %v4975_v9  ;;  %v17517_v9 = vld [vmem:[#allocation8 + $0x408] sm:$0xff]  }
 0x97f   : > { %v17518_v10 = vld [vmem:[#allocation8 + $0x448] sm:$0xff]  }
 0x980   : > { %v4979_v21 = vmul.f32 0.03125, %v4977_v20  ;;  %v17519_v20 = vld [vmem:[#allocation8 + $0x410] sm:$0xff]  }
 0x982   : > { %v4980_v22 = vpack.c.bf16 %v4979_v21, %v4979_v21  ;;  %v17520_v21 = vld [vmem:[#allocation8 + $0x450] sm:$0xff]  }
 0x984   : > { %15604 = vmatmul.mubr.bf16.vlgmr.msra.gmra.mrb[24].mxu0 %v4980_v22  ;;  %v17521_v22 = vld [vmem:[#allocation8 + $0x418] sm:$0xff]  }
 0x985   : > { %15643 = vmatprep.mubr.msk.bf16.mxu0 %vm18332_vm0, %v18331_v18  ;;  %15628 = vmatpush3.bf16.msra.mxu0 %v17499_v30  ;;  %v17529_v30 = vld [vmem:[#allocation8 + $0x438] sm:$0xff]  }
 0x986   : > { %15629 = vmatprep.subr.bf16.mxu0 %v18331_v18 }
 0x989   : > { %15630 = vmatpush3.bf16.msra.mxu0 %v17501_v32 }
 0x98a   : > { %15631 = vmatprep.subr.bf16.mxu0 %v18331_v18 }
 0x98d   : > { %15632 = vmatpush3.bf16.msra.mxu0 %v17503_v34 }
 0x98e   : > { %15633 = vmatprep.subr.bf16.mxu0 %v18331_v18 }
 0x991   : > { %15634 = vmatpush3.bf16.msra.mxu0 %v17505_v12  ;;  %v17531_v12 = vld [vmem:[#allocation8 + $0x480] sm:$0xff]  }
 0x992   : > { %15635 = vmatprep.subr.bf16.mxu0 %v18331_v18 }
 0x995   : > { %15636 = vmatpush3.bf16.msra.mxu0 %v17507_v45  ;;  %v17532_v45 = vld [vmem:[#allocation8 + $0x4c0] sm:$0xff]  }
 0x996   : > { %15637 = vmatprep.subr.bf16.mxu0 %v18331_v18 }
 0x999   : > { %15638 = vmatpush3.bf16.msra.mxu0 %v17509_v13  ;;  %v17533_v13 = vld [vmem:[#allocation8 + $0x488] sm:$0xff]  }
 0x99a   : > { %15639 = vmatprep.subr.bf16.mxu0 %v18331_v18 }
 0x99d   : > { %15640 = vmatpush3.bf16.msra.mxu0 %v17511_v39  ;;  %v17535_v39 = vld [vmem:[#allocation8 + $0x490] sm:$0xff]  }
 0x99e   : > { %15641 = vmatprep.subr.bf16.mxu0 %v18331_v18 }
 0x9a1   : > { %15642 = vmatpush3.bf16.msra.mxu0 %v17513_v57  ;;  %v17537_v57 = vld [vmem:[#allocation8 + $0x498] sm:$0xff]  }
 0x9a2   : > { %15667 = vmatprep.subr.bf16.mxu0 %v18331_v18 }
 0xa57   : > { %v5080_v24 = vpop.f32.mrb[24].mxu0 }
 0xa58   : > { %v5086_v25 = vmax.f32 %v5080_v24, 0.0  ;;  %v15605_v26 = vpop.f32.mrb[25].mxu0  ;;  %v17523_v24 = vld [vmem:[#allocation8 + $0x420] sm:$0xff]  }
 0xa59   : > { %v5083_v27 = vpop.f32.mrb[26].mxu0  ;;  %v17525_v26 = vld [vmem:[#allocation8 + $0x428] sm:$0xff]  }
 0xa5a   : > { %v5087_v28 = vpack.c.bf16 %v5086_v25, %v5086_v25  ;;  %v15606_v29 = vpop.f32.mrb[27].mxu0  ;;  %v17524_v25 = vld [vmem:[#allocation8 + $0x460] sm:$0xff]   ;;  %v17526_v27 = vld [vmem:[#allocation8 + $0x468] sm:$0xff]  }
 0xa5b   : > { %v17528_v29 = vld [vmem:[#allocation8 + $0x470] sm:$0xff]  }
 0xa5c   : > { %15624 = vmatmul.mubr.bf16.vlgmr.msra.gmra.mrb[20].mxu1 %v5087_v28  ;;  %v17527_v28 = vld [vmem:[#allocation8 + $0x430] sm:$0xff]  }
 0xa5d   : > { %15663 = vmatprep.mubr.msk.bf16.mxu1 %vm18332_vm0, %v18331_v18  ;;  %15648 = vmatpush3.bf16.msra.mxu1 %v17500_v31  ;;  %v17530_v31 = vld [vmem:[#allocation8 + $0x478] sm:$0xff]  }
 0xa5e   : > { %15649 = vmatprep.subr.bf16.mxu1 %v18331_v18 }
 0xa61   : > { %15650 = vmatpush3.bf16.msra.mxu1 %v17502_v33 }
 0xa62   : > { %15651 = vmatprep.subr.bf16.mxu1 %v18331_v18 }
 0xa65   : > { %15652 = vmatpush3.bf16.msra.mxu1 %v17504_v11 }
 0xa66   : > { %15653 = vmatprep.subr.bf16.mxu1 %v18331_v18 }
 0xa69   : > { %15654 = vmatpush3.bf16.msra.mxu1 %v17506_v43 }
 0xa6a   : > { %15655 = vmatprep.subr.bf16.mxu1 %v18331_v18 }
 0xa6d   : > { %15656 = vmatpush3.bf16.msra.mxu1 %v17508_v46 }
 0xa6e   : > { %15657 = vmatprep.subr.bf16.mxu1 %v18331_v18 }
 0xa71   : > { %15658 = vmatpush3.bf16.msra.mxu1 %v17510_v36  ;;  %v17534_v36 = vld [vmem:[#allocation8 + $0x4c8] sm:$0xff]  }
 0xa72   : > { %15659 = vmatprep.subr.bf16.mxu1 %v18331_v18 }
 0xa75   : > { %15660 = vmatpush3.bf16.msra.mxu1 %v17512_v54  ;;  %v17536_v54 = vld [vmem:[#allocation8 + $0x4d0] sm:$0xff]  }
 0xa76   : > { %15661 = vmatprep.subr.bf16.mxu1 %v18331_v18 }
 0xa79   : > { %15662 = vmatpush3.bf16.msra.mxu1 %v17514_v37  ;;  %v17538_v37 = vld [vmem:[#allocation8 + $0x4d8] sm:$0xff]  }
 0xa7a   : > { %15687 = vmatprep.subr.bf16.mxu1 %v18331_v18 }
 0xb2f   : > { %v5187_v59 = vpop.f32.mrb[20].mxu1 }
 0xb30   : > { %v13346_v60 = vmul.f32 -1.442695, %v5187_v59  ;;  %v15625_v61 = vpop.f32.mrb[21].mxu1  ;;  %v17539_v59 = vld [vmem:[#allocation8 + $0x4a0] sm:$0xff]  }
 0xb31   : > { %v5190_v62 = vpop.f32.mrb[22].mxu1  ;;  %v17541_v61 = vld [vmem:[#allocation8 + $0x4a8] sm:$0xff]  }
 0xb32   : > { %18047 = vpow2.f32 %v13346_v60  ;;  %v15626_v63 = vpop.f32.mrb[23].mxu1  ;;  %v17540_v60 = vld [vmem:[#allocation8 + $0x4e0] sm:$0xff]   ;;  %v17542_v62 = vld [vmem:[#allocation8 + $0x4e8] sm:$0xff]  }
 0xb33   : > { %v17543_v63 = vld [vmem:[#allocation8 + $0x4b0] sm:$0xff]  }
 0xb3c   : > { %v18048_v35 = vpop.eup %18047 }
 0xb3d   : > { %v5196_v58 = vadd.f32 1.0, %v18048_v35  ;;  %v17544_v35 = vld [vmem:[#allocation8 + $0x4f0] sm:$0xff]  }
 0xb3f   : > { %18049 = vrcp.f32 %v5196_v58  ;;  %v17545_v58 = vld [vmem:[#allocation8 + $0x4b8] sm:$0xff]  }
 0xb49   : > { %v18050_v1 = vpop.eup %18049 }
 0xb4a   : > { %v5202_v2 = vrot.slane %v18050_v1, %v18802_v38 }
 0xb4c   : > { %v5203_v4 = vmul.f32 %v5202_v2, %v18869_v7  ;;  %v5204_v42 = vmul.f32 %v5202_v2, %v18871_v52  ;;  %v5205_v5 = vmul.f32 %v5202_v2, %v18873_v53  ;;  %v5206_v44 = vmul.f32 %v5202_v2, %v18877_v8 }
 0xb4e   : > { %v5207_v6 = vadd.f32 %v5203_v4, %v4955_v40  ;;  %v5208_v48 = vadd.f32 %v5204_v42, %v4958_v41  ;;  %v5209_v56 = vadd.f32 %v5205_v5, %v4963_v3  ;;  %v5210_v14 = vadd.f32 %v5206_v44, %v4966_v55  ;;  %v17547_v55 = vld [vmem:[#allocation8 + $0x500] sm:$0xff]   ;;  %v17548_v42 = vld [vmem:[#allocation8 + $0x508] sm:$0xff]   ;;  %v17549_v5 = vld [vmem:[#allocation8 + $0x510] sm:$0xff]  }
 0xb4f   : > { %v17550_v44 = vld [vmem:[#allocation8 + $0x518] sm:$0xff]  }
 0xb50   : > { %v5211_v15 = vmax.f32 %v5207_v6, 0.0  ;;  %v5212_v47 = vmax.f32 %v5208_v48, 0.0  ;;  %v5213_v16 = vmax.f32 %v5209_v56, 0.0  ;;  %v5214_v49 = vmax.f32 %v5210_v14, 0.0  ;;  %v17551_v6 = vld [vmem:[#allocation8 + $0x520] sm:$0xff]   ;;  %v17552_v48 = vld [vmem:[#allocation8 + $0x528] sm:$0xff]  }
 0xb51   : > { %v17553_v56 = vld [vmem:[#allocation8 + $0x530] sm:$0xff]   ;;  %v17554_v14 = vld [vmem:[#allocation8 + $0x538] sm:$0xff]  }
 0xb52   : > { %5217 = vst [vmem:[#allocation3 + $0x3] sm:$0xff] %v5211_v15  ;;  %5218 = vst [vmem:[#allocation3 + $0xb] sm:$0xff] %v5212_v47 }
 0xb53   : > { %5219 = vst [vmem:[#allocation3 + $0x13] sm:$0xff] %v5213_v16  ;;  %5220 = vst [vmem:[#allocation3 + $0x1b] sm:$0xff] %v5214_v49  ;;  %v17555_v49 = vld [vmem:[#allocation12 + $0x3c0] sm:$0xff]  }
 0xb59   : > { %v5243_v51 = vld [vmem:[#allocation3 + $0x1] ss:$2 sm:$0xff]  ;;  %v5221_v52 = vld [vmem:[#allocation3] ss:$2 sm:$0xff] }
 0xb5a   : > { %v5245_v7 = vld [vmem:[#allocation3 + $0x11] ss:$2 sm:$0xff]  ;;  %v5223_v53 = vld [vmem:[#allocation3 + $0x10] ss:$2 sm:$0xff] }
 0xb5b   : > { %v5246_v17 = vpack.c.bf16 %v5245_v7, %v5243_v51  ;;  %v5224_v8 = vpack.c.bf16 %v5223_v53, %v5221_v52  ;;  %v5443_v32 = vld [vmem:[#allocation3 + $0x2] ss:$2 sm:$0xff]  ;;  %v5445_v33 = vld [vmem:[#allocation3 + $0x12] ss:$2 sm:$0xff]  ;;  %v5556_v34 = vld [vmem:[#allocation3 + $0x3] ss:$2 sm:$0xff] }
 0xb5c   : > { %v5558_v11 = vld [vmem:[#allocation3 + $0x13] ss:$2 sm:$0xff]  ;;  %v5446_v43 = vpack.c.bf16 %v5445_v33, %v5443_v32  ;;  %v5669_v1 = vld [vmem:[#allocation3 + $0x4] ss:$2 sm:$0xff]  ;;  %v5671_v2 = vld [vmem:[#allocation3 + $0x14] ss:$2 sm:$0xff] }
 0xb5d   : > { %15644 = vmatmul.mubr.bf16.vlgmr.msra.gmra.mrb[28].mxu0 %v5246_v17  ;;  %15664 = vmatmul.mubr.bf16.vlgmr.msra.gmra.mrb[24].mxu1 %v5224_v8  ;;  %v5559_v46 = vpack.c.bf16 %v5558_v11, %v5556_v34  ;;  %v5782_v3 = vld [vmem:[#allocation3 + $0x5] ss:$2 sm:$0xff]  ;;  %v5784_v40 = vld [vmem:[#allocation3 + $0x15] ss:$2 sm:$0xff]  ;;  %v5672_v41 = vpack.c.bf16 %v5671_v2, %v5669_v1  ;;  %v5895_v15 = vld [vmem:[#allocation3 + $0x6] ss:$2 sm:$0xff] }
 0xb5e   : > { %15668 = vmatpush3.bf16.msra.mxu0 %v17515_v50  ;;  %15688 = vmatpush3.bf16.msra.mxu1 %v17516_v19  ;;  %v5785_v4 = vpack.c.bf16 %v5784_v40, %v5782_v3  ;;  %v5897_v47 = vld [vmem:[#allocation3 + $0x16] ss:$2 sm:$0xff]  ;;  %v17556_v50 = vld [vmem:[#allocation12 + $0x380] sm:$0xff]   ;;  %v17561_v53 = vld [vmem:[#allocation12 + $0x3d8] sm:$0xff]  }
 0xb5f   : > { %15669 = vmatprep.subr.bf16.mxu0 %v18331_v18  ;;  %15689 = vmatprep.subr.bf16.mxu1 %v18331_v18  ;;  %v5898_v16 = vpack.c.bf16 %v5897_v47, %v5895_v15  ;;  %v17557_v51 = vld [vmem:[#allocation12 + $0x3c8] sm:$0xff]   ;;  %v17559_v52 = vld [vmem:[#allocation12 + $0x3d0] sm:$0xff]   ;;  %v17562_v19 = vld [vmem:[#allocation12 + $0x398] sm:$0xff]  }
 0xb60   : > { %15683 = vmatprep.mubr.msk.bf16.mxu0 %vm18332_vm0, %v18331_v18  ;;  %15703 = vmatprep.mubr.msk.bf16.mxu1 %vm18332_vm0, %v18331_v18  ;;  %v17558_v7 = vld [vmem:[#allocation12 + $0x388] sm:$0xff]   ;;  %v17560_v17 = vld [vmem:[#allocation12 + $0x390] sm:$0xff]   ;;  %v17563_v8 = vld [vmem:[#allocation12 + $0x3e0] sm:$0xff]  }
 0xb62   : > { %15670 = vmatpush3.bf16.msra.mxu0 %v17517_v9  ;;  %15690 = vmatpush3.bf16.msra.mxu1 %v17518_v10  ;;  %v17564_v9 = vld [vmem:[#allocation12 + $0x3a0] sm:$0xff]   ;;  %v17565_v10 = vld [vmem:[#allocation12 + $0x3e8] sm:$0xff]  }
 0xb63   : > { %15671 = vmatprep.subr.bf16.mxu0 %v18331_v18  ;;  %15691 = vmatprep.subr.bf16.mxu1 %v18331_v18 }
 0xb66   : > { %15672 = vmatpush3.bf16.msra.mxu0 %v17519_v20  ;;  %15692 = vmatpush3.bf16.msra.mxu1 %v17520_v21  ;;  %v17566_v20 = vld [vmem:[#allocation12 + $0x3a8] sm:$0xff]   ;;  %v17567_v21 = vld [vmem:[#allocation12 + $0x3f0] sm:$0xff]  }
 0xb67   : > { %15673 = vmatprep.subr.bf16.mxu0 %v18331_v18  ;;  %15693 = vmatprep.subr.bf16.mxu1 %v18331_v18 }
 0xb6a   : > { %15674 = vmatpush3.bf16.msra.mxu0 %v17521_v22  ;;  %15694 = vmatpush3.bf16.msra.mxu1 %v17522_v23  ;;  %v17568_v22 = vld [vmem:[#allocation12 + $0x3b0] sm:$0xff]   ;;  %v17569_v23 = vld [vmem:[#allocation12 + $0x3f8] sm:$0xff]  }
 0xb6b   : > { %15675 = vmatprep.subr.bf16.mxu0 %v18331_v18  ;;  %15695 = vmatprep.subr.bf16.mxu1 %v18331_v18 }
 0xb6e   : > { %15676 = vmatpush3.bf16.msra.mxu0 %v17523_v24  ;;  %15696 = vmatpush3.bf16.msra.mxu1 %v17524_v25  ;;  %v17570_v24 = vld [vmem:[#allocation12 + $0x3b8] sm:$0xff]  }
 0xb6f   : > { %15677 = vmatprep.subr.bf16.mxu0 %v18331_v18  ;;  %15697 = vmatprep.subr.bf16.mxu1 %v18331_v18 }
 0xb72   : > { %15678 = vmatpush3.bf16.msra.mxu0 %v17525_v26  ;;  %15698 = vmatpush3.bf16.msra.mxu1 %v17526_v27 }
 0xb73   : > { %15679 = vmatprep.subr.bf16.mxu0 %v18331_v18  ;;  %15699 = vmatprep.subr.bf16.mxu1 %v18331_v18 }
 0xb76   : > { %15680 = vmatpush3.bf16.msra.mxu0 %v17527_v28  ;;  %15700 = vmatpush3.bf16.msra.mxu1 %v17528_v29 }
 0xb77   : > { %15681 = vmatprep.subr.bf16.mxu0 %v18331_v18  ;;  %15701 = vmatprep.subr.bf16.mxu1 %v18331_v18 }
 0xb7a   : > { %15682 = vmatpush3.bf16.msra.mxu0 %v17529_v30  ;;  %15702 = vmatpush3.bf16.msra.mxu1 %v17530_v31 }
 0xb7b   : > { %15707 = vmatprep.subr.bf16.mxu0 %v18331_v18  ;;  %15727 = vmatprep.subr.bf16.mxu1 %v18331_v18 }
 0xb7d   : > { %15684 = vmatmul.mubr.bf16.vlgmr.msra.gmra.mrb[32].mxu0 %v5446_v43  ;;  %15704 = vmatmul.mubr.bf16.vlgmr.msra.gmra.mrb[28].mxu1 %v5559_v46 }
 0xb7e   : > { %15708 = vmatpush3.bf16.msra.mxu0 %v17531_v12  ;;  %15728 = vmatpush3.bf16.msra.mxu1 %v17532_v45 }
 0xb7f   : > { %15709 = vmatprep.subr.bf16.mxu0 %v18331_v18  ;;  %15729 = vmatprep.subr.bf16.mxu1 %v18331_v18 }
 0xb80   : > { %15723 = vmatprep.mubr.msk.bf16.mxu0 %vm18332_vm0, %v18331_v18  ;;  %15743 = vmatprep.mubr.msk.bf16.mxu1 %vm18332_vm0, %v18331_v18 }
 0xb82   : > { %15710 = vmatpush3.bf16.msra.mxu0 %v17533_v13  ;;  %15730 = vmatpush3.bf16.msra.mxu1 %v17534_v36 }
 0xb83   : > { %15711 = vmatprep.subr.bf16.mxu0 %v18331_v18  ;;  %15731 = vmatprep.subr.bf16.mxu1 %v18331_v18 }
 0xb86   : > { %15712 = vmatpush3.bf16.msra.mxu0 %v17535_v39  ;;  %15732 = vmatpush3.bf16.msra.mxu1 %v17536_v54 }
 0xb87   : > { %15713 = vmatprep.subr.bf16.mxu0 %v18331_v18  ;;  %15733 = vmatprep.subr.bf16.mxu1 %v18331_v18 }
 0xb8a   : > { %15714 = vmatpush3.bf16.msra.mxu0 %v17537_v57  ;;  %15734 = vmatpush3.bf16.msra.mxu1 %v17538_v37 }
 0xb8b   : > { %15715 = vmatprep.subr.bf16.mxu0 %v18331_v18  ;;  %15735 = vmatprep.subr.bf16.mxu1 %v18331_v18 }
 0xb8e   : > { %15716 = vmatpush3.bf16.msra.mxu0 %v17539_v59  ;;  %15736 = vmatpush3.bf16.msra.mxu1 %v17540_v60 }
 0xb8f   : > { %15717 = vmatprep.subr.bf16.mxu0 %v18331_v18  ;;  %15737 = vmatprep.subr.bf16.mxu1 %v18331_v18 }
 0xb92   : > { %15718 = vmatpush3.bf16.msra.mxu0 %v17541_v61  ;;  %15738 = vmatpush3.bf16.msra.mxu1 %v17542_v62 }
 0xb93   : > { %15719 = vmatprep.subr.bf16.mxu0 %v18331_v18  ;;  %15739 = vmatprep.subr.bf16.mxu1 %v18331_v18 }
 0xb96   : > { %15720 = vmatpush3.bf16.msra.mxu0 %v17543_v63  ;;  %15740 = vmatpush3.bf16.msra.mxu1 %v17544_v35 }
 0xb97   : > { %15721 = vmatprep.subr.bf16.mxu0 %v18331_v18  ;;  %15741 = vmatprep.subr.bf16.mxu1 %v18331_v18 }
 0xb9a   : > { %15722 = vmatpush3.bf16.msra.mxu0 %v17545_v58  ;;  %15742 = vmatpush3.bf16.msra.mxu1 %v17546_v0 }
 0xb9b   : > { %15747 = vmatprep.subr.bf16.mxu0 %v18331_v18  ;;  %15767 = vmatprep.subr.bf16.mxu1 %v18331_v18 }
 0xb9d   : > { %15724 = vmatmul.mubr.bf16.vlgmr.msra.gmra.mrb[36].mxu0 %v5672_v41  ;;  %15744 = vmatmul.mubr.bf16.vlgmr.msra.gmra.mrb[32].mxu1 %v5785_v4  ;;  %v13403_v4 = vld [vmem:[#allocation10 + $0x2] ss:$0 sm:$0xff] }
 0xb9e   : > { %15748 = vmatpush3.bf16.msra.mxu0 %v17547_v55  ;;  %15763 = vmatprep.mubr.msk.bf16.mxu0 %vm18332_vm0, %v18331_v18 }
 0xb9f   : > { %15749 = vmatprep.subr.bf16.mxu0 %v18331_v18  ;;  %15783 = vmatprep.mubr.msk.bf16.mxu1 %vm18332_vm0, %v18331_v18 }
 0xba0   : > { %15768 = vmatpush3.bf16.msra.mxu1 %v17555_v49 }
 0xba1   : > { %15769 = vmatprep.subr.bf16.mxu1 %v18331_v18 }
 0xba2   : > { %15750 = vmatpush3.bf16.msra.mxu0 %v17548_v42 }
 0xba3   : > { %15751 = vmatprep.subr.bf16.mxu0 %v18331_v18 }
 0xba4   : > { %15770 = vmatpush3.bf16.msra.mxu1 %v17557_v51 }
 0xba5   : > { %15771 = vmatprep.subr.bf16.mxu1 %v18331_v18 }
 0xba6   : > { %15752 = vmatpush3.bf16.msra.mxu0 %v17549_v5 }
 0xba7   : > { %15753 = vmatprep.subr.bf16.mxu0 %v18331_v18 }
 0xba8   : > { %15772 = vmatpush3.bf16.msra.mxu1 %v17559_v52 }
 0xba9   : > { %15773 = vmatprep.subr.bf16.mxu1 %v18331_v18 }
 0xbaa   : > { %15754 = vmatpush3.bf16.msra.mxu0 %v17550_v44 }
 0xbab   : > { %15755 = vmatprep.subr.bf16.mxu0 %v18331_v18 }
 0xbac   : > { %15774 = vmatpush3.bf16.msra.mxu1 %v17561_v53  ;;  %v17572_v53 = vld [vmem:[#allocation12 + $0x440] sm:$0xff]  }
 0xbad   : > { %15775 = vmatprep.subr.bf16.mxu1 %v18331_v18 }
 0xbae   : > { %15756 = vmatpush3.bf16.msra.mxu0 %v17551_v6 }
 0xbaf   : > { %15757 = vmatprep.subr.bf16.mxu0 %v18331_v18 }
 0xbb0   : > { %15776 = vmatpush3.bf16.msra.mxu1 %v17563_v8 }
 0xbb1   : > { %15777 = vmatprep.subr.bf16.mxu1 %v18331_v18 }
 0xbb2   : > { %15758 = vmatpush3.bf16.msra.mxu0 %v17552_v48 }
 0xbb3   : > { %15759 = vmatprep.subr.bf16.mxu0 %v18331_v18 }
 0xbb4   : > { %15778 = vmatpush3.bf16.msra.mxu1 %v17565_v10 }
 0xbb5   : > { %15779 = vmatprep.subr.bf16.mxu1 %v18331_v18 }
 0xbb6   : > { %15760 = vmatpush3.bf16.msra.mxu0 %v17553_v56 }
 0xbb7   : > { %15761 = vmatprep.subr.bf16.mxu0 %v18331_v18 }
 0xbb8   : > { %15780 = vmatpush3.bf16.msra.mxu1 %v17567_v21 }
 0xbb9   : > { %15781 = vmatprep.subr.bf16.mxu1 %v18331_v18 }
 0xbba   : > { %15762 = vmatpush3.bf16.msra.mxu0 %v17554_v14 }
 0xbbb   : > { %15787 = vmatprep.subr.bf16.mxu0 %v18331_v18 }
 0xbbc   : > { %15782 = vmatpush3.bf16.msra.mxu1 %v17569_v23 }
 0xbbd   : > { %15764 = vmatmul.mubr.bf16.vlgmr.msra.gmra.mrb[40].mxu0 %v5898_v16  ;;  %15807 = vmatprep.subr.bf16.mxu1 %v18331_v18 }
 0xbbe   : > { %15803 = vmatprep.mubr.msk.bf16.mxu0 %vm18332_vm0, %v18331_v18  ;;  %15788 = vmatpush3.bf16.msra.mxu0 %v17556_v50 }
 0xbbf   : > { %15789 = vmatprep.subr.bf16.mxu0 %v18331_v18 }
 0xbc2   : > { %15790 = vmatpush3.bf16.msra.mxu0 %v17558_v7  ;;  %v17571_v7 = vld [vmem:[#allocation12 + $0x400] sm:$0xff]  }
 0xbc3   : > { %15791 = vmatprep.subr.bf16.mxu0 %v18331_v18 }
 0xbc6   : > { %15792 = vmatpush3.bf16.msra.mxu0 %v17560_v17 }
 0xbc7   : > { %15793 = vmatprep.subr.bf16.mxu0 %v18331_v18 }
 0xbca   : > { %15794 = vmatpush3.bf16.msra.mxu0 %v17562_v19 }
 0xbcb   : > { %15795 = vmatprep.subr.bf16.mxu0 %v18331_v18 }
 0xbce   : > { %15796 = vmatpush3.bf16.msra.mxu0 %v17564_v9 }
 0xbcf   : > { %15797 = vmatprep.subr.bf16.mxu0 %v18331_v18 }
 0xbd2   : > { %15798 = vmatpush3.bf16.msra.mxu0 %v17566_v20 }
 0xbd3   : > { %15799 = vmatprep.subr.bf16.mxu0 %v18331_v18 }
 0xbd6   : > { %15800 = vmatpush3.bf16.msra.mxu0 %v17568_v22 }
 0xbd7   : > { %15801 = vmatprep.subr.bf16.mxu0 %v18331_v18 }
 0xbda   : > { %15802 = vmatpush3.bf16.msra.mxu0 %v17570_v24  ;;  %v17573_v24 = vld [vmem:[#allocation12 + $0x408] sm:$0xff]  }
 0xbdb   : > { %15827 = vmatprep.subr.bf16.mxu0 %v18331_v18 }
 0xc30   : > { %v5346_v25 = vpop.f32.mrb[28].mxu0  ;;  %v5435_v26 = vpop.f32.mrb[24].mxu1 }
 0xc31   : > { %v15645_v27 = vpop.f32.mrb[29].mxu0  ;;  %v5436_v28 = vadd.f32 %v5435_v26, %v5346_v25  ;;  %v15665_v29 = vpop.f32.mrb[25].mxu1  ;;  %v17574_v25 = vld [vmem:[#allocation12 + $0x448] sm:$0xff]   ;;  %v17575_v26 = vld [vmem:[#allocation12 + $0x410] sm:$0xff]  }
 0xc32   : > { %v5349_v30 = vpop.f32.mrb[30].mxu0  ;;  %v5438_v31 = vpop.f32.mrb[26].mxu1  ;;  %v17576_v27 = vld [vmem:[#allocation12 + $0x450] sm:$0xff]   ;;  %v17578_v29 = vld [vmem:[#allocation12 + $0x458] sm:$0xff]  }
 0xc33   : > { %v15646_v32 = vpop.f32.mrb[31].mxu0  ;;  %v5439_v33 = vadd.f32 %v5438_v31, %v5349_v30  ;;  %v15666_v34 = vpop.f32.mrb[27].mxu1  ;;  %v17579_v30 = vld [vmem:[#allocation12 + $0x420] sm:$0xff]  }
 0xc34   : > { %v17580_v31 = vld [vmem:[#allocation12 + $0x460] sm:$0xff]   ;;  %v17581_v32 = vld [vmem:[#allocation12 + $0x428] sm:$0xff]   ;;  %v17583_v34 = vld [vmem:[#allocation12 + $0x430] sm:$0xff]  }
 0xc50   : > { %v5546_v11 = vpop.f32.mrb[32].mxu0  ;;  %v5659_v43 = vpop.f32.mrb[28].mxu1 }
 0xc51   : > { %v5553_v12 = vadd.f32 %v5546_v11, %v5436_v28  ;;  %v15685_v45 = vpop.f32.mrb[33].mxu0  ;;  %v15705_v46 = vpop.f32.mrb[29].mxu1  ;;  %v17577_v28 = vld [vmem:[#allocation12 + $0x418] sm:$0xff]   ;;  %v17584_v11 = vld [vmem:[#allocation12 + $0x470] sm:$0xff]  }
 0xc52   : > { %v5549_v13 = vpop.f32.mrb[34].mxu0  ;;  %v5662_v54 = vpop.f32.mrb[30].mxu1  ;;  %v17587_v45 = vld [vmem:[#allocation12 + $0x480] sm:$0xff]  }
 0xc53   : > { %v5666_v36 = vadd.f32 %v5659_v43, %v5553_v12  ;;  %v5554_v39 = vadd.f32 %v5549_v13, %v5439_v33  ;;  %v15686_v57 = vpop.f32.mrb[35].mxu0  ;;  %v15706_v37 = vpop.f32.mrb[31].mxu1  ;;  %v17582_v33 = vld [vmem:[#allocation12 + $0x468] sm:$0xff]   ;;  %v17585_v12 = vld [vmem:[#allocation12 + $0x438] sm:$0xff]   ;;  %v17588_v46 = vld [vmem:[#allocation12 + $0x4c0] sm:$0xff]  }
 0xc54   : > { %v17586_v43 = vld [vmem:[#allocation12 + $0x478] sm:$0xff]   ;;  %v17592_v57 = vld [vmem:[#allocation12 + $0x4d0] sm:$0xff]  }
 0xc55   : > { %v5667_v59 = vadd.f32 %v5662_v54, %v5554_v39  ;;  %v17590_v39 = vld [vmem:[#allocation12 + $0x4c8] sm:$0xff]   ;;  %v17591_v54 = vld [vmem:[#allocation12 + $0x490] sm:$0xff]   ;;  %v17593_v37 = vld [vmem:[#allocation12 + $0x498] sm:$0xff]  }
 0xc70   : > { %v5772_v60 = vpop.f32.mrb[36].mxu0  ;;  %v5885_v62 = vpop.f32.mrb[32].mxu1 }
 0xc71   : > { %v5779_v61 = vadd.f32 %v5772_v60, %v5666_v36  ;;  %v15725_v63 = vpop.f32.mrb[37].mxu0  ;;  %v15745_v35 = vpop.f32.mrb[33].mxu1  ;;  %v17589_v36 = vld [vmem:[#allocation12 + $0x488] sm:$0xff]   ;;  %v17595_v60 = vld [vmem:[#allocation12 + $0x4a0] sm:$0xff]  }
 0xc72   : > { %v5775_v58 = vpop.f32.mrb[38].mxu0  ;;  %v5888_v2 = vpop.f32.mrb[34].mxu1  ;;  %v17598_v63 = vld [vmem:[#allocation12 + $0x4e8] sm:$0xff]   ;;  %v17599_v35 = vld [vmem:[#allocation12 + $0x4b0] sm:$0xff]  }
 0xc73   : > { %v5892_v0 = vadd.f32 %v5885_v62, %v5779_v61  ;;  %v5780_v1 = vadd.f32 %v5775_v58, %v5667_v59  ;;  %v15726_v3 = vpop.f32.mrb[39].mxu0  ;;  %v15746_v40 = vpop.f32.mrb[35].mxu1  ;;  %v17594_v59 = vld [vmem:[#allocation12 + $0x4d8] sm:$0xff]   ;;  %v17596_v61 = vld [vmem:[#allocation12 + $0x4e0] sm:$0xff]   ;;  %v17597_v62 = vld [vmem:[#allocation12 + $0x4a8] sm:$0xff]  }
 0xc74   : > { %v17600_v58 = vld [vmem:[#allocation12 + $0x4f0] sm:$0xff]   ;;  %v17604_v3 = vld [vmem:[#allocation15 + $0x80] sm:$0xff]  }
 0xc75   : > { %v5893_v55 = vadd.f32 %v5888_v2, %v5780_v1  ;;  %v17602_v1 = vld [vmem:[#allocation12 + $0x4f8] sm:$0xff]   ;;  %v17603_v2 = vld [vmem:[#allocation12 + $0x500] sm:$0xff]  }
 0xc90   : > { %v5998_v41 = vpop.f32.mrb[40].mxu0 }
 0xc91   : > { %v6005_v42 = vadd.f32 %v5998_v41, %v5892_v0  ;;  %v15765_v5 = vpop.f32.mrb[41].mxu0  ;;  %v17601_v0 = vld [vmem:[#allocation12 + $0x4b8] sm:$0xff]   ;;  %v17605_v41 = vld [vmem:[#allocation12 + $0x508] sm:$0xff]  }
 0xc92   : > { %v6001_v44 = vpop.f32.mrb[42].mxu0  ;;  %v17608_v5 = vld [vmem:[#allocation15 + $0x90] sm:$0xff]  }
 0xc93   : > { %v6015_v6 = vadd.f32 %v13403_v4, %v6005_v42  ;;  %v6006_v48 = vadd.f32 %v6001_v44, %v5893_v55  ;;  %v15766_v56 = vpop.f32.mrb[43].mxu0  ;;  %v17607_v42 = vld [vmem:[#allocation12 + $0x510] sm:$0xff]   ;;  %v17609_v44 = vld [vmem:[#allocation12 + $0x518] sm:$0xff]  }
 0xc94   : > { %v17612_v56 = vld [vmem:[#allocation15 + $0xa0] sm:$0xff]  }
 0xc95   : > { %v6017_v14 = vmax.f32 %v6015_v6, 0.0  ;;  %v6016_v15 = vadd.f32 %v13403_v4, %v6006_v48  ;;  %v17606_v4 = vld [vmem:[#allocation15 + $0x88] sm:$0xff]   ;;  %v17610_v6 = vld [vmem:[#allocation15 + $0x98] sm:$0xff]  }
 0xc96   : > { %v17611_v48 = vld [vmem:[#allocation12 + $0x520] sm:$0xff]  }
 0xc97   : > { %6021 = vst [vmem:[#allocation7 + $0x3] sm:$0xff] %v6017_v14  ;;  %v6018_v47 = vmax.f32 %v6016_v15, 0.0  ;;  %v17614_v15 = vld [vmem:[#allocation15 + $0xa8] sm:$0xff]  }
 0xc99   : > { %6022 = vst [vmem:[#allocation7 + $0xb] sm:$0xff] %v6018_v47  ;;  %v18981_v16 = vpack.c.bf16 %v6018_v47, %v6017_v14  ;;  %v17613_v14 = vld [vmem:[#allocation12 + $0x528] sm:$0xff]   ;;  %v17615_v47 = vld [vmem:[#allocation12 + $0x530] sm:$0xff]  }
 0xc9e   : > { %v6043_v49 = vld [vmem:[#allocation7 + $0x1] sm:$0xff] }
 0xc9f   : > { %v6023_v50 = vld [vmem:[#allocation7] sm:$0xff] }
 0xca0   : > { %v18983_v51 = vld [vmem:[#allocation7 + $0x2] sm:$0xff]  ;;  %v6242_v9 = vld [vmem:[#allocation7 + $0xa] sm:$0xff] }
 0xca1   : > { %7939 = vst [vmem:[#allocation7] sm:$0x7] %v18331_v18  ;;  %v6044_v52 = vld [vmem:[#allocation7 + $0x9] sm:$0xff]  ;;  %v6243_v13 = vpack.c.bf16 %v6242_v9, %v18983_v51 }
 0xca2   : > { %v6024_v17 = vld [vmem:[#allocation7 + $0x8] sm:$0xff]  ;;  %v6045_v19 = vpack.c.bf16 %v6044_v52, %v6043_v49 }
 0xca3   : > { %v6025_v8 = vpack.c.bf16 %v6024_v17, %v6023_v50  ;;  %v18986_v10 = vld [vmem:[#allocation7 + $0x4] sm:$0xff]  ;;  %v18988_v20 = vld [vmem:[#allocation7 + $0xc] sm:$0xff] }
 0xca4   : > { %v18990_v21 = vld [vmem:[#allocation7 + $0x5] sm:$0xff]  ;;  %v18992_v22 = vld [vmem:[#allocation7 + $0xd] sm:$0xff]  ;;  %15784 = vmatmul.mubr.bf16.vlgmr.msra.gmra.mrb[36].mxu1 %v6045_v19  ;;  %v6465_v40 = vpack.c.bf16 %v18988_v20, %v18986_v10  ;;  %v17619_v20 = vld [vmem:[#allocation18 + $0x80] sm:$0xff]  }
 0xca5   : > { %v18994_v23 = vld [vmem:[#allocation7 + $0x6] sm:$0xff]  ;;  %15804 = vmatmul.mubr.bf16.vlgmr.msra.gmra.mrb[44].mxu0 %v6025_v8  ;;  %15808 = vmatpush3.bf16.msra.mxu1 %v17571_v7  ;;  %v6576_v55 = vpack.c.bf16 %v18992_v22, %v18990_v21  ;;  %v6807_v50 = vld [vmem:[#allocation3 + $0x13] ss:$2 sm:$0xff]  ;;  %v6809_v7 = vld [vmem:[#allocation3 + $0x14] ss:$2 sm:$0xff] }
 0xca6   : > { %7940 = vst [vmem:[#allocation7 + $0xb] sm:$0x7] %v18331_v18  ;;  %15828 = vmatpush3.bf16.msra.mxu0 %v17572_v53  ;;  %15809 = vmatprep.subr.bf16.mxu1 %v18331_v18  ;;  %v6806_v49 = vld [vmem:[#allocation3 + $0x3] ss:$2 sm:$0xff]  ;;  %v6808_v51 = vld [vmem:[#allocation3 + $0x4] ss:$2 sm:$0xff]  ;;  %v6811_v19 = vmax.f32 %v6807_v50, %v6809_v7 }
 0xca7   : > { %15829 = vmatprep.subr.bf16.mxu0 %v18331_v18  ;;  %15823 = vmatprep.mubr.msk.bf16.mxu1 %vm18332_vm0, %v18331_v18  ;;  %v17617_v52 = vld [vmem:[#allocation12 + $0x538] sm:$0xff]   ;;  %v6810_v53 = vmax.f32 %v6806_v49, %v6808_v51  ;;  %v6686_v8 = vld [vmem:[#allocation7 + $0xe] sm:$0xff] }
 0xca8   : > { %15843 = vmatprep.mubr.msk.bf16.mxu0 %vm18332_vm0, %v18331_v18  ;;  %v17618_v17 = vld [vmem:[#allocation15 + $0xb8] sm:$0xff]   ;;  %v6687_v9 = vpack.c.bf16 %v6686_v8, %v18994_v23  ;;  %v17620_v21 = vld [vmem:[#allocation18 + $0x88] sm:$0xff]  }
 0xca9   : > { %15810 = vmatpush3.bf16.msra.mxu1 %v17573_v24  ;;  %v6812_v10 = vpack.c.bf16 %v6811_v19, %v6810_v53  ;;  %v17621_v22 = vld [vmem:[#allocation18 + $0x90] sm:$0xff]   ;;  %v17622_v23 = vld [vmem:[#allocation18 + $0x98] sm:$0xff]   ;;  %v17623_v24 = vld [vmem:[#allocation18 + $0xa0] sm:$0xff]  }
 0xcaa   : > { %15830 = vmatpush3.bf16.msra.mxu0 %v17574_v25  ;;  %15811 = vmatprep.subr.bf16.mxu1 %v18331_v18  ;;  %v17624_v25 = vld [vmem:[#allocation18 + $0xa8] sm:$0xff]   ;;  %v13460_v7 = vld [vmem:[#allocation13 + $0x2] ss:$0 sm:$0xff] }
 0xcab   : > { %15831 = vmatprep.subr.bf16.mxu0 %v18331_v18 }
 0xcad   : > { %15812 = vmatpush3.bf16.msra.mxu1 %v17575_v26  ;;  %v17625_v26 = vld [vmem:[#allocation18 + $0xb0] sm:$0xff]  }
 0xcae   : > { %15832 = vmatpush3.bf16.msra.mxu0 %v17576_v27  ;;  %15813 = vmatprep.subr.bf16.mxu1 %v18331_v18  ;;  %v17627_v27 = vld [vmem:[#allocation19 + $0x80] sm:$0xff]  }
 0xcaf   : > { %15833 = vmatprep.subr.bf16.mxu0 %v18331_v18 }
 0xcb1   : > { %15814 = vmatpush3.bf16.msra.mxu1 %v17577_v28  ;;  %v17626_v28 = vld [vmem:[#allocation18 + $0xb8] sm:$0xff]  }
 0xcb2   : > { %15834 = vmatpush3.bf16.msra.mxu0 %v17578_v29  ;;  %15815 = vmatprep.subr.bf16.mxu1 %v18331_v18  ;;  %v17628_v29 = vld [vmem:[#allocation19 + $0x88] sm:$0xff]  }
 0xcb3   : > { %15835 = vmatprep.subr.bf16.mxu0 %v18331_v18 }
 0xcb5   : > { %15816 = vmatpush3.bf16.msra.mxu1 %v17579_v30  ;;  %v17629_v30 = vld [vmem:[#allocation19 + $0x90] sm:$0xff]  }
 0xcb6   : > { %15836 = vmatpush3.bf16.msra.mxu0 %v17580_v31  ;;  %15817 = vmatprep.subr.bf16.mxu1 %v18331_v18 }
 0xcb7   : > { %15837 = vmatprep.subr.bf16.mxu0 %v18331_v18 }
 0xcb9   : > { %15818 = vmatpush3.bf16.msra.mxu1 %v17581_v32 }
 0xcba   : > { %15838 = vmatpush3.bf16.msra.mxu0 %v17582_v33  ;;  %15819 = vmatprep.subr.bf16.mxu1 %v18331_v18 }
 0xcbb   : > { %15839 = vmatprep.subr.bf16.mxu0 %v18331_v18 }
 0xcbd   : > { %15820 = vmatpush3.bf16.msra.mxu1 %v17583_v34 }
 0xcbe   : > { %15840 = vmatpush3.bf16.msra.mxu0 %v17584_v11  ;;  %15821 = vmatprep.subr.bf16.mxu1 %v18331_v18 }
 0xcbf   : > { %15841 = vmatprep.subr.bf16.mxu0 %v18331_v18 }
 0xcc1   : > { %15822 = vmatpush3.bf16.msra.mxu1 %v17585_v12 }
 0xcc2   : > { %15842 = vmatpush3.bf16.msra.mxu0 %v17586_v43  ;;  %15847 = vmatprep.subr.bf16.mxu1 %v18331_v18 }
 0xcc3   : > { %15867 = vmatprep.subr.bf16.mxu0 %v18331_v18 }
 0xcc4   : > { %15824 = vmatmul.mubr.bf16.vlgmr.msra.gmra.mrb[40].mxu1 %v6243_v13 }
 0xcc5   : > { %15844 = vmatmul.mubr.bf16.vlgmr.msra.gmra.mrb[48].mxu0 %v18981_v16  ;;  %15848 = vmatpush3.bf16.msra.mxu1 %v17587_v45  ;;  %v17616_v16 = vld [vmem:[#allocation15 + $0xb0] sm:$0xff]  }
 0xcc6   : > { %15868 = vmatpush3.bf16.msra.mxu0 %v17588_v46  ;;  %15849 = vmatprep.subr.bf16.mxu1 %v18331_v18 }
 0xcc7   : > { %15869 = vmatprep.subr.bf16.mxu0 %v18331_v18  ;;  %15863 = vmatprep.mubr.msk.bf16.mxu1 %vm18332_vm0, %v18331_v18 }
 0xcc8   : > { %15883 = vmatprep.mubr.msk.bf16.mxu0 %vm18332_vm0, %v18331_v18 }
 0xcc9   : > { %15850 = vmatpush3.bf16.msra.mxu1 %v17589_v36  ;;  %v17630_v36 = vld [vmem:[#allocation19 + $0x98] sm:$0xff]  }
 0xcca   : > { %15870 = vmatpush3.bf16.msra.mxu0 %v17590_v39  ;;  %15851 = vmatprep.subr.bf16.mxu1 %v18331_v18  ;;  %v17631_v39 = vld [vmem:[#allocation19 + $0xa0] sm:$0xff]  }
 0xccb   : > { %15871 = vmatprep.subr.bf16.mxu0 %v18331_v18 }
 0xccd   : > { %15852 = vmatpush3.bf16.msra.mxu1 %v17591_v54  ;;  %v17632_v54 = vld [vmem:[#allocation19 + $0xa8] sm:$0xff]  }
 0xcce   : > { %15872 = vmatpush3.bf16.msra.mxu0 %v17592_v57  ;;  %15853 = vmatprep.subr.bf16.mxu1 %v18331_v18  ;;  %v17633_v57 = vld [vmem:[#allocation19 + $0xb0] sm:$0xff]  }
 0xccf   : > { %15873 = vmatprep.subr.bf16.mxu0 %v18331_v18 }
 0xcd1   : > { %15854 = vmatpush3.bf16.msra.mxu1 %v17593_v37 }
 0xcd2   : > { %15874 = vmatpush3.bf16.msra.mxu0 %v17594_v59  ;;  %15855 = vmatprep.subr.bf16.mxu1 %v18331_v18 }
 0xcd3   : > { %15875 = vmatprep.subr.bf16.mxu0 %v18331_v18 }
 0xcd5   : > { %15856 = vmatpush3.bf16.msra.mxu1 %v17595_v60 }
 0xcd6   : > { %15876 = vmatpush3.bf16.msra.mxu0 %v17596_v61  ;;  %15857 = vmatprep.subr.bf16.mxu1 %v18331_v18 }
 0xcd7   : > { %15877 = vmatprep.subr.bf16.mxu0 %v18331_v18 }
 0xcd9   : > { %15858 = vmatpush3.bf16.msra.mxu1 %v17597_v62 }
 0xcda   : > { %15878 = vmatpush3.bf16.msra.mxu0 %v17598_v63  ;;  %15859 = vmatprep.subr.bf16.mxu1 %v18331_v18 }
 0xcdb   : > { %15879 = vmatprep.subr.bf16.mxu0 %v18331_v18 }
 0xcdd   : > { %15860 = vmatpush3.bf16.msra.mxu1 %v17599_v35 }
 0xcde   : > { %15880 = vmatpush3.bf16.msra.mxu0 %v17600_v58  ;;  %15861 = vmatprep.subr.bf16.mxu1 %v18331_v18 }
 0xcdf   : > { %15881 = vmatprep.subr.bf16.mxu0 %v18331_v18 }
 0xce1   : > { %15862 = vmatpush3.bf16.msra.mxu1 %v17601_v0 }
 0xce2   : > { %15882 = vmatpush3.bf16.msra.mxu0 %v17602_v1  ;;  %15887 = vmatprep.subr.bf16.mxu1 %v18331_v18 }
 0xce3   : > { %15907 = vmatprep.subr.bf16.mxu0 %v18331_v18 }
 0xce4   : > { %15864 = vmatmul.mubr.bf16.vlgmr.msra.gmra.mrb[44].mxu1 %v6465_v40 }
 0xce5   : > { %15884 = vmatmul.mubr.bf16.vlgmr.msra.gmra.mrb[52].mxu0 %v6576_v55  ;;  %15888 = vmatpush3.bf16.msra.mxu1 %v17603_v2 }
 0xce6   : > { %15908 = vmatpush3.bf16.msra.mxu0 %v17604_v3  ;;  %15889 = vmatprep.subr.bf16.mxu1 %v18331_v18 }
 0xce7   : > { %15909 = vmatprep.subr.bf16.mxu0 %v18331_v18  ;;  %15903 = vmatprep.mubr.msk.bf16.mxu1 %vm18332_vm0, %v18331_v18 }
 0xce8   : > { %15923 = vmatprep.mubr.msk.bf16.mxu0 %vm18332_vm0, %v18331_v18 }
 0xce9   : > { %15890 = vmatpush3.bf16.msra.mxu1 %v17605_v41 }
 0xcea   : > { %15910 = vmatpush3.bf16.msra.mxu0 %v17606_v4  ;;  %15891 = vmatprep.subr.bf16.mxu1 %v18331_v18 }
 0xceb   : > { %15911 = vmatprep.subr.bf16.mxu0 %v18331_v18 }
 0xced   : > { %15892 = vmatpush3.bf16.msra.mxu1 %v17607_v42 }
 0xcee   : > { %15912 = vmatpush3.bf16.msra.mxu0 %v17608_v5  ;;  %15893 = vmatprep.subr.bf16.mxu1 %v18331_v18 }
 0xcef   : > { %15913 = vmatprep.subr.bf16.mxu0 %v18331_v18 }
 0xcf1   : > { %15894 = vmatpush3.bf16.msra.mxu1 %v17609_v44 }
 0xcf2   : > { %15914 = vmatpush3.bf16.msra.mxu0 %v17610_v6  ;;  %15895 = vmatprep.subr.bf16.mxu1 %v18331_v18 }
 0xcf3   : > { %15915 = vmatprep.subr.bf16.mxu0 %v18331_v18 }
 0xcf5   : > { %15896 = vmatpush3.bf16.msra.mxu1 %v17611_v48 }
 0xcf6   : > { %15916 = vmatpush3.bf16.msra.mxu0 %v17612_v56  ;;  %15897 = vmatprep.subr.bf16.mxu1 %v18331_v18 }
 0xcf7   : > { %15917 = vmatprep.subr.bf16.mxu0 %v18331_v18 }
 0xcf9   : > { %15898 = vmatpush3.bf16.msra.mxu1 %v17613_v14 }
 0xcfa   : > { %15918 = vmatpush3.bf16.msra.mxu0 %v17614_v15  ;;  %15899 = vmatprep.subr.bf16.mxu1 %v18331_v18 }
 0xcfb   : > { %15919 = vmatprep.subr.bf16.mxu0 %v18331_v18 }
 0xcfd   : > { %15900 = vmatpush3.bf16.msra.mxu1 %v17615_v47 }
 0xcfe   : > { %15920 = vmatpush3.bf16.msra.mxu0 %v17616_v16  ;;  %15901 = vmatprep.subr.bf16.mxu1 %v18331_v18 }
 0xcff   : > { %15921 = vmatprep.subr.bf16.mxu0 %v18331_v18 }
 0xd01   : > { %15902 = vmatpush3.bf16.msra.mxu1 %v17617_v52 }
 0xd02   : > { %15922 = vmatpush3.bf16.msra.mxu0 %v17618_v17  ;;  %15927 = vmatprep.subr.bf16.mxu1 %v18331_v18 }
 0xd03   : > { %15947 = vmatprep.subr.bf16.mxu0 %v18331_v18 }
 0xd04   : > { %15904 = vmatmul.mubr.bf16.vlgmr.msra.gmra.mrb[48].mxu1 %v6687_v9 }
 0xd05   : > { %15924 = vmatmul.mubr.bf16.vlgmr.msra.gmra.mrb[56].mxu0 %v6812_v10  ;;  %15943 = vmatprep.mubr.msk.bf16.mxu1 %vm18332_vm0, %v18331_v18 }
 0xd06   : > { %15963 = vmatprep.mubr.msk.bf16.mxu0 %vm18332_vm0, %v18331_v18  ;;  %15928 = vmatpush3.bf16.msra.mxu1 %v17619_v20 }
 0xd07   : > { %15929 = vmatprep.subr.bf16.mxu1 %v18331_v18  ;;  %15948 = vmatpush3.bf16.msra.mxu0 %v17627_v27 }
 0xd08   : > { %15949 = vmatprep.subr.bf16.mxu0 %v18331_v18 }
 0xd0a   : > { %15930 = vmatpush3.bf16.msra.mxu1 %v17620_v21 }
 0xd0b   : > { %15931 = vmatprep.subr.bf16.mxu1 %v18331_v18  ;;  %15950 = vmatpush3.bf16.msra.mxu0 %v17628_v29  ;;  %v17634_v29 = vld [vmem:[#allocation19 + $0xb8] sm:$0xff]  }
 0xd0c   : > { %15951 = vmatprep.subr.bf16.mxu0 %v18331_v18 }
 0xd0e   : > { %15932 = vmatpush3.bf16.msra.mxu1 %v17621_v22 }
 0xd0f   : > { %15933 = vmatprep.subr.bf16.mxu1 %v18331_v18  ;;  %15952 = vmatpush3.bf16.msra.mxu0 %v17629_v30 }
 0xd10   : > { %15953 = vmatprep.subr.bf16.mxu0 %v18331_v18 }
 0xd12   : > { %15934 = vmatpush3.bf16.msra.mxu1 %v17622_v23 }
 0xd13   : > { %15935 = vmatprep.subr.bf16.mxu1 %v18331_v18  ;;  %15954 = vmatpush3.bf16.msra.mxu0 %v17630_v36  ;;  %v17640_v36 = vld [vmem:[#allocation8 + $0x550] sm:$0xff]  }
 0xd14   : > { %15955 = vmatprep.subr.bf16.mxu0 %v18331_v18 }
 0xd16   : > { %15936 = vmatpush3.bf16.msra.mxu1 %v17623_v24 }
 0xd17   : > { %15937 = vmatprep.subr.bf16.mxu1 %v18331_v18  ;;  %15956 = vmatpush3.bf16.msra.mxu0 %v17631_v39  ;;  %v17641_v39 = vld [vmem:[#allocation8 + $0x598] sm:$0xff]  }
 0xd18   : > { %15957 = vmatprep.subr.bf16.mxu0 %v18331_v18 }
 0xd1a   : > { %15938 = vmatpush3.bf16.msra.mxu1 %v17624_v25 }
 0xd1b   : > { %15939 = vmatprep.subr.bf16.mxu1 %v18331_v18  ;;  %15958 = vmatpush3.bf16.msra.mxu0 %v17632_v54  ;;  %v17642_v54 = vld [vmem:[#allocation8 + $0x558] sm:$0xff]  }
 0xd1c   : > { %15959 = vmatprep.subr.bf16.mxu0 %v18331_v18 }
 0xd1e   : > { %15940 = vmatpush3.bf16.msra.mxu1 %v17625_v26 }
 0xd1f   : > { %15941 = vmatprep.subr.bf16.mxu1 %v18331_v18  ;;  %15960 = vmatpush3.bf16.msra.mxu0 %v17633_v57  ;;  %v17643_v57 = vld [vmem:[#allocation8 + $0x5a0] sm:$0xff]  }
 0xd20   : > { %15961 = vmatprep.subr.bf16.mxu0 %v18331_v18 }
 0xd22   : > { %15942 = vmatpush3.bf16.msra.mxu1 %v17626_v28 }
 0xd23   : > { %15967 = vmatprep.subr.bf16.mxu1 %v18331_v18  ;;  %15962 = vmatpush3.bf16.msra.mxu0 %v17634_v29 }
 0xd24   : > { %15987 = vmatprep.subr.bf16.mxu0 %v18331_v18 }
 0xd77   : > { %v6145_v31 = vpop.f32.mrb[36].mxu1 }
 0xd78   : > { %v6234_v32 = vpop.f32.mrb[44].mxu0  ;;  %v15785_v34 = vpop.f32.mrb[37].mxu1 }
 0xd79   : > { %v6235_v33 = vadd.f32 %v6234_v32, %v6145_v31  ;;  %v15805_v11 = vpop.f32.mrb[45].mxu0  ;;  %v6148_v12 = vpop.f32.mrb[38].mxu1 }
 0xd7a   : > { %v6237_v43 = vpop.f32.mrb[46].mxu0  ;;  %v15786_v46 = vpop.f32.mrb[39].mxu1 }
 0xd7b   : > { %v6238_v45 = vadd.f32 %v6237_v43, %v6148_v12  ;;  %v15806_v13 = vpop.f32.mrb[47].mxu0  ;;  %v17635_v12 = vld [vmem:[#allocation8 + $0x580] sm:$0xff]   ;;  %v17638_v46 = vld [vmem:[#allocation8 + $0x548] sm:$0xff]  }
 0xd7c   : > { %v17636_v43 = vld [vmem:[#allocation8 + $0x540] sm:$0xff]   ;;  %v17639_v13 = vld [vmem:[#allocation8 + $0x590] sm:$0xff]  }
 0xd97   : > { %v6343_v37 = vpop.f32.mrb[40].mxu1 }
 0xd98   : > { %v6454_v59 = vpop.f32.mrb[48].mxu0  ;;  %v6350_v60 = vadd.f32 %v6343_v37, %v6235_v33  ;;  %v15825_v61 = vpop.f32.mrb[41].mxu1  ;;  %v17644_v37 = vld [vmem:[#allocation8 + $0x560] sm:$0xff]  }
 0xd99   : > { %v15845_v62 = vpop.f32.mrb[49].mxu0  ;;  %v6346_v63 = vpop.f32.mrb[42].mxu1  ;;  %v17647_v61 = vld [vmem:[#allocation8 + $0x5b0] sm:$0xff]  }
 0xd9a   : > { %v6457_v35 = vpop.f32.mrb[50].mxu0  ;;  %v6461_v58 = vadd.f32 %v6454_v59, %v6350_v60  ;;  %v6351_v0 = vadd.f32 %v6346_v63, %v6238_v45  ;;  %v15826_v1 = vpop.f32.mrb[43].mxu1  ;;  %v17637_v45 = vld [vmem:[#allocation8 + $0x588] sm:$0xff]   ;;  %v17648_v62 = vld [vmem:[#allocation8 + $0x570] sm:$0xff]   ;;  %v17649_v63 = vld [vmem:[#allocation8 + $0x5b8] sm:$0xff]  }
 0xd9b   : > { %v15846_v2 = vpop.f32.mrb[51].mxu0  ;;  %v17645_v59 = vld [vmem:[#allocation8 + $0x5a8] sm:$0xff]  }
 0xd9c   : > { %v6462_v3 = vadd.f32 %v6457_v35, %v6351_v0  ;;  %v17646_v60 = vld [vmem:[#allocation8 + $0x568] sm:$0xff]   ;;  %v17650_v35 = vld [vmem:[#allocation8 + $0x578] sm:$0xff]  }
 0xdb7   : > { %v6565_v40 = vpop.f32.mrb[44].mxu1 }
 0xdb8   : > { %v6676_v55 = vpop.f32.mrb[52].mxu0  ;;  %v6572_v41 = vadd.f32 %v6565_v40, %v6461_v58  ;;  %v15865_v4 = vpop.f32.mrb[45].mxu1 }
 0xdb9   : > { %v15885_v42 = vpop.f32.mrb[53].mxu0  ;;  %v6568_v5 = vpop.f32.mrb[46].mxu1  ;;  %v13461_v4 = vld [vmem:[#allocation16 + $0x2] ss:$0 sm:$0xff] }
 0xdba   : > { %v6679_v44 = vpop.f32.mrb[54].mxu0  ;;  %v6683_v6 = vadd.f32 %v6676_v55, %v6572_v41  ;;  %v6573_v48 = vadd.f32 %v6568_v5, %v6462_v3  ;;  %v15866_v56 = vpop.f32.mrb[47].mxu1 }
 0xdbb   : > { %v15886_v14 = vpop.f32.mrb[55].mxu0 }
 0xdbc   : > { %v6684_v15 = vadd.f32 %v6679_v44, %v6573_v48 }
 0xdd7   : > { %v6787_v47 = vpop.f32.mrb[48].mxu1 }
 0xdd8   : > { %v19083_v16 = vpop.f32.mrb[56].mxu0  ;;  %v6794_v49 = vadd.f32 %v6787_v47, %v6683_v6  ;;  %v15905_v50 = vpop.f32.mrb[49].mxu1 }
 0xdd9   : > { %v15925_v51 = vpop.f32.mrb[57].mxu0  ;;  %v6790_v52 = vpop.f32.mrb[50].mxu1  ;;  %v6921_v5 = vadd.f32 %v13461_v4, %v19083_v16  ;;  %v17653_v16 = vld [vmem:[#allocation8 + $0x5c8] sm:$0xff]  }
 0xdda   : > { %v19085_v17 = vpop.f32.mrb[58].mxu0  ;;  %v6795_v53 = vadd.f32 %v6790_v52, %v6684_v15  ;;  %v15906_v19 = vpop.f32.mrb[51].mxu1  ;;  %v19087_v9 = vadd.f32 %v13460_v7, %v6794_v49  ;;  %v17651_v49 = vld [vmem:[#allocation8 + $0x5c0] sm:$0xff]  }
 0xddb   : > { %v15926_v8 = vpop.f32.mrb[59].mxu0  ;;  %v6924_v44 = vadd.f32 %v13461_v4, %v19085_v17  ;;  %v17654_v17 = vld [vmem:[#allocation8 + $0x608] sm:$0xff]   ;;  %v17655_v19 = vld [vmem:[#allocation8 + $0x5d0] sm:$0xff]  }
 0xddc   : > { %v19089_v10 = vadd.f32 %v13460_v7, %v6795_v53  ;;  %v17652_v7 = vld [vmem:[#allocation8 + $0x600] sm:$0xff]   ;;  %v17656_v8 = vld [vmem:[#allocation8 + $0x610] sm:$0xff]  }
 0xdde   : > { %v6927_v20 = vadd.f32 %v19089_v10, %v19087_v9 }
 0xde0   : > { %v6928_v21 = vrot.slane %v6927_v20, 4 }
 0xde2   : > { %v6929_v22 = vadd.f32 %v6928_v21, %v6927_v20  ;;  %v17659_v20 = vld [vmem:[#allocation8 + $0x5e0] sm:$0xff]  }
 0xde3   : > { %v17660_v21 = vld [vmem:[#allocation8 + $0x620] sm:$0xff]  }
 0xde4   : > { %v6930_v23 = vrot.slane %v6929_v22, 2 }
 0xde6   : > { %v6931_v24 = vadd.f32 %v6930_v23, %v6929_v22  ;;  %v17661_v22 = vld [vmem:[#allocation8 + $0x5e8] sm:$0xff]  }
 0xde7   : > { %v17662_v23 = vld [vmem:[#allocation8 + $0x628] sm:$0xff]  }
 0xde8   : > { %v6932_v25 = vrot.slane %v6931_v24, 1 }
 0xdea   : > { %v6933_v26 = vadd.f32 %v6932_v25, %v6931_v24  ;;  %v17663_v24 = vld [vmem:[#allocation8 + $0x5f0] sm:$0xff]  }
 0xdeb   : > { %v17664_v25 = vld [vmem:[#allocation8 + $0x630] sm:$0xff]  }
 0xdec   : > { %v6935_v27 = vmul.f32 0.0625, %v6933_v26  ;;  %v17665_v26 = vld [vmem:[#allocation8 + $0x5f8] sm:$0xff]  }
 0xdee   : > { %v6936_v28 = vpack.c.bf16 %v6935_v27, %v6935_v27  ;;  %v17666_v27 = vld [vmem:[#allocation8 + $0x638] sm:$0xff]  }
 0xdf0   : > { %15944 = vmatmul.mubr.bf16.vlgmr.msra.gmra.mrb[52].mxu1 %v6936_v28 }
 0xdf1   : > { %15983 = vmatprep.mubr.msk.bf16.mxu1 %vm18332_vm0, %v18331_v18  ;;  %15968 = vmatpush3.bf16.msra.mxu1 %v17635_v12  ;;  %v17671_v12 = vld [vmem:[#allocation8 + $0x650] sm:$0xff]  }
 0xdf2   : > { %15969 = vmatprep.subr.bf16.mxu1 %v18331_v18 }
 0xdf5   : > { %15970 = vmatpush3.bf16.msra.mxu1 %v17637_v45  ;;  %v17673_v45 = vld [vmem:[#allocation8 + $0x658] sm:$0xff]  }
 0xdf6   : > { %15971 = vmatprep.subr.bf16.mxu1 %v18331_v18 }
 0xdf9   : > { %15972 = vmatpush3.bf16.msra.mxu1 %v17639_v13  ;;  %v17675_v13 = vld [vmem:[#allocation8 + $0x660] sm:$0xff]  }
 0xdfa   : > { %15973 = vmatprep.subr.bf16.mxu1 %v18331_v18 }
 0xdfd   : > { %15974 = vmatpush3.bf16.msra.mxu1 %v17641_v39  ;;  %v17677_v39 = vld [vmem:[#allocation8 + $0x668] sm:$0xff]  }
 0xdfe   : > { %15975 = vmatprep.subr.bf16.mxu1 %v18331_v18 }
 0xe01   : > { %15976 = vmatpush3.bf16.msra.mxu1 %v17643_v57  ;;  %v17679_v57 = vld [vmem:[#allocation8 + $0x670] sm:$0xff]  }
 0xe02   : > { %15977 = vmatprep.subr.bf16.mxu1 %v18331_v18 }
 0xe05   : > { %15978 = vmatpush3.bf16.msra.mxu1 %v17645_v59  ;;  %v17681_v59 = vld [vmem:[#allocation8 + $0x678] sm:$0xff]  }
 0xe06   : > { %15979 = vmatprep.subr.bf16.mxu1 %v18331_v18 }
 0xe09   : > { %15980 = vmatpush3.bf16.msra.mxu1 %v17647_v61 }
 0xe0a   : > { %15981 = vmatprep.subr.bf16.mxu1 %v18331_v18 }
 0xe0d   : > { %15982 = vmatpush3.bf16.msra.mxu1 %v17649_v63  ;;  %v17683_v63 = vld [vmem:[#allocation8 + $0x6c0] sm:$0xff]  }
 0xe0e   : > { %16007 = vmatprep.subr.bf16.mxu1 %v18331_v18 }
 0xec3   : > { %v7036_v30 = vpop.f32.mrb[52].mxu1 }
 0xec4   : > { %v7042_v31 = vmax.f32 %v7036_v30, 0.0  ;;  %v15945_v32 = vpop.f32.mrb[53].mxu1  ;;  %v17667_v30 = vld [vmem:[#allocation8 + $0x640] sm:$0xff]  }
 0xec5   : > { %v7039_v33 = vpop.f32.mrb[54].mxu1 }
 0xec6   : > { %v7043_v34 = vpack.c.bf16 %v7042_v31, %v7042_v31  ;;  %v15946_v11 = vpop.f32.mrb[55].mxu1  ;;  %v17668_v31 = vld [vmem:[#allocation8 + $0x680] sm:$0xff]  }
 0xec7   : > { %v17670_v11 = vld [vmem:[#allocation8 + $0x688] sm:$0xff]  }
 0xec8   : > { %15964 = vmatmul.mubr.bf16.vlgmr.msra.gmra.mrb[60].mxu0 %v7043_v34  ;;  %v17669_v34 = vld [vmem:[#allocation8 + $0x648] sm:$0xff]  }
 0xec9   : > { %16003 = vmatprep.mubr.msk.bf16.mxu0 %vm18332_vm0, %v18331_v18  ;;  %15988 = vmatpush3.bf16.msra.mxu0 %v17636_v43  ;;  %v17672_v43 = vld [vmem:[#allocation8 + $0x690] sm:$0xff]  }
 0xeca   : > { %15989 = vmatprep.subr.bf16.mxu0 %v18331_v18 }
 0xecd   : > { %15990 = vmatpush3.bf16.msra.mxu0 %v17638_v46  ;;  %v17674_v46 = vld [vmem:[#allocation8 + $0x698] sm:$0xff]  }
 0xece   : > { %15991 = vmatprep.subr.bf16.mxu0 %v18331_v18 }
 0xed1   : > { %15992 = vmatpush3.bf16.msra.mxu0 %v17640_v36  ;;  %v17676_v36 = vld [vmem:[#allocation8 + $0x6a0] sm:$0xff]  }
 0xed2   : > { %15993 = vmatprep.subr.bf16.mxu0 %v18331_v18 }
 0xed5   : > { %15994 = vmatpush3.bf16.msra.mxu0 %v17642_v54  ;;  %v17678_v54 = vld [vmem:[#allocation8 + $0x6a8] sm:$0xff]  }
 0xed6   : > { %15995 = vmatprep.subr.bf16.mxu0 %v18331_v18 }
 0xed9   : > { %15996 = vmatpush3.bf16.msra.mxu0 %v17644_v37  ;;  %v17680_v37 = vld [vmem:[#allocation8 + $0x6b0] sm:$0xff]  }
 0xeda   : > { %15997 = vmatprep.subr.bf16.mxu0 %v18331_v18 }
 0xedd   : > { %15998 = vmatpush3.bf16.msra.mxu0 %v17646_v60  ;;  %v17682_v60 = vld [vmem:[#allocation8 + $0x6b8] sm:$0xff]  }
 0xede   : > { %15999 = vmatprep.subr.bf16.mxu0 %v18331_v18 }
 0xee1   : > { %16000 = vmatpush3.bf16.msra.mxu0 %v17648_v62 }
 0xee2   : > { %16001 = vmatprep.subr.bf16.mxu0 %v18331_v18 }
 0xee5   : > { %16002 = vmatpush3.bf16.msra.mxu0 %v17650_v35 }
 0xee6   : > { %16027 = vmatprep.subr.bf16.mxu0 %v18331_v18 }
 0xf9b   : > { %v7143_v58 = vpop.f32.mrb[60].mxu0 }
 0xf9c   : > { %v13486_v0 = vmul.f32 -1.442695, %v7143_v58  ;;  %v15965_v1 = vpop.f32.mrb[61].mxu0 }
 0xf9d   : > { %v7146_v2 = vpop.f32.mrb[62].mxu0  ;;  %v17685_v1 = vld [vmem:[#allocation8 + $0x6d0] sm:$0xff]  }
 0xf9e   : > { %18051 = vpow2.f32 %v13486_v0  ;;  %v15966_v3 = vpop.f32.mrb[63].mxu0  ;;  %v17684_v0 = vld [vmem:[#allocation8 + $0x6c8] sm:$0xff]   ;;  %v17686_v2 = vld [vmem:[#allocation8 + $0x6d8] sm:$0xff]  }
 0xf9f   : > { %v17687_v3 = vld [vmem:[#allocation8 + $0x6e0] sm:$0xff]  }
 0xfa8   : > { %v18052_v40 = vpop.eup %18051 }
 0xfa9   : > { %v7152_v55 = vadd.f32 1.0, %v18052_v40  ;;  %v17688_v40 = vld [vmem:[#allocation8 + $0x6e8] sm:$0xff]  }
 0xfab   : > { %18053 = vrcp.f32 %v7152_v55  ;;  %v17689_v55 = vld [vmem:[#allocation8 + $0x6f0] sm:$0xff]  }
 0xfb5   : > { %v18054_v41 = vpop.eup %18053 }
 0xfb6   : > { %v7158_v42 = vrot.slane %v18054_v41, %v18802_v38  ;;  %v17690_v41 = vld [vmem:[#allocation8 + $0x6f8] sm:$0xff]  }
 0xfb8   : > { %v7159_v6 = vmul.f32 %v7158_v42, %v19087_v9  ;;  %v7160_v48 = vmul.f32 %v7158_v42, %v19089_v10  ;;  %v17657_v9 = vld [vmem:[#allocation8 + $0x5d8] sm:$0xff]  }
 0xfb9   : > { %v17658_v10 = vld [vmem:[#allocation8 + $0x618] sm:$0xff]  }
 0xfba   : > { %v7161_v56 = vadd.f32 %v7159_v6, %v6921_v5  ;;  %v7162_v14 = vadd.f32 %v7160_v48, %v6924_v44  ;;  %v17691_v5 = vld [vmem:[#allocation12 + $0x580] sm:$0xff]   ;;  %v17693_v6 = vld [vmem:[#allocation12 + $0x588] sm:$0xff]  }
 0xfbb   : > { %v17692_v44 = vld [vmem:[#allocation12 + $0x540] sm:$0xff]   ;;  %v17694_v48 = vld [vmem:[#allocation12 + $0x548] sm:$0xff]  }
 0xfbc   : > { %v7163_v15 = vmax.f32 %v7161_v56, 0.0  ;;  %v7164_v47 = vmax.f32 %v7162_v14, 0.0  ;;  %v17695_v56 = vld [vmem:[#allocation12 + $0x590] sm:$0xff]  }
 0xfbd   : > { %v17696_v14 = vld [vmem:[#allocation12 + $0x550] sm:$0xff]  }
 0xfbe   : > { %7167 = vst [vmem:[#allocation4 + $0x3] sm:$0xff] %v7163_v15  ;;  %7168 = vst [vmem:[#allocation4 + $0xb] sm:$0xff] %v7164_v47  ;;  %v17697_v15 = vld [vmem:[#allocation12 + $0x598] sm:$0xff]  }
 0xfbf   : > { %v17698_v47 = vld [vmem:[#allocation12 + $0x558] sm:$0xff]  }
 0xfc5   : > { %v7189_v50 = vld [vmem:[#allocation4 + $0x1] ss:$2 sm:$0xff]  ;;  %v7169_v51 = vld [vmem:[#allocation4] ss:$2 sm:$0xff] }
 0xfc6   : > { %v7190_v52 = vpack.c.bf16 %v7189_v50, %v7189_v50  ;;  %v7170_v53 = vpack.c.bf16 %v7169_v51, %v7169_v51  ;;  %v7385_v28 = vld [vmem:[#allocation4 + $0x2] ss:$2 sm:$0xff]  ;;  %v7494_v29 = vld [vmem:[#allocation4 + $0x3] ss:$2 sm:$0xff] }
 0xfc7   : > { %v7386_v32 = vpack.c.bf16 %v7385_v28, %v7385_v28  ;;  %v7495_v33 = vpack.c.bf16 %v7494_v29, %v7494_v29  ;;  %v7603_v61 = vld [vmem:[#allocation4 + $0x4] ss:$2 sm:$0xff]  ;;  %v7712_v62 = vld [vmem:[#allocation4 + $0x5] ss:$2 sm:$0xff] }
 0xfc8   : > { %15984 = vmatmul.mubr.bf16.vlgmr.msra.gmra.mrb[56].mxu1 %v7190_v52  ;;  %16004 = vmatmul.mubr.bf16.vlgmr.msra.gmra.mrb[64].mxu0 %v7170_v53  ;;  %v7604_v35 = vpack.c.bf16 %v7603_v61, %v7603_v61  ;;  %v7713_v58 = vpack.c.bf16 %v7712_v62, %v7712_v62  ;;  %v7821_v4 = vld [vmem:[#allocation4 + $0x6] ss:$2 sm:$0xff]  ;;  %v17703_v52 = vld [vmem:[#allocation12 + $0x5b0] sm:$0xff]  }
 0xfc9   : > { %16008 = vmatpush3.bf16.msra.mxu1 %v17651_v49  ;;  %16028 = vmatpush3.bf16.msra.mxu0 %v17652_v7  ;;  %v7822_v42 = vpack.c.bf16 %v7821_v4, %v7821_v4  ;;  %v17699_v49 = vld [vmem:[#allocation12 + $0x5a0] sm:$0xff]   ;;  %v17701_v51 = vld [vmem:[#allocation12 + $0x5a8] sm:$0xff]   ;;  %v17704_v53 = vld [vmem:[#allocation12 + $0x570] sm:$0xff]  }
 0xfca   : > { %16009 = vmatprep.subr.bf16.mxu1 %v18331_v18  ;;  %16029 = vmatprep.subr.bf16.mxu0 %v18331_v18  ;;  %v17700_v50 = vld [vmem:[#allocation12 + $0x560] sm:$0xff]   ;;  %v17702_v7 = vld [vmem:[#allocation12 + $0x568] sm:$0xff]  }
 0xfcb   : > { %16023 = vmatprep.mubr.msk.bf16.mxu1 %vm18332_vm0, %v18331_v18  ;;  %16043 = vmatprep.mubr.msk.bf16.mxu0 %vm18332_vm0, %v18331_v18 }
 0xfcd   : > { %16010 = vmatpush3.bf16.msra.mxu1 %v17653_v16  ;;  %16030 = vmatpush3.bf16.msra.mxu0 %v17654_v17  ;;  %v17705_v16 = vld [vmem:[#allocation12 + $0x5b8] sm:$0xff]  }
 0xfce   : > { %16011 = vmatprep.subr.bf16.mxu1 %v18331_v18  ;;  %16031 = vmatprep.subr.bf16.mxu0 %v18331_v18  ;;  %v17706_v17 = vld [vmem:[#allocation12 + $0x578] sm:$0xff]  }
 0xfd1   : > { %16012 = vmatpush3.bf16.msra.mxu1 %v17655_v19  ;;  %16032 = vmatpush3.bf16.msra.mxu0 %v17656_v8 }
 0xfd2   : > { %16013 = vmatprep.subr.bf16.mxu1 %v18331_v18  ;;  %16033 = vmatprep.subr.bf16.mxu0 %v18331_v18 }
 0xfd5   : > { %16014 = vmatpush3.bf16.msra.mxu1 %v17657_v9  ;;  %16034 = vmatpush3.bf16.msra.mxu0 %v17658_v10 }
 0xfd6   : > { %16015 = vmatprep.subr.bf16.mxu1 %v18331_v18  ;;  %16035 = vmatprep.subr.bf16.mxu0 %v18331_v18 }
 0xfd9   : > { %16016 = vmatpush3.bf16.msra.mxu1 %v17659_v20  ;;  %16036 = vmatpush3.bf16.msra.mxu0 %v17660_v21 }
 0xfda   : > { %16017 = vmatprep.subr.bf16.mxu1 %v18331_v18  ;;  %16037 = vmatprep.subr.bf16.mxu0 %v18331_v18 }
 0xfdd   : > { %16018 = vmatpush3.bf16.msra.mxu1 %v17661_v22  ;;  %16038 = vmatpush3.bf16.msra.mxu0 %v17662_v23 }
 0xfde   : > { %16019 = vmatprep.subr.bf16.mxu1 %v18331_v18  ;;  %16039 = vmatprep.subr.bf16.mxu0 %v18331_v18 }
 0xfe1   : > { %16020 = vmatpush3.bf16.msra.mxu1 %v17663_v24  ;;  %16040 = vmatpush3.bf16.msra.mxu0 %v17664_v25 }
 0xfe2   : > { %16021 = vmatprep.subr.bf16.mxu1 %v18331_v18  ;;  %16041 = vmatprep.subr.bf16.mxu0 %v18331_v18 }
 0xfe5   : > { %16022 = vmatpush3.bf16.msra.mxu1 %v17665_v26  ;;  %16042 = vmatpush3.bf16.msra.mxu0 %v17666_v27 }
 0xfe6   : > { %16047 = vmatprep.subr.bf16.mxu1 %v18331_v18  ;;  %16067 = vmatprep.subr.bf16.mxu0 %v18331_v18 }
 0xfe8   : > { %16024 = vmatmul.mubr.bf16.vlgmr.msra.gmra.mrb[60].mxu1 %v7386_v32  ;;  %16044 = vmatmul.mubr.bf16.vlgmr.msra.gmra.mrb[68].mxu0 %v7495_v33 }
 0xfe9   : > { %16048 = vmatpush3.bf16.msra.mxu1 %v17667_v30  ;;  %16068 = vmatpush3.bf16.msra.mxu0 %v17668_v31 }
 0xfea   : > { %16049 = vmatprep.subr.bf16.mxu1 %v18331_v18  ;;  %16069 = vmatprep.subr.bf16.mxu0 %v18331_v18 }
 0xfeb   : > { %16063 = vmatprep.mubr.msk.bf16.mxu1 %vm18332_vm0, %v18331_v18  ;;  %16083 = vmatprep.mubr.msk.bf16.mxu0 %vm18332_vm0, %v18331_v18 }
 0xfed   : > { %16050 = vmatpush3.bf16.msra.mxu1 %v17669_v34  ;;  %16070 = vmatpush3.bf16.msra.mxu0 %v17670_v11 }
 0xfee   : > { %16051 = vmatprep.subr.bf16.mxu1 %v18331_v18  ;;  %16071 = vmatprep.subr.bf16.mxu0 %v18331_v18 }
 0xff1   : > { %16052 = vmatpush3.bf16.msra.mxu1 %v17671_v12  ;;  %16072 = vmatpush3.bf16.msra.mxu0 %v17672_v43 }
 0xff2   : > { %16053 = vmatprep.subr.bf16.mxu1 %v18331_v18  ;;  %16073 = vmatprep.subr.bf16.mxu0 %v18331_v18 }
 0xff5   : > { %16054 = vmatpush3.bf16.msra.mxu1 %v17673_v45  ;;  %16074 = vmatpush3.bf16.msra.mxu0 %v17674_v46 }
 0xff6   : > { %16055 = vmatprep.subr.bf16.mxu1 %v18331_v18  ;;  %16075 = vmatprep.subr.bf16.mxu0 %v18331_v18 }
 0xff9   : > { %16056 = vmatpush3.bf16.msra.mxu1 %v17675_v13  ;;  %16076 = vmatpush3.bf16.msra.mxu0 %v17676_v36 }
 0xffa   : > { %16057 = vmatprep.subr.bf16.mxu1 %v18331_v18  ;;  %16077 = vmatprep.subr.bf16.mxu0 %v18331_v18 }
 0xffd   : > { %16058 = vmatpush3.bf16.msra.mxu1 %v17677_v39  ;;  %16078 = vmatpush3.bf16.msra.mxu0 %v17678_v54 }
 0xffe   : > { %16059 = vmatprep.subr.bf16.mxu1 %v18331_v18  ;;  %16079 = vmatprep.subr.bf16.mxu0 %v18331_v18 }
0x1001   : > { %16060 = vmatpush3.bf16.msra.mxu1 %v17679_v57  ;;  %16080 = vmatpush3.bf16.msra.mxu0 %v17680_v37 }
0x1002   : > { %16061 = vmatprep.subr.bf16.mxu1 %v18331_v18  ;;  %16081 = vmatprep.subr.bf16.mxu0 %v18331_v18 }
0x1005   : > { %16062 = vmatpush3.bf16.msra.mxu1 %v17681_v59  ;;  %16082 = vmatpush3.bf16.msra.mxu0 %v17682_v60  ;;  %v13543_v59 = vld [vmem:[#allocation10 + $0x3] ss:$0 sm:$0xff] }
0x1006   : > { %16087 = vmatprep.subr.bf16.mxu1 %v18331_v18  ;;  %16107 = vmatprep.subr.bf16.mxu0 %v18331_v18 }
0x1008   : > { %16064 = vmatmul.mubr.bf16.vlgmr.msra.gmra.mrb[64].mxu1 %v7604_v35  ;;  %16084 = vmatmul.mubr.bf16.vlgmr.msra.gmra.mrb[72].mxu0 %v7713_v58 }
0x1009   : > { %16088 = vmatpush3.bf16.msra.mxu1 %v17683_v63  ;;  %16103 = vmatprep.mubr.msk.bf16.mxu1 %vm18332_vm0, %v18331_v18 }
0x100a   : > { %16089 = vmatprep.subr.bf16.mxu1 %v18331_v18  ;;  %16123 = vmatprep.mubr.msk.bf16.mxu0 %vm18332_vm0, %v18331_v18 }
0x100b   : > { %16108 = vmatpush3.bf16.msra.mxu0 %v17691_v5 }
0x100c   : > { %16109 = vmatprep.subr.bf16.mxu0 %v18331_v18 }
0x100d   : > { %16090 = vmatpush3.bf16.msra.mxu1 %v17684_v0  ;;  %v17707_v0 = vld [vmem:[#allocation12 + $0x5c0] sm:$0xff]  }
0x100e   : > { %16091 = vmatprep.subr.bf16.mxu1 %v18331_v18 }
0x100f   : > { %16110 = vmatpush3.bf16.msra.mxu0 %v17693_v6  ;;  %v17710_v6 = vld [vmem:[#allocation12 + $0x608] sm:$0xff]  }
0x1010   : > { %16111 = vmatprep.subr.bf16.mxu0 %v18331_v18 }
0x1011   : > { %16092 = vmatpush3.bf16.msra.mxu1 %v17685_v1  ;;  %v17708_v1 = vld [vmem:[#allocation12 + $0x600] sm:$0xff]  }
0x1012   : > { %16093 = vmatprep.subr.bf16.mxu1 %v18331_v18 }
0x1013   : > { %16112 = vmatpush3.bf16.msra.mxu0 %v17695_v56  ;;  %v17712_v56 = vld [vmem:[#allocation12 + $0x610] sm:$0xff]  }
0x1014   : > { %16113 = vmatprep.subr.bf16.mxu0 %v18331_v18 }
0x1015   : > { %16094 = vmatpush3.bf16.msra.mxu1 %v17686_v2 }
0x1016   : > { %16095 = vmatprep.subr.bf16.mxu1 %v18331_v18 }
0x1017   : > { %16114 = vmatpush3.bf16.msra.mxu0 %v17697_v15  ;;  %v17714_v15 = vld [vmem:[#allocation12 + $0x618] sm:$0xff]  }
0x1018   : > { %16115 = vmatprep.subr.bf16.mxu0 %v18331_v18 }
0x1019   : > { %16096 = vmatpush3.bf16.msra.mxu1 %v17687_v3 }
0x101a   : > { %16097 = vmatprep.subr.bf16.mxu1 %v18331_v18 }
0x101b   : > { %16116 = vmatpush3.bf16.msra.mxu0 %v17699_v49  ;;  %v17716_v49 = vld [vmem:[#allocation12 + $0x620] sm:$0xff]  }
0x101c   : > { %16117 = vmatprep.subr.bf16.mxu0 %v18331_v18 }
0x101d   : > { %16098 = vmatpush3.bf16.msra.mxu1 %v17688_v40 }
0x101e   : > { %16099 = vmatprep.subr.bf16.mxu1 %v18331_v18 }
0x101f   : > { %16118 = vmatpush3.bf16.msra.mxu0 %v17701_v51  ;;  %v17718_v51 = vld [vmem:[#allocation12 + $0x628] sm:$0xff]  }
0x1020   : > { %16119 = vmatprep.subr.bf16.mxu0 %v18331_v18 }
0x1021   : > { %16100 = vmatpush3.bf16.msra.mxu1 %v17689_v55 }
0x1022   : > { %16101 = vmatprep.subr.bf16.mxu1 %v18331_v18 }
0x1023   : > { %16120 = vmatpush3.bf16.msra.mxu0 %v17703_v52  ;;  %v17720_v52 = vld [vmem:[#allocation12 + $0x630] sm:$0xff]  }
0x1024   : > { %16121 = vmatprep.subr.bf16.mxu0 %v18331_v18 }
0x1025   : > { %16102 = vmatpush3.bf16.msra.mxu1 %v17690_v41 }
0x1026   : > { %16127 = vmatprep.subr.bf16.mxu1 %v18331_v18 }
0x1027   : > { %16122 = vmatpush3.bf16.msra.mxu0 %v17705_v16  ;;  %v17722_v16 = vld [vmem:[#allocation12 + $0x638] sm:$0xff]  }
0x1028   : > { %16104 = vmatmul.mubr.bf16.vlgmr.msra.gmra.mrb[68].mxu1 %v7822_v42  ;;  %16147 = vmatprep.subr.bf16.mxu0 %v18331_v18 }
0x1029   : > { %16143 = vmatprep.mubr.msk.bf16.mxu1 %vm18332_vm0, %v18331_v18  ;;  %16128 = vmatpush3.bf16.msra.mxu1 %v17692_v44  ;;  %v17709_v44 = vld [vmem:[#allocation12 + $0x5c8] sm:$0xff]  }
0x102a   : > { %16129 = vmatprep.subr.bf16.mxu1 %v18331_v18 }
0x102d   : > { %16130 = vmatpush3.bf16.msra.mxu1 %v17694_v48  ;;  %v17711_v48 = vld [vmem:[#allocation12 + $0x5d0] sm:$0xff]  }
0x102e   : > { %16131 = vmatprep.subr.bf16.mxu1 %v18331_v18 }
0x1031   : > { %16132 = vmatpush3.bf16.msra.mxu1 %v17696_v14  ;;  %v17713_v14 = vld [vmem:[#allocation12 + $0x5d8] sm:$0xff]  }
0x1032   : > { %16133 = vmatprep.subr.bf16.mxu1 %v18331_v18 }
0x1035   : > { %16134 = vmatpush3.bf16.msra.mxu1 %v17698_v47  ;;  %v17715_v47 = vld [vmem:[#allocation12 + $0x5e0] sm:$0xff]  }
0x1036   : > { %16135 = vmatprep.subr.bf16.mxu1 %v18331_v18 }
0x1039   : > { %16136 = vmatpush3.bf16.msra.mxu1 %v17700_v50  ;;  %v17717_v50 = vld [vmem:[#allocation12 + $0x5e8] sm:$0xff]  }
0x103a   : > { %16137 = vmatprep.subr.bf16.mxu1 %v18331_v18 }
0x103d   : > { %16138 = vmatpush3.bf16.msra.mxu1 %v17702_v7  ;;  %v17719_v7 = vld [vmem:[#allocation12 + $0x5f0] sm:$0xff]  }
0x103e   : > { %16139 = vmatprep.subr.bf16.mxu1 %v18331_v18 }
0x1041   : > { %16140 = vmatpush3.bf16.msra.mxu1 %v17704_v53  ;;  %v17721_v53 = vld [vmem:[#allocation12 + $0x5f8] sm:$0xff]  }
0x1042   : > { %16141 = vmatprep.subr.bf16.mxu1 %v18331_v18 }
0x1045   : > { %16142 = vmatpush3.bf16.msra.mxu1 %v17706_v17  ;;  %v17723_v17 = vld [vmem:[#allocation12 + $0x640] sm:$0xff]  }
0x1046   : > { %16167 = vmatprep.subr.bf16.mxu1 %v18331_v18 }
0x109b   : > { %v7290_v19 = vpop.f32.mrb[56].mxu1  ;;  %v7378_v8 = vpop.f32.mrb[64].mxu0 }
0x109c   : > { %v7379_v9 = vadd.f32 %v7378_v8, %v7290_v19  ;;  %v15985_v10 = vpop.f32.mrb[57].mxu1  ;;  %v16005_v20 = vpop.f32.mrb[65].mxu0  ;;  %v17724_v19 = vld [vmem:[#allocation12 + $0x680] sm:$0xff]  }
0x109d   : > { %v7293_v21 = vpop.f32.mrb[58].mxu1  ;;  %v7381_v22 = vpop.f32.mrb[66].mxu0  ;;  %v17725_v10 = vld [vmem:[#allocation12 + $0x648] sm:$0xff]  }
0x109e   : > { %v15986_v23 = vpop.f32.mrb[59].mxu1  ;;  %v16006_v24 = vpop.f32.mrb[67].mxu0  ;;  %v17726_v20 = vld [vmem:[#allocation12 + $0x688] sm:$0xff]   ;;  %v17727_v21 = vld [vmem:[#allocation12 + $0x650] sm:$0xff]  }
0x109f   : > { %v17728_v22 = vld [vmem:[#allocation12 + $0x690] sm:$0xff]   ;;  %v17729_v23 = vld [vmem:[#allocation12 + $0x658] sm:$0xff]  }
0x10a0   : > { %v17730_v24 = vld [vmem:[#allocation12 + $0x698] sm:$0xff]  }
0x10bb   : > { %v7486_v25 = vpop.f32.mrb[60].mxu1  ;;  %v7595_v26 = vpop.f32.mrb[68].mxu0 }
0x10bc   : > { %v7492_v27 = vadd.f32 %v7486_v25, %v7379_v9  ;;  %v16025_v28 = vpop.f32.mrb[61].mxu1  ;;  %v16045_v29 = vpop.f32.mrb[69].mxu0  ;;  %v17731_v25 = vld [vmem:[#allocation12 + $0x660] sm:$0xff]  }
0x10bd   : > { %v7489_v30 = vpop.f32.mrb[62].mxu1  ;;  %v7598_v31 = vpop.f32.mrb[70].mxu0  ;;  %v17734_v28 = vld [vmem:[#allocation12 + $0x6a8] sm:$0xff]   ;;  %v17735_v29 = vld [vmem:[#allocation12 + $0x670] sm:$0xff]  }
0x10be   : > { %v7601_v32 = vadd.f32 %v7595_v26, %v7492_v27  ;;  %v16026_v33 = vpop.f32.mrb[63].mxu1  ;;  %v16046_v34 = vpop.f32.mrb[71].mxu0  ;;  %v17732_v26 = vld [vmem:[#allocation12 + $0x6a0] sm:$0xff]   ;;  %v17733_v27 = vld [vmem:[#allocation12 + $0x668] sm:$0xff]   ;;  %v17736_v30 = vld [vmem:[#allocation12 + $0x6b0] sm:$0xff]  }
0x10bf   : > { %v17737_v31 = vld [vmem:[#allocation12 + $0x678] sm:$0xff]   ;;  %v17739_v33 = vld [vmem:[#allocation12 + $0x6c0] sm:$0xff]  }
0x10c0   : > { %v17740_v34 = vld [vmem:[#allocation15 + $0xc0] sm:$0xff]  }
0x10db   : > { %v7704_v11 = vpop.f32.mrb[64].mxu1  ;;  %v7813_v12 = vpop.f32.mrb[72].mxu0 }
0x10dc   : > { %v7710_v43 = vadd.f32 %v7704_v11, %v7601_v32  ;;  %v16065_v45 = vpop.f32.mrb[65].mxu1  ;;  %v16085_v46 = vpop.f32.mrb[73].mxu0  ;;  %v17738_v32 = vld [vmem:[#allocation12 + $0x6b8] sm:$0xff]  }
0x10dd   : > { %v7707_v13 = vpop.f32.mrb[66].mxu1  ;;  %v7816_v36 = vpop.f32.mrb[74].mxu0  ;;  %v17742_v45 = vld [vmem:[#allocation15 + $0xc8] sm:$0xff]  }
0x10de   : > { %v7819_v39 = vadd.f32 %v7813_v12, %v7710_v43  ;;  %v16066_v54 = vpop.f32.mrb[67].mxu1  ;;  %v16086_v57 = vpop.f32.mrb[75].mxu0  ;;  %v17741_v43 = vld [vmem:[#allocation12 + $0x6c8] sm:$0xff]   ;;  %v17743_v46 = vld [vmem:[#allocation12 + $0x6d0] sm:$0xff]   ;;  %v17745_v36 = vld [vmem:[#allocation12 + $0x6d8] sm:$0xff]  }
0x10df   : > { %v17744_v13 = vld [vmem:[#allocation15 + $0xd0] sm:$0xff]   ;;  %v17747_v54 = vld [vmem:[#allocation12 + $0x6e0] sm:$0xff]  }
0x10e0   : > { %v17748_v57 = vld [vmem:[#allocation15 + $0xe0] sm:$0xff]  }
0x10fb   : > { %v7922_v37 = vpop.f32.mrb[68].mxu1 }
0x10fc   : > { %v7928_v60 = vadd.f32 %v7922_v37, %v7819_v39  ;;  %v16105_v61 = vpop.f32.mrb[69].mxu1  ;;  %v17746_v39 = vld [vmem:[#allocation15 + $0xd8] sm:$0xff]   ;;  %v17749_v37 = vld [vmem:[#allocation12 + $0x6e8] sm:$0xff]  }
0x10fd   : > { %v7925_v62 = vpop.f32.mrb[70].mxu1  ;;  %v17752_v61 = vld [vmem:[#allocation15 + $0xf0] sm:$0xff]  }
0x10fe   : > { %v7937_v63 = vadd.f32 %v13543_v59, %v7928_v60  ;;  %v16106_v35 = vpop.f32.mrb[71].mxu1  ;;  %v17750_v59 = vld [vmem:[#allocation15 + $0xe8] sm:$0xff]   ;;  %v8705_v62 = vld [vmem:[#allocation4 + $0x3] ss:$2 sm:$0xff] }
0x10ff   : > { %v17751_v60 = vld [vmem:[#allocation12 + $0x6f0] sm:$0xff]   ;;  %v17753_v35 = vld [vmem:[#allocation12 + $0x6f8] sm:$0xff]  }
0x1100   : > { %v19189_v58 = vmax.f32 %v7937_v63, 0.0  ;;  %v8706_v63 = vld [vmem:[#allocation4 + $0x4] ss:$2 sm:$0xff] }
0x1102   : > { %7941 = vst [vmem:[#allocation7 + $0x3] sm:$0xff] %v19189_v58  ;;  %v8265_v9 = vpack.c.bf16 %v19189_v58, %v19189_v58  ;;  %v17754_v58 = vld [vmem:[#allocation15 + $0xf8] sm:$0xff]  }
0x1109   : > { %v7961_v2 = vld [vmem:[#allocation7 + $0x1] sm:$0xff] }
0x110a   : > { %v7942_v3 = vld [vmem:[#allocation7] sm:$0xff]  ;;  %v7962_v55 = vpack.c.bf16 %v7961_v2, %v7961_v2 }
0x110b   : > { %v8156_v40 = vld [vmem:[#allocation7 + $0x2] sm:$0xff]  ;;  %v7943_v41 = vpack.c.bf16 %v7942_v3, %v7942_v3  ;;  %v17755_v3 = vld [vmem:[#allocation18 + $0xc0] sm:$0xff]  }
0x110c   : > { %9829 = vst [vmem:[#allocation7] sm:$0x7] %v18331_v18  ;;  %v19193_v4 = vld [vmem:[#allocation7 + $0x4] sm:$0xff]  ;;  %16124 = vmatmul.mubr.bf16.vlgmr.msra.gmra.mrb[76].mxu0 %v7962_v55  ;;  %v8157_v8 = vpack.c.bf16 %v8156_v40, %v8156_v40 }
0x110d   : > { %v19195_v42 = vld [vmem:[#allocation7 + $0x5] sm:$0xff]  ;;  %16144 = vmatmul.mubr.bf16.vlgmr.msra.gmra.mrb[72].mxu1 %v7943_v41  ;;  %16148 = vmatpush3.bf16.msra.mxu0 %v17707_v0  ;;  %v8373_v11 = vpack.c.bf16 %v19193_v4, %v19193_v4  ;;  %v8707_v0 = vmax.f32 %v8705_v62, %v8706_v63  ;;  %v17758_v41 = vld [vmem:[#allocation18 + $0xd8] sm:$0xff]   ;;  %v17759_v4 = vld [vmem:[#allocation18 + $0xe0] sm:$0xff]  }
0x110e   : > { %v19197_v5 = vld [vmem:[#allocation7 + $0x6] sm:$0xff]  ;;  %16168 = vmatpush3.bf16.msra.mxu1 %v17708_v1  ;;  %16149 = vmatprep.subr.bf16.mxu0 %v18331_v18  ;;  %v8481_v12 = vpack.c.bf16 %v19195_v42, %v19195_v42 }
0x110f   : > { %9830 = vst [vmem:[#allocation7 + $0x7] sm:$0x7] %v18331_v18  ;;  %16169 = vmatprep.subr.bf16.mxu1 %v18331_v18  ;;  %16163 = vmatprep.mubr.msk.bf16.mxu0 %vm18332_vm0, %v18331_v18  ;;  %v8589_v1 = vpack.c.bf16 %v19197_v5, %v19197_v5  ;;  %v8708_v2 = vpack.c.bf16 %v8707_v0, %v8707_v0  ;;  %v17756_v40 = vld [vmem:[#allocation18 + $0xc8] sm:$0xff]   ;;  %v17757_v55 = vld [vmem:[#allocation18 + $0xd0] sm:$0xff]  }
0x1110   : > { %16183 = vmatprep.mubr.msk.bf16.mxu1 %vm18332_vm0, %v18331_v18  ;;  %v17760_v42 = vld [vmem:[#allocation18 + $0xe8] sm:$0xff]   ;;  %v17761_v5 = vld [vmem:[#allocation18 + $0xf0] sm:$0xff]  }
0x1111   : > { %16150 = vmatpush3.bf16.msra.mxu0 %v17709_v44  ;;  %v17762_v44 = vld [vmem:[#allocation18 + $0xf8] sm:$0xff]  }
0x1112   : > { %16170 = vmatpush3.bf16.msra.mxu1 %v17710_v6  ;;  %16151 = vmatprep.subr.bf16.mxu0 %v18331_v18  ;;  %v17763_v6 = vld [vmem:[#allocation19 + $0xc0] sm:$0xff]  }
0x1113   : > { %16171 = vmatprep.subr.bf16.mxu1 %v18331_v18 }
0x1115   : > { %16152 = vmatpush3.bf16.msra.mxu0 %v17711_v48  ;;  %v17764_v48 = vld [vmem:[#allocation19 + $0xc8] sm:$0xff]  }
0x1116   : > { %16172 = vmatpush3.bf16.msra.mxu1 %v17712_v56  ;;  %16153 = vmatprep.subr.bf16.mxu0 %v18331_v18  ;;  %v17765_v56 = vld [vmem:[#allocation19 + $0xd0] sm:$0xff]  }
0x1117   : > { %16173 = vmatprep.subr.bf16.mxu1 %v18331_v18 }
0x1119   : > { %16154 = vmatpush3.bf16.msra.mxu0 %v17713_v14  ;;  %v17766_v14 = vld [vmem:[#allocation19 + $0xd8] sm:$0xff]  }
0x111a   : > { %16174 = vmatpush3.bf16.msra.mxu1 %v17714_v15  ;;  %16155 = vmatprep.subr.bf16.mxu0 %v18331_v18 }
0x111b   : > { %16175 = vmatprep.subr.bf16.mxu1 %v18331_v18 }
0x111d   : > { %16156 = vmatpush3.bf16.msra.mxu0 %v17715_v47 }
0x111e   : > { %16176 = vmatpush3.bf16.msra.mxu1 %v17716_v49  ;;  %16157 = vmatprep.subr.bf16.mxu0 %v18331_v18 }
0x111f   : > { %16177 = vmatprep.subr.bf16.mxu1 %v18331_v18 }
0x1121   : > { %16158 = vmatpush3.bf16.msra.mxu0 %v17717_v50 }
0x1122   : > { %16178 = vmatpush3.bf16.msra.mxu1 %v17718_v51  ;;  %16159 = vmatprep.subr.bf16.mxu0 %v18331_v18 }
0x1123   : > { %16179 = vmatprep.subr.bf16.mxu1 %v18331_v18 }
0x1125   : > { %16160 = vmatpush3.bf16.msra.mxu0 %v17719_v7 }
0x1126   : > { %16180 = vmatpush3.bf16.msra.mxu1 %v17720_v52  ;;  %16161 = vmatprep.subr.bf16.mxu0 %v18331_v18 }
0x1127   : > { %16181 = vmatprep.subr.bf16.mxu1 %v18331_v18 }
0x1129   : > { %16162 = vmatpush3.bf16.msra.mxu0 %v17721_v53 }
0x112a   : > { %16182 = vmatpush3.bf16.msra.mxu1 %v17722_v16  ;;  %16187 = vmatprep.subr.bf16.mxu0 %v18331_v18 }
0x112b   : > { %16207 = vmatprep.subr.bf16.mxu1 %v18331_v18 }
0x112c   : > { %16164 = vmatmul.mubr.bf16.vlgmr.msra.gmra.mrb[80].mxu0 %v8157_v8  ;;  %v17769_v8 = vld [vmem:[#allocation19 + $0xf0] sm:$0xff]  }
0x112d   : > { %16184 = vmatmul.mubr.bf16.vlgmr.msra.gmra.mrb[76].mxu1 %v8265_v9  ;;  %16188 = vmatpush3.bf16.msra.mxu0 %v17723_v17  ;;  %v17767_v17 = vld [vmem:[#allocation19 + $0xe0] sm:$0xff]  }
0x112e   : > { %16208 = vmatpush3.bf16.msra.mxu1 %v17724_v19  ;;  %16189 = vmatprep.subr.bf16.mxu0 %v18331_v18  ;;  %v17768_v19 = vld [vmem:[#allocation19 + $0xe8] sm:$0xff]  }
0x112f   : > { %16209 = vmatprep.subr.bf16.mxu1 %v18331_v18  ;;  %16203 = vmatprep.mubr.msk.bf16.mxu0 %vm18332_vm0, %v18331_v18 }
0x1130   : > { %16223 = vmatprep.mubr.msk.bf16.mxu1 %vm18332_vm0, %v18331_v18 }
0x1131   : > { %16190 = vmatpush3.bf16.msra.mxu0 %v17725_v10 }
0x1132   : > { %16210 = vmatpush3.bf16.msra.mxu1 %v17726_v20  ;;  %16191 = vmatprep.subr.bf16.mxu0 %v18331_v18 }
0x1133   : > { %16211 = vmatprep.subr.bf16.mxu1 %v18331_v18 }
0x1135   : > { %16192 = vmatpush3.bf16.msra.mxu0 %v17727_v21 }
0x1136   : > { %16212 = vmatpush3.bf16.msra.mxu1 %v17728_v22  ;;  %16193 = vmatprep.subr.bf16.mxu0 %v18331_v18 }
0x1137   : > { %16213 = vmatprep.subr.bf16.mxu1 %v18331_v18 }
0x1139   : > { %16194 = vmatpush3.bf16.msra.mxu0 %v17729_v23 }
0x113a   : > { %16214 = vmatpush3.bf16.msra.mxu1 %v17730_v24  ;;  %16195 = vmatprep.subr.bf16.mxu0 %v18331_v18 }
0x113b   : > { %16215 = vmatprep.subr.bf16.mxu1 %v18331_v18 }
0x113d   : > { %16196 = vmatpush3.bf16.msra.mxu0 %v17731_v25 }
0x113e   : > { %16216 = vmatpush3.bf16.msra.mxu1 %v17732_v26  ;;  %16197 = vmatprep.subr.bf16.mxu0 %v18331_v18 }
0x113f   : > { %16217 = vmatprep.subr.bf16.mxu1 %v18331_v18 }
0x1141   : > { %16198 = vmatpush3.bf16.msra.mxu0 %v17733_v27 }
0x1142   : > { %16218 = vmatpush3.bf16.msra.mxu1 %v17734_v28  ;;  %16199 = vmatprep.subr.bf16.mxu0 %v18331_v18 }
0x1143   : > { %16219 = vmatprep.subr.bf16.mxu1 %v18331_v18 }
0x1145   : > { %16200 = vmatpush3.bf16.msra.mxu0 %v17735_v29 }
0x1146   : > { %16220 = vmatpush3.bf16.msra.mxu1 %v17736_v30  ;;  %16201 = vmatprep.subr.bf16.mxu0 %v18331_v18 }
0x1147   : > { %16221 = vmatprep.subr.bf16.mxu1 %v18331_v18 }
0x1149   : > { %16202 = vmatpush3.bf16.msra.mxu0 %v17737_v31 }
0x114a   : > { %16222 = vmatpush3.bf16.msra.mxu1 %v17738_v32  ;;  %16227 = vmatprep.subr.bf16.mxu0 %v18331_v18 }
0x114b   : > { %16247 = vmatprep.subr.bf16.mxu1 %v18331_v18 }
0x114c   : > { %16204 = vmatmul.mubr.bf16.vlgmr.msra.gmra.mrb[84].mxu0 %v8373_v11 }
0x114d   : > { %16224 = vmatmul.mubr.bf16.vlgmr.msra.gmra.mrb[80].mxu1 %v8481_v12  ;;  %16228 = vmatpush3.bf16.msra.mxu0 %v17739_v33 }
0x114e   : > { %16248 = vmatpush3.bf16.msra.mxu1 %v17740_v34  ;;  %16229 = vmatprep.subr.bf16.mxu0 %v18331_v18 }
0x114f   : > { %16249 = vmatprep.subr.bf16.mxu1 %v18331_v18  ;;  %16243 = vmatprep.mubr.msk.bf16.mxu0 %vm18332_vm0, %v18331_v18 }
0x1150   : > { %16263 = vmatprep.mubr.msk.bf16.mxu1 %vm18332_vm0, %v18331_v18 }
0x1151   : > { %16230 = vmatpush3.bf16.msra.mxu0 %v17741_v43 }
0x1152   : > { %16250 = vmatpush3.bf16.msra.mxu1 %v17742_v45  ;;  %16231 = vmatprep.subr.bf16.mxu0 %v18331_v18 }
0x1153   : > { %16251 = vmatprep.subr.bf16.mxu1 %v18331_v18 }
0x1155   : > { %16232 = vmatpush3.bf16.msra.mxu0 %v17743_v46  ;;  %v13600_v46 = vld [vmem:[#allocation13 + $0x3] ss:$0 sm:$0xff] }
0x1156   : > { %16252 = vmatpush3.bf16.msra.mxu1 %v17744_v13  ;;  %16233 = vmatprep.subr.bf16.mxu0 %v18331_v18 }
0x1157   : > { %16253 = vmatprep.subr.bf16.mxu1 %v18331_v18 }
0x1159   : > { %16234 = vmatpush3.bf16.msra.mxu0 %v17745_v36 }
0x115a   : > { %16254 = vmatpush3.bf16.msra.mxu1 %v17746_v39  ;;  %16235 = vmatprep.subr.bf16.mxu0 %v18331_v18 }
0x115b   : > { %16255 = vmatprep.subr.bf16.mxu1 %v18331_v18 }
0x115d   : > { %16236 = vmatpush3.bf16.msra.mxu0 %v17747_v54 }
0x115e   : > { %16256 = vmatpush3.bf16.msra.mxu1 %v17748_v57  ;;  %16237 = vmatprep.subr.bf16.mxu0 %v18331_v18 }
0x115f   : > { %16257 = vmatprep.subr.bf16.mxu1 %v18331_v18 }
0x1161   : > { %16238 = vmatpush3.bf16.msra.mxu0 %v17749_v37 }
0x1162   : > { %16258 = vmatpush3.bf16.msra.mxu1 %v17750_v59  ;;  %16239 = vmatprep.subr.bf16.mxu0 %v18331_v18 }
0x1163   : > { %16259 = vmatprep.subr.bf16.mxu1 %v18331_v18 }
0x1165   : > { %16240 = vmatpush3.bf16.msra.mxu0 %v17751_v60 }
0x1166   : > { %16260 = vmatpush3.bf16.msra.mxu1 %v17752_v61  ;;  %16241 = vmatprep.subr.bf16.mxu0 %v18331_v18 }
0x1167   : > { %16261 = vmatprep.subr.bf16.mxu1 %v18331_v18 }
0x1169   : > { %16242 = vmatpush3.bf16.msra.mxu0 %v17753_v35 }
0x116a   : > { %16262 = vmatpush3.bf16.msra.mxu1 %v17754_v58  ;;  %16267 = vmatprep.subr.bf16.mxu0 %v18331_v18 }
0x116b   : > { %16287 = vmatprep.subr.bf16.mxu1 %v18331_v18 }
0x116c   : > { %16244 = vmatmul.mubr.bf16.vlgmr.msra.gmra.mrb[88].mxu0 %v8589_v1 }
0x116d   : > { %16264 = vmatmul.mubr.bf16.vlgmr.msra.gmra.mrb[84].mxu1 %v8708_v2  ;;  %16283 = vmatprep.mubr.msk.bf16.mxu0 %vm18332_vm0, %v18331_v18 }
0x116e   : > { %16303 = vmatprep.mubr.msk.bf16.mxu1 %vm18332_vm0, %v18331_v18  ;;  %16268 = vmatpush3.bf16.msra.mxu0 %v17755_v3 }
0x116f   : > { %16269 = vmatprep.subr.bf16.mxu0 %v18331_v18  ;;  %16288 = vmatpush3.bf16.msra.mxu1 %v17763_v6  ;;  %v17771_v6 = vld [vmem:[#allocation8 + $0x740] sm:$0xff]  }
0x1170   : > { %16289 = vmatprep.subr.bf16.mxu1 %v18331_v18 }
0x1172   : > { %16270 = vmatpush3.bf16.msra.mxu0 %v17756_v40  ;;  %v17770_v40 = vld [vmem:[#allocation19 + $0xf8] sm:$0xff]  }
0x1173   : > { %16271 = vmatprep.subr.bf16.mxu0 %v18331_v18  ;;  %16290 = vmatpush3.bf16.msra.mxu1 %v17764_v48  ;;  %v17772_v48 = vld [vmem:[#allocation8 + $0x700] sm:$0xff]  }
0x1174   : > { %16291 = vmatprep.subr.bf16.mxu1 %v18331_v18 }
0x1176   : > { %16272 = vmatpush3.bf16.msra.mxu0 %v17757_v55 }
0x1177   : > { %16273 = vmatprep.subr.bf16.mxu0 %v18331_v18  ;;  %16292 = vmatpush3.bf16.msra.mxu1 %v17765_v56  ;;  %v17773_v56 = vld [vmem:[#allocation8 + $0x748] sm:$0xff]  }
0x1178   : > { %16293 = vmatprep.subr.bf16.mxu1 %v18331_v18 }
0x117a   : > { %16274 = vmatpush3.bf16.msra.mxu0 %v17758_v41 }
0x117b   : > { %16275 = vmatprep.subr.bf16.mxu0 %v18331_v18  ;;  %16294 = vmatpush3.bf16.msra.mxu1 %v17766_v14  ;;  %v17774_v14 = vld [vmem:[#allocation8 + $0x708] sm:$0xff]  }
0x117c   : > { %16295 = vmatprep.subr.bf16.mxu1 %v18331_v18 }
0x117e   : > { %16276 = vmatpush3.bf16.msra.mxu0 %v17759_v4 }
0x117f   : > { %16277 = vmatprep.subr.bf16.mxu0 %v18331_v18  ;;  %16296 = vmatpush3.bf16.msra.mxu1 %v17767_v17  ;;  %v17784_v17 = vld [vmem:[#allocation8 + $0x730] sm:$0xff]  }
0x1180   : > { %16297 = vmatprep.subr.bf16.mxu1 %v18331_v18 }
0x1182   : > { %16278 = vmatpush3.bf16.msra.mxu0 %v17760_v42 }
0x1183   : > { %16279 = vmatprep.subr.bf16.mxu0 %v18331_v18  ;;  %16298 = vmatpush3.bf16.msra.mxu1 %v17768_v19  ;;  %v17785_v19 = vld [vmem:[#allocation8 + $0x778] sm:$0xff]  }
0x1184   : > { %16299 = vmatprep.subr.bf16.mxu1 %v18331_v18 }
0x1186   : > { %16280 = vmatpush3.bf16.msra.mxu0 %v17761_v5 }
0x1187   : > { %16281 = vmatprep.subr.bf16.mxu0 %v18331_v18  ;;  %16300 = vmatpush3.bf16.msra.mxu1 %v17769_v8  ;;  %v17786_v8 = vld [vmem:[#allocation8 + $0x738] sm:$0xff]  }
0x1188   : > { %16301 = vmatprep.subr.bf16.mxu1 %v18331_v18 }
0x118a   : > { %16282 = vmatpush3.bf16.msra.mxu0 %v17762_v44 }
0x118b   : > { %16307 = vmatprep.subr.bf16.mxu0 %v18331_v18  ;;  %16302 = vmatpush3.bf16.msra.mxu1 %v17770_v40 }
0x118c   : > { %16327 = vmatprep.subr.bf16.mxu1 %v18331_v18 }
0x11df   : > { %v8062_v15 = vpop.f32.mrb[76].mxu0 }
0x11e0   : > { %v8150_v47 = vpop.f32.mrb[72].mxu1  ;;  %v16125_v50 = vpop.f32.mrb[77].mxu0 }
0x11e1   : > { %v8151_v49 = vadd.f32 %v8150_v47, %v8062_v15  ;;  %v16145_v51 = vpop.f32.mrb[73].mxu1  ;;  %v8065_v7 = vpop.f32.mrb[78].mxu0  ;;  %v17775_v15 = vld [vmem:[#allocation8 + $0x750] sm:$0xff]   ;;  %v17778_v50 = vld [vmem:[#allocation8 + $0x718] sm:$0xff]  }
0x11e2   : > { %v8153_v52 = vpop.f32.mrb[74].mxu1  ;;  %v16126_v53 = vpop.f32.mrb[79].mxu0  ;;  %v17776_v47 = vld [vmem:[#allocation8 + $0x710] sm:$0xff]   ;;  %v17779_v51 = vld [vmem:[#allocation8 + $0x760] sm:$0xff]  }
0x11e3   : > { %v16146_v16 = vpop.f32.mrb[75].mxu1  ;;  %v17780_v7 = vld [vmem:[#allocation8 + $0x720] sm:$0xff]   ;;  %v17781_v52 = vld [vmem:[#allocation8 + $0x768] sm:$0xff]  }
0x11e4   : > { %v17782_v53 = vld [vmem:[#allocation8 + $0x728] sm:$0xff]   ;;  %v17783_v16 = vld [vmem:[#allocation8 + $0x770] sm:$0xff]  }
0x11ff   : > { %v8257_v9 = vpop.f32.mrb[80].mxu0 }
0x1200   : > { %v8365_v10 = vpop.f32.mrb[76].mxu1  ;;  %v8263_v20 = vadd.f32 %v8257_v9, %v8151_v49  ;;  %v16165_v21 = vpop.f32.mrb[81].mxu0  ;;  %v17777_v49 = vld [vmem:[#allocation8 + $0x758] sm:$0xff]  }
0x1201   : > { %v16185_v22 = vpop.f32.mrb[77].mxu1  ;;  %v8260_v23 = vpop.f32.mrb[82].mxu0 }
0x1202   : > { %v8368_v24 = vpop.f32.mrb[78].mxu1  ;;  %v8371_v25 = vadd.f32 %v8365_v10, %v8263_v20  ;;  %v16166_v26 = vpop.f32.mrb[83].mxu0 }
0x1203   : > { %v16186_v27 = vpop.f32.mrb[79].mxu1  ;;  %v13601_v26 = vld [vmem:[#allocation16 + $0x3] ss:$0 sm:$0xff] }
0x121f   : > { %v8473_v28 = vpop.f32.mrb[84].mxu0 }
0x1220   : > { %v8581_v29 = vpop.f32.mrb[80].mxu1  ;;  %v8479_v30 = vadd.f32 %v8473_v28, %v8371_v25  ;;  %v16205_v31 = vpop.f32.mrb[85].mxu0 }
0x1221   : > { %v16225_v32 = vpop.f32.mrb[81].mxu1  ;;  %v8476_v33 = vpop.f32.mrb[86].mxu0 }
0x1222   : > { %v8584_v34 = vpop.f32.mrb[82].mxu1  ;;  %v8587_v11 = vadd.f32 %v8581_v29, %v8479_v30  ;;  %v16206_v12 = vpop.f32.mrb[87].mxu0  ;;  %v17787_v32 = vld [vmem:[#allocation8 + $0x780] sm:$0xff]  }
0x1223   : > { %v16226_v43 = vpop.f32.mrb[83].mxu1  ;;  %v17788_v33 = vld [vmem:[#allocation8 + $0x7c0] sm:$0xff]  }
0x123f   : > { %v8689_v45 = vpop.f32.mrb[88].mxu0 }
0x1240   : > { %v19287_v13 = vpop.f32.mrb[84].mxu1  ;;  %v8695_v36 = vadd.f32 %v8689_v45, %v8587_v11  ;;  %v16245_v39 = vpop.f32.mrb[89].mxu0  ;;  %v17789_v45 = vld [vmem:[#allocation8 + $0x788] sm:$0xff]  }
0x1241   : > { %v16265_v54 = vpop.f32.mrb[85].mxu1  ;;  %v8692_v57 = vpop.f32.mrb[90].mxu0  ;;  %v8817_v28 = vadd.f32 %v13601_v26, %v19287_v13  ;;  %v17791_v13 = vld [vmem:[#allocation8 + $0x790] sm:$0xff]   ;;  %v17793_v39 = vld [vmem:[#allocation8 + $0x798] sm:$0xff]  }
0x1242   : > { %v8819_v37 = vpop.f32.mrb[86].mxu1  ;;  %v19289_v59 = vadd.f32 %v13600_v46, %v8695_v36  ;;  %v16246_v60 = vpop.f32.mrb[91].mxu0  ;;  %v17790_v46 = vld [vmem:[#allocation8 + $0x7c8] sm:$0xff]   ;;  %v17792_v36 = vld [vmem:[#allocation8 + $0x7d0] sm:$0xff]   ;;  %v17794_v54 = vld [vmem:[#allocation8 + $0x7d8] sm:$0xff]  }
0x1243   : > { %v16266_v61 = vpop.f32.mrb[87].mxu1  ;;  %v17795_v57 = vld [vmem:[#allocation8 + $0x7a0] sm:$0xff]   ;;  %v17798_v60 = vld [vmem:[#allocation8 + $0x7e8] sm:$0xff]  }
0x1244   : > { %v8822_v62 = vrot.slane %v19289_v59, 4  ;;  %v17796_v37 = vld [vmem:[#allocation8 + $0x7e0] sm:$0xff]   ;;  %v17799_v61 = vld [vmem:[#allocation8 + $0x7b0] sm:$0xff]  }
0x1245   : > { %v17829_v26 = vld [vmem:[#allocation12 + $0x748] sm:$0xff]  }
0x1246   : > { %v8823_v63 = vadd.f32 %v8822_v62, %v19289_v59  ;;  %v17800_v62 = vld [vmem:[#allocation8 + $0x7f0] sm:$0xff]  }
0x1248   : > { %v8824_v35 = vrot.slane %v8823_v63, 2 }
0x124a   : > { %v8825_v58 = vadd.f32 %v8824_v35, %v8823_v63  ;;  %v17801_v63 = vld [vmem:[#allocation8 + $0x7b8] sm:$0xff]  }
0x124b   : > { %v17802_v35 = vld [vmem:[#allocation8 + $0x7f8] sm:$0xff]  }
0x124c   : > { %v8826_v0 = vrot.slane %v8825_v58, 1 }
0x124e   : > { %v8827_v1 = vadd.f32 %v8826_v0, %v8825_v58 }
0x1250   : > { %v8829_v2 = vmul.f32 0.125, %v8827_v1  ;;  %v17803_v1 = vld [vmem:[#allocation8 + $0x800] sm:$0xff]  }
0x1252   : > { %v8830_v3 = vpack.c.bf16 %v8829_v2, %v8829_v2  ;;  %v17804_v2 = vld [vmem:[#allocation8 + $0x840] sm:$0xff]  }
0x1254   : > { %16284 = vmatmul.mubr.bf16.vlgmr.msra.gmra.mrb[92].mxu0 %v8830_v3 }
0x1255   : > { %16323 = vmatprep.mubr.msk.bf16.mxu0 %vm18332_vm0, %v18331_v18  ;;  %16308 = vmatpush3.bf16.msra.mxu0 %v17771_v6  ;;  %v17811_v6 = vld [vmem:[#allocation8 + $0x820] sm:$0xff]  }
0x1256   : > { %16309 = vmatprep.subr.bf16.mxu0 %v18331_v18 }
0x1259   : > { %16310 = vmatpush3.bf16.msra.mxu0 %v17773_v56  ;;  %v17813_v56 = vld [vmem:[#allocation8 + $0x828] sm:$0xff]  }
0x125a   : > { %16311 = vmatprep.subr.bf16.mxu0 %v18331_v18 }
0x125d   : > { %16312 = vmatpush3.bf16.msra.mxu0 %v17775_v15  ;;  %v17815_v15 = vld [vmem:[#allocation8 + $0x830] sm:$0xff]  }
0x125e   : > { %16313 = vmatprep.subr.bf16.mxu0 %v18331_v18 }
0x1261   : > { %16314 = vmatpush3.bf16.msra.mxu0 %v17777_v49  ;;  %v17817_v49 = vld [vmem:[#allocation8 + $0x838] sm:$0xff]  }
0x1262   : > { %16315 = vmatprep.subr.bf16.mxu0 %v18331_v18 }
0x1265   : > { %16316 = vmatpush3.bf16.msra.mxu0 %v17779_v51 }
0x1266   : > { %16317 = vmatprep.subr.bf16.mxu0 %v18331_v18 }
0x1269   : > { %16318 = vmatpush3.bf16.msra.mxu0 %v17781_v52  ;;  %v17819_v52 = vld [vmem:[#allocation8 + $0x880] sm:$0xff]  }
0x126a   : > { %16319 = vmatprep.subr.bf16.mxu0 %v18331_v18 }
0x126d   : > { %16320 = vmatpush3.bf16.msra.mxu0 %v17783_v16 }
0x126e   : > { %16321 = vmatprep.subr.bf16.mxu0 %v18331_v18 }
0x1271   : > { %16322 = vmatpush3.bf16.msra.mxu0 %v17785_v19  ;;  %v17821_v19 = vld [vmem:[#allocation8 + $0x890] sm:$0xff]  }
0x1272   : > { %16347 = vmatprep.subr.bf16.mxu0 %v18331_v18 }
0x1327   : > { %v8930_v55 = vpop.f32.mrb[92].mxu0 }
0x1328   : > { %v8936_v41 = vmax.f32 %v8930_v55, 0.0  ;;  %v16285_v4 = vpop.f32.mrb[93].mxu0  ;;  %v17805_v55 = vld [vmem:[#allocation8 + $0x808] sm:$0xff]  }
0x1329   : > { %v8933_v42 = vpop.f32.mrb[94].mxu0  ;;  %v17807_v4 = vld [vmem:[#allocation8 + $0x810] sm:$0xff]  }
0x132a   : > { %v8937_v5 = vpack.c.bf16 %v8936_v41, %v8936_v41  ;;  %v16286_v44 = vpop.f32.mrb[95].mxu0  ;;  %v17806_v41 = vld [vmem:[#allocation8 + $0x848] sm:$0xff]   ;;  %v17808_v42 = vld [vmem:[#allocation8 + $0x850] sm:$0xff]  }
0x132b   : > { %v17810_v44 = vld [vmem:[#allocation8 + $0x858] sm:$0xff]  }
0x132c   : > { %16304 = vmatmul.mubr.bf16.vlgmr.msra.gmra.mrb[88].mxu1 %v8937_v5  ;;  %v17809_v5 = vld [vmem:[#allocation8 + $0x818] sm:$0xff]  }
0x132d   : > { %16343 = vmatprep.mubr.msk.bf16.mxu1 %vm18332_vm0, %v18331_v18  ;;  %16328 = vmatpush3.bf16.msra.mxu1 %v17772_v48  ;;  %v17812_v48 = vld [vmem:[#allocation8 + $0x860] sm:$0xff]  }
0x132e   : > { %16329 = vmatprep.subr.bf16.mxu1 %v18331_v18 }
0x1331   : > { %16330 = vmatpush3.bf16.msra.mxu1 %v17774_v14  ;;  %v17814_v14 = vld [vmem:[#allocation8 + $0x868] sm:$0xff]  }
0x1332   : > { %16331 = vmatprep.subr.bf16.mxu1 %v18331_v18 }
0x1335   : > { %16332 = vmatpush3.bf16.msra.mxu1 %v17776_v47  ;;  %v17816_v47 = vld [vmem:[#allocation8 + $0x870] sm:$0xff]  }
0x1336   : > { %16333 = vmatprep.subr.bf16.mxu1 %v18331_v18 }
0x1339   : > { %16334 = vmatpush3.bf16.msra.mxu1 %v17778_v50  ;;  %v17818_v50 = vld [vmem:[#allocation8 + $0x878] sm:$0xff]  }
0x133a   : > { %16335 = vmatprep.subr.bf16.mxu1 %v18331_v18 }
0x133d   : > { %16336 = vmatpush3.bf16.msra.mxu1 %v17780_v7 }
0x133e   : > { %16337 = vmatprep.subr.bf16.mxu1 %v18331_v18 }
0x1341   : > { %16338 = vmatpush3.bf16.msra.mxu1 %v17782_v53 }
0x1342   : > { %16339 = vmatprep.subr.bf16.mxu1 %v18331_v18 }
0x1345   : > { %16340 = vmatpush3.bf16.msra.mxu1 %v17784_v17  ;;  %v17820_v17 = vld [vmem:[#allocation8 + $0x888] sm:$0xff]  }
0x1346   : > { %16341 = vmatprep.subr.bf16.mxu1 %v18331_v18 }
0x1349   : > { %16342 = vmatpush3.bf16.msra.mxu1 %v17786_v8  ;;  %v17822_v8 = vld [vmem:[#allocation8 + $0x898] sm:$0xff]  }
0x134a   : > { %16367 = vmatprep.subr.bf16.mxu1 %v18331_v18 }
0x13ff   : > { %v9037_v9 = vpop.f32.mrb[88].mxu1 }
0x1400   : > { %v13626_v10 = vmul.f32 -1.442695, %v9037_v9  ;;  %v16305_v20 = vpop.f32.mrb[89].mxu1  ;;  %v17823_v9 = vld [vmem:[#allocation8 + $0x8a0] sm:$0xff]  }
0x1401   : > { %v9040_v21 = vpop.f32.mrb[90].mxu1  ;;  %v17825_v20 = vld [vmem:[#allocation8 + $0x8b0] sm:$0xff]  }
0x1402   : > { %18055 = vpow2.f32 %v13626_v10  ;;  %v16306_v22 = vpop.f32.mrb[91].mxu1  ;;  %v17824_v10 = vld [vmem:[#allocation8 + $0x8a8] sm:$0xff]   ;;  %v17826_v21 = vld [vmem:[#allocation8 + $0x8b8] sm:$0xff]  }
0x140c   : > { %v18056_v23 = vpop.eup %18055 }
0x140d   : > { %v9046_v24 = vadd.f32 1.0, %v18056_v23 }
0x140f   : > { %18057 = vrcp.f32 %v9046_v24  ;;  %v17827_v24 = vld [vmem:[#allocation12 + $0x740] sm:$0xff]  }
0x1419   : > { %v18058_v25 = vpop.eup %18057 }
0x141a   : > { %v9052_v27 = vrot.slane %v18058_v25, %v18802_v38  ;;  %v17828_v25 = vld [vmem:[#allocation12 + $0x700] sm:$0xff]  }
0x141c   : > { %v9053_v29 = vmul.f32 %v9052_v27, %v19289_v59  ;;  %v17797_v59 = vld [vmem:[#allocation8 + $0x7a8] sm:$0xff]  }
0x141d   : > { %v17830_v27 = vld [vmem:[#allocation12 + $0x708] sm:$0xff]  }
0x141e   : > { %v9054_v30 = vadd.f32 %v9053_v29, %v8817_v28  ;;  %v17831_v28 = vld [vmem:[#allocation12 + $0x750] sm:$0xff]  }
0x141f   : > { %v17832_v29 = vld [vmem:[#allocation12 + $0x710] sm:$0xff]  }
0x1420   : > { %v9055_v31 = vmax.f32 %v9054_v30, 0.0  ;;  %v17833_v30 = vld [vmem:[#allocation12 + $0x758] sm:$0xff]  }
0x1422   : > { %9058 = vst [vmem:[#allocation5 + $0x3] sm:$0xff] %v9055_v31  ;;  %v17834_v31 = vld [vmem:[#allocation12 + $0x718] sm:$0xff]  }
0x1429   : > { %v9079_v34 = vld [vmem:[#allocation5 + $0x1] ss:$2 sm:$0xf]  ;;  %v9059_v11 = vld [vmem:[#allocation5] ss:$2 sm:$0xf] }
0x142a   : > { %v9080_v12 = vpack.c.bf16 %v9079_v34, %v9079_v34  ;;  %v9060_v43 = vpack.c.bf16 %v9059_v11, %v9059_v11  ;;  %v9275_v58 = vld [vmem:[#allocation5 + $0x2] ss:$2 sm:$0xf]  ;;  %v9384_v0 = vld [vmem:[#allocation5 + $0x3] ss:$2 sm:$0xf] }
0x142b   : > { %v9276_v3 = vpack.c.bf16 %v9275_v58, %v9275_v58  ;;  %v9385_v40 = vpack.c.bf16 %v9384_v0, %v9384_v0  ;;  %v9493_v51 = vld [vmem:[#allocation5 + $0x4] ss:$2 sm:$0xf]  ;;  %v9602_v7 = vld [vmem:[#allocation5 + $0x5] ss:$2 sm:$0xf] }
0x142c   : > { %16324 = vmatmul.mubr.bf16.vlgmr.msra.gmra.mrb[96].mxu0 %v9080_v12  ;;  %16344 = vmatmul.mubr.bf16.vlgmr.msra.gmra.mrb[92].mxu1 %v9060_v43  ;;  %v9494_v53 = vpack.c.bf16 %v9493_v51, %v9493_v51  ;;  %v9603_v16 = vpack.c.bf16 %v9602_v7, %v9602_v7  ;;  %v9711_v22 = vld [vmem:[#allocation5 + $0x6] ss:$2 sm:$0xf]  ;;  %v17837_v34 = vld [vmem:[#allocation12 + $0x768] sm:$0xff]   ;;  %v17839_v12 = vld [vmem:[#allocation12 + $0x770] sm:$0xff]  }
0x142d   : > { %16348 = vmatpush3.bf16.msra.mxu0 %v17787_v32  ;;  %16368 = vmatpush3.bf16.msra.mxu1 %v17788_v33  ;;  %v9712_v23 = vpack.c.bf16 %v9711_v22, %v9711_v22  ;;  %v17835_v32 = vld [vmem:[#allocation12 + $0x760] sm:$0xff]   ;;  %v17838_v11 = vld [vmem:[#allocation12 + $0x728] sm:$0xff]   ;;  %v17840_v43 = vld [vmem:[#allocation12 + $0x730] sm:$0xff]  }
0x142e   : > { %16349 = vmatprep.subr.bf16.mxu0 %v18331_v18  ;;  %16369 = vmatprep.subr.bf16.mxu1 %v18331_v18  ;;  %v17836_v33 = vld [vmem:[#allocation12 + $0x720] sm:$0xff]  }
0x142f   : > { %16363 = vmatprep.mubr.msk.bf16.mxu0 %vm18332_vm0, %v18331_v18  ;;  %16383 = vmatprep.mubr.msk.bf16.mxu1 %vm18332_vm0, %v18331_v18 }
0x1431   : > { %16350 = vmatpush3.bf16.msra.mxu0 %v17789_v45  ;;  %16370 = vmatpush3.bf16.msra.mxu1 %v17790_v46  ;;  %v17841_v45 = vld [vmem:[#allocation12 + $0x778] sm:$0xff]  }
0x1432   : > { %16351 = vmatprep.subr.bf16.mxu0 %v18331_v18  ;;  %16371 = vmatprep.subr.bf16.mxu1 %v18331_v18  ;;  %v17842_v46 = vld [vmem:[#allocation12 + $0x738] sm:$0xff]  }
0x1435   : > { %16352 = vmatpush3.bf16.msra.mxu0 %v17791_v13  ;;  %16372 = vmatpush3.bf16.msra.mxu1 %v17792_v36 }
0x1436   : > { %16353 = vmatprep.subr.bf16.mxu0 %v18331_v18  ;;  %16373 = vmatprep.subr.bf16.mxu1 %v18331_v18 }
0x1439   : > { %16354 = vmatpush3.bf16.msra.mxu0 %v17793_v39  ;;  %16374 = vmatpush3.bf16.msra.mxu1 %v17794_v54 }
0x143a   : > { %16355 = vmatprep.subr.bf16.mxu0 %v18331_v18  ;;  %16375 = vmatprep.subr.bf16.mxu1 %v18331_v18 }
0x143d   : > { %16356 = vmatpush3.bf16.msra.mxu0 %v17795_v57  ;;  %16376 = vmatpush3.bf16.msra.mxu1 %v17796_v37 }
0x143e   : > { %16357 = vmatprep.subr.bf16.mxu0 %v18331_v18  ;;  %16377 = vmatprep.subr.bf16.mxu1 %v18331_v18 }
0x1441   : > { %16358 = vmatpush3.bf16.msra.mxu0 %v17797_v59  ;;  %16378 = vmatpush3.bf16.msra.mxu1 %v17798_v60 }
0x1442   : > { %16359 = vmatprep.subr.bf16.mxu0 %v18331_v18  ;;  %16379 = vmatprep.subr.bf16.mxu1 %v18331_v18 }
0x1445   : > { %16360 = vmatpush3.bf16.msra.mxu0 %v17799_v61  ;;  %16380 = vmatpush3.bf16.msra.mxu1 %v17800_v62 }
0x1446   : > { %16361 = vmatprep.subr.bf16.mxu0 %v18331_v18  ;;  %16381 = vmatprep.subr.bf16.mxu1 %v18331_v18 }
0x1449   : > { %16362 = vmatpush3.bf16.msra.mxu0 %v17801_v63  ;;  %16382 = vmatpush3.bf16.msra.mxu1 %v17802_v35 }
0x144a   : > { %16387 = vmatprep.subr.bf16.mxu0 %v18331_v18  ;;  %16407 = vmatprep.subr.bf16.mxu1 %v18331_v18 }
0x144c   : > { %16364 = vmatmul.mubr.bf16.vlgmr.msra.gmra.mrb[100].mxu0 %v9276_v3  ;;  %16384 = vmatmul.mubr.bf16.vlgmr.msra.gmra.mrb[96].mxu1 %v9385_v40 }
0x144d   : > { %16388 = vmatpush3.bf16.msra.mxu0 %v17803_v1  ;;  %16408 = vmatpush3.bf16.msra.mxu1 %v17804_v2 }
0x144e   : > { %16389 = vmatprep.subr.bf16.mxu0 %v18331_v18  ;;  %16409 = vmatprep.subr.bf16.mxu1 %v18331_v18 }
0x144f   : > { %16403 = vmatprep.mubr.msk.bf16.mxu0 %vm18332_vm0, %v18331_v18  ;;  %16423 = vmatprep.mubr.msk.bf16.mxu1 %vm18332_vm0, %v18331_v18 }
0x1451   : > { %16390 = vmatpush3.bf16.msra.mxu0 %v17805_v55  ;;  %16410 = vmatpush3.bf16.msra.mxu1 %v17806_v41 }
0x1452   : > { %16391 = vmatprep.subr.bf16.mxu0 %v18331_v18  ;;  %16411 = vmatprep.subr.bf16.mxu1 %v18331_v18 }
0x1455   : > { %16392 = vmatpush3.bf16.msra.mxu0 %v17807_v4  ;;  %16412 = vmatpush3.bf16.msra.mxu1 %v17808_v42 }
0x1456   : > { %16393 = vmatprep.subr.bf16.mxu0 %v18331_v18  ;;  %16413 = vmatprep.subr.bf16.mxu1 %v18331_v18 }
0x1459   : > { %16394 = vmatpush3.bf16.msra.mxu0 %v17809_v5  ;;  %16414 = vmatpush3.bf16.msra.mxu1 %v17810_v44 }
0x145a   : > { %16395 = vmatprep.subr.bf16.mxu0 %v18331_v18  ;;  %16415 = vmatprep.subr.bf16.mxu1 %v18331_v18 }
0x145d   : > { %16396 = vmatpush3.bf16.msra.mxu0 %v17811_v6  ;;  %16416 = vmatpush3.bf16.msra.mxu1 %v17812_v48 }
0x145e   : > { %16397 = vmatprep.subr.bf16.mxu0 %v18331_v18  ;;  %16417 = vmatprep.subr.bf16.mxu1 %v18331_v18 }
0x1461   : > { %16398 = vmatpush3.bf16.msra.mxu0 %v17813_v56  ;;  %16418 = vmatpush3.bf16.msra.mxu1 %v17814_v14 }
0x1462   : > { %16399 = vmatprep.subr.bf16.mxu0 %v18331_v18  ;;  %16419 = vmatprep.subr.bf16.mxu1 %v18331_v18 }
0x1465   : > { %16400 = vmatpush3.bf16.msra.mxu0 %v17815_v15  ;;  %16420 = vmatpush3.bf16.msra.mxu1 %v17816_v47 }
0x1466   : > { %16401 = vmatprep.subr.bf16.mxu0 %v18331_v18  ;;  %16421 = vmatprep.subr.bf16.mxu1 %v18331_v18 }
0x1469   : > { %16402 = vmatpush3.bf16.msra.mxu0 %v17817_v49  ;;  %16422 = vmatpush3.bf16.msra.mxu1 %v17818_v50  ;;  %v13683_v49 = vld [vmem:[#allocation10 + $0x4] ss:$0 sm:$0xff] }
0x146a   : > { %16427 = vmatprep.subr.bf16.mxu0 %v18331_v18  ;;  %16447 = vmatprep.subr.bf16.mxu1 %v18331_v18 }
0x146c   : > { %16404 = vmatmul.mubr.bf16.vlgmr.msra.gmra.mrb[104].mxu0 %v9494_v53  ;;  %16424 = vmatmul.mubr.bf16.vlgmr.msra.gmra.mrb[100].mxu1 %v9603_v16 }
0x146d   : > { %16428 = vmatpush3.bf16.msra.mxu0 %v17819_v52  ;;  %16443 = vmatprep.mubr.msk.bf16.mxu0 %vm18332_vm0, %v18331_v18 }
0x146e   : > { %16429 = vmatprep.subr.bf16.mxu0 %v18331_v18  ;;  %16463 = vmatprep.mubr.msk.bf16.mxu1 %vm18332_vm0, %v18331_v18 }
0x146f   : > { %16448 = vmatpush3.bf16.msra.mxu1 %v17827_v24 }
0x1470   : > { %16449 = vmatprep.subr.bf16.mxu1 %v18331_v18 }
0x1471   : > { %16430 = vmatpush3.bf16.msra.mxu0 %v17820_v17  ;;  %v17843_v17 = vld [vmem:[#allocation12 + $0x780] sm:$0xff]  }
0x1472   : > { %16431 = vmatprep.subr.bf16.mxu0 %v18331_v18 }
0x1473   : > { %16450 = vmatpush3.bf16.msra.mxu1 %v17829_v26  ;;  %v17845_v26 = vld [vmem:[#allocation12 + $0x788] sm:$0xff]  }
0x1474   : > { %16451 = vmatprep.subr.bf16.mxu1 %v18331_v18 }
0x1475   : > { %16432 = vmatpush3.bf16.msra.mxu0 %v17821_v19  ;;  %v17844_v19 = vld [vmem:[#allocation12 + $0x7c0] sm:$0xff]  }
0x1476   : > { %16433 = vmatprep.subr.bf16.mxu0 %v18331_v18 }
0x1477   : > { %16452 = vmatpush3.bf16.msra.mxu1 %v17831_v28  ;;  %v17847_v28 = vld [vmem:[#allocation12 + $0x790] sm:$0xff]  }
0x1478   : > { %16453 = vmatprep.subr.bf16.mxu1 %v18331_v18 }
0x1479   : > { %16434 = vmatpush3.bf16.msra.mxu0 %v17822_v8 }
0x147a   : > { %16435 = vmatprep.subr.bf16.mxu0 %v18331_v18 }
0x147b   : > { %16454 = vmatpush3.bf16.msra.mxu1 %v17833_v30  ;;  %v17849_v30 = vld [vmem:[#allocation12 + $0x798] sm:$0xff]  }
0x147c   : > { %16455 = vmatprep.subr.bf16.mxu1 %v18331_v18 }
0x147d   : > { %16436 = vmatpush3.bf16.msra.mxu0 %v17823_v9 }
0x147e   : > { %16437 = vmatprep.subr.bf16.mxu0 %v18331_v18 }
0x147f   : > { %16456 = vmatpush3.bf16.msra.mxu1 %v17835_v32  ;;  %v17851_v32 = vld [vmem:[#allocation12 + $0x7a0] sm:$0xff]  }
0x1480   : > { %16457 = vmatprep.subr.bf16.mxu1 %v18331_v18 }
0x1481   : > { %16438 = vmatpush3.bf16.msra.mxu0 %v17824_v10 }
0x1482   : > { %16439 = vmatprep.subr.bf16.mxu0 %v18331_v18 }
0x1483   : > { %16458 = vmatpush3.bf16.msra.mxu1 %v17837_v34  ;;  %v17853_v34 = vld [vmem:[#allocation12 + $0x7a8] sm:$0xff]  }
0x1484   : > { %16459 = vmatprep.subr.bf16.mxu1 %v18331_v18 }
0x1485   : > { %16440 = vmatpush3.bf16.msra.mxu0 %v17825_v20 }
0x1486   : > { %16441 = vmatprep.subr.bf16.mxu0 %v18331_v18 }
0x1487   : > { %16460 = vmatpush3.bf16.msra.mxu1 %v17839_v12  ;;  %v17855_v12 = vld [vmem:[#allocation12 + $0x7b0] sm:$0xff]  }
0x1488   : > { %16461 = vmatprep.subr.bf16.mxu1 %v18331_v18 }
0x1489   : > { %16442 = vmatpush3.bf16.msra.mxu0 %v17826_v21 }
0x148a   : > { %16467 = vmatprep.subr.bf16.mxu0 %v18331_v18 }
0x148b   : > { %16462 = vmatpush3.bf16.msra.mxu1 %v17841_v45  ;;  %v17857_v45 = vld [vmem:[#allocation12 + $0x7b8] sm:$0xff]  }
0x148c   : > { %16444 = vmatmul.mubr.bf16.vlgmr.msra.gmra.mrb[108].mxu0 %v9712_v23  ;;  %16487 = vmatprep.subr.bf16.mxu1 %v18331_v18 }
0x148d   : > { %16483 = vmatprep.mubr.msk.bf16.mxu0 %vm18332_vm0, %v18331_v18  ;;  %16468 = vmatpush3.bf16.msra.mxu0 %v17828_v25 }
0x148e   : > { %16469 = vmatprep.subr.bf16.mxu0 %v18331_v18 }
0x1491   : > { %16470 = vmatpush3.bf16.msra.mxu0 %v17830_v27  ;;  %v17846_v27 = vld [vmem:[#allocation12 + $0x7c8] sm:$0xff]  }
0x1492   : > { %16471 = vmatprep.subr.bf16.mxu0 %v18331_v18 }
0x1495   : > { %16472 = vmatpush3.bf16.msra.mxu0 %v17832_v29  ;;  %v17848_v29 = vld [vmem:[#allocation12 + $0x7d0] sm:$0xff]  }
0x1496   : > { %16473 = vmatprep.subr.bf16.mxu0 %v18331_v18 }
0x1499   : > { %16474 = vmatpush3.bf16.msra.mxu0 %v17834_v31  ;;  %v17850_v31 = vld [vmem:[#allocation12 + $0x7d8] sm:$0xff]  }
0x149a   : > { %16475 = vmatprep.subr.bf16.mxu0 %v18331_v18 }
0x149d   : > { %16476 = vmatpush3.bf16.msra.mxu0 %v17836_v33  ;;  %v17852_v33 = vld [vmem:[#allocation12 + $0x7e0] sm:$0xff]  }
0x149e   : > { %16477 = vmatprep.subr.bf16.mxu0 %v18331_v18 }
0x14a1   : > { %16478 = vmatpush3.bf16.msra.mxu0 %v17838_v11  ;;  %v17854_v11 = vld [vmem:[#allocation12 + $0x7e8] sm:$0xff]  }
0x14a2   : > { %16479 = vmatprep.subr.bf16.mxu0 %v18331_v18 }
0x14a5   : > { %16480 = vmatpush3.bf16.msra.mxu0 %v17840_v43  ;;  %v17856_v43 = vld [vmem:[#allocation12 + $0x7f0] sm:$0xff]  }
0x14a6   : > { %16481 = vmatprep.subr.bf16.mxu0 %v18331_v18 }
0x14a9   : > { %16482 = vmatpush3.bf16.msra.mxu0 %v17842_v46  ;;  %v17858_v46 = vld [vmem:[#allocation12 + $0x7f8] sm:$0xff]  }
0x14aa   : > { %16507 = vmatprep.subr.bf16.mxu0 %v18331_v18 }
0x14ff   : > { %v9180_v13 = vpop.f32.mrb[96].mxu0  ;;  %v9268_v36 = vpop.f32.mrb[92].mxu1 }
0x1500   : > { %v9269_v39 = vadd.f32 %v9268_v36, %v9180_v13  ;;  %v16325_v54 = vpop.f32.mrb[97].mxu0  ;;  %v16345_v57 = vpop.f32.mrb[93].mxu1  ;;  %v17859_v13 = vld [vmem:[#allocation12 + $0x800] sm:$0xff]  }
0x1501   : > { %v9183_v37 = vpop.f32.mrb[98].mxu0  ;;  %v9271_v59 = vpop.f32.mrb[94].mxu1  ;;  %v17860_v36 = vld [vmem:[#allocation12 + $0x840] sm:$0xff]   ;;  %v17861_v57 = vld [vmem:[#allocation12 + $0x808] sm:$0xff]  }
0x1502   : > { %v16326_v60 = vpop.f32.mrb[99].mxu0  ;;  %v16346_v61 = vpop.f32.mrb[95].mxu1  ;;  %v17862_v37 = vld [vmem:[#allocation12 + $0x848] sm:$0xff]   ;;  %v17863_v59 = vld [vmem:[#allocation12 + $0x810] sm:$0xff]  }
0x1503   : > { %v17864_v60 = vld [vmem:[#allocation12 + $0x850] sm:$0xff]   ;;  %v17865_v61 = vld [vmem:[#allocation12 + $0x818] sm:$0xff]  }
0x151f   : > { %v9376_v62 = vpop.f32.mrb[100].mxu0  ;;  %v9485_v63 = vpop.f32.mrb[96].mxu1 }
0x1520   : > { %v9382_v35 = vadd.f32 %v9376_v62, %v9269_v39  ;;  %v16365_v58 = vpop.f32.mrb[101].mxu0  ;;  %v16385_v0 = vpop.f32.mrb[97].mxu1  ;;  %v17866_v62 = vld [vmem:[#allocation12 + $0x858] sm:$0xff]  }
0x1521   : > { %v9379_v1 = vpop.f32.mrb[102].mxu0  ;;  %v9488_v2 = vpop.f32.mrb[98].mxu1  ;;  %v17869_v58 = vld [vmem:[#allocation12 + $0x828] sm:$0xff]  }
0x1522   : > { %v9491_v3 = vadd.f32 %v9485_v63, %v9382_v35  ;;  %v16366_v40 = vpop.f32.mrb[103].mxu0  ;;  %v16386_v55 = vpop.f32.mrb[99].mxu1  ;;  %v17867_v63 = vld [vmem:[#allocation12 + $0x820] sm:$0xff]   ;;  %v17870_v0 = vld [vmem:[#allocation12 + $0x868] sm:$0xff]   ;;  %v17871_v1 = vld [vmem:[#allocation12 + $0x830] sm:$0xff]  }
0x1523   : > { %v17868_v35 = vld [vmem:[#allocation12 + $0x860] sm:$0xff]   ;;  %v17872_v2 = vld [vmem:[#allocation12 + $0x870] sm:$0xff]   ;;  %v17874_v40 = vld [vmem:[#allocation12 + $0x878] sm:$0xff]  }
0x1524   : > { %v17875_v55 = vld [vmem:[#allocation12 + $0x880] sm:$0xff]  }
0x153f   : > { %v9594_v41 = vpop.f32.mrb[104].mxu0  ;;  %v9703_v4 = vpop.f32.mrb[100].mxu1 }
0x1540   : > { %v9600_v42 = vadd.f32 %v9594_v41, %v9491_v3  ;;  %v16405_v5 = vpop.f32.mrb[105].mxu0  ;;  %v16425_v44 = vpop.f32.mrb[101].mxu1  ;;  %v17873_v3 = vld [vmem:[#allocation12 + $0x838] sm:$0xff]   ;;  %v17876_v41 = vld [vmem:[#allocation15 + $0x100] sm:$0xff]  }
0x1541   : > { %v9597_v6 = vpop.f32.mrb[106].mxu0  ;;  %v9706_v48 = vpop.f32.mrb[102].mxu1  ;;  %v17877_v5 = vld [vmem:[#allocation12 + $0x888] sm:$0xff]  }
0x1542   : > { %v9709_v56 = vadd.f32 %v9703_v4, %v9600_v42  ;;  %v16406_v14 = vpop.f32.mrb[107].mxu0  ;;  %v16426_v15 = vpop.f32.mrb[103].mxu1  ;;  %v17878_v44 = vld [vmem:[#allocation15 + $0x108] sm:$0xff]   ;;  %v17880_v48 = vld [vmem:[#allocation15 + $0x110] sm:$0xff]  }
0x1543   : > { %v17879_v6 = vld [vmem:[#allocation12 + $0x890] sm:$0xff]   ;;  %v17882_v14 = vld [vmem:[#allocation15 + $0x118] sm:$0xff]  }
0x1544   : > { %v17883_v15 = vld [vmem:[#allocation12 + $0x8a0] sm:$0xff]  }
0x155f   : > { %v9812_v47 = vpop.f32.mrb[108].mxu0 }
0x1560   : > { %v9818_v50 = vadd.f32 %v9812_v47, %v9709_v56  ;;  %v16445_v51 = vpop.f32.mrb[109].mxu0  ;;  %v17881_v56 = vld [vmem:[#allocation12 + $0x898] sm:$0xff]   ;;  %v17884_v47 = vld [vmem:[#allocation15 + $0x120] sm:$0xff]  }
0x1561   : > { %v9815_v7 = vpop.f32.mrb[110].mxu0  ;;  %v17887_v51 = vld [vmem:[#allocation12 + $0x8b0] sm:$0xff]  }
0x1562   : > { %v9827_v52 = vadd.f32 %v13683_v49, %v9818_v50  ;;  %v16446_v53 = vpop.f32.mrb[111].mxu0  ;;  %v17885_v49 = vld [vmem:[#allocation12 + $0x8a8] sm:$0xff]   ;;  %v17888_v7 = vld [vmem:[#allocation15 + $0x130] sm:$0xff]  }
0x1563   : > { %v17886_v50 = vld [vmem:[#allocation15 + $0x128] sm:$0xff]   ;;  %v10596_v53 = vld [vmem:[#allocation5 + $0x4] ss:$2 sm:$0xf] }
0x1564   : > { %v9828_v16 = vmax.f32 %v9827_v52, 0.0  ;;  %v10595_v52 = vld [vmem:[#allocation5 + $0x3] ss:$2 sm:$0xf] }
0x1566   : > { %9831 = vst [vmem:[#allocation7 + $0x3] sm:$0xf] %v9828_v16  ;;  %v17889_v16 = vld [vmem:[#allocation12 + $0x8b8] sm:$0xff]  }
0x156d   : > { %v9851_v8 = vld [vmem:[#allocation7 + $0x1] sm:$0xf]  ;;  %v19392_v24 = vld [vmem:[#allocation7 + $0x5] sm:$0xf] }
0x156e   : > { %v9832_v9 = vld [vmem:[#allocation7] sm:$0xf]  ;;  %v9852_v20 = vpack.c.bf16 %v9851_v8, %v9851_v8  ;;  %v19390_v23 = vld [vmem:[#allocation7 + $0x4] sm:$0xf]  ;;  %v10371_v42 = vpack.c.bf16 %v19392_v24, %v19392_v24 }
0x156f   : > { %v19387_v10 = vld [vmem:[#allocation7 + $0x2] sm:$0xf]  ;;  %v9833_v21 = vpack.c.bf16 %v9832_v9, %v9832_v9  ;;  %v19394_v25 = vld [vmem:[#allocation7 + $0x6] sm:$0xf]  ;;  %v10263_v4 = vpack.c.bf16 %v19390_v23, %v19390_v23  ;;  %v17895_v23 = vld [vmem:[#allocation18 + $0x120] sm:$0xff]  }
0x1570   : > { %11721 = vst [vmem:[#allocation7] sm:$0x7] %v18331_v18  ;;  %v10154_v22 = vld [vmem:[#allocation7 + $0x3] sm:$0xf]  ;;  %16464 = vmatmul.mubr.bf16.vlgmr.msra.gmra.mrb[104].mxu1 %v9852_v20  ;;  %v10047_v39 = vpack.c.bf16 %v19387_v10, %v19387_v10  ;;  %v10479_v8 = vpack.c.bf16 %v19394_v25, %v19394_v25  ;;  %v17891_v10 = vld [vmem:[#allocation18 + $0x100] sm:$0xff]   ;;  %v17897_v25 = vld [vmem:[#allocation18 + $0x130] sm:$0xff]  }
0x1571   : > { %16484 = vmatmul.mubr.bf16.vlgmr.msra.gmra.mrb[112].mxu0 %v9833_v21  ;;  %11722 = vst [vmem:[#allocation7 + $0x5] sm:$0x7] %v18331_v18  ;;  %16488 = vmatpush3.bf16.msra.mxu1 %v17843_v17  ;;  %v10155_v54 = vpack.c.bf16 %v10154_v22, %v10154_v22  ;;  %v17890_v17 = vld [vmem:[#allocation15 + $0x138] sm:$0xff]   ;;  %v17892_v20 = vld [vmem:[#allocation18 + $0x108] sm:$0xff]  }
0x1572   : > { %16508 = vmatpush3.bf16.msra.mxu0 %v17844_v19  ;;  %16489 = vmatprep.subr.bf16.mxu1 %v18331_v18  ;;  %v10597_v19 = vmax.f32 %v10595_v52, %v10596_v53  ;;  %v17893_v21 = vld [vmem:[#allocation18 + $0x110] sm:$0xff]   ;;  %v17894_v22 = vld [vmem:[#allocation18 + $0x118] sm:$0xff]   ;;  %v17896_v24 = vld [vmem:[#allocation18 + $0x128] sm:$0xff]  }
0x1573   : > { %16509 = vmatprep.subr.bf16.mxu0 %v18331_v18  ;;  %16503 = vmatprep.mubr.msk.bf16.mxu1 %vm18332_vm0, %v18331_v18 }
0x1574   : > { %16523 = vmatprep.mubr.msk.bf16.mxu0 %vm18332_vm0, %v18331_v18  ;;  %v10598_v9 = vpack.c.bf16 %v10597_v19, %v10597_v19 }
0x1575   : > { %16490 = vmatpush3.bf16.msra.mxu1 %v17845_v26  ;;  %v17898_v26 = vld [vmem:[#allocation18 + $0x138] sm:$0xff]  }
0x1576   : > { %16510 = vmatpush3.bf16.msra.mxu0 %v17846_v27  ;;  %16491 = vmatprep.subr.bf16.mxu1 %v18331_v18  ;;  %v17899_v27 = vld [vmem:[#allocation19 + $0x100] sm:$0xff]  }
0x1577   : > { %16511 = vmatprep.subr.bf16.mxu0 %v18331_v18 }
0x1579   : > { %16492 = vmatpush3.bf16.msra.mxu1 %v17847_v28  ;;  %v17900_v28 = vld [vmem:[#allocation19 + $0x108] sm:$0xff]  }
0x157a   : > { %16512 = vmatpush3.bf16.msra.mxu0 %v17848_v29  ;;  %16493 = vmatprep.subr.bf16.mxu1 %v18331_v18  ;;  %v17901_v29 = vld [vmem:[#allocation19 + $0x110] sm:$0xff]  }
0x157b   : > { %16513 = vmatprep.subr.bf16.mxu0 %v18331_v18 }
0x157d   : > { %16494 = vmatpush3.bf16.msra.mxu1 %v17849_v30 }
0x157e   : > { %16514 = vmatpush3.bf16.msra.mxu0 %v17850_v31  ;;  %16495 = vmatprep.subr.bf16.mxu1 %v18331_v18 }
0x157f   : > { %16515 = vmatprep.subr.bf16.mxu0 %v18331_v18 }
0x1581   : > { %16496 = vmatpush3.bf16.msra.mxu1 %v17851_v32  ;;  %v17902_v32 = vld [vmem:[#allocation19 + $0x118] sm:$0xff]  }
0x1582   : > { %16516 = vmatpush3.bf16.msra.mxu0 %v17852_v33  ;;  %16497 = vmatprep.subr.bf16.mxu1 %v18331_v18 }
0x1583   : > { %16517 = vmatprep.subr.bf16.mxu0 %v18331_v18 }
0x1585   : > { %16498 = vmatpush3.bf16.msra.mxu1 %v17853_v34 }
0x1586   : > { %16518 = vmatpush3.bf16.msra.mxu0 %v17854_v11  ;;  %16499 = vmatprep.subr.bf16.mxu1 %v18331_v18 }
0x1587   : > { %16519 = vmatprep.subr.bf16.mxu0 %v18331_v18 }
0x1589   : > { %16500 = vmatpush3.bf16.msra.mxu1 %v17855_v12 }
0x158a   : > { %16520 = vmatpush3.bf16.msra.mxu0 %v17856_v43  ;;  %16501 = vmatprep.subr.bf16.mxu1 %v18331_v18 }
0x158b   : > { %16521 = vmatprep.subr.bf16.mxu0 %v18331_v18 }
0x158d   : > { %16502 = vmatpush3.bf16.msra.mxu1 %v17857_v45 }
0x158e   : > { %16522 = vmatpush3.bf16.msra.mxu0 %v17858_v46  ;;  %16527 = vmatprep.subr.bf16.mxu1 %v18331_v18 }
0x158f   : > { %16547 = vmatprep.subr.bf16.mxu0 %v18331_v18 }
0x1590   : > { %16504 = vmatmul.mubr.bf16.vlgmr.msra.gmra.mrb[108].mxu1 %v10047_v39  ;;  %v17905_v39 = vld [vmem:[#allocation19 + $0x130] sm:$0xff]  }
0x1591   : > { %16524 = vmatmul.mubr.bf16.vlgmr.msra.gmra.mrb[116].mxu0 %v10155_v54  ;;  %16528 = vmatpush3.bf16.msra.mxu1 %v17859_v13  ;;  %v17903_v13 = vld [vmem:[#allocation19 + $0x120] sm:$0xff]  }
0x1592   : > { %16548 = vmatpush3.bf16.msra.mxu0 %v17860_v36  ;;  %16529 = vmatprep.subr.bf16.mxu1 %v18331_v18  ;;  %v17904_v36 = vld [vmem:[#allocation19 + $0x128] sm:$0xff]  }
0x1593   : > { %16549 = vmatprep.subr.bf16.mxu0 %v18331_v18  ;;  %16543 = vmatprep.mubr.msk.bf16.mxu1 %vm18332_vm0, %v18331_v18 }
0x1594   : > { %16563 = vmatprep.mubr.msk.bf16.mxu0 %vm18332_vm0, %v18331_v18 }
0x1595   : > { %16530 = vmatpush3.bf16.msra.mxu1 %v17861_v57 }
0x1596   : > { %16550 = vmatpush3.bf16.msra.mxu0 %v17862_v37  ;;  %16531 = vmatprep.subr.bf16.mxu1 %v18331_v18 }
0x1597   : > { %16551 = vmatprep.subr.bf16.mxu0 %v18331_v18 }
0x1599   : > { %16532 = vmatpush3.bf16.msra.mxu1 %v17863_v59 }
0x159a   : > { %16552 = vmatpush3.bf16.msra.mxu0 %v17864_v60  ;;  %16533 = vmatprep.subr.bf16.mxu1 %v18331_v18 }
0x159b   : > { %16553 = vmatprep.subr.bf16.mxu0 %v18331_v18 }
0x159d   : > { %16534 = vmatpush3.bf16.msra.mxu1 %v17865_v61 }
0x159e   : > { %16554 = vmatpush3.bf16.msra.mxu0 %v17866_v62  ;;  %16535 = vmatprep.subr.bf16.mxu1 %v18331_v18 }
0x159f   : > { %16555 = vmatprep.subr.bf16.mxu0 %v18331_v18 }
0x15a1   : > { %16536 = vmatpush3.bf16.msra.mxu1 %v17867_v63 }
0x15a2   : > { %16556 = vmatpush3.bf16.msra.mxu0 %v17868_v35  ;;  %16537 = vmatprep.subr.bf16.mxu1 %v18331_v18 }
0x15a3   : > { %16557 = vmatprep.subr.bf16.mxu0 %v18331_v18 }
0x15a5   : > { %16538 = vmatpush3.bf16.msra.mxu1 %v17869_v58 }
0x15a6   : > { %16558 = vmatpush3.bf16.msra.mxu0 %v17870_v0  ;;  %16539 = vmatprep.subr.bf16.mxu1 %v18331_v18 }
0x15a7   : > { %16559 = vmatprep.subr.bf16.mxu0 %v18331_v18 }
0x15a9   : > { %16540 = vmatpush3.bf16.msra.mxu1 %v17871_v1 }
0x15aa   : > { %16560 = vmatpush3.bf16.msra.mxu0 %v17872_v2  ;;  %16541 = vmatprep.subr.bf16.mxu1 %v18331_v18 }
0x15ab   : > { %16561 = vmatprep.subr.bf16.mxu0 %v18331_v18 }
0x15ad   : > { %16542 = vmatpush3.bf16.msra.mxu1 %v17873_v3 }
0x15ae   : > { %16562 = vmatpush3.bf16.msra.mxu0 %v17874_v40  ;;  %16567 = vmatprep.subr.bf16.mxu1 %v18331_v18 }
0x15af   : > { %16587 = vmatprep.subr.bf16.mxu0 %v18331_v18 }
0x15b0   : > { %16544 = vmatmul.mubr.bf16.vlgmr.msra.gmra.mrb[112].mxu1 %v10263_v4 }
0x15b1   : > { %16564 = vmatmul.mubr.bf16.vlgmr.msra.gmra.mrb[120].mxu0 %v10371_v42  ;;  %16568 = vmatpush3.bf16.msra.mxu1 %v17875_v55 }
0x15b2   : > { %16588 = vmatpush3.bf16.msra.mxu0 %v17876_v41  ;;  %16569 = vmatprep.subr.bf16.mxu1 %v18331_v18 }
0x15b3   : > { %16589 = vmatprep.subr.bf16.mxu0 %v18331_v18  ;;  %16583 = vmatprep.mubr.msk.bf16.mxu1 %vm18332_vm0, %v18331_v18 }
0x15b4   : > { %16603 = vmatprep.mubr.msk.bf16.mxu0 %vm18332_vm0, %v18331_v18 }
0x15b5   : > { %16570 = vmatpush3.bf16.msra.mxu1 %v17877_v5 }
0x15b6   : > { %16590 = vmatpush3.bf16.msra.mxu0 %v17878_v44  ;;  %16571 = vmatprep.subr.bf16.mxu1 %v18331_v18 }
0x15b7   : > { %16591 = vmatprep.subr.bf16.mxu0 %v18331_v18 }
0x15b9   : > { %16572 = vmatpush3.bf16.msra.mxu1 %v17879_v6  ;;  %v13740_v6 = vld [vmem:[#allocation13 + $0x4] ss:$0 sm:$0xff] }
0x15ba   : > { %16592 = vmatpush3.bf16.msra.mxu0 %v17880_v48  ;;  %16573 = vmatprep.subr.bf16.mxu1 %v18331_v18 }
0x15bb   : > { %16593 = vmatprep.subr.bf16.mxu0 %v18331_v18 }
0x15bd   : > { %16574 = vmatpush3.bf16.msra.mxu1 %v17881_v56 }
0x15be   : > { %16594 = vmatpush3.bf16.msra.mxu0 %v17882_v14  ;;  %16575 = vmatprep.subr.bf16.mxu1 %v18331_v18 }
0x15bf   : > { %16595 = vmatprep.subr.bf16.mxu0 %v18331_v18 }
0x15c1   : > { %16576 = vmatpush3.bf16.msra.mxu1 %v17883_v15 }
0x15c2   : > { %16596 = vmatpush3.bf16.msra.mxu0 %v17884_v47  ;;  %16577 = vmatprep.subr.bf16.mxu1 %v18331_v18 }
0x15c3   : > { %16597 = vmatprep.subr.bf16.mxu0 %v18331_v18 }
0x15c5   : > { %16578 = vmatpush3.bf16.msra.mxu1 %v17885_v49 }
0x15c6   : > { %16598 = vmatpush3.bf16.msra.mxu0 %v17886_v50  ;;  %16579 = vmatprep.subr.bf16.mxu1 %v18331_v18 }
0x15c7   : > { %16599 = vmatprep.subr.bf16.mxu0 %v18331_v18 }
0x15c9   : > { %16580 = vmatpush3.bf16.msra.mxu1 %v17887_v51 }
0x15ca   : > { %16600 = vmatpush3.bf16.msra.mxu0 %v17888_v7  ;;  %16581 = vmatprep.subr.bf16.mxu1 %v18331_v18 }
0x15cb   : > { %16601 = vmatprep.subr.bf16.mxu0 %v18331_v18 }
0x15cd   : > { %16582 = vmatpush3.bf16.msra.mxu1 %v17889_v16 }
0x15ce   : > { %16602 = vmatpush3.bf16.msra.mxu0 %v17890_v17  ;;  %16607 = vmatprep.subr.bf16.mxu1 %v18331_v18 }
0x15cf   : > { %16627 = vmatprep.subr.bf16.mxu0 %v18331_v18 }
0x15d0   : > { %16584 = vmatmul.mubr.bf16.vlgmr.msra.gmra.mrb[116].mxu1 %v10479_v8 }
0x15d1   : > { %16604 = vmatmul.mubr.bf16.vlgmr.msra.gmra.mrb[124].mxu0 %v10598_v9  ;;  %16623 = vmatprep.mubr.msk.bf16.mxu1 %vm18332_vm0, %v18331_v18 }
0x15d2   : > { %16643 = vmatprep.mubr.msk.bf16.mxu0 %vm18332_vm0, %v18331_v18  ;;  %16608 = vmatpush3.bf16.msra.mxu1 %v17891_v10 }
0x15d3   : > { %16609 = vmatprep.subr.bf16.mxu1 %v18331_v18  ;;  %16628 = vmatpush3.bf16.msra.mxu0 %v17899_v27 }
0x15d4   : > { %16629 = vmatprep.subr.bf16.mxu0 %v18331_v18 }
0x15d6   : > { %16610 = vmatpush3.bf16.msra.mxu1 %v17892_v20 }
0x15d7   : > { %16611 = vmatprep.subr.bf16.mxu1 %v18331_v18  ;;  %16630 = vmatpush3.bf16.msra.mxu0 %v17900_v28 }
0x15d8   : > { %16631 = vmatprep.subr.bf16.mxu0 %v18331_v18 }
0x15da   : > { %16612 = vmatpush3.bf16.msra.mxu1 %v17893_v21  ;;  %v17906_v21 = vld [vmem:[#allocation19 + $0x138] sm:$0xff]  }
0x15db   : > { %16613 = vmatprep.subr.bf16.mxu1 %v18331_v18  ;;  %16632 = vmatpush3.bf16.msra.mxu0 %v17901_v29  ;;  %v17908_v29 = vld [vmem:[#allocation8 + $0x8c8] sm:$0xff]  }
0x15dc   : > { %16633 = vmatprep.subr.bf16.mxu0 %v18331_v18 }
0x15de   : > { %16614 = vmatpush3.bf16.msra.mxu1 %v17894_v22 }
0x15df   : > { %16615 = vmatprep.subr.bf16.mxu1 %v18331_v18  ;;  %16634 = vmatpush3.bf16.msra.mxu0 %v17902_v32  ;;  %v17911_v32 = vld [vmem:[#allocation8 + $0x8e0] sm:$0xff]  }
0x15e0   : > { %16635 = vmatprep.subr.bf16.mxu0 %v18331_v18 }
0x15e2   : > { %16616 = vmatpush3.bf16.msra.mxu1 %v17895_v23 }
0x15e3   : > { %16617 = vmatprep.subr.bf16.mxu1 %v18331_v18  ;;  %16636 = vmatpush3.bf16.msra.mxu0 %v17903_v13  ;;  %v17917_v13 = vld [vmem:[#allocation8 + $0x908] sm:$0xff]  }
0x15e4   : > { %16637 = vmatprep.subr.bf16.mxu0 %v18331_v18 }
0x15e6   : > { %16618 = vmatpush3.bf16.msra.mxu1 %v17896_v24 }
0x15e7   : > { %16619 = vmatprep.subr.bf16.mxu1 %v18331_v18  ;;  %16638 = vmatpush3.bf16.msra.mxu0 %v17904_v36  ;;  %v17918_v36 = vld [vmem:[#allocation8 + $0x988] sm:$0xff]  }
0x15e8   : > { %16639 = vmatprep.subr.bf16.mxu0 %v18331_v18 }
0x15ea   : > { %16620 = vmatpush3.bf16.msra.mxu1 %v17897_v25 }
0x15eb   : > { %16621 = vmatprep.subr.bf16.mxu1 %v18331_v18  ;;  %16640 = vmatpush3.bf16.msra.mxu0 %v17905_v39  ;;  %v17919_v39 = vld [vmem:[#allocation8 + $0x910] sm:$0xff]  }
0x15ec   : > { %16641 = vmatprep.subr.bf16.mxu0 %v18331_v18 }
0x15ee   : > { %16622 = vmatpush3.bf16.msra.mxu1 %v17898_v26  ;;  %v17907_v26 = vld [vmem:[#allocation8 + $0x8c0] sm:$0xff]  }
0x15ef   : > { %16647 = vmatprep.subr.bf16.mxu1 %v18331_v18  ;;  %16642 = vmatpush3.bf16.msra.mxu0 %v17906_v21  ;;  %v17942_v21 = vld [vmem:[#allocation8 + $0xa28] sm:$0xff]  }
0x15f0   : > { %16667 = vmatprep.subr.bf16.mxu0 %v18331_v18 }
0x1643   : > { %v9952_v30 = vpop.f32.mrb[104].mxu1 }
0x1644   : > { %v10040_v31 = vpop.f32.mrb[112].mxu0  ;;  %v16465_v34 = vpop.f32.mrb[105].mxu1 }
0x1645   : > { %v10041_v33 = vadd.f32 %v10040_v31, %v9952_v30  ;;  %v16485_v11 = vpop.f32.mrb[113].mxu0  ;;  %v9955_v12 = vpop.f32.mrb[106].mxu1  ;;  %v17909_v30 = vld [vmem:[#allocation8 + $0x8d0] sm:$0xff]   ;;  %v17910_v31 = vld [vmem:[#allocation8 + $0x8d8] sm:$0xff]  }
0x1646   : > { %v10043_v43 = vpop.f32.mrb[114].mxu0  ;;  %v16466_v45 = vpop.f32.mrb[107].mxu1  ;;  %v17913_v34 = vld [vmem:[#allocation8 + $0x8f0] sm:$0xff]   ;;  %v17914_v11 = vld [vmem:[#allocation8 + $0x8f8] sm:$0xff]  }
0x1647   : > { %v16486_v46 = vpop.f32.mrb[115].mxu0  ;;  %v10951_v12 = vld [vmem:[#allocation6] ss:$2 sm:$0x3]  ;;  %v17915_v43 = vld [vmem:[#allocation8 + $0x900] sm:$0xff]  }
0x1648   : > { %v10952_v45 = vpack.c.bf16 %v10951_v12, %v10951_v12  ;;  %v17916_v46 = vld [vmem:[#allocation8 + $0x980] sm:$0xff]   ;;  %v17953_v12 = vld [vmem:[#allocation8 + $0x9f0] sm:$0xff]  }
0x1663   : > { %v10147_v54 = vpop.f32.mrb[108].mxu1 }
0x1664   : > { %v10255_v57 = vpop.f32.mrb[116].mxu0  ;;  %v10153_v37 = vadd.f32 %v10147_v54, %v10041_v33  ;;  %v16505_v59 = vpop.f32.mrb[109].mxu1  ;;  %v17912_v33 = vld [vmem:[#allocation8 + $0x8e8] sm:$0xff]   ;;  %v17920_v54 = vld [vmem:[#allocation8 + $0x990] sm:$0xff]  }
0x1665   : > { %v16525_v60 = vpop.f32.mrb[117].mxu0  ;;  %v10150_v61 = vpop.f32.mrb[110].mxu1  ;;  %v17923_v59 = vld [vmem:[#allocation8 + $0x920] sm:$0xff]  }
0x1666   : > { %v10258_v62 = vpop.f32.mrb[118].mxu0  ;;  %v10261_v63 = vadd.f32 %v10255_v57, %v10153_v37  ;;  %v16506_v35 = vpop.f32.mrb[111].mxu1  ;;  %v17921_v57 = vld [vmem:[#allocation8 + $0x918] sm:$0xff]   ;;  %v17924_v60 = vld [vmem:[#allocation8 + $0x9a0] sm:$0xff]   ;;  %v17925_v61 = vld [vmem:[#allocation8 + $0x928] sm:$0xff]  }
0x1667   : > { %v16526_v58 = vpop.f32.mrb[119].mxu0  ;;  %v17922_v37 = vld [vmem:[#allocation8 + $0x998] sm:$0xff]   ;;  %v17926_v62 = vld [vmem:[#allocation8 + $0x9a8] sm:$0xff]   ;;  %v17928_v35 = vld [vmem:[#allocation8 + $0x9b0] sm:$0xff]  }
0x1668   : > { %v17929_v58 = vld [vmem:[#allocation8 + $0x938] sm:$0xff]  }
0x1683   : > { %v10363_v0 = vpop.f32.mrb[112].mxu1 }
0x1684   : > { %v10471_v1 = vpop.f32.mrb[120].mxu0  ;;  %v10369_v2 = vadd.f32 %v10363_v0, %v10261_v63  ;;  %v16545_v3 = vpop.f32.mrb[113].mxu1  ;;  %v17927_v63 = vld [vmem:[#allocation8 + $0x930] sm:$0xff]   ;;  %v17930_v0 = vld [vmem:[#allocation8 + $0x9b8] sm:$0xff]  }
0x1685   : > { %v16565_v40 = vpop.f32.mrb[121].mxu0  ;;  %v10366_v55 = vpop.f32.mrb[114].mxu1 }
0x1686   : > { %v10474_v41 = vpop.f32.mrb[122].mxu0  ;;  %v10477_v4 = vadd.f32 %v10471_v1, %v10369_v2  ;;  %v16546_v42 = vpop.f32.mrb[115].mxu1 }
0x1687   : > { %v16566_v5 = vpop.f32.mrb[123].mxu0 }
0x1688   : > { %v13741_v5 = vld [vmem:[#allocation16 + $0x4] ss:$0 sm:$0xff] }
0x16a3   : > { %v10579_v44 = vpop.f32.mrb[116].mxu1 }
0x16a4   : > { %v19484_v48 = vpop.f32.mrb[124].mxu0  ;;  %v10585_v56 = vadd.f32 %v10579_v44, %v10477_v4  ;;  %v16585_v14 = vpop.f32.mrb[117].mxu1 }
0x16a5   : > { %v16605_v15 = vpop.f32.mrb[125].mxu0  ;;  %v10582_v47 = vpop.f32.mrb[118].mxu1 }
0x16a6   : > { %v10709_v49 = vpop.f32.mrb[126].mxu0  ;;  %v19486_v50 = vadd.f32 %v13740_v6, %v10585_v56  ;;  %v16586_v51 = vpop.f32.mrb[119].mxu1  ;;  %v10707_v6 = vadd.f32 %v13741_v5, %v19484_v48  ;;  %v17931_v47 = vld [vmem:[#allocation8 + $0x940] sm:$0xff]   ;;  %v17935_v48 = vld [vmem:[#allocation8 + $0x950] sm:$0xff]  }
0x16a7   : > { %v16606_v7 = vpop.f32.mrb[127].mxu0  ;;  %v17932_v49 = vld [vmem:[#allocation8 + $0xa00] sm:$0xff]  }
0x16a8   : > { %v10713_v52 = vsel %vm10712_vm1, %v19486_v50, 0.0  ;;  %v17971_v5 = vld [vmem:[#allocation12 + $0x920] sm:$0xff]  }
0x16a9   : > { %v10714_v53 = vrot.slane %v10713_v52, 4 }
0x16ab   : > { %v10715_v16 = vadd.f32 %v10714_v53, %v10713_v52 }
0x16ad   : > { %v10716_v17 = vrot.slane %v10715_v16, 2 }
0x16af   : > { %v10717_v19 = vadd.f32 %v10716_v17, %v10715_v16  ;;  %v17933_v16 = vld [vmem:[#allocation8 + $0x948] sm:$0xff]  }
0x16b0   : > { %v17934_v17 = vld [vmem:[#allocation8 + $0xa08] sm:$0xff]  }
0x16b1   : > { %v10718_v8 = vrot.slane %v10717_v19, 1 }
0x16b3   : > { %v10719_v9 = vadd.f32 %v10718_v8, %v10717_v19  ;;  %v17937_v19 = vld [vmem:[#allocation8 + $0x958] sm:$0xff]  }
0x16b4   : > { %v17938_v8 = vld [vmem:[#allocation8 + $0xa18] sm:$0xff]  }
0x16b5   : > { %v10721_v10 = vmul.f32 0.25, %v10719_v9  ;;  %v17939_v9 = vld [vmem:[#allocation8 + $0x960] sm:$0xff]  }
0x16b7   : > { %v10722_v20 = vpack.c.bf16 %v10721_v10, %v10721_v10  ;;  %v17940_v10 = vld [vmem:[#allocation8 + $0xa20] sm:$0xff]  }
0x16b9   : > { %16624 = vmatmul.mubr.bf16.vlgmr.msra.gmra.mrb[120].mxu1 %v10722_v20  ;;  %v17941_v20 = vld [vmem:[#allocation8 + $0x968] sm:$0xff]  }
0x16ba   : > { %16663 = vmatprep.mubr.msk.bf16.mxu1 %vm18332_vm0, %v18331_v18  ;;  %16648 = vmatpush3.bf16.msra.mxu1 %v17915_v43 }
0x16bb   : > { %16649 = vmatprep.subr.bf16.mxu1 %v18331_v18 }
0x16be   : > { %16650 = vmatpush3.bf16.msra.mxu1 %v17917_v13 }
0x16bf   : > { %16651 = vmatprep.subr.bf16.mxu1 %v18331_v18 }
0x16c2   : > { %16652 = vmatpush3.bf16.msra.mxu1 %v17919_v39 }
0x16c3   : > { %16653 = vmatprep.subr.bf16.mxu1 %v18331_v18 }
0x16c6   : > { %16654 = vmatpush3.bf16.msra.mxu1 %v17921_v57 }
0x16c7   : > { %16655 = vmatprep.subr.bf16.mxu1 %v18331_v18 }
0x16ca   : > { %16656 = vmatpush3.bf16.msra.mxu1 %v17923_v59  ;;  %v17957_v59 = vld [vmem:[#allocation8 + $0xa50] sm:$0xff]  }
0x16cb   : > { %16657 = vmatprep.subr.bf16.mxu1 %v18331_v18 }
0x16ce   : > { %16658 = vmatpush3.bf16.msra.mxu1 %v17925_v61  ;;  %v17959_v61 = vld [vmem:[#allocation8 + $0xa60] sm:$0xff]  }
0x16cf   : > { %16659 = vmatprep.subr.bf16.mxu1 %v18331_v18 }
0x16d2   : > { %16660 = vmatpush3.bf16.msra.mxu1 %v17927_v63  ;;  %v17961_v63 = vld [vmem:[#allocation8 + $0xa70] sm:$0xff]  }
0x16d3   : > { %16661 = vmatprep.subr.bf16.mxu1 %v18331_v18 }
0x16d6   : > { %16662 = vmatpush3.bf16.msra.mxu1 %v17929_v58 }
0x16d7   : > { %16687 = vmatprep.subr.bf16.mxu1 %v18331_v18 }
0x178c   : > { %v10822_v22 = vpop.f32.mrb[120].mxu1 }
0x178d   : > { %v10828_v23 = vmax.f32 %v10822_v22, 0.0  ;;  %v16625_v24 = vpop.f32.mrb[121].mxu1  ;;  %v17943_v22 = vld [vmem:[#allocation8 + $0x970] sm:$0xff]  }
0x178e   : > { %v10825_v25 = vpop.f32.mrb[122].mxu1  ;;  %v17945_v24 = vld [vmem:[#allocation8 + $0x978] sm:$0xff]  }
0x178f   : > { %v10829_v27 = vpack.c.bf16 %v10828_v23, %v10828_v23  ;;  %v16626_v28 = vpop.f32.mrb[123].mxu1  ;;  %v17944_v23 = vld [vmem:[#allocation8 + $0xa30] sm:$0xff]   ;;  %v17946_v25 = vld [vmem:[#allocation8 + $0xa38] sm:$0xff]  }
0x1790   : > { %v17947_v28 = vld [vmem:[#allocation8 + $0x9c0] sm:$0xff]  }
0x1791   : > { %16644 = vmatmul.mubr.bf16.vlgmr.msra.gmra.mrb[128].mxu0 %v10829_v27 }
0x1792   : > { %16668 = vmatpush3.bf16.msra.mxu0 %v17907_v26  ;;  %16683 = vmatprep.mubr.msk.bf16.mxu0 %vm18332_vm0, %v18331_v18 }
0x1793   : > { %16669 = vmatprep.subr.bf16.mxu0 %v18331_v18 }
0x1796   : > { %16670 = vmatpush3.bf16.msra.mxu0 %v17908_v29 }
0x1797   : > { %16671 = vmatprep.subr.bf16.mxu0 %v18331_v18 }
0x179a   : > { %16672 = vmatpush3.bf16.msra.mxu0 %v17909_v30 }
0x179b   : > { %16673 = vmatprep.subr.bf16.mxu0 %v18331_v18 }
0x179e   : > { %16674 = vmatpush3.bf16.msra.mxu0 %v17910_v31  ;;  %v17948_v31 = vld [vmem:[#allocation8 + $0x9c8] sm:$0xff]  }
0x179f   : > { %16675 = vmatprep.subr.bf16.mxu0 %v18331_v18 }
0x17a2   : > { %16676 = vmatpush3.bf16.msra.mxu0 %v17911_v32  ;;  %v17949_v32 = vld [vmem:[#allocation8 + $0x9d0] sm:$0xff]  }
0x17a3   : > { %16677 = vmatprep.subr.bf16.mxu0 %v18331_v18 }
0x17a6   : > { %16678 = vmatpush3.bf16.msra.mxu0 %v17912_v33  ;;  %v17950_v33 = vld [vmem:[#allocation8 + $0x9d8] sm:$0xff]  }
0x17a7   : > { %16679 = vmatprep.subr.bf16.mxu0 %v18331_v18 }
0x17aa   : > { %16680 = vmatpush3.bf16.msra.mxu0 %v17913_v34  ;;  %v17951_v34 = vld [vmem:[#allocation8 + $0x9e0] sm:$0xff]  }
0x17ab   : > { %16681 = vmatprep.subr.bf16.mxu0 %v18331_v18 }
0x17ae   : > { %16682 = vmatpush3.bf16.msra.mxu0 %v17914_v11  ;;  %v17952_v11 = vld [vmem:[#allocation8 + $0x9e8] sm:$0xff]  }
0x17af   : > { %16707 = vmatprep.subr.bf16.mxu0 %v18331_v18 }
0x17b1   : > { %16684 = vmatmul.mubr.bf16.vlgmr.msra.gmra.mrb[132].mxu0 %v10952_v45 }
0x17b2   : > { %16708 = vmatpush3.bf16.msra.mxu0 %v17916_v46  ;;  %16723 = vmatprep.mubr.msk.bf16.mxu0 %vm18332_vm0, %v18331_v18  ;;  %v17954_v46 = vld [vmem:[#allocation8 + $0x9f8] sm:$0xff]  }
0x17b3   : > { %16709 = vmatprep.subr.bf16.mxu0 %v18331_v18 }
0x17b6   : > { %16710 = vmatpush3.bf16.msra.mxu0 %v17918_v36 }
0x17b7   : > { %16711 = vmatprep.subr.bf16.mxu0 %v18331_v18 }
0x17ba   : > { %16712 = vmatpush3.bf16.msra.mxu0 %v17920_v54  ;;  %v17955_v54 = vld [vmem:[#allocation8 + $0xa40] sm:$0xff]  }
0x17bb   : > { %16713 = vmatprep.subr.bf16.mxu0 %v18331_v18 }
0x17be   : > { %16714 = vmatpush3.bf16.msra.mxu0 %v17922_v37  ;;  %v17956_v37 = vld [vmem:[#allocation8 + $0xa48] sm:$0xff]  }
0x17bf   : > { %16715 = vmatprep.subr.bf16.mxu0 %v18331_v18 }
0x17c2   : > { %16716 = vmatpush3.bf16.msra.mxu0 %v17924_v60  ;;  %v17958_v60 = vld [vmem:[#allocation8 + $0xa58] sm:$0xff]  }
0x17c3   : > { %16717 = vmatprep.subr.bf16.mxu0 %v18331_v18 }
0x17c6   : > { %16718 = vmatpush3.bf16.msra.mxu0 %v17926_v62  ;;  %v17960_v62 = vld [vmem:[#allocation8 + $0xa68] sm:$0xff]  }
0x17c7   : > { %16719 = vmatprep.subr.bf16.mxu0 %v18331_v18 }
0x17ca   : > { %16720 = vmatpush3.bf16.msra.mxu0 %v17928_v35  ;;  %v17962_v35 = vld [vmem:[#allocation8 + $0xa78] sm:$0xff]  }
0x17cb   : > { %16721 = vmatprep.subr.bf16.mxu0 %v18331_v18 }
0x17ce   : > { %16722 = vmatpush3.bf16.msra.mxu0 %v17930_v0 }
0x17cf   : > { %16747 = vmatprep.subr.bf16.mxu0 %v18331_v18 }
0x1864   : > { %v10929_v1 = vpop.f32.mrb[128].mxu0 }
0x1865   : > { %v13766_v2 = vmul.f32 -1.442695, %v10929_v1  ;;  %v16645_v3 = vpop.f32.mrb[129].mxu0  ;;  %v17963_v1 = vld [vmem:[#allocation12 + $0x900] sm:$0xff]  }
0x1866   : > { %v10932_v40 = vpop.f32.mrb[130].mxu0  ;;  %v17965_v3 = vld [vmem:[#allocation12 + $0x908] sm:$0xff]  }
0x1867   : > { %18059 = vpow2.f32 %v13766_v2  ;;  %v16646_v55 = vpop.f32.mrb[131].mxu0  ;;  %v17964_v2 = vld [vmem:[#allocation12 + $0x8c0] sm:$0xff]   ;;  %v17966_v40 = vld [vmem:[#allocation12 + $0x8c8] sm:$0xff]  }
0x1868   : > { %v17967_v55 = vld [vmem:[#allocation12 + $0x910] sm:$0xff]  }
0x1871   : > { %v18060_v41 = vpop.eup %18059 }
0x1872   : > { %v10938_v4 = vadd.f32 1.0, %v18060_v41  ;;  %v17968_v41 = vld [vmem:[#allocation12 + $0x8d0] sm:$0xff]  }
0x1874   : > { %18061 = vrcp.f32 %v10938_v4  ;;  %v17969_v4 = vld [vmem:[#allocation12 + $0x918] sm:$0xff]  }
0x187e   : > { %v18062_v42 = vpop.eup %18061 }
0x187f   : > { %v10944_v44 = vrot.slane %v18062_v42, %v18802_v38  ;;  %v17970_v42 = vld [vmem:[#allocation12 + $0x8d8] sm:$0xff]  }
0x1881   : > { %v10945_v56 = vmul.f32 %v10944_v44, %v19486_v50  ;;  %v17936_v50 = vld [vmem:[#allocation8 + $0xa10] sm:$0xff]   ;;  %v17972_v44 = vld [vmem:[#allocation12 + $0x8e0] sm:$0xff]  }
0x1883   : > { %v10946_v14 = vadd.f32 %v10945_v56, %v10707_v6  ;;  %v17973_v6 = vld [vmem:[#allocation12 + $0x928] sm:$0xff]  }
0x1884   : > { %v19553_v43 = vpop.f32.mrb[132].mxu0  ;;  %v17974_v56 = vld [vmem:[#allocation12 + $0x8e8] sm:$0xff]  }
0x1885   : > { %v10947_v15 = vmax.f32 %v10946_v14, 0.0  ;;  %v16685_v45 = vpop.f32.mrb[133].mxu0  ;;  %v17975_v14 = vld [vmem:[#allocation12 + $0x930] sm:$0xff]  }
0x1886   : > { %v11163_v13 = vpop.f32.mrb[134].mxu0 }
0x1887   : > { %10950 = vst [vmem:[#allocation6 + $0x3] sm:$0xf] %v10947_v15  ;;  %v16686_v36 = vpop.f32.mrb[135].mxu0  ;;  %v17976_v15 = vld [vmem:[#allocation12 + $0x8f0] sm:$0xff]  }
0x188e   : > { %v10971_v51 = vld [vmem:[#allocation6 + $0x1] ss:$2 sm:$0x3]  ;;  %v11167_v26 = vld [vmem:[#allocation6 + $0x2] ss:$2 sm:$0x3] }
0x188f   : > { %v11276_v7 = vld [vmem:[#allocation6 + $0x3] ss:$2 sm:$0x3]  ;;  %v10972_v52 = vpack.c.bf16 %v10971_v51, %v10971_v51  ;;  %v11168_v29 = vpack.c.bf16 %v11167_v26, %v11167_v26  ;;  %v11385_v39 = vld [vmem:[#allocation6 + $0x4] ss:$2 sm:$0x3] }
0x1890   : > { %v11277_v53 = vpack.c.bf16 %v11276_v7, %v11276_v7  ;;  %v11494_v27 = vld [vmem:[#allocation6 + $0x5] ss:$2 sm:$0x3]  ;;  %v11386_v57 = vpack.c.bf16 %v11385_v39, %v11385_v39  ;;  %v11603_v58 = vld [vmem:[#allocation6 + $0x6] ss:$2 sm:$0x3] }
0x1891   : > { %16664 = vmatmul.mubr.bf16.vlgmr.msra.gmra.mrb[124].mxu1 %v10972_v52  ;;  %v11495_v30 = vpack.c.bf16 %v11494_v27, %v11494_v27  ;;  %v11604_v0 = vpack.c.bf16 %v11603_v58, %v11603_v58  ;;  %v17978_v51 = vld [vmem:[#allocation12 + $0x8f8] sm:$0xff]   ;;  %v11724_v7 = vld [vmem:[#allocation7] sm:$0x3] }
0x1892   : > { %16724 = vmatmul.mubr.bf16.vlgmr.msra.gmra.mrb[136].mxu0 %v11277_v53  ;;  %16688 = vmatpush3.bf16.msra.mxu1 %v17931_v47  ;;  %v17977_v47 = vld [vmem:[#allocation12 + $0x938] sm:$0xff]   ;;  %v17979_v53 = vld [vmem:[#allocation12 + $0x940] sm:$0xff]  }
0x1893   : > { %16748 = vmatpush3.bf16.msra.mxu0 %v17932_v49  ;;  %16689 = vmatprep.subr.bf16.mxu1 %v18331_v18  ;;  %v11743_v49 = vld [vmem:[#allocation7 + $0x1] sm:$0x3]  ;;  %v17993_v26 = vld [vmem:[#allocation12 + $0x978] sm:$0xff]  }
0x1894   : > { %16749 = vmatprep.subr.bf16.mxu0 %v18331_v18  ;;  %16703 = vmatprep.mubr.msk.bf16.mxu1 %vm18332_vm0, %v18331_v18  ;;  %v11744_v52 = vpack.c.bf16 %v11743_v49, %v11743_v49  ;;  %v17994_v27 = vld [vmem:[#allocation12 + $0x9b8] sm:$0xff]   ;;  %v17999_v49 = vld [vmem:[#allocation12 + $0x9d0] sm:$0xff]  }
0x1895   : > { %16763 = vmatprep.mubr.msk.bf16.mxu0 %vm18332_vm0, %v18331_v18 }
0x1896   : > { %16690 = vmatpush3.bf16.msra.mxu1 %v17933_v16  ;;  %v11725_v16 = vpack.c.bf16 %v11724_v7, %v11724_v7  ;;  %v18001_v7 = vld [vmem:[#allocation12 + $0x9d8] sm:$0xff]  }
0x1897   : > { %16750 = vmatpush3.bf16.msra.mxu0 %v17934_v17  ;;  %16691 = vmatprep.subr.bf16.mxu1 %v18331_v18  ;;  %v17980_v17 = vld [vmem:[#allocation12 + $0x980] sm:$0xff]  }
0x1898   : > { %16751 = vmatprep.subr.bf16.mxu0 %v18331_v18 }
0x189a   : > { %16692 = vmatpush3.bf16.msra.mxu1 %v17935_v48  ;;  %v17981_v48 = vld [vmem:[#allocation12 + $0x948] sm:$0xff]  }
0x189b   : > { %16752 = vmatpush3.bf16.msra.mxu0 %v17936_v50  ;;  %16693 = vmatprep.subr.bf16.mxu1 %v18331_v18  ;;  %v17982_v50 = vld [vmem:[#allocation12 + $0x988] sm:$0xff]  }
0x189c   : > { %16753 = vmatprep.subr.bf16.mxu0 %v18331_v18 }
0x189e   : > { %16694 = vmatpush3.bf16.msra.mxu1 %v17937_v19  ;;  %v17983_v19 = vld [vmem:[#allocation12 + $0x950] sm:$0xff]  }
0x189f   : > { %16754 = vmatpush3.bf16.msra.mxu0 %v17938_v8  ;;  %16695 = vmatprep.subr.bf16.mxu1 %v18331_v18  ;;  %v17984_v8 = vld [vmem:[#allocation12 + $0x990] sm:$0xff]  }
0x18a0   : > { %16755 = vmatprep.subr.bf16.mxu0 %v18331_v18 }
0x18a2   : > { %16696 = vmatpush3.bf16.msra.mxu1 %v17939_v9  ;;  %v17985_v9 = vld [vmem:[#allocation12 + $0x958] sm:$0xff]  }
0x18a3   : > { %16756 = vmatpush3.bf16.msra.mxu0 %v17940_v10  ;;  %16697 = vmatprep.subr.bf16.mxu1 %v18331_v18  ;;  %v17986_v10 = vld [vmem:[#allocation12 + $0x998] sm:$0xff]  }
0x18a4   : > { %16757 = vmatprep.subr.bf16.mxu0 %v18331_v18 }
0x18a6   : > { %16698 = vmatpush3.bf16.msra.mxu1 %v17941_v20  ;;  %v17987_v20 = vld [vmem:[#allocation12 + $0x960] sm:$0xff]  }
0x18a7   : > { %16758 = vmatpush3.bf16.msra.mxu0 %v17942_v21  ;;  %16699 = vmatprep.subr.bf16.mxu1 %v18331_v18  ;;  %v17988_v21 = vld [vmem:[#allocation12 + $0x9a0] sm:$0xff]  }
0x18a8   : > { %16759 = vmatprep.subr.bf16.mxu0 %v18331_v18 }
0x18aa   : > { %16700 = vmatpush3.bf16.msra.mxu1 %v17943_v22  ;;  %v17989_v22 = vld [vmem:[#allocation12 + $0x968] sm:$0xff]  }
0x18ab   : > { %16760 = vmatpush3.bf16.msra.mxu0 %v17944_v23  ;;  %16701 = vmatprep.subr.bf16.mxu1 %v18331_v18  ;;  %v17990_v23 = vld [vmem:[#allocation12 + $0x9a8] sm:$0xff]  }
0x18ac   : > { %16761 = vmatprep.subr.bf16.mxu0 %v18331_v18 }
0x18ae   : > { %16702 = vmatpush3.bf16.msra.mxu1 %v17945_v24  ;;  %v17991_v24 = vld [vmem:[#allocation12 + $0x970] sm:$0xff]  }
0x18af   : > { %16762 = vmatpush3.bf16.msra.mxu0 %v17946_v25  ;;  %16727 = vmatprep.subr.bf16.mxu1 %v18331_v18  ;;  %v17992_v25 = vld [vmem:[#allocation12 + $0x9b0] sm:$0xff]  }
0x18b0   : > { %16787 = vmatprep.subr.bf16.mxu0 %v18331_v18 }
0x18b1   : > { %16704 = vmatmul.mubr.bf16.vlgmr.msra.gmra.mrb[128].mxu1 %v11168_v29 }
0x18b2   : > { %16764 = vmatmul.mubr.bf16.vlgmr.msra.gmra.mrb[140].mxu0 %v11495_v30  ;;  %16728 = vmatpush3.bf16.msra.mxu1 %v17947_v28 }
0x18b3   : > { %16743 = vmatprep.mubr.msk.bf16.mxu1 %vm18332_vm0, %v18331_v18  ;;  %16729 = vmatprep.subr.bf16.mxu1 %v18331_v18 }
0x18b4   : > { %16803 = vmatprep.mubr.msk.bf16.mxu0 %vm18332_vm0, %v18331_v18  ;;  %16788 = vmatpush3.bf16.msra.mxu0 %v17963_v1  ;;  %v13823_v1 = vld [vmem:[#allocation10 + $0x5] ss:$0 sm:$0xff] }
0x18b5   : > { %16789 = vmatprep.subr.bf16.mxu0 %v18331_v18 }
0x18b6   : > { %16730 = vmatpush3.bf16.msra.mxu1 %v17948_v31 }
0x18b7   : > { %16731 = vmatprep.subr.bf16.mxu1 %v18331_v18 }
0x18b8   : > { %16790 = vmatpush3.bf16.msra.mxu0 %v17965_v3 }
0x18b9   : > { %16791 = vmatprep.subr.bf16.mxu0 %v18331_v18 }
0x18ba   : > { %16732 = vmatpush3.bf16.msra.mxu1 %v17949_v32 }
0x18bb   : > { %16733 = vmatprep.subr.bf16.mxu1 %v18331_v18 }
0x18bc   : > { %16792 = vmatpush3.bf16.msra.mxu0 %v17967_v55 }
0x18bd   : > { %16793 = vmatprep.subr.bf16.mxu0 %v18331_v18 }
0x18be   : > { %16734 = vmatpush3.bf16.msra.mxu1 %v17950_v33 }
0x18bf   : > { %16735 = vmatprep.subr.bf16.mxu1 %v18331_v18 }
0x18c0   : > { %16794 = vmatpush3.bf16.msra.mxu0 %v17969_v4 }
0x18c1   : > { %16795 = vmatprep.subr.bf16.mxu0 %v18331_v18 }
0x18c2   : > { %16736 = vmatpush3.bf16.msra.mxu1 %v17951_v34 }
0x18c3   : > { %16737 = vmatprep.subr.bf16.mxu1 %v18331_v18 }
0x18c4   : > { %16796 = vmatpush3.bf16.msra.mxu0 %v17971_v5 }
0x18c5   : > { %16797 = vmatprep.subr.bf16.mxu0 %v18331_v18 }
0x18c6   : > { %16738 = vmatpush3.bf16.msra.mxu1 %v17952_v11 }
0x18c7   : > { %16739 = vmatprep.subr.bf16.mxu1 %v18331_v18 }
0x18c8   : > { %16798 = vmatpush3.bf16.msra.mxu0 %v17973_v6  ;;  %v17996_v6 = vld [vmem:[#allocation12 + $0xa00] sm:$0xff]  }
0x18c9   : > { %16799 = vmatprep.subr.bf16.mxu0 %v18331_v18 }
0x18ca   : > { %16740 = vmatpush3.bf16.msra.mxu1 %v17953_v12 }
0x18cb   : > { %16741 = vmatprep.subr.bf16.mxu1 %v18331_v18 }
0x18cc   : > { %16800 = vmatpush3.bf16.msra.mxu0 %v17975_v14 }
0x18cd   : > { %16801 = vmatprep.subr.bf16.mxu0 %v18331_v18 }
0x18ce   : > { %16742 = vmatpush3.bf16.msra.mxu1 %v17954_v46 }
0x18cf   : > { %16767 = vmatprep.subr.bf16.mxu1 %v18331_v18 }
0x18d0   : > { %16802 = vmatpush3.bf16.msra.mxu0 %v17977_v47  ;;  %v17998_v47 = vld [vmem:[#allocation12 + $0xa08] sm:$0xff]  }
0x18d1   : > { %16744 = vmatmul.mubr.bf16.vlgmr.msra.gmra.mrb[132].mxu1 %v11386_v57  ;;  %16827 = vmatprep.subr.bf16.mxu0 %v18331_v18 }
0x18d2   : > { %16768 = vmatpush3.bf16.msra.mxu1 %v17955_v54  ;;  %16783 = vmatprep.mubr.msk.bf16.mxu1 %vm18332_vm0, %v18331_v18 }
0x18d3   : > { %16769 = vmatprep.subr.bf16.mxu1 %v18331_v18  ;;  %16804 = vmatmul.mubr.bf16.vlgmr.msra.gmra.mrb[144].mxu0 %v11744_v52  ;;  %v18002_v52 = vld [vmem:[#allocation12 + $0xa18] sm:$0xff]  }
0x18d4   : > { %16828 = vmatpush3.bf16.msra.mxu0 %v17979_v53  ;;  %16843 = vmatprep.mubr.msk.bf16.mxu0 %vm18332_vm0, %v18331_v18  ;;  %v18003_v53 = vld [vmem:[#allocation12 + $0x9e0] sm:$0xff]  }
0x18d5   : > { %16829 = vmatprep.subr.bf16.mxu0 %v18331_v18 }
0x18d6   : > { %16770 = vmatpush3.bf16.msra.mxu1 %v17956_v37 }
0x18d7   : > { %16771 = vmatprep.subr.bf16.mxu1 %v18331_v18 }
0x18d8   : > { %16830 = vmatpush3.bf16.msra.mxu0 %v17981_v48  ;;  %v18006_v48 = vld [vmem:[#allocation12 + $0xa28] sm:$0xff]  }
0x18d9   : > { %16831 = vmatprep.subr.bf16.mxu0 %v18331_v18 }
0x18da   : > { %16772 = vmatpush3.bf16.msra.mxu1 %v17957_v59 }
0x18db   : > { %16773 = vmatprep.subr.bf16.mxu1 %v18331_v18 }
0x18dc   : > { %16832 = vmatpush3.bf16.msra.mxu0 %v17983_v19  ;;  %v18008_v19 = vld [vmem:[#allocation12 + $0xa30] sm:$0xff]  }
0x18dd   : > { %16833 = vmatprep.subr.bf16.mxu0 %v18331_v18 }
0x18de   : > { %16774 = vmatpush3.bf16.msra.mxu1 %v17958_v60 }
0x18df   : > { %16775 = vmatprep.subr.bf16.mxu1 %v18331_v18 }
0x18e0   : > { %16834 = vmatpush3.bf16.msra.mxu0 %v17985_v9  ;;  %v18010_v9 = vld [vmem:[#allocation12 + $0xa38] sm:$0xff]  }
0x18e1   : > { %16835 = vmatprep.subr.bf16.mxu0 %v18331_v18 }
0x18e2   : > { %16776 = vmatpush3.bf16.msra.mxu1 %v17959_v61 }
0x18e3   : > { %16777 = vmatprep.subr.bf16.mxu1 %v18331_v18 }
0x18e4   : > { %16836 = vmatpush3.bf16.msra.mxu0 %v17987_v20 }
0x18e5   : > { %16837 = vmatprep.subr.bf16.mxu0 %v18331_v18 }
0x18e6   : > { %16778 = vmatpush3.bf16.msra.mxu1 %v17960_v62 }
0x18e7   : > { %16779 = vmatprep.subr.bf16.mxu1 %v18331_v18 }
0x18e8   : > { %16838 = vmatpush3.bf16.msra.mxu0 %v17989_v22  ;;  %v18011_v22 = vld [vmem:[#allocation12 + $0xa40] sm:$0xff]  }
0x18e9   : > { %16839 = vmatprep.subr.bf16.mxu0 %v18331_v18 }
0x18ea   : > { %16780 = vmatpush3.bf16.msra.mxu1 %v17961_v63 }
0x18eb   : > { %16781 = vmatprep.subr.bf16.mxu1 %v18331_v18 }
0x18ec   : > { %16840 = vmatpush3.bf16.msra.mxu0 %v17991_v24 }
0x18ed   : > { %16841 = vmatprep.subr.bf16.mxu0 %v18331_v18 }
0x18ee   : > { %16782 = vmatpush3.bf16.msra.mxu1 %v17962_v35 }
0x18ef   : > { %16807 = vmatprep.subr.bf16.mxu1 %v18331_v18 }
0x18f0   : > { %16842 = vmatpush3.bf16.msra.mxu0 %v17993_v26  ;;  %v18014_v26 = vld [vmem:[#allocation15 + $0x148] sm:$0xff]  }
0x18f1   : > { %16784 = vmatmul.mubr.bf16.vlgmr.msra.gmra.mrb[136].mxu1 %v11604_v0  ;;  %16867 = vmatprep.subr.bf16.mxu0 %v18331_v18 }
0x18f2   : > { %16823 = vmatprep.mubr.msk.bf16.mxu1 %vm18332_vm0, %v18331_v18  ;;  %16808 = vmatpush3.bf16.msra.mxu1 %v17964_v2 }
0x18f3   : > { %16809 = vmatprep.subr.bf16.mxu1 %v18331_v18 }
0x18f6   : > { %16810 = vmatpush3.bf16.msra.mxu1 %v17966_v40 }
0x18f7   : > { %16811 = vmatprep.subr.bf16.mxu1 %v18331_v18 }
0x18fa   : > { %16812 = vmatpush3.bf16.msra.mxu1 %v17968_v41 }
0x18fb   : > { %16813 = vmatprep.subr.bf16.mxu1 %v18331_v18 }
0x18fe   : > { %16814 = vmatpush3.bf16.msra.mxu1 %v17970_v42  ;;  %v17995_v42 = vld [vmem:[#allocation12 + $0x9c0] sm:$0xff]  }
0x18ff   : > { %16815 = vmatprep.subr.bf16.mxu1 %v18331_v18 }
0x1902   : > { %16816 = vmatpush3.bf16.msra.mxu1 %v17972_v44 }
0x1903   : > { %16817 = vmatprep.subr.bf16.mxu1 %v18331_v18 }
0x1906   : > { %16818 = vmatpush3.bf16.msra.mxu1 %v17974_v56 }
0x1907   : > { %16819 = vmatprep.subr.bf16.mxu1 %v18331_v18 }
0x190a   : > { %16820 = vmatpush3.bf16.msra.mxu1 %v17976_v15  ;;  %v17997_v15 = vld [vmem:[#allocation12 + $0x9c8] sm:$0xff]  }
0x190b   : > { %16821 = vmatprep.subr.bf16.mxu1 %v18331_v18 }
0x190e   : > { %16822 = vmatpush3.bf16.msra.mxu1 %v17978_v51  ;;  %v18000_v51 = vld [vmem:[#allocation12 + $0xa10] sm:$0xff]  }
0x190f   : > { %16847 = vmatprep.subr.bf16.mxu1 %v18331_v18 }
0x1911   : > { %16824 = vmatmul.mubr.bf16.vlgmr.msra.gmra.mrb[140].mxu1 %v11725_v16  ;;  %v18004_v16 = vld [vmem:[#allocation12 + $0xa20] sm:$0xff]  }
0x1912   : > { %16848 = vmatpush3.bf16.msra.mxu1 %v17980_v17  ;;  %16863 = vmatprep.mubr.msk.bf16.mxu1 %vm18332_vm0, %v18331_v18  ;;  %v18005_v17 = vld [vmem:[#allocation12 + $0x9e8] sm:$0xff]  }
0x1913   : > { %16849 = vmatprep.subr.bf16.mxu1 %v18331_v18 }
0x1916   : > { %16850 = vmatpush3.bf16.msra.mxu1 %v17982_v50  ;;  %v18007_v50 = vld [vmem:[#allocation12 + $0x9f0] sm:$0xff]  }
0x1917   : > { %16851 = vmatprep.subr.bf16.mxu1 %v18331_v18 }
0x191a   : > { %16852 = vmatpush3.bf16.msra.mxu1 %v17984_v8  ;;  %v18009_v8 = vld [vmem:[#allocation12 + $0x9f8] sm:$0xff]  }
0x191b   : > { %16853 = vmatprep.subr.bf16.mxu1 %v18331_v18 }
0x191e   : > { %16854 = vmatpush3.bf16.msra.mxu1 %v17986_v10  ;;  %v12262_v10 = vld [vmem:[#allocation7 + $0x5] sm:$0x3] }
0x191f   : > { %16855 = vmatprep.subr.bf16.mxu1 %v18331_v18 }
0x1922   : > { %16856 = vmatpush3.bf16.msra.mxu1 %v17988_v21  ;;  %v12263_v21 = vpack.c.bf16 %v12262_v10, %v12262_v10 }
0x1923   : > { %16857 = vmatprep.subr.bf16.mxu1 %v18331_v18 }
0x1926   : > { %16858 = vmatpush3.bf16.msra.mxu1 %v17990_v23  ;;  %v18012_v23 = vld [vmem:[#allocation15 + $0x140] sm:$0xff]  }
0x1927   : > { %16859 = vmatprep.subr.bf16.mxu1 %v18331_v18 }
0x192a   : > { %16860 = vmatpush3.bf16.msra.mxu1 %v17992_v25  ;;  %v18013_v25 = vld [vmem:[#allocation12 + $0xa48] sm:$0xff]  }
0x192b   : > { %16861 = vmatprep.subr.bf16.mxu1 %v18331_v18 }
0x192e   : > { %16862 = vmatpush3.bf16.msra.mxu1 %v17994_v27  ;;  %v18015_v27 = vld [vmem:[#allocation12 + $0xa50] sm:$0xff]  }
0x192f   : > { %16887 = vmatprep.subr.bf16.mxu1 %v18331_v18 }
0x1964   : > { %v11072_v28 = vpop.f32.mrb[124].mxu1 }
0x1965   : > { %v11377_v29 = vpop.f32.mrb[136].mxu0  ;;  %v11161_v30 = vadd.f32 %v19553_v43, %v11072_v28  ;;  %v16665_v31 = vpop.f32.mrb[125].mxu1  ;;  %v18016_v28 = vld [vmem:[#allocation15 + $0x150] sm:$0xff]  }
0x1966   : > { %v16725_v32 = vpop.f32.mrb[137].mxu0  ;;  %v11075_v33 = vpop.f32.mrb[126].mxu1  ;;  %v18019_v31 = vld [vmem:[#allocation12 + $0xa60] sm:$0xff]  }
0x1967   : > { %v11380_v34 = vpop.f32.mrb[138].mxu0  ;;  %v16666_v11 = vpop.f32.mrb[127].mxu1  ;;  %v18020_v32 = vld [vmem:[#allocation15 + $0x160] sm:$0xff]  }
0x1968   : > { %v16726_v12 = vpop.f32.mrb[139].mxu0  ;;  %v18021_v33 = vld [vmem:[#allocation12 + $0xa68] sm:$0xff]  }
0x1969   : > { %v18022_v34 = vld [vmem:[#allocation15 + $0x168] sm:$0xff]  }
0x1984   : > { %v11268_v45 = vpop.f32.mrb[128].mxu1 }
0x1985   : > { %v11595_v46 = vpop.f32.mrb[140].mxu0  ;;  %v11274_v13 = vadd.f32 %v11268_v45, %v11161_v30  ;;  %v16705_v36 = vpop.f32.mrb[129].mxu1  ;;  %v18018_v30 = vld [vmem:[#allocation15 + $0x158] sm:$0xff]  }
0x1986   : > { %v16765_v39 = vpop.f32.mrb[141].mxu0  ;;  %v11271_v54 = vpop.f32.mrb[130].mxu1  ;;  %v18024_v36 = vld [vmem:[#allocation15 + $0x170] sm:$0xff]  }
0x1987   : > { %v11598_v57 = vpop.f32.mrb[142].mxu0  ;;  %v16706_v37 = vpop.f32.mrb[131].mxu1  ;;  %v11383_v60 = vadd.f32 %v11377_v29, %v11274_v13  ;;  %v18017_v29 = vld [vmem:[#allocation12 + $0xa58] sm:$0xff]   ;;  %v18023_v13 = vld [vmem:[#allocation12 + $0xa70] sm:$0xff]  }
0x1988   : > { %v16766_v59 = vpop.f32.mrb[143].mxu0  ;;  %v12487_v37 = vld [vmem:[#allocation6 + $0x3] ss:$2 sm:$0x3] }
0x19a4   : > { %v11486_v61 = vpop.f32.mrb[132].mxu1 }
0x19a5   : > { %v11492_v62 = vadd.f32 %v11486_v61, %v11383_v60  ;;  %v16745_v63 = vpop.f32.mrb[133].mxu1  ;;  %v12488_v60 = vld [vmem:[#allocation6 + $0x4] ss:$2 sm:$0x3] }
0x19a6   : > { %v11489_v43 = vpop.f32.mrb[134].mxu1  ;;  %v11844_v11 = vpop.f32.mrb[144].mxu0  ;;  %v18026_v63 = vld [vmem:[#allocation15 + $0x178] sm:$0xff]  }
0x19a7   : > { %v16746_v35 = vpop.f32.mrb[135].mxu1  ;;  %v11601_v58 = vadd.f32 %v11595_v46, %v11492_v62  ;;  %v16805_v12 = vpop.f32.mrb[145].mxu0  ;;  %v18025_v62 = vld [vmem:[#allocation12 + $0xa78] sm:$0xff]  }
0x19a8   : > { %v11847_v45 = vpop.f32.mrb[146].mxu0  ;;  %v12370_v43 = vld [vmem:[#allocation7 + $0x6] sm:$0x3]  ;;  %v12489_v35 = vmax.f32 %v12487_v37, %v12488_v60  ;;  %v18042_v60 = vld [vmem:[#allocation19 + $0x178] sm:$0xff]  }
0x19a9   : > { %v16806_v39 = vpop.f32.mrb[147].mxu0 }
0x19c4   : > { %v11704_v0 = vpop.f32.mrb[136].mxu1 }
0x19c5   : > { %v11710_v2 = vadd.f32 %v11704_v0, %v11601_v58  ;;  %v16785_v3 = vpop.f32.mrb[137].mxu1  ;;  %v12371_v58 = vpack.c.bf16 %v12370_v43, %v12370_v43  ;;  %v12490_v0 = vpack.c.bf16 %v12489_v35, %v12489_v35 }
0x19c6   : > { %v11707_v40 = vpop.f32.mrb[138].mxu1  ;;  %v18029_v3 = vld [vmem:[#allocation18 + $0x150] sm:$0xff]  }
0x19c7   : > { %v11719_v55 = vadd.f32 %v13823_v1, %v11710_v2  ;;  %v16786_v41 = vpop.f32.mrb[139].mxu1  ;;  %v18027_v1 = vld [vmem:[#allocation18 + $0x140] sm:$0xff]   ;;  %v18028_v2 = vld [vmem:[#allocation18 + $0x148] sm:$0xff]   ;;  %v18030_v40 = vld [vmem:[#allocation18 + $0x158] sm:$0xff]  }
0x19c8   : > { %v18032_v41 = vld [vmem:[#allocation18 + $0x168] sm:$0xff]  }
0x19c9   : > { %v11720_v4 = vmax.f32 %v11719_v55, 0.0  ;;  %v18031_v55 = vld [vmem:[#allocation18 + $0x160] sm:$0xff]  }
0x19cb   : > { %11723 = vst [vmem:[#allocation7 + $0x3] sm:$0x3] %v11720_v4  ;;  %v18033_v4 = vld [vmem:[#allocation18 + $0x170] sm:$0xff]  }
0x19d2   : > { %v11938_v5 = vld [vmem:[#allocation7 + $0x2] sm:$0x3]  ;;  %v12154_v20 = vld [vmem:[#allocation7 + $0x4] sm:$0x3] }
0x19d3   : > { %v12046_v44 = vld [vmem:[#allocation7 + $0x3] sm:$0x3]  ;;  %v11939_v56 = vpack.c.bf16 %v11938_v5, %v11938_v5  ;;  %v12155_v24 = vpack.c.bf16 %v12154_v20, %v12154_v20  ;;  %v18035_v5 = vld [vmem:[#allocation19 + $0x140] sm:$0xff]  }
0x19d4   : > { %v12047_v14 = vpack.c.bf16 %v12046_v44, %v12046_v44  ;;  %v18036_v44 = vld [vmem:[#allocation19 + $0x148] sm:$0xff]  }
0x19d5   : > { %16844 = vmatmul.mubr.bf16.vlgmr.msra.gmra.mrb[148].mxu0 %v11939_v56  ;;  %v18038_v56 = vld [vmem:[#allocation19 + $0x158] sm:$0xff]  }
0x19d6   : > { %16864 = vmatmul.mubr.bf16.vlgmr.msra.gmra.mrb[144].mxu1 %v12047_v14  ;;  %16868 = vmatpush3.bf16.msra.mxu0 %v17995_v42  ;;  %v18034_v42 = vld [vmem:[#allocation18 + $0x178] sm:$0xff]   ;;  %v18039_v14 = vld [vmem:[#allocation19 + $0x160] sm:$0xff]  }
0x19d7   : > { %16888 = vmatpush3.bf16.msra.mxu1 %v17996_v6  ;;  %16869 = vmatprep.subr.bf16.mxu0 %v18331_v18  ;;  %v18037_v6 = vld [vmem:[#allocation19 + $0x150] sm:$0xff]  }
0x19d8   : > { %16889 = vmatprep.subr.bf16.mxu1 %v18331_v18  ;;  %16883 = vmatprep.mubr.msk.bf16.mxu0 %vm18332_vm0, %v18331_v18 }
0x19d9   : > { %16903 = vmatprep.mubr.msk.bf16.mxu1 %vm18332_vm0, %v18331_v18 }
0x19da   : > { %16870 = vmatpush3.bf16.msra.mxu0 %v17997_v15  ;;  %v18040_v15 = vld [vmem:[#allocation19 + $0x168] sm:$0xff]  }
0x19db   : > { %16890 = vmatpush3.bf16.msra.mxu1 %v17998_v47  ;;  %16871 = vmatprep.subr.bf16.mxu0 %v18331_v18  ;;  %v18041_v47 = vld [vmem:[#allocation19 + $0x170] sm:$0xff]  }
0x19dc   : > { %16891 = vmatprep.subr.bf16.mxu1 %v18331_v18 }
0x19de   : > { %16872 = vmatpush3.bf16.msra.mxu0 %v17999_v49 }
0x19df   : > { %16892 = vmatpush3.bf16.msra.mxu1 %v18000_v51  ;;  %16873 = vmatprep.subr.bf16.mxu0 %v18331_v18 }
0x19e0   : > { %16893 = vmatprep.subr.bf16.mxu1 %v18331_v18 }
0x19e2   : > { %16874 = vmatpush3.bf16.msra.mxu0 %v18001_v7 }
0x19e3   : > { %16894 = vmatpush3.bf16.msra.mxu1 %v18002_v52  ;;  %16875 = vmatprep.subr.bf16.mxu0 %v18331_v18 }
0x19e4   : > { %16895 = vmatprep.subr.bf16.mxu1 %v18331_v18  ;;  %v11932_v46 = vpop.f32.mrb[140].mxu1 }
0x19e5   : > { %v19640_v54 = vadd.f32 %v11932_v46, %v11844_v11  ;;  %v16825_v57 = vpop.f32.mrb[141].mxu1 }
0x19e6   : > { %16876 = vmatpush3.bf16.msra.mxu0 %v18003_v53  ;;  %v11935_v59 = vpop.f32.mrb[142].mxu1 }
0x19e7   : > { %16896 = vmatpush3.bf16.msra.mxu1 %v18004_v16  ;;  %16877 = vmatprep.subr.bf16.mxu0 %v18331_v18  ;;  %v16826_v61 = vpop.f32.mrb[143].mxu1 }
0x19e8   : > { %16897 = vmatprep.subr.bf16.mxu1 %v18331_v18 }
0x19ea   : > { %16878 = vmatpush3.bf16.msra.mxu0 %v18005_v17 }
0x19eb   : > { %16898 = vmatpush3.bf16.msra.mxu1 %v18006_v48  ;;  %16879 = vmatprep.subr.bf16.mxu0 %v18331_v18 }
0x19ec   : > { %16899 = vmatprep.subr.bf16.mxu1 %v18331_v18 }
0x19ee   : > { %16880 = vmatpush3.bf16.msra.mxu0 %v18007_v50 }
0x19ef   : > { %16900 = vmatpush3.bf16.msra.mxu1 %v18008_v19  ;;  %16881 = vmatprep.subr.bf16.mxu0 %v18331_v18 }
0x19f0   : > { %16901 = vmatprep.subr.bf16.mxu1 %v18331_v18 }
0x19f2   : > { %16882 = vmatpush3.bf16.msra.mxu0 %v18009_v8 }
0x19f3   : > { %16902 = vmatpush3.bf16.msra.mxu1 %v18010_v9  ;;  %16907 = vmatprep.subr.bf16.mxu0 %v18331_v18 }
0x19f4   : > { %16927 = vmatprep.subr.bf16.mxu1 %v18331_v18 }
0x19f5   : > { %16884 = vmatmul.mubr.bf16.vlgmr.msra.gmra.mrb[152].mxu0 %v12155_v24 }
0x19f6   : > { %16904 = vmatmul.mubr.bf16.vlgmr.msra.gmra.mrb[148].mxu1 %v12263_v21  ;;  %16908 = vmatpush3.bf16.msra.mxu0 %v18011_v22 }
0x19f7   : > { %16928 = vmatpush3.bf16.msra.mxu1 %v18012_v23  ;;  %16909 = vmatprep.subr.bf16.mxu0 %v18331_v18 }
0x19f8   : > { %16929 = vmatprep.subr.bf16.mxu1 %v18331_v18  ;;  %16923 = vmatprep.mubr.msk.bf16.mxu0 %vm18332_vm0, %v18331_v18 }
0x19f9   : > { %16943 = vmatprep.mubr.msk.bf16.mxu1 %vm18332_vm0, %v18331_v18 }
0x19fa   : > { %16910 = vmatpush3.bf16.msra.mxu0 %v18013_v25 }
0x19fb   : > { %16930 = vmatpush3.bf16.msra.mxu1 %v18014_v26  ;;  %16911 = vmatprep.subr.bf16.mxu0 %v18331_v18 }
0x19fc   : > { %16931 = vmatprep.subr.bf16.mxu1 %v18331_v18 }
0x19fe   : > { %16912 = vmatpush3.bf16.msra.mxu0 %v18015_v27  ;;  %v13880_v27 = vld [vmem:[#allocation13 + $0x5] ss:$0 sm:$0xff] }
0x19ff   : > { %16932 = vmatpush3.bf16.msra.mxu1 %v18016_v28  ;;  %16913 = vmatprep.subr.bf16.mxu0 %v18331_v18 }
0x1a00   : > { %16933 = vmatprep.subr.bf16.mxu1 %v18331_v18 }
0x1a02   : > { %16914 = vmatpush3.bf16.msra.mxu0 %v18017_v29 }
0x1a03   : > { %16934 = vmatpush3.bf16.msra.mxu1 %v18018_v30  ;;  %16915 = vmatprep.subr.bf16.mxu0 %v18331_v18 }
0x1a04   : > { %16935 = vmatprep.subr.bf16.mxu1 %v18331_v18 }
0x1a06   : > { %16916 = vmatpush3.bf16.msra.mxu0 %v18019_v31 }
0x1a07   : > { %16936 = vmatpush3.bf16.msra.mxu1 %v18020_v32  ;;  %16917 = vmatprep.subr.bf16.mxu0 %v18331_v18 }
0x1a08   : > { %16937 = vmatprep.subr.bf16.mxu1 %v18331_v18 }
0x1a0a   : > { %16918 = vmatpush3.bf16.msra.mxu0 %v18021_v33 }
0x1a0b   : > { %16938 = vmatpush3.bf16.msra.mxu1 %v18022_v34  ;;  %16919 = vmatprep.subr.bf16.mxu0 %v18331_v18 }
0x1a0c   : > { %16939 = vmatprep.subr.bf16.mxu1 %v18331_v18 }
0x1a0e   : > { %16920 = vmatpush3.bf16.msra.mxu0 %v18023_v13 }
0x1a0f   : > { %16940 = vmatpush3.bf16.msra.mxu1 %v18024_v36  ;;  %16921 = vmatprep.subr.bf16.mxu0 %v18331_v18 }
0x1a10   : > { %16941 = vmatprep.subr.bf16.mxu1 %v18331_v18 }
0x1a12   : > { %16922 = vmatpush3.bf16.msra.mxu0 %v18025_v62 }
0x1a13   : > { %16942 = vmatpush3.bf16.msra.mxu1 %v18026_v63  ;;  %16947 = vmatprep.subr.bf16.mxu0 %v18331_v18 }
0x1a14   : > { %16967 = vmatprep.subr.bf16.mxu1 %v18331_v18 }
0x1a15   : > { %16924 = vmatmul.mubr.bf16.vlgmr.msra.gmra.mrb[156].mxu0 %v12371_v58 }
0x1a16   : > { %16944 = vmatmul.mubr.bf16.vlgmr.msra.gmra.mrb[152].mxu1 %v12490_v0  ;;  %16963 = vmatprep.mubr.msk.bf16.mxu0 %vm18332_vm0, %v18331_v18 }
0x1a17   : > { %16983 = vmatprep.mubr.msk.bf16.mxu1 %vm18332_vm0, %v18331_v18  ;;  %16948 = vmatpush3.bf16.msra.mxu0 %v18027_v1 }
0x1a18   : > { %16949 = vmatprep.subr.bf16.mxu0 %v18331_v18  ;;  %16968 = vmatpush3.bf16.msra.mxu1 %v18035_v5 }
0x1a19   : > { %16969 = vmatprep.subr.bf16.mxu1 %v18331_v18 }
0x1a1b   : > { %16950 = vmatpush3.bf16.msra.mxu0 %v18028_v2 }
0x1a1c   : > { %16951 = vmatprep.subr.bf16.mxu0 %v18331_v18  ;;  %16970 = vmatpush3.bf16.msra.mxu1 %v18036_v44 }
0x1a1d   : > { %16971 = vmatprep.subr.bf16.mxu1 %v18331_v18 }
0x1a1f   : > { %16952 = vmatpush3.bf16.msra.mxu0 %v18029_v3 }
0x1a20   : > { %16953 = vmatprep.subr.bf16.mxu0 %v18331_v18  ;;  %16972 = vmatpush3.bf16.msra.mxu1 %v18037_v6 }
0x1a21   : > { %16973 = vmatprep.subr.bf16.mxu1 %v18331_v18 }
0x1a23   : > { %16954 = vmatpush3.bf16.msra.mxu0 %v18030_v40 }
0x1a24   : > { %16955 = vmatprep.subr.bf16.mxu0 %v18331_v18  ;;  %16974 = vmatpush3.bf16.msra.mxu1 %v18038_v56 }
0x1a25   : > { %16975 = vmatprep.subr.bf16.mxu1 %v18331_v18 }
0x1a27   : > { %16956 = vmatpush3.bf16.msra.mxu0 %v18031_v55 }
0x1a28   : > { %16957 = vmatprep.subr.bf16.mxu0 %v18331_v18  ;;  %16976 = vmatpush3.bf16.msra.mxu1 %v18039_v14 }
0x1a29   : > { %16977 = vmatprep.subr.bf16.mxu1 %v18331_v18 }
0x1a2b   : > { %16958 = vmatpush3.bf16.msra.mxu0 %v18032_v41 }
0x1a2c   : > { %16959 = vmatprep.subr.bf16.mxu0 %v18331_v18  ;;  %16978 = vmatpush3.bf16.msra.mxu1 %v18040_v15 }
0x1a2d   : > { %16979 = vmatprep.subr.bf16.mxu1 %v18331_v18 }
0x1a2f   : > { %16960 = vmatpush3.bf16.msra.mxu0 %v18033_v4 }
0x1a30   : > { %16961 = vmatprep.subr.bf16.mxu0 %v18331_v18  ;;  %16980 = vmatpush3.bf16.msra.mxu1 %v18041_v47 }
0x1a31   : > { %16981 = vmatprep.subr.bf16.mxu1 %v18331_v18 }
0x1a33   : > { %16962 = vmatpush3.bf16.msra.mxu0 %v18034_v42  ;;  %v13881_v42 = vld [vmem:[#allocation16 + $0x5] ss:$0 sm:$0xff] }
0x1a34   : > { %16982 = vmatpush3.bf16.msra.mxu1 %v18042_v60 }
0x1aa8   : > { %v12039_v49 = vpop.f32.mrb[148].mxu0 }
0x1aa9   : > { %v12147_v51 = vpop.f32.mrb[144].mxu1  ;;  %v12045_v7 = vadd.f32 %v12039_v49, %v19640_v54  ;;  %v16845_v52 = vpop.f32.mrb[149].mxu0 }
0x1aaa   : > { %v16865_v53 = vpop.f32.mrb[145].mxu1  ;;  %v12042_v16 = vpop.f32.mrb[150].mxu0 }
0x1aab   : > { %v12150_v17 = vpop.f32.mrb[146].mxu1  ;;  %v12153_v48 = vadd.f32 %v12147_v51, %v12045_v7  ;;  %v16846_v50 = vpop.f32.mrb[151].mxu0 }
0x1aac   : > { %v16866_v19 = vpop.f32.mrb[147].mxu1 }
0x1ac8   : > { %v12255_v8 = vpop.f32.mrb[152].mxu0 }
0x1ac9   : > { %v12363_v9 = vpop.f32.mrb[148].mxu1  ;;  %v12261_v10 = vadd.f32 %v12255_v8, %v12153_v48  ;;  %v16885_v20 = vpop.f32.mrb[153].mxu0 }
0x1aca   : > { %v16905_v21 = vpop.f32.mrb[149].mxu1  ;;  %v12258_v22 = vpop.f32.mrb[154].mxu0 }
0x1acb   : > { %v12366_v23 = vpop.f32.mrb[150].mxu1  ;;  %v12369_v24 = vadd.f32 %v12363_v9, %v12261_v10  ;;  %v16886_v18 = vpop.f32.mrb[155].mxu0 }
0x1acc   : > { %v16906_v25 = vpop.f32.mrb[151].mxu1 }
0x1ae8   : > { %v12471_v26 = vpop.f32.mrb[156].mxu0 }
0x1ae9   : > { %v12598_v28 = vpop.f32.mrb[152].mxu1  ;;  %v12477_v29 = vadd.f32 %v12471_v26, %v12369_v24  ;;  %v16925_v30 = vpop.f32.mrb[157].mxu0 }
0x1aea   : > { %v16945_v31 = vpop.f32.mrb[153].mxu1  ;;  %v12474_v32 = vpop.f32.mrb[158].mxu0  ;;  %v12599_v44 = vadd.f32 %v13881_v42, %v12598_v28 }
0x1aeb   : > { %v12601_v33 = vpop.f32.mrb[154].mxu1  ;;  %v12486_v34 = vadd.f32 %v13880_v27, %v12477_v29  ;;  %v16926_v11 = vpop.f32.mrb[159].mxu0 }
0x1aec   : > { %v16946_v12 = vpop.f32.mrb[155].mxu1 }
0x1aed   : > { %v12605_v45 = vsel %vm12604_vm2, %v12486_v34, 0.0 }
0x1aee   : > { %v12606_v46 = vrot.slane %v12605_v45, 4 }
0x1af0   : > { %v12607_v13 = vadd.f32 %v12606_v46, %v12605_v45 }
0x1af2   : > { %v12608_v36 = vrot.slane %v12607_v13, 2 }
0x1af4   : > { %v12609_v39 = vadd.f32 %v12608_v36, %v12607_v13 }
0x1af6   : > { %v12610_v54 = vrot.slane %v12609_v39, 1 }
0x1af8   : > { %v12611_v57 = vadd.f32 %v12610_v54, %v12609_v39 }
0x1afa   : > { %v12613_v37 = vmul.f32 0.5, %v12611_v57 }
0x1afc   : > { %v12614_v59 = vpack.c.bf16 %v12613_v37, %v12613_v37 }
0x1afe   : > { %16964 = vmatmul.mubr.bf16.vlgmr.msra.gmra.mrb[160].mxu0 %v12614_v59 }
0x1bd1   : > { %v12714_v61 = vpop.f32.mrb[160].mxu0 }
0x1bd2   : > { %v12720_v62 = vmax.f32 %v12714_v61, 0.0  ;;  %v16965_v63 = vpop.f32.mrb[161].mxu0 }
0x1bd3   : > { %v12717_v43 = vpop.f32.mrb[162].mxu0 }
0x1bd4   : > { %v12721_v35 = vpack.c.bf16 %v12720_v62, %v12720_v62  ;;  %v16966_v58 = vpop.f32.mrb[163].mxu0 }
0x1bd6   : > { %16984 = vmatmul.mubr.bf16.vlgmr.msra.gmra.mrb[156].mxu1 %v12721_v35 }
0x1ca9   : > { %v12821_v0 = vpop.f32.mrb[156].mxu1 }
0x1caa   : > { %v13906_v1 = vmul.f32 -1.442695, %v12821_v0  ;;  %v16985_v2 = vpop.f32.mrb[157].mxu1 }
0x1cab   : > { %v12824_v3 = vpop.f32.mrb[158].mxu1 }
0x1cac   : > { %18063 = vpow2.f32 %v13906_v1  ;;  %v16986_v40 = vpop.f32.mrb[159].mxu1 }
0x1cb6   : > { %v18064_v55 = vpop.eup %18063 }
0x1cb7   : > { %v12830_v41 = vadd.f32 1.0, %v18064_v55 }
0x1cb9   : > { %18065 = vrcp.f32 %v12830_v41 }
0x1cc3   : > { %v18066_v4 = vpop.eup %18065 }
0x1cc4   : > { %v12836_v5 = vrot.slane %v18066_v4, %v18802_v38 }
0x1cc6   : > { %v12837_v6 = vmul.f32 %v12836_v5, %v12486_v34 }
0x1cc8   : > { %v12838_v56 = vadd.f32 %v12837_v6, %v12599_v44 }
0x1cca   : > { %v12839_v14 = vmax.f32 %v12838_v56, 0.0 }
0x1ccc   : > { %12840 = vst [vmem:[%s447_s28] sm:$0x3] %v12839_v14 }
0x1ccd PF: > { %s24_s30 = sadd.s32 1, %s18317_s30  }
0x1cce   : > { %p21_p11 = scmp.ge.s32.totalorder %s24_s30, 4  }
0x1cd0   :  { %23 = sbr.rel (!%p21_p11) target bundleno = 5 (0x5), region = 344 }
0x1cd7   :  { %12860 = vsyncpa [#allocation9], 1 }
0x1cd8   :  { %12862 = vsyncpa [#allocation9 + $0x1], 1 }
0x1cd9   :  { %12863 = vsyncpa [#allocation11], 1 }
0x1cda   :  { %12864 = vsyncpa [#allocation14], 1 }
0x1cdb   :  { %12865 = vsyncpa [#allocation17], 1 }
0x1cdc   :  { %12866 = vsyncpa [#allocation20], 1 }

</bundles_post_ra>
